<compile_context>
chip_gen: v6e
topology: v6e:2x2x1
jax: 0.10.0
libtpu: 0.0.40
codegen_flags: <defaults>
</compile_context>

<pallas_src>
import functools

import jax
import jax.numpy as jnp
from jax.experimental import pallas as pl
from jax.experimental.pallas import tpu as pltpu


# ---------------------------------------------------------------------------
# Per-generation VMEM budget: v5e/v6e have 128 MiB physical VMEM, v7x 64 MiB.
# ---------------------------------------------------------------------------
@functools.lru_cache(maxsize=None)
def _vmem_limit_bytes():
    cap = 64 * 1024 * 1024  # conservative fallback (v7x-sized)
    try:
        info = pltpu.get_tpu_info()
        cap = int(getattr(info, "vmem_capacity_bytes", cap))
    except Exception:
        pass
    return max(32 * 1024 * 1024, min(cap - 8 * 1024 * 1024, 112 * 1024 * 1024))


def _mxu_dot(a, b):
    """MXU matmul with f32 accumulation.

    bf16 operands -> one MXU matmul (products exact, f32 accumulate).
    f32 operands (validation mode) -> manual 3-pass bf16 hi/lo split
    (~Precision.HIGHEST), independent of Mosaic's default f32 matmul precision.
    """
    if a.dtype == jnp.float32:
        f32, bf16 = jnp.float32, jnp.bfloat16
        ah = a.astype(bf16)
        al = (a - ah.astype(f32)).astype(bf16)
        bh = b.astype(bf16)
        bl = (b - bh.astype(f32)).astype(bf16)
        d = lambda u, v: jnp.dot(u, v, preferred_element_type=f32)
        return d(ah, bh) + d(ah, bl) + d(al, bh)
    return jnp.dot(a, b, preferred_element_type=jnp.float32)


# ---------------------------------------------------------------------------
# Fused stage kernel:
#   [optional BN affine] -> bias -> PReLU -> bias -> LTQ  -> padded frame
#   (VMEM scratch)       -> 3x3 stride-1 conv (MXU)       -> y + BN moments
#
# Padded-frame trick: the frame is (H+4, Wp=W+2, Cin) flattened to
# ((H+4)*Wp, Cin).  Data rows sit at flat rows [2*Wp, 2*Wp+H*Wp) with the last
# two columns of every data row zero; conv tap (kh, kw) of output flat row r is
# then the *contiguous* frame row r + (kh+1)*Wp + kw - 1, so the 9 taps are
# plain pl.ds windows.  When Cin < 128 the 9 windows are concatenated along
# the lane axis and contracted in a single K = 9*Cin MXU matmul.
# Output flat rows with (row mod Wp) >= W are width-padding; they are masked
# out of the BN moments and sliced away downstream.
# ---------------------------------------------------------------------------
def _stage_kernel(n_val, H, W, apply_bn, merge_taps, strip,
                  x_ref, par_ref, sc_ref, w_ref,
                  y_ref, sum_ref, ssq_ref, frame_ref):
    f32 = jnp.float32
    Cin = x_ref.shape[3]
    Cout = w_ref.shape[1]
    Wp = W + 2
    HWp = H * Wp

    # ---- pre-activation (all f32 math) -----------------------------------
    par = par_ref[...]                                   # (5, Cin) f32
    v = x_ref[...][0, :, 0:W, :].astype(f32)             # (H, W, Cin) valid cols
    if apply_bn:
        v = v * par[0:1, :] + par[1:2, :]                # folded BatchNorm affine
    v = v + par[2:3, :]                                  # LearnableBias
    v = jnp.where(v >= 0.0, v, par[3:4, :] * v)          # PReLU
    v = v + par[4:5, :]                                  # LearnableBias
    v = v * sc_ref[0]                                    # LTQ scale1
    q = jnp.zeros_like(v)
    for i in range(n_val):                               # unrolled LTQ staircase
        q = jnp.where(v > sc_ref[2 + i], sc_ref[2 + n_val + i], q)
    q = (q * sc_ref[1]).astype(frame_ref.dtype)          # LTQ scale2

    # ---- build the padded frame in VMEM scratch ---------------------------
    # Top / bottom zero rows are rewritten every iteration (tiny, and safe
    # under megacore "parallel" sharding where program_id==0 tricks are not).
    zrow = jnp.zeros((2 * Wp, Cin), frame_ref.dtype)
    frame_ref[pl.ds(0, 2 * Wp), :] = zrow
    frame_ref[pl.ds(2 * Wp + HWp, 2 * Wp), :] = zrow
    # Data block: width-padded by 2 zero columns so it is one contiguous store.
    qp = jnp.concatenate([q, jnp.zeros((H, 2, Cin), frame_ref.dtype)], axis=1)
    frame_ref[pl.ds(2 * Wp, HWp), :] = qp.reshape(HWp, Cin)

    # ---- conv + BN moments, row-stripped accumulator ----------------------
    w = w_ref[...]                                        # (9*Cin, Cout)
    sum_acc = jnp.zeros((1, Cout), f32)
    ssq_acc = jnp.zeros((1, Cout), f32)
    n_strips = -(-HWp // strip)
    for s in range(n_strips):                             # static strip loop
        r0 = s * strip
        rows = min(strip, HWp - r0)
        if merge_taps:
            lhs = jnp.concatenate(
                [frame_ref[pl.ds((kh + 1) * Wp + (kw - 1) + r0, rows), :]
                 for kh in range(3) for kw in range(3)], axis=1)   # (rows, 9*Cin)
            acc = _mxu_dot(lhs, w)                                  # (rows, Cout)
        else:
            acc = jnp.zeros((rows, Cout), f32)
            for t in range(9):
                kh, kw = divmod(t, 3)
                off = (kh + 1) * Wp + (kw - 1) + r0
                acc = acc + _mxu_dot(frame_ref[pl.ds(off, rows), :],
                                     w[t * Cin:(t + 1) * Cin, :])
        col = (jax.lax.broadcasted_iota(jnp.int32, (rows, 1), 0) + r0) % Wp
        valid = (col < W).astype(f32)
        accv = acc * valid
        sum_acc = sum_acc + jnp.sum(accv, axis=0, keepdims=True)
        ssq_acc = ssq_acc + jnp.sum(accv * acc, axis=0, keepdims=True)
        y_ref[:, pl.ds(r0, rows), :] = acc[None].astype(y_ref.dtype)
    sum_ref[...] = sum_acc[None]
    ssq_ref[...] = ssq_acc[None]


def fused_preact_conv(x, par5, scal, w9, H, W, *, apply_bn, act_dtype, n_val):
    """x: (N, H, Win, Cin) with Win in {W, W+2}; w9: (9*Cin, Cout).
    Returns (y (N, H*(W+2), Cout) act_dtype, per-sample channel sums, sum-sq)."""
    N, _, Win, Cin = x.shape
    KC, Cout = w9.shape
    Wp = W + 2
    merge_taps = Cin < 128            # K-merge the 9 taps while the MXU K dim is sparse
    strip = 512                       # accumulator rows per strip (avoids vreg spills)
    kern = functools.partial(_stage_kernel, n_val, H, W, apply_bn, merge_taps, strip)
    return pl.pallas_call(
        kern,
        out_shape=(jax.ShapeDtypeStruct((N, H * Wp, Cout), act_dtype),
                   jax.ShapeDtypeStruct((N, 1, Cout), jnp.float32),
                   jax.ShapeDtypeStruct((N, 1, Cout), jnp.float32)),
        grid=(N,),
        in_specs=[pl.BlockSpec((1, H, Win, Cin), lambda n: (n, 0, 0, 0)),
                  pl.BlockSpec((5, Cin), lambda n: (0, 0)),
                  pl.BlockSpec(memory_space=pltpu.MemorySpace.SMEM),
                  pl.BlockSpec((KC, Cout), lambda n: (0, 0))],
        out_specs=(pl.BlockSpec((1, H * Wp, Cout), lambda n: (n, 0, 0)),
                   pl.BlockSpec((1, 1, Cout), lambda n: (n, 0, 0)),
                   pl.BlockSpec((1, 1, Cout), lambda n: (n, 0, 0))),
        scratch_shapes=[pltpu.VMEM(((H + 4) * Wp, Cin), act_dtype)],
        compiler_params=pltpu.CompilerParams(
            dimension_semantics=("parallel",),
            vmem_limit_bytes=_vmem_limit_bytes()),
    )(x, par5, scal, w9.astype(act_dtype))


# ---------------------------------------------------------------------------
# Stage 3: BN2 affine + residual add + bias -> PReLU -> bias (valid cols only)
# ---------------------------------------------------------------------------
def _residual_kernel(W, y_ref, id_ref, par_ref, o_ref):
    f32 = jnp.float32
    par = par_ref[...]
    y = y_ref[...][0, :, 0:W, :].astype(f32)
    v = y * par[0:1, :] + par[1:2, :]                    # BatchNorm2 affine
    v = v + id_ref[...][0].astype(f32)                   # residual add
    v = v + par[2:3, :]
    v = jnp.where(v >= 0.0, v, par[3:4, :] * v)
    v = v + par[4:5, :]
    o_ref[...] = v[None].astype(o_ref.dtype)


def bn_residual_act(y_frame, identity, par5):
    N, H, Wp, C = y_frame.shape
    W = Wp - 2
    act_dtype = y_frame.dtype
    kern = functools.partial(_residual_kernel, W)
    return pl.pallas_call(
        kern,
        out_shape=jax.ShapeDtypeStruct((N, H, W, C), act_dtype),
        grid=(N,),
        in_specs=[pl.BlockSpec((1, H, Wp, C), lambda n: (n, 0, 0, 0)),
                  pl.BlockSpec((1, H, W, C), lambda n: (n, 0, 0, 0)),
                  pl.BlockSpec((5, C), lambda n: (0, 0))],
        out_specs=pl.BlockSpec((1, H, W, C), lambda n: (n, 0, 0, 0)),
        compiler_params=pltpu.CompilerParams(
            dimension_semantics=("parallel",),
            vmem_limit_bytes=_vmem_limit_bytes()),
    )(y_frame, identity.astype(act_dtype), par5)


# ---------------------------------------------------------------------------
# Parameter-sized JAX glue (exactly mirrors the PyTorch forward values)
# ---------------------------------------------------------------------------
def quantize_conv_weight(w_oihw, num_bits, clip_val):
    """HardQuantizeConv forward-value weight quantization."""
    gamma = (2 ** num_bits - 1) / 2 ** (num_bits - 1)
    scaling = gamma * jnp.mean(jnp.abs(w_oihw), axis=(1, 2, 3), keepdims=True)
    scaling = jnp.maximum(scaling, 1e-12)        # guard all-zero filter (0/0 NaN)
    scaled = w_oihw / scaling
    half = clip_val / 2.0
    clipped = jnp.maximum(jnp.minimum(scaled, half), -half)
    n = (2.0 ** num_bits - 1.0) / clip_val
    return scaling * (jnp.round((clipped + half) * n) / n - half)


def ltq_tables(start, a, eps, num_bits):
    """Forward staircase thresholds and output levels of LTQ."""
    n_val = 2 ** num_bits - 1
    interval = 2.0 / n_val
    a_pos = jnp.where(a > eps, a, eps)
    thres = []
    t = start[0] + a_pos[0] / 2.0
    for i in range(n_val):
        if i > 0:
            t = t + a_pos[i - 1] / 2.0 + a_pos[i] / 2.0
        thres.append(t)
    thre = jnp.stack(thres).astype(jnp.float32)
    step = jnp.arange(1, n_val + 1, dtype=jnp.float32) * interval
    return thre, step


def bn_affine_from_moments(sums, sumsqs, count, gamma, beta, eps=1e-5):
    """Training-mode BatchNorm2d folded to (scale, shift) from per-sample moments."""
    total = jnp.sum(sums, axis=0).reshape(-1)
    total_sq = jnp.sum(sumsqs, axis=0).reshape(-1)
    mean = total / count
    var = jnp.maximum(total_sq / count - mean * mean, 0.0)   # biased variance
    scale = gamma / jnp.sqrt(var + eps)
    shift = beta - mean * scale
    return scale, shift


def _pack_channel_params(C, *vecs):
    rows = [jnp.broadcast_to(jnp.asarray(v, jnp.float32).reshape(-1), (C,)) for v in vecs]
    return jnp.stack(rows, axis=0)                        # (len(vecs), C)


def _pack_ltq_scalars(scale1, scale2, thre, step):
    return jnp.concatenate([jnp.asarray(scale1, jnp.float32).reshape(-1),
                            jnp.asarray(scale2, jnp.float32).reshape(-1),
                            thre.astype(jnp.float32), step.astype(jnp.float32)])


def init_basic_block(key, n_bit, inplanes, planes):
    k1, k2 = jax.random.split(key)
    n_val = 2 ** n_bit - 1
    interval = 2.0 / n_val

    def ltq_params():
        return dict(start=jnp.zeros((1,), jnp.float32),
                    a=jnp.full((n_val,), interval, jnp.float32),
                    scale1=jnp.ones((1,), jnp.float32),
                    scale2=jnp.ones((1,), jnp.float32),
                    eps=jnp.full((1,), 1e-3, jnp.float32))

    return dict(
        bias11=jnp.zeros((inplanes,), jnp.float32),
        prelu1=jnp.full((inplanes,), 0.25, jnp.float32),
        bias12=jnp.zeros((inplanes,), jnp.float32),
        quan1=ltq_params(),
        conv1_w=(jax.random.uniform(k1, (planes, inplanes, 3, 3), jnp.float32) - 0.5) * 1e-3,
        conv1_clip=jnp.full((1,), 2.0, jnp.float32),
        bn1_gamma=jnp.ones((planes,), jnp.float32),
        bn1_beta=jnp.zeros((planes,), jnp.float32),
        bias21=jnp.zeros((planes,), jnp.float32),
        prelu2=jnp.full((planes,), 0.25, jnp.float32),
        bias22=jnp.zeros((planes,), jnp.float32),
        quan2=ltq_params(),
        conv2_w=(jax.random.uniform(k2, (planes, planes, 3, 3), jnp.float32) - 0.5) * 1e-3,
        conv2_clip=jnp.full((1,), 2.0, jnp.float32),
        bn2_gamma=jnp.ones((planes,), jnp.float32),
        bn2_beta=jnp.zeros((planes,), jnp.float32),
        bias31=jnp.zeros((planes,), jnp.float32),
        prelu3=jnp.full((planes,), 0.25, jnp.float32),
        bias32=jnp.zeros((planes,), jnp.float32),
    )


def basic_block_forward(x_nchw, params, n_bit, act_dtype=jnp.bfloat16):
    """Forward value of BasicBlock (stride=1, no downsample).  NCHW in / out."""
    x = jnp.transpose(x_nchw, (0, 2, 3, 1)).astype(jnp.float32)   # NHWC, f32
    N, H, W, C = x.shape
    Wp = W + 2
    count = N * H * W
    n_val = 2 ** n_bit - 1
    planes, inplanes = params["conv1_w"].shape[0], params["conv1_w"].shape[1]
    # TODO(synk): stride>1 / downsample path of BasicBlock not implemented.
    assert inplanes == planes == C, "residual path requires stride=1, no downsample"
    ones_c = jnp.ones((C,), jnp.float32)
    zeros_c = jnp.zeros((C,), jnp.float32)

    # ---- stage 1: bias11 -> prelu1 -> bias12 -> quan1 -> conv1 (+ BN1 moments)
    q1 = params["quan1"]
    t1, s1 = ltq_tables(q1["start"], q1["a"], q1["eps"], n_bit)
    sc1 = _pack_ltq_scalars(q1["scale1"], q1["scale2"], t1, s1)
    par1 = _pack_channel_params(C, ones_c, zeros_c,
                                params["bias11"], params["prelu1"], params["bias12"])
    qw1 = quantize_conv_weight(params["conv1_w"], n_bit, params["conv1_clip"])
    w1 = jnp.transpose(qw1, (2, 3, 1, 0)).reshape(9 * C, C)        # OIHW -> (9*Cin, Cout)
    y1, sum1, ssq1 = fused_preact_conv(x, par1, sc1, w1, H, W, apply_bn=False,
                                       act_dtype=act_dtype, n_val=n_val)
    bn1_s, bn1_b = bn_affine_from_moments(sum1, ssq1, count,
                                          params["bn1_gamma"], params["bn1_beta"])

    # ---- stage 2: bn1 -> bias21 -> prelu2 -> bias22 -> quan2 -> conv2 (+ BN2 moments)
    q2 = params["quan2"]
    t2, s2 = ltq_tables(q2["start"], q2["a"], q2["eps"], n_bit)
    sc2 = _pack_ltq_scalars(q2["scale1"], q2["scale2"], t2, s2)
    par2 = _pack_channel_params(C, bn1_s, bn1_b,
                                params["bias21"], params["prelu2"], params["bias22"])
    qw2 = quantize_conv_weight(params["conv2_w"], n_bit, params["conv2_clip"])
    w2 = jnp.transpose(qw2, (2, 3, 1, 0)).reshape(9 * C, C)
    y2, sum2, ssq2 = fused_preact_conv(y1.reshape(N, H, Wp, C), par2, sc2, w2, H, W,
                                       apply_bn=True, act_dtype=act_dtype, n_val=n_val)
    bn2_s, bn2_b = bn_affine_from_moments(sum2, ssq2, count,
                                          params["bn2_gamma"], params["bn2_beta"])

    # ---- stage 3: bn2 -> +identity -> bias31 -> prelu3 -> bias32
    par3 = _pack_channel_params(C, bn2_s, bn2_b,
                                params["bias31"], params["prelu3"], params["bias32"])
    out = bn_residual_act(y2.reshape(N, H, Wp, C), x, par3)
    return jnp.transpose(out, (0, 3, 1, 2))


# ---------------------------------------------------------------------------
# Pure-JAX reference (NCHW).  act_dtype=float32 mirrors the PyTorch forward
# literally; act_dtype=bfloat16 additionally mirrors the bf16 storage points of
# the Pallas pipeline (after LTQ, after each conv, identity, final output).
# ---------------------------------------------------------------------------
def ref_forward(x, params, n_bit, act_dtype=jnp.float32):
    f32 = jnp.float32
    cast = lambda t: t.astype(act_dtype).astype(f32)

    def bias(t, b): return t + b.reshape(1, -1, 1, 1)
    def prelu(t, w): return jnp.where(t >= 0, t, w.reshape(1, -1, 1, 1) * t)

    def ltq(t, q):
        n_val = 2 ** n_bit - 1
        interval = 2.0 / n_val
        t = t * q["scale1"]
        a_pos = jnp.where(q["a"] > q["eps"], q["a"], q["eps"])
        xf = jnp.zeros_like(t)
        thr = q["start"][0] + a_pos[0] / 2.0
        for i in range(n_val):
            if i > 0:
                thr = thr + a_pos[i - 1] / 2.0 + a_pos[i] / 2.0
            xf = jnp.where(t > thr, (i + 1) * interval, xf)
        return xf * q["scale2"]

    def conv(a, w, clip):
        qw = cast(quantize_conv_weight(w, n_bit, clip))
        return jax.lax.conv_general_dilated(
            a, qw, (1, 1), ((1, 1), (1, 1)),
            dimension_numbers=("NCHW", "OIHW", "NCHW"),
            precision=jax.lax.Precision.HIGHEST)

    def bn(y_acc, g, b, eps=1e-5):
        m = jnp.mean(y_acc, axis=(0, 2, 3), keepdims=True)
        v = jnp.mean((y_acc - m) ** 2, axis=(0, 2, 3), keepdims=True)   # biased var
        scale = g.reshape(1, -1, 1, 1) / jnp.sqrt(v + eps)
        shift = b.reshape(1, -1, 1, 1) - m * scale
        return cast(y_acc) * scale + shift

    identity = x
    out = bias(x, params["bias11"]); out = prelu(out, params["prelu1"])
    out = bias(out, params["bias12"]); out = cast(ltq(out, params["quan1"]))
    y1 = conv(out, params["conv1_w"], params["conv1_clip"])
    out = bn(y1, params["bn1_gamma"], params["bn1_beta"])
    out = bias(out, params["bias21"]); out = prelu(out, params["prelu2"])
    out = bias(out, params["bias22"]); out = cast(ltq(out, params["quan2"]))
    y2 = conv(out, params["conv2_w"], params["conv2_clip"])
    out = bn(y2, params["bn2_gamma"], params["bn2_beta"])
    out = out + cast(identity)
    out = bias(out, params["bias31"]); out = prelu(out, params["prelu3"])
    out = bias(out, params["bias32"])
    return cast(out)


if __name__ == "__main__":
    n_bit = 2
    N, C, H, W = 2, 8, 16, 16          # inplanes == planes, stride=1, no downsample

    key = jax.random.PRNGKey(0)
    kx, kp = jax.random.split(key)
    x = jax.random.normal(kx, (N, C, H, W), jnp.float32)
    params = init_basic_block(kp, n_bit, C, C)

    fwd_bf16 = jax.jit(functools.partial(basic_block_forward, n_bit=n_bit,
                                         act_dtype=jnp.bfloat16))
    fwd_f32 = jax.jit(functools.partial(basic_block_forward, n_bit=n_bit,
                                        act_dtype=jnp.float32))

    out_bf16 = fwd_bf16(x, params)
    jax.block_until_ready(out_bf16)
    out_f32 = fwd_f32(x, params)
    jax.block_until_ready(out_f32)

    assert out_bf16.shape == (N, C, H, W)
    assert out_f32.shape == (N, C, H, W)
    assert bool(jnp.all(jnp.isfinite(out_bf16.astype(jnp.float32))))
    assert bool(jnp.all(jnp.isfinite(out_f32)))

    # (1) bf16 pipeline vs a reference with matching bf16 storage points.  All MXU
    #     products are exact for bf16 operands, so this is the tight functional
    #     check (mismatch-fraction criterion tolerates rare LTQ bin flips on
    #     rounding boundaries, which BN amplification can turn into local outliers).
    ref_b = ref_forward(x, params, n_bit, jnp.bfloat16)
    mis_b = float(jnp.mean((jnp.abs(out_bf16.astype(jnp.float32) - ref_b) > 2e-2)
                           .astype(jnp.float32)))
    assert mis_b < 0.05, f"bf16 mismatch fraction too high: {mis_b}"

    # (2) f32 pipeline vs the PyTorch-faithful f32 reference (kernel emulates the
    #     f32 matmul with a 3-pass bf16 split ~ Precision.HIGHEST).
    ref_f = ref_forward(x, params, n_bit, jnp.float32)
    mis_f = float(jnp.mean((jnp.abs(out_f32 - ref_f) > 1e-2).astype(jnp.float32)))
    assert mis_f < 0.05, f"f32 mismatch fraction too high: {mis_f}"

    print("KERNEL_OK")
</pallas_src>

<mosaic_0001>
module attributes {stable_mosaic.version = 11 : i64} {
  func.func @_stage_kernel(%arg0: i32, %arg1: memref<1x16x18x8xbf16, #tpu.memory_space<vmem>>, %arg2: memref<5x8xf32, #tpu.memory_space<vmem>>, %arg3: memref<8xf32, #tpu.memory_space<smem>>, %arg4: memref<72x8xbf16, #tpu.memory_space<vmem>>, %arg5: memref<1x288x8xbf16, #tpu.memory_space<vmem>>, %arg6: memref<1x1x8xf32, #tpu.memory_space<vmem>>, %arg7: memref<1x1x8xf32, #tpu.memory_space<vmem>>, %arg8: memref<360x8xbf16, #tpu.memory_space<vmem>>) attributes {dimension_semantics = [#tpu.dimension_semantics<parallel>], iteration_bounds = array<i64: 2>, scalar_prefetch = 0 : i64, scratch_operands = 1 : i64, tpu.core_type = #tpu.core_type<tc>, window_params = [{transform_indices = @transform_0, window_bounds = array<i64: 1, 16, 18, 8>}, {pipeline_mode = #tpu.pipeline_mode<synchronous>, transform_indices = @transform_1, window_bounds = array<i64: 5, 8>}, {transform_indices = @transform_2, window_bounds = array<i64: 8>}, {pipeline_mode = #tpu.pipeline_mode<synchronous>, transform_indices = @transform_3, window_bounds = array<i64: 72, 8>}, {transform_indices = @transform_4, window_bounds = array<i64: 1, 288, 8>}, {transform_indices = @transform_5, window_bounds = array<i64: 1, 1, 8>}, {transform_indices = @transform_6, window_bounds = array<i64: 1, 1, 8>}]} {
    %c0 = arith.constant 0 : index
    %c0_0 = arith.constant 0 : index
    %0 = vector.load %arg2[%c0, %c0_0] : memref<5x8xf32, #tpu.memory_space<vmem>>, vector<5x8xf32>
    %c0_1 = arith.constant 0 : index
    %c0_2 = arith.constant 0 : index
    %c0_3 = arith.constant 0 : index
    %c0_4 = arith.constant 0 : index
    %1 = vector.load %arg1[%c0_1, %c0_2, %c0_3, %c0_4] : memref<1x16x18x8xbf16, #tpu.memory_space<vmem>>, vector<1x16x18x8xbf16>
    %2 = vector.extract_strided_slice %1 {offsets = [0, 0, 0, 0], sizes = [1, 16, 16, 8], strides = [1, 1, 1, 1]} : vector<1x16x18x8xbf16> to vector<1x16x16x8xbf16>
    %3 = vector.shape_cast %2 : vector<1x16x16x8xbf16> to vector<16x16x8xbf16>
    %4 = arith.extf %3 : vector<16x16x8xbf16> to vector<16x16x8xf32>
    %5 = vector.extract_strided_slice %0 {offsets = [0, 0], sizes = [1, 8], strides = [1, 1]} : vector<5x8xf32> to vector<1x8xf32>
    %6 = vector.shape_cast %5 : vector<1x8xf32> to vector<1x1x8xf32>
    %7 = vector.broadcast %6 : vector<1x1x8xf32> to vector<16x16x8xf32>
    %8 = arith.mulf %4, %7 : vector<16x16x8xf32>
    %9 = vector.extract_strided_slice %0 {offsets = [1, 0], sizes = [1, 8], strides = [1, 1]} : vector<5x8xf32> to vector<1x8xf32>
    %10 = vector.shape_cast %9 : vector<1x8xf32> to vector<1x1x8xf32>
    %11 = vector.broadcast %10 : vector<1x1x8xf32> to vector<16x16x8xf32>
    %12 = arith.addf %8, %11 : vector<16x16x8xf32>
    %13 = vector.extract_strided_slice %0 {offsets = [2, 0], sizes = [1, 8], strides = [1, 1]} : vector<5x8xf32> to vector<1x8xf32>
    %14 = vector.shape_cast %13 : vector<1x8xf32> to vector<1x1x8xf32>
    %15 = vector.broadcast %14 : vector<1x1x8xf32> to vector<16x16x8xf32>
    %16 = arith.addf %12, %15 : vector<16x16x8xf32>
    %cst = arith.constant 0.000000e+00 : f32
    %17 = vector.broadcast %cst : f32 to vector<16x16x8xf32>
    %18 = arith.cmpf oge, %16, %17 : vector<16x16x8xf32>
    %19 = vector.extract_strided_slice %0 {offsets = [3, 0], sizes = [1, 8], strides = [1, 1]} : vector<5x8xf32> to vector<1x8xf32>
    %20 = vector.shape_cast %19 : vector<1x8xf32> to vector<1x1x8xf32>
    %21 = vector.broadcast %20 : vector<1x1x8xf32> to vector<16x16x8xf32>
    %22 = arith.mulf %21, %16 : vector<16x16x8xf32>
    %23 = arith.select %18, %16, %22 : vector<16x16x8xi1>, vector<16x16x8xf32>
    %24 = vector.extract_strided_slice %0 {offsets = [4, 0], sizes = [1, 8], strides = [1, 1]} : vector<5x8xf32> to vector<1x8xf32>
    %25 = vector.shape_cast %24 : vector<1x8xf32> to vector<1x1x8xf32>
    %26 = vector.broadcast %25 : vector<1x1x8xf32> to vector<16x16x8xf32>
    %27 = arith.addf %23, %26 : vector<16x16x8xf32>
    %c0_5 = arith.constant 0 : index
    %28 = memref.load %arg3[%c0_5] : memref<8xf32, #tpu.memory_space<smem>>
    %29 = vector.broadcast %28 : f32 to vector<16x16x8xf32>
    %30 = arith.mulf %27, %29 : vector<16x16x8xf32>
    %cst_6 = arith.constant 0.000000e+00 : f32
    %31 = vector.broadcast %cst_6 : f32 to vector<16x16x8xf32>
    %c2 = arith.constant 2 : index
    %32 = memref.load %arg3[%c2] : memref<8xf32, #tpu.memory_space<smem>>
    %33 = vector.broadcast %32 : f32 to vector<16x16x8xf32>
    %34 = arith.cmpf ogt, %30, %33 : vector<16x16x8xf32>
    %c5 = arith.constant 5 : index
    %35 = memref.load %arg3[%c5] : memref<8xf32, #tpu.memory_space<smem>>
    %36 = vector.broadcast %35 : f32 to vector<16x16x8xf32>
    %37 = arith.select %34, %36, %31 : vector<16x16x8xi1>, vector<16x16x8xf32>
    %c3 = arith.constant 3 : index
    %38 = memref.load %arg3[%c3] : memref<8xf32, #tpu.memory_space<smem>>
    %39 = vector.broadcast %38 : f32 to vector<16x16x8xf32>
    %40 = arith.cmpf ogt, %30, %39 : vector<16x16x8xf32>
    %c6 = arith.constant 6 : index
    %41 = memref.load %arg3[%c6] : memref<8xf32, #tpu.memory_space<smem>>
    %42 = vector.broadcast %41 : f32 to vector<16x16x8xf32>
    %43 = arith.select %40, %42, %37 : vector<16x16x8xi1>, vector<16x16x8xf32>
    %c4 = arith.constant 4 : index
    %44 = memref.load %arg3[%c4] : memref<8xf32, #tpu.memory_space<smem>>
    %45 = vector.broadcast %44 : f32 to vector<16x16x8xf32>
    %46 = arith.cmpf ogt, %30, %45 : vector<16x16x8xf32>
    %c7 = arith.constant 7 : index
    %47 = memref.load %arg3[%c7] : memref<8xf32, #tpu.memory_space<smem>>
    %48 = vector.broadcast %47 : f32 to vector<16x16x8xf32>
    %49 = arith.select %46, %48, %43 : vector<16x16x8xi1>, vector<16x16x8xf32>
    %c1 = arith.constant 1 : index
    %50 = memref.load %arg3[%c1] : memref<8xf32, #tpu.memory_space<smem>>
    %51 = vector.broadcast %50 : f32 to vector<16x16x8xf32>
    %52 = arith.mulf %49, %51 : vector<16x16x8xf32>
    %53 = arith.truncf %52 : vector<16x16x8xf32> to vector<16x16x8xbf16>
    %cst_7 = arith.constant 0.000000e+00 : bf16
    %54 = vector.broadcast %cst_7 : bf16 to vector<36x8xbf16>
    %c0_8 = arith.constant 0 : index
    %c0_9 = arith.constant 0 : index
    %55 = vector.load %arg8[%c0_8, %c0_9] : memref<360x8xbf16, #tpu.memory_space<vmem>>, vector<36x8xbf16>
    tpu.vector_store %arg8[%c0_8, %c0_9], %54 {strides = array<i32>} : memref<360x8xbf16, #tpu.memory_space<vmem>>, vector<36x8xbf16>,
    %c324 = arith.constant 324 : index
    %c0_10 = arith.constant 0 : index
    %56 = vector.load %arg8[%c324, %c0_10] : memref<360x8xbf16, #tpu.memory_space<vmem>>, vector<36x8xbf16>
    tpu.vector_store %arg8[%c324, %c0_10], %54 {strides = array<i32>} : memref<360x8xbf16, #tpu.memory_space<vmem>>, vector<36x8xbf16>,
    %cst_11 = arith.constant 0.000000e+00 : bf16
    %57 = vector.broadcast %cst_11 : bf16 to vector<16x2x8xbf16>
    %58 = tpu.concatenate %53, %57 in 1 : vector<16x16x8xbf16>, vector<16x2x8xbf16> -> vector<16x18x8xbf16>
    %59 = vector.shape_cast %58 : vector<16x18x8xbf16> to vector<288x8xbf16>
    %c36 = arith.constant 36 : index
    %c0_12 = arith.constant 0 : index
    %60 = vector.load %arg8[%c36, %c0_12] : memref<360x8xbf16, #tpu.memory_space<vmem>>, vector<288x8xbf16>
    tpu.vector_store %arg8[%c36, %c0_12], %59 {strides = array<i32>} : memref<360x8xbf16, #tpu.memory_space<vmem>>, vector<288x8xbf16>,
    %c0_13 = arith.constant 0 : index
    %c0_14 = arith.constant 0 : index
    %61 = vector.load %arg4[%c0_13, %c0_14] : memref<72x8xbf16, #tpu.memory_space<vmem>>, vector<72x8xbf16>
    %cst_15 = arith.constant 0.000000e+00 : f32
    %62 = vector.broadcast %cst_15 : f32 to vector<1x8xf32>
    %cst_16 = arith.constant 0.000000e+00 : f32
    %63 = vector.broadcast %cst_16 : f32 to vector<1x8xf32>
    %c17 = arith.constant 17 : index
    %c0_17 = arith.constant 0 : index
    %64 = vector.load %arg8[%c17, %c0_17] : memref<360x8xbf16, #tpu.memory_space<vmem>>, vector<288x8xbf16>
    %c18 = arith.constant 18 : index
    %c0_18 = arith.constant 0 : index
    %65 = vector.load %arg8[%c18, %c0_18] : memref<360x8xbf16, #tpu.memory_space<vmem>>, vector<288x8xbf16>
    %c19 = arith.constant 19 : index
    %c0_19 = arith.constant 0 : index
    %66 = vector.load %arg8[%c19, %c0_19] : memref<360x8xbf16, #tpu.memory_space<vmem>>, vector<288x8xbf16>
    %c35 = arith.constant 35 : index
    %c0_20 = arith.constant 0 : index
    %67 = vector.load %arg8[%c35, %c0_20] : memref<360x8xbf16, #tpu.memory_space<vmem>>, vector<288x8xbf16>
    %c36_21 = arith.constant 36 : index
    %c0_22 = arith.constant 0 : index
    %68 = vector.load %arg8[%c36_21, %c0_22] : memref<360x8xbf16, #tpu.memory_space<vmem>>, vector<288x8xbf16>
    %c37 = arith.constant 37 : index
    %c0_23 = arith.constant 0 : index
    %69 = vector.load %arg8[%c37, %c0_23] : memref<360x8xbf16, #tpu.memory_space<vmem>>, vector<288x8xbf16>
    %c53 = arith.constant 53 : index
    %c0_24 = arith.constant 0 : index
    %70 = vector.load %arg8[%c53, %c0_24] : memref<360x8xbf16, #tpu.memory_space<vmem>>, vector<288x8xbf16>
    %c54 = arith.constant 54 : index
    %c0_25 = arith.constant 0 : index
    %71 = vector.load %arg8[%c54, %c0_25] : memref<360x8xbf16, #tpu.memory_space<vmem>>, vector<288x8xbf16>
    %c55 = arith.constant 55 : index
    %c0_26 = arith.constant 0 : index
    %72 = vector.load %arg8[%c55, %c0_26] : memref<360x8xbf16, #tpu.memory_space<vmem>>, vector<288x8xbf16>
    %73 = tpu.concatenate %64, %65, %66, %67, %68, %69, %70, %71, %72 in 1 : vector<288x8xbf16>, vector<288x8xbf16>, vector<288x8xbf16>, vector<288x8xbf16>, vector<288x8xbf16>, vector<288x8xbf16>, vector<288x8xbf16>, vector<288x8xbf16>, vector<288x8xbf16> -> vector<288x72xbf16>
    %cst_27 = arith.constant dense<0.000000e+00> : vector<288x8xf32>
    %74 = tpu.matmul %73, %61, %cst_27 {dimension_numbers = #tpu.dot_dimension_numbers<[1], [0], [0], [1], [0, 0, 1, 1], [], []>} : vector<288x72xbf16>, vector<72x8xbf16>, vector<288x8xf32> -> vector<288x8xf32>
    %75 = tpu.iota {dimensions = array<i32: 0>} : vector<288x1xi32>
    %c0_i32 = arith.constant 0 : i32
    %76 = vector.broadcast %c0_i32 : i32 to vector<288x1xi32>
    %77 = arith.addi %75, %76 : vector<288x1xi32>
    %c18_i32 = arith.constant 18 : i32
    %c0_i32_28 = arith.constant 0 : i32
    %78 = arith.cmpi eq, %c18_i32, %c0_i32_28 : i32
    %c1_i32 = arith.constant 1 : i32
    %79 = arith.select %78, %c1_i32, %c18_i32 : i32
    %80 = vector.broadcast %79 : i32 to vector<288x1xi32>
    %81 = arith.remsi %77, %80 : vector<288x1xi32>
    %c0_i32_29 = arith.constant 0 : i32
    %82 = vector.broadcast %c0_i32_29 : i32 to vector<288x1xi32>
    %83 = arith.cmpi ne, %81, %82 : vector<288x1xi32>
    %c0_i32_30 = arith.constant 0 : i32
    %84 = vector.broadcast %c0_i32_30 : i32 to vector<288x1xi32>
    %85 = arith.cmpi slt, %81, %84 : vector<288x1xi32>
    %c0_i32_31 = arith.constant 0 : i32
    %86 = arith.cmpi slt, %79, %c0_i32_31 : i32
    %87 = vector.broadcast %86 : i1 to vector<288x1xi1>
    %88 = vector.broadcast %87 : vector<288x1xi1> to vector<288x1xi1>
    %89 = arith.xori %85, %88 : vector<288x1xi1>
    %90 = arith.andi %89, %83 : vector<288x1xi1>
    %91 = vector.broadcast %79 : i32 to vector<288x1xi32>
    %92 = arith.addi %81, %91 : vector<288x1xi32>
    %93 = arith.select %90, %92, %81 : vector<288x1xi1>, vector<288x1xi32>
    %c16_i32 = arith.constant 16 : i32
    %94 = vector.broadcast %c16_i32 : i32 to vector<288x1xi32>
    %95 = arith.cmpi slt, %93, %94 : vector<288x1xi32>
    %96 = arith.extui %95 : vector<288x1xi1> to vector<288x1xi32>
    %97 = arith.sitofp %96 : vector<288x1xi32> to vector<288x1xf32>
    %98 = vector.broadcast %97 : vector<288x1xf32> to vector<288x8xf32>
    %99 = arith.mulf %74, %98 : vector<288x8xf32>
    %cst_32 = arith.constant dense<0.000000e+00> : vector<8xf32>
    %100 = vector.multi_reduction <add>, %99, %cst_32 [0] : vector<288x8xf32> to vector<8xf32>
    %101 = vector.shape_cast %100 : vector<8xf32> to vector<1x8xf32>
    %102 = arith.addf %62, %101 : vector<1x8xf32>
    %103 = arith.mulf %99, %74 : vector<288x8xf32>
    %cst_33 = arith.constant dense<0.000000e+00> : vector<8xf32>
    %104 = vector.multi_reduction <add>, %103, %cst_33 [0] : vector<288x8xf32> to vector<8xf32>
    %105 = vector.shape_cast %104 : vector<8xf32> to vector<1x8xf32>
    %106 = arith.addf %63, %105 : vector<1x8xf32>
    %107 = vector.shape_cast %74 : vector<288x8xf32> to vector<1x288x8xf32>
    %108 = arith.truncf %107 : vector<1x288x8xf32> to vector<1x288x8xbf16>
    %c0_34 = arith.constant 0 : index
    %c0_35 = arith.constant 0 : index
    %c0_36 = arith.constant 0 : index
    %109 = vector.load %arg5[%c0_34, %c0_35, %c0_36] : memref<1x288x8xbf16, #tpu.memory_space<vmem>>, vector<1x288x8xbf16>
    tpu.vector_store %arg5[%c0_34, %c0_35, %c0_36], %108 {strides = array<i32>} : memref<1x288x8xbf16, #tpu.memory_space<vmem>>, vector<1x288x8xbf16>,
    %110 = vector.shape_cast %102 : vector<1x8xf32> to vector<1x1x8xf32>
    %c0_37 = arith.constant 0 : index
    %c0_38 = arith.constant 0 : index
    %c0_39 = arith.constant 0 : index
    %111 = vector.load %arg6[%c0_37, %c0_38, %c0_39] : memref<1x1x8xf32, #tpu.memory_space<vmem>>, vector<1x1x8xf32>
    tpu.vector_store %arg6[%c0_37, %c0_38, %c0_39], %110 {strides = array<i32>} : memref<1x1x8xf32, #tpu.memory_space<vmem>>, vector<1x1x8xf32>,
    %112 = vector.shape_cast %106 : vector<1x8xf32> to vector<1x1x8xf32>
    %c0_40 = arith.constant 0 : index
    %c0_41 = arith.constant 0 : index
    %c0_42 = arith.constant 0 : index
    %113 = vector.load %arg7[%c0_40, %c0_41, %c0_42] : memref<1x1x8xf32, #tpu.memory_space<vmem>>, vector<1x1x8xf32>
    tpu.vector_store %arg7[%c0_40, %c0_41, %c0_42], %112 {strides = array<i32>} : memref<1x1x8xf32, #tpu.memory_space<vmem>>, vector<1x1x8xf32>,
    return
  }
  func.func @transform_0(%arg0: i32) -> (i32, i32, i32, i32) {
    %c0_i32 = arith.constant 0 : i32
    %c0_i32_0 = arith.constant 0 : i32
    %c0_i32_1 = arith.constant 0 : i32
    %c0_i32_2 = arith.constant 0 : i32
    return %arg0, %c0_i32, %c0_i32_0, %c0_i32_1 : i32, i32, i32, i32
  }
  func.func @transform_1(%arg0: i32) -> (i32, i32) {
    %c0_i32 = arith.constant 0 : i32
    %c0_i32_0 = arith.constant 0 : i32
    %c0_i32_1 = arith.constant 0 : i32
    return %c0_i32, %c0_i32_0 : i32, i32
  }
  func.func @transform_2(%arg0: i32) -> i32 {
    %c0_i32 = arith.constant 0 : i32
    %c0_i32_0 = arith.constant 0 : i32
    return %c0_i32 : i32
  }
  func.func @transform_3(%arg0: i32) -> (i32, i32) {
    %c0_i32 = arith.constant 0 : i32
    %c0_i32_0 = arith.constant 0 : i32
    %c0_i32_1 = arith.constant 0 : i32
    return %c0_i32, %c0_i32_0 : i32, i32
  }
  func.func @transform_4(%arg0: i32) -> (i32, i32, i32) {
    %c0_i32 = arith.constant 0 : i32
    %c0_i32_0 = arith.constant 0 : i32
    %c0_i32_1 = arith.constant 0 : i32
    return %arg0, %c0_i32, %c0_i32_0 : i32, i32, i32
  }
  func.func @transform_5(%arg0: i32) -> (i32, i32, i32) {
    %c0_i32 = arith.constant 0 : i32
    %c0_i32_0 = arith.constant 0 : i32
    %c0_i32_1 = arith.constant 0 : i32
    return %arg0, %c0_i32, %c0_i32_0 : i32, i32, i32
  }
  func.func @transform_6(%arg0: i32) -> (i32, i32, i32) {
    %c0_i32 = arith.constant 0 : i32
    %c0_i32_0 = arith.constant 0 : i32
    %c0_i32_1 = arith.constant 0 : i32
    return %arg0, %c0_i32, %c0_i32_0 : i32, i32, i32
  }
}

module attributes {stable_mosaic.version = 11 : i64} {
  func.func @_stage_kernel(%arg0: i32, %arg1: memref<1x16x16x8xf32, #tpu.memory_space<vmem>>, %arg2: memref<5x8xf32, #tpu.memory_space<vmem>>, %arg3: memref<8xf32, #tpu.memory_space<smem>>, %arg4: memref<72x8xbf16, #tpu.memory_space<vmem>>, %arg5: memref<1x288x8xbf16, #tpu.memory_space<vmem>>, %arg6: memref<1x1x8xf32, #tpu.memory_space<vmem>>, %arg7: memref<1x1x8xf32, #tpu.memory_space<vmem>>, %arg8: memref<360x8xbf16, #tpu.memory_space<vmem>>) attributes {dimension_semantics = [#tpu.dimension_semantics<parallel>], iteration_bounds = array<i64: 2>, scalar_prefetch = 0 : i64, scratch_operands = 1 : i64, tpu.core_type = #tpu.core_type<tc>, window_params = [{transform_indices = @transform_0, window_bounds = array<i64: 1, 16, 16, 8>}, {pipeline_mode = #tpu.pipeline_mode<synchronous>, transform_indices = @transform_1, window_bounds = array<i64: 5, 8>}, {transform_indices = @transform_2, window_bounds = array<i64: 8>}, {pipeline_mode = #tpu.pipeline_mode<synchronous>, transform_indices = @transform_3, window_bounds = array<i64: 72, 8>}, {transform_indices = @transform_4, window_bounds = array<i64: 1, 288, 8>}, {transform_indices = @transform_5, window_bounds = array<i64: 1, 1, 8>}, {transform_indices = @transform_6, window_bounds = array<i64: 1, 1, 8>}]} {
    %c0 = arith.constant 0 : index
    %c0_0 = arith.constant 0 : index
    %0 = vector.load %arg2[%c0, %c0_0] : memref<5x8xf32, #tpu.memory_space<vmem>>, vector<5x8xf32>
    %c0_1 = arith.constant 0 : index
    %c0_2 = arith.constant 0 : index
    %c0_3 = arith.constant 0 : index
    %c0_4 = arith.constant 0 : index
    %1 = vector.load %arg1[%c0_1, %c0_2, %c0_3, %c0_4] : memref<1x16x16x8xf32, #tpu.memory_space<vmem>>, vector<1x16x16x8xf32>
    %2 = vector.shape_cast %1 : vector<1x16x16x8xf32> to vector<16x16x8xf32>
    %3 = vector.extract_strided_slice %0 {offsets = [2, 0], sizes = [1, 8], strides = [1, 1]} : vector<5x8xf32> to vector<1x8xf32>
    %4 = vector.shape_cast %3 : vector<1x8xf32> to vector<1x1x8xf32>
    %5 = vector.broadcast %4 : vector<1x1x8xf32> to vector<16x16x8xf32>
    %6 = arith.addf %2, %5 : vector<16x16x8xf32>
    %cst = arith.constant 0.000000e+00 : f32
    %7 = vector.broadcast %cst : f32 to vector<16x16x8xf32>
    %8 = arith.cmpf oge, %6, %7 : vector<16x16x8xf32>
    %9 = vector.extract_strided_slice %0 {offsets = [3, 0], sizes = [1, 8], strides = [1, 1]} : vector<5x8xf32> to vector<1x8xf32>
    %10 = vector.shape_cast %9 : vector<1x8xf32> to vector<1x1x8xf32>
    %11 = vector.broadcast %10 : vector<1x1x8xf32> to vector<16x16x8xf32>
    %12 = arith.mulf %11, %6 : vector<16x16x8xf32>
    %13 = arith.select %8, %6, %12 : vector<16x16x8xi1>, vector<16x16x8xf32>
    %14 = vector.extract_strided_slice %0 {offsets = [4, 0], sizes = [1, 8], strides = [1, 1]} : vector<5x8xf32> to vector<1x8xf32>
    %15 = vector.shape_cast %14 : vector<1x8xf32> to vector<1x1x8xf32>
    %16 = vector.broadcast %15 : vector<1x1x8xf32> to vector<16x16x8xf32>
    %17 = arith.addf %13, %16 : vector<16x16x8xf32>
    %c0_5 = arith.constant 0 : index
    %18 = memref.load %arg3[%c0_5] : memref<8xf32, #tpu.memory_space<smem>>
    %19 = vector.broadcast %18 : f32 to vector<16x16x8xf32>
    %20 = arith.mulf %17, %19 : vector<16x16x8xf32>
    %cst_6 = arith.constant 0.000000e+00 : f32
    %21 = vector.broadcast %cst_6 : f32 to vector<16x16x8xf32>
    %c2 = arith.constant 2 : index
    %22 = memref.load %arg3[%c2] : memref<8xf32, #tpu.memory_space<smem>>
    %23 = vector.broadcast %22 : f32 to vector<16x16x8xf32>
    %24 = arith.cmpf ogt, %20, %23 : vector<16x16x8xf32>
    %c5 = arith.constant 5 : index
    %25 = memref.load %arg3[%c5] : memref<8xf32, #tpu.memory_space<smem>>
    %26 = vector.broadcast %25 : f32 to vector<16x16x8xf32>
    %27 = arith.select %24, %26, %21 : vector<16x16x8xi1>, vector<16x16x8xf32>
    %c3 = arith.constant 3 : index
    %28 = memref.load %arg3[%c3] : memref<8xf32, #tpu.memory_space<smem>>
    %29 = vector.broadcast %28 : f32 to vector<16x16x8xf32>
    %30 = arith.cmpf ogt, %20, %29 : vector<16x16x8xf32>
    %c6 = arith.constant 6 : index
    %31 = memref.load %arg3[%c6] : memref<8xf32, #tpu.memory_space<smem>>
    %32 = vector.broadcast %31 : f32 to vector<16x16x8xf32>
    %33 = arith.select %30, %32, %27 : vector<16x16x8xi1>, vector<16x16x8xf32>
    %c4 = arith.constant 4 : index
    %34 = memref.load %arg3[%c4] : memref<8xf32, #tpu.memory_space<smem>>
    %35 = vector.broadcast %34 : f32 to vector<16x16x8xf32>
    %36 = arith.cmpf ogt, %20, %35 : vector<16x16x8xf32>
    %c7 = arith.constant 7 : index
    %37 = memref.load %arg3[%c7] : memref<8xf32, #tpu.memory_space<smem>>
    %38 = vector.broadcast %37 : f32 to vector<16x16x8xf32>
    %39 = arith.select %36, %38, %33 : vector<16x16x8xi1>, vector<16x16x8xf32>
    %c1 = arith.constant 1 : index
    %40 = memref.load %arg3[%c1] : memref<8xf32, #tpu.memory_space<smem>>
    %41 = vector.broadcast %40 : f32 to vector<16x16x8xf32>
    %42 = arith.mulf %39, %41 : vector<16x16x8xf32>
    %43 = arith.truncf %42 : vector<16x16x8xf32> to vector<16x16x8xbf16>
    %cst_7 = arith.constant 0.000000e+00 : bf16
    %44 = vector.broadcast %cst_7 : bf16 to vector<36x8xbf16>
    %c0_8 = arith.constant 0 : index
    %c0_9 = arith.constant 0 : index
    %45 = vector.load %arg8[%c0_8, %c0_9] : memref<360x8xbf16, #tpu.memory_space<vmem>>, vector<36x8xbf16>
    tpu.vector_store %arg8[%c0_8, %c0_9], %44 {strides = array<i32>} : memref<360x8xbf16, #tpu.memory_space<vmem>>, vector<36x8xbf16>,
    %c324 = arith.constant 324 : index
    %c0_10 = arith.constant 0 : index
    %46 = vector.load %arg8[%c324, %c0_10] : memref<360x8xbf16, #tpu.memory_space<vmem>>, vector<36x8xbf16>
    tpu.vector_store %arg8[%c324, %c0_10], %44 {strides = array<i32>} : memref<360x8xbf16, #tpu.memory_space<vmem>>, vector<36x8xbf16>,
    %cst_11 = arith.constant 0.000000e+00 : bf16
    %47 = vector.broadcast %cst_11 : bf16 to vector<16x2x8xbf16>
    %48 = tpu.concatenate %43, %47 in 1 : vector<16x16x8xbf16>, vector<16x2x8xbf16> -> vector<16x18x8xbf16>
    %49 = vector.shape_cast %48 : vector<16x18x8xbf16> to vector<288x8xbf16>
    %c36 = arith.constant 36 : index
    %c0_12 = arith.constant 0 : index
    %50 = vector.load %arg8[%c36, %c0_12] : memref<360x8xbf16, #tpu.memory_space<vmem>>, vector<288x8xbf16>
    tpu.vector_store %arg8[%c36, %c0_12], %49 {strides = array<i32>} : memref<360x8xbf16, #tpu.memory_space<vmem>>, vector<288x8xbf16>,
    %c0_13 = arith.constant 0 : index
    %c0_14 = arith.constant 0 : index
    %51 = vector.load %arg4[%c0_13, %c0_14] : memref<72x8xbf16, #tpu.memory_space<vmem>>, vector<72x8xbf16>
    %cst_15 = arith.constant 0.000000e+00 : f32
    %52 = vector.broadcast %cst_15 : f32 to vector<1x8xf32>
    %cst_16 = arith.constant 0.000000e+00 : f32
    %53 = vector.broadcast %cst_16 : f32 to vector<1x8xf32>
    %c17 = arith.constant 17 : index
    %c0_17 = arith.constant 0 : index
    %54 = vector.load %arg8[%c17, %c0_17] : memref<360x8xbf16, #tpu.memory_space<vmem>>, vector<288x8xbf16>
    %c18 = arith.constant 18 : index
    %c0_18 = arith.constant 0 : index
    %55 = vector.load %arg8[%c18, %c0_18] : memref<360x8xbf16, #tpu.memory_space<vmem>>, vector<288x8xbf16>
    %c19 = arith.constant 19 : index
    %c0_19 = arith.constant 0 : index
    %56 = vector.load %arg8[%c19, %c0_19] : memref<360x8xbf16, #tpu.memory_space<vmem>>, vector<288x8xbf16>
    %c35 = arith.constant 35 : index
    %c0_20 = arith.constant 0 : index
    %57 = vector.load %arg8[%c35, %c0_20] : memref<360x8xbf16, #tpu.memory_space<vmem>>, vector<288x8xbf16>
    %c36_21 = arith.constant 36 : index
    %c0_22 = arith.constant 0 : index
    %58 = vector.load %arg8[%c36_21, %c0_22] : memref<360x8xbf16, #tpu.memory_space<vmem>>, vector<288x8xbf16>
    %c37 = arith.constant 37 : index
    %c0_23 = arith.constant 0 : index
    %59 = vector.load %arg8[%c37, %c0_23] : memref<360x8xbf16, #tpu.memory_space<vmem>>, vector<288x8xbf16>
    %c53 = arith.constant 53 : index
    %c0_24 = arith.constant 0 : index
    %60 = vector.load %arg8[%c53, %c0_24] : memref<360x8xbf16, #tpu.memory_space<vmem>>, vector<288x8xbf16>
    %c54 = arith.constant 54 : index
    %c0_25 = arith.constant 0 : index
    %61 = vector.load %arg8[%c54, %c0_25] : memref<360x8xbf16, #tpu.memory_space<vmem>>, vector<288x8xbf16>
    %c55 = arith.constant 55 : index
    %c0_26 = arith.constant 0 : index
    %62 = vector.load %arg8[%c55, %c0_26] : memref<360x8xbf16, #tpu.memory_space<vmem>>, vector<288x8xbf16>
    %63 = tpu.concatenate %54, %55, %56, %57, %58, %59, %60, %61, %62 in 1 : vector<288x8xbf16>, vector<288x8xbf16>, vector<288x8xbf16>, vector<288x8xbf16>, vector<288x8xbf16>, vector<288x8xbf16>, vector<288x8xbf16>, vector<288x8xbf16>, vector<288x8xbf16> -> vector<288x72xbf16>
    %cst_27 = arith.constant dense<0.000000e+00> : vector<288x8xf32>
    %64 = tpu.matmul %63, %51, %cst_27 {dimension_numbers = #tpu.dot_dimension_numbers<[1], [0], [0], [1], [0, 0, 1, 1], [], []>} : vector<288x72xbf16>, vector<72x8xbf16>, vector<288x8xf32> -> vector<288x8xf32>
    %65 = tpu.iota {dimensions = array<i32: 0>} : vector<288x1xi32>
    %c0_i32 = arith.constant 0 : i32
    %66 = vector.broadcast %c0_i32 : i32 to vector<288x1xi32>
    %67 = arith.addi %65, %66 : vector<288x1xi32>
    %c18_i32 = arith.constant 18 : i32
    %c0_i32_28 = arith.constant 0 : i32
    %68 = arith.cmpi eq, %c18_i32, %c0_i32_28 : i32
    %c1_i32 = arith.constant 1 : i32
    %69 = arith.select %68, %c1_i32, %c18_i32 : i32
    %70 = vector.broadcast %69 : i32 to vector<288x1xi32>
    %71 = arith.remsi %67, %70 : vector<288x1xi32>
    %c0_i32_29 = arith.constant 0 : i32
    %72 = vector.broadcast %c0_i32_29 : i32 to vector<288x1xi32>
    %73 = arith.cmpi ne, %71, %72 : vector<288x1xi32>
    %c0_i32_30 = arith.constant 0 : i32
    %74 = vector.broadcast %c0_i32_30 : i32 to vector<288x1xi32>
    %75 = arith.cmpi slt, %71, %74 : vector<288x1xi32>
    %c0_i32_31 = arith.constant 0 : i32
    %76 = arith.cmpi slt, %69, %c0_i32_31 : i32
    %77 = vector.broadcast %76 : i1 to vector<288x1xi1>
    %78 = vector.broadcast %77 : vector<288x1xi1> to vector<288x1xi1>
    %79 = arith.xori %75, %78 : vector<288x1xi1>
    %80 = arith.andi %79, %73 : vector<288x1xi1>
    %81 = vector.broadcast %69 : i32 to vector<288x1xi32>
    %82 = arith.addi %71, %81 : vector<288x1xi32>
    %83 = arith.select %80, %82, %71 : vector<288x1xi1>, vector<288x1xi32>
    %c16_i32 = arith.constant 16 : i32
    %84 = vector.broadcast %c16_i32 : i32 to vector<288x1xi32>
    %85 = arith.cmpi slt, %83, %84 : vector<288x1xi32>
    %86 = arith.extui %85 : vector<288x1xi1> to vector<288x1xi32>
    %87 = arith.sitofp %86 : vector<288x1xi32> to vector<288x1xf32>
    %88 = vector.broadcast %87 : vector<288x1xf32> to vector<288x8xf32>
    %89 = arith.mulf %64, %88 : vector<288x8xf32>
    %cst_32 = arith.constant dense<0.000000e+00> : vector<8xf32>
    %90 = vector.multi_reduction <add>, %89, %cst_32 [0] : vector<288x8xf32> to vector<8xf32>
    %91 = vector.shape_cast %90 : vector<8xf32> to vector<1x8xf32>
    %92 = arith.addf %52, %91 : vector<1x8xf32>
    %93 = arith.mulf %89, %64 : vector<288x8xf32>
    %cst_33 = arith.constant dense<0.000000e+00> : vector<8xf32>
    %94 = vector.multi_reduction <add>, %93, %cst_33 [0] : vector<288x8xf32> to vector<8xf32>
    %95 = vector.shape_cast %94 : vector<8xf32> to vector<1x8xf32>
    %96 = arith.addf %53, %95 : vector<1x8xf32>
    %97 = vector.shape_cast %64 : vector<288x8xf32> to vector<1x288x8xf32>
    %98 = arith.truncf %97 : vector<1x288x8xf32> to vector<1x288x8xbf16>
    %c0_34 = arith.constant 0 : index
    %c0_35 = arith.constant 0 : index
    %c0_36 = arith.constant 0 : index
    %99 = vector.load %arg5[%c0_34, %c0_35, %c0_36] : memref<1x288x8xbf16, #tpu.memory_space<vmem>>, vector<1x288x8xbf16>
    tpu.vector_store %arg5[%c0_34, %c0_35, %c0_36], %98 {strides = array<i32>} : memref<1x288x8xbf16, #tpu.memory_space<vmem>>, vector<1x288x8xbf16>,
    %100 = vector.shape_cast %92 : vector<1x8xf32> to vector<1x1x8xf32>
    %c0_37 = arith.constant 0 : index
    %c0_38 = arith.constant 0 : index
    %c0_39 = arith.constant 0 : index
    %101 = vector.load %arg6[%c0_37, %c0_38, %c0_39] : memref<1x1x8xf32, #tpu.memory_space<vmem>>, vector<1x1x8xf32>
    tpu.vector_store %arg6[%c0_37, %c0_38, %c0_39], %100 {strides = array<i32>} : memref<1x1x8xf32, #tpu.memory_space<vmem>>, vector<1x1x8xf32>,
    %102 = vector.shape_cast %96 : vector<1x8xf32> to vector<1x1x8xf32>
    %c0_40 = arith.constant 0 : index
    %c0_41 = arith.constant 0 : index
    %c0_42 = arith.constant 0 : index
    %103 = vector.load %arg7[%c0_40, %c0_41, %c0_42] : memref<1x1x8xf32, #tpu.memory_space<vmem>>, vector<1x1x8xf32>
    tpu.vector_store %arg7[%c0_40, %c0_41, %c0_42], %102 {strides = array<i32>} : memref<1x1x8xf32, #tpu.memory_space<vmem>>, vector<1x1x8xf32>,
    return
  }
  func.func @transform_0(%arg0: i32) -> (i32, i32, i32, i32) {
    %c0_i32 = arith.constant 0 : i32
    %c0_i32_0 = arith.constant 0 : i32
    %c0_i32_1 = arith.constant 0 : i32
    %c0_i32_2 = arith.constant 0 : i32
    return %arg0, %c0_i32, %c0_i32_0, %c0_i32_1 : i32, i32, i32, i32
  }
  func.func @transform_1(%arg0: i32) -> (i32, i32) {
    %c0_i32 = arith.constant 0 : i32
    %c0_i32_0 = arith.constant 0 : i32
    %c0_i32_1 = arith.constant 0 : i32
    return %c0_i32, %c0_i32_0 : i32, i32
  }
  func.func @transform_2(%arg0: i32) -> i32 {
    %c0_i32 = arith.constant 0 : i32
    %c0_i32_0 = arith.constant 0 : i32
    return %c0_i32 : i32
  }
  func.func @transform_3(%arg0: i32) -> (i32, i32) {
    %c0_i32 = arith.constant 0 : i32
    %c0_i32_0 = arith.constant 0 : i32
    %c0_i32_1 = arith.constant 0 : i32
    return %c0_i32, %c0_i32_0 : i32, i32
  }
  func.func @transform_4(%arg0: i32) -> (i32, i32, i32) {
    %c0_i32 = arith.constant 0 : i32
    %c0_i32_0 = arith.constant 0 : i32
    %c0_i32_1 = arith.constant 0 : i32
    return %arg0, %c0_i32, %c0_i32_0 : i32, i32, i32
  }
  func.func @transform_5(%arg0: i32) -> (i32, i32, i32) {
    %c0_i32 = arith.constant 0 : i32
    %c0_i32_0 = arith.constant 0 : i32
    %c0_i32_1 = arith.constant 0 : i32
    return %arg0, %c0_i32, %c0_i32_0 : i32, i32, i32
  }
  func.func @transform_6(%arg0: i32) -> (i32, i32, i32) {
    %c0_i32 = arith.constant 0 : i32
    %c0_i32_0 = arith.constant 0 : i32
    %c0_i32_1 = arith.constant 0 : i32
    return %arg0, %c0_i32, %c0_i32_0 : i32, i32, i32
  }
}

module attributes {stable_mosaic.version = 11 : i64} {
  func.func @_residual_kernel(%arg0: i32, %arg1: memref<1x16x18x8xbf16, #tpu.memory_space<vmem>>, %arg2: memref<1x16x16x8xbf16, #tpu.memory_space<vmem>>, %arg3: memref<5x8xf32, #tpu.memory_space<vmem>>, %arg4: memref<1x16x16x8xbf16, #tpu.memory_space<vmem>>) attributes {dimension_semantics = [#tpu.dimension_semantics<parallel>], iteration_bounds = array<i64: 2>, scalar_prefetch = 0 : i64, scratch_operands = 0 : i64, tpu.core_type = #tpu.core_type<tc>, window_params = [{transform_indices = @transform_0, window_bounds = array<i64: 1, 16, 18, 8>}, {transform_indices = @transform_1, window_bounds = array<i64: 1, 16, 16, 8>}, {pipeline_mode = #tpu.pipeline_mode<synchronous>, transform_indices = @transform_2, window_bounds = array<i64: 5, 8>}, {transform_indices = @transform_3, window_bounds = array<i64: 1, 16, 16, 8>}]} {
    %c0 = arith.constant 0 : index
    %c0_0 = arith.constant 0 : index
    %0 = vector.load %arg3[%c0, %c0_0] : memref<5x8xf32, #tpu.memory_space<vmem>>, vector<5x8xf32>
    %c0_1 = arith.constant 0 : index
    %c0_2 = arith.constant 0 : index
    %c0_3 = arith.constant 0 : index
    %c0_4 = arith.constant 0 : index
    %1 = vector.load %arg1[%c0_1, %c0_2, %c0_3, %c0_4] : memref<1x16x18x8xbf16, #tpu.memory_space<vmem>>, vector<1x16x18x8xbf16>
    %2 = vector.extract_strided_slice %1 {offsets = [0, 0, 0, 0], sizes = [1, 16, 16, 8], strides = [1, 1, 1, 1]} : vector<1x16x18x8xbf16> to vector<1x16x16x8xbf16>
    %3 = vector.shape_cast %2 : vector<1x16x16x8xbf16> to vector<16x16x8xbf16>
    %4 = arith.extf %3 : vector<16x16x8xbf16> to vector<16x16x8xf32>
    %5 = vector.extract_strided_slice %0 {offsets = [0, 0], sizes = [1, 8], strides = [1, 1]} : vector<5x8xf32> to vector<1x8xf32>
    %6 = vector.shape_cast %5 : vector<1x8xf32> to vector<1x1x8xf32>
    %7 = vector.broadcast %6 : vector<1x1x8xf32> to vector<16x16x8xf32>
    %8 = arith.mulf %4, %7 : vector<16x16x8xf32>
    %9 = vector.extract_strided_slice %0 {offsets = [1, 0], sizes = [1, 8], strides = [1, 1]} : vector<5x8xf32> to vector<1x8xf32>
    %10 = vector.shape_cast %9 : vector<1x8xf32> to vector<1x1x8xf32>
    %11 = vector.broadcast %10 : vector<1x1x8xf32> to vector<16x16x8xf32>
    %12 = arith.addf %8, %11 : vector<16x16x8xf32>
    %c0_5 = arith.constant 0 : index
    %c0_6 = arith.constant 0 : index
    %c0_7 = arith.constant 0 : index
    %c0_8 = arith.constant 0 : index
    %13 = vector.load %arg2[%c0_5, %c0_6, %c0_7, %c0_8] : memref<1x16x16x8xbf16, #tpu.memory_space<vmem>>, vector<1x16x16x8xbf16>
    %14 = vector.shape_cast %13 : vector<1x16x16x8xbf16> to vector<16x16x8xbf16>
    %15 = arith.extf %14 : vector<16x16x8xbf16> to vector<16x16x8xf32>
    %16 = arith.addf %12, %15 : vector<16x16x8xf32>
    %17 = vector.extract_strided_slice %0 {offsets = [2, 0], sizes = [1, 8], strides = [1, 1]} : vector<5x8xf32> to vector<1x8xf32>
    %18 = vector.shape_cast %17 : vector<1x8xf32> to vector<1x1x8xf32>
    %19 = vector.broadcast %18 : vector<1x1x8xf32> to vector<16x16x8xf32>
    %20 = arith.addf %16, %19 : vector<16x16x8xf32>
    %cst = arith.constant 0.000000e+00 : f32
    %21 = vector.broadcast %cst : f32 to vector<16x16x8xf32>
    %22 = arith.cmpf oge, %20, %21 : vector<16x16x8xf32>
    %23 = vector.extract_strided_slice %0 {offsets = [3, 0], sizes = [1, 8], strides = [1, 1]} : vector<5x8xf32> to vector<1x8xf32>
    %24 = vector.shape_cast %23 : vector<1x8xf32> to vector<1x1x8xf32>
    %25 = vector.broadcast %24 : vector<1x1x8xf32> to vector<16x16x8xf32>
    %26 = arith.mulf %25, %20 : vector<16x16x8xf32>
    %27 = arith.select %22, %20, %26 : vector<16x16x8xi1>, vector<16x16x8xf32>
    %28 = vector.extract_strided_slice %0 {offsets = [4, 0], sizes = [1, 8], strides = [1, 1]} : vector<5x8xf32> to vector<1x8xf32>
    %29 = vector.shape_cast %28 : vector<1x8xf32> to vector<1x1x8xf32>
    %30 = vector.broadcast %29 : vector<1x1x8xf32> to vector<16x16x8xf32>
    %31 = arith.addf %27, %30 : vector<16x16x8xf32>
    %32 = vector.shape_cast %31 : vector<16x16x8xf32> to vector<1x16x16x8xf32>
    %33 = arith.truncf %32 : vector<1x16x16x8xf32> to vector<1x16x16x8xbf16>
    %c0_9 = arith.constant 0 : index
    %c0_10 = arith.constant 0 : index
    %c0_11 = arith.constant 0 : index
    %c0_12 = arith.constant 0 : index
    %34 = vector.load %arg4[%c0_9, %c0_10, %c0_11, %c0_12] : memref<1x16x16x8xbf16, #tpu.memory_space<vmem>>, vector<1x16x16x8xbf16>
    tpu.vector_store %arg4[%c0_9, %c0_10, %c0_11, %c0_12], %33 {strides = array<i32>} : memref<1x16x16x8xbf16, #tpu.memory_space<vmem>>, vector<1x16x16x8xbf16>,
    return
  }
  func.func @transform_0(%arg0: i32) -> (i32, i32, i32, i32) {
    %c0_i32 = arith.constant 0 : i32
    %c0_i32_0 = arith.constant 0 : i32
    %c0_i32_1 = arith.constant 0 : i32
    %c0_i32_2 = arith.constant 0 : i32
    return %arg0, %c0_i32, %c0_i32_0, %c0_i32_1 : i32, i32, i32, i32
  }
  func.func @transform_1(%arg0: i32) -> (i32, i32, i32, i32) {
    %c0_i32 = arith.constant 0 : i32
    %c0_i32_0 = arith.constant 0 : i32
    %c0_i32_1 = arith.constant 0 : i32
    %c0_i32_2 = arith.constant 0 : i32
    return %arg0, %c0_i32, %c0_i32_0, %c0_i32_1 : i32, i32, i32, i32
  }
  func.func @transform_2(%arg0: i32) -> (i32, i32) {
    %c0_i32 = arith.constant 0 : i32
    %c0_i32_0 = arith.constant 0 : i32
    %c0_i32_1 = arith.constant 0 : i32
    return %c0_i32, %c0_i32_0 : i32, i32
  }
  func.func @transform_3(%arg0: i32) -> (i32, i32, i32, i32) {
    %c0_i32 = arith.constant 0 : i32
    %c0_i32_0 = arith.constant 0 : i32
    %c0_i32_1 = arith.constant 0 : i32
    %c0_i32_2 = arith.constant 0 : i32
    return %arg0, %c0_i32, %c0_i32_0, %c0_i32_1 : i32, i32, i32, i32
  }
}

</mosaic_0001>

<bundles_post_ra>
// kernel: basic_block_forward.5
= control target key start
LH: loop header
LB: loop body
LE: loop exit
PB: predicated region body
PF: predicated region fallthrough
CT: control target
= control target key end

     0   :  { %s1057_s12 = smov 0   ;;  %s1364_s0 = inlined_call_operand.vmem [shape: bf16[2,16,18,8], index: 0, kind: input, shape index: {}]   ;;  %s1365_s1 = inlined_call_operand.vmem [shape: bf16[2,16,16,8], index: 1, kind: input, shape index: {}]   ;;  %s1366_s2 = inlined_call_operand.vmem [shape: f32[5,8], index: 2, kind: input, shape index: {}]   ;;  %s1367_s3 = inlined_call_operand.vmem [shape: bf16[2,16,16,8], index: 3, kind: output, shape index: {}]  }
   0x1 LB: > { %s824_s13 = sadd.s32 4294967295, %s1035_s12   ;;  %p828_p0 = scmp.ge.s32.totalorder %s1035_s12, 1  ;;  %s1035_s12 = sphi %s1057_s12, %s13_s12  }
   0x2   : > { %p147_p1 = scmp.lt.s32.totalorder %s1035_s12, 3 }
   0x4   : > { %p148_p2 = pnand %p828_p0, %p147_p1 }
   0x5   : > { %p176_p3 = scmp.lt.s32.totalorder (!%p148_p2), %s824_s13, 1 }
   0x6   : > { %151 = sbr.rel (%p148_p2) target bundleno = 116 (0x74), region = 32 }
   0xb   : > { %v256_v0 = vlaneseq  ;;  %s1369_s13 = smov (!%p176_p3, %s824_s13), 1  ;;  %v191_v2 = vld [vmem:[%s1366_s2] sm:$0x1f]  ;;  %vm724_vm0 = vcmask 60416  }
   0xc   : > { %s1020_s16 = smul.u32 192, %s1369_s13  ;;  %s868_s17 = sshll.u32 %s1369_s13, 7 }
   0xd   : > { %v257_v1 = vshrl.u32 %v256_v0, 7  ;;  %s1077_s20 = scalar_lea.vmem %s1365_s1, %s868_s17  ;;  %s1138_s26 = scalar_lea.vmem %s1367_s3, %s868_s17 }
   0xe   : > { %s1082_s23 = scalar_lea.vmem %s1364_s0, %s1020_s16  ;;  %v935_v10 = vld [vmem:[%s1077_s20] sm:$0xff]   ;;  %v1005_v13 = vld [vmem:[%s1077_s20 + $0x8] sm:$0xff]   ;;  %v1006_v14 = vld [vmem:[%s1077_s20 + $0x10] sm:$0xff]  }
   0xf   : > { %v258_v3 = vsub.s32 0, %v257_v1  ;;  %v294_v4 = vsub.s32 1, %v257_v1  ;;  %v426_v5 = vsub.s32 2, %v257_v1  ;;  %v494_v6 = vsub.s32 3, %v257_v1  ;;  %v903_v15 = vld [vmem:[%s1082_s23] sm:$0xff]   ;;  %v194_v19 = vld [vmem:[%s1082_s23 + $0xc] sm:$0xff]  }
  0x10   : > { %v562_v7 = vsub.s32 4, %v257_v1  ;;  %v936_v16 = vunpack.c.l.bf16 %v935_v10  ;;  %v937_v18 = vunpack.c.h.bf16 %v935_v10  ;;  %v940_v20 = vunpack.c.l.bf16 %v1005_v13  ;;  %v998_v21 = vld [vmem:[%s1082_s23 + $0x18] sm:$0xff]   ;;  %v198_v26 = vld [vmem:[%s1082_s23 + $0x24] sm:$0xff]  }
  0x11   : > { %v1084_v8 = vrot.slane %v191_v2, %v258_v3  ;;  %v1086_v9 = vrot.slane %v191_v2, %v294_v4  ;;  %v1089_v11 = vrot.slane %v191_v2, %v426_v5  ;;  %v1091_v12 = vrot.slane %v191_v2, %v494_v6  ;;  %v1106_v35 = vld [vmem:[%s1077_s20 + $0x18] sm:$0xff]  }
  0x12   : > { %v1096_v17 = vrot.slane %v191_v2, %v562_v7  ;;  %v904_v22 = vunpack.c.l.bf16 %v903_v15  ;;  %v905_v23 = vunpack.c.h.bf16 %v903_v15  ;;  %v226_v24 = vunpack.c.l.bf16 %v194_v19 }
  0x13   : > { %v227_v25 = vunpack.c.h.bf16 %v194_v19  ;;  %v941_v27 = vunpack.c.h.bf16 %v1005_v13  ;;  %v908_v28 = vunpack.c.l.bf16 %v998_v21  ;;  %v944_v29 = vunpack.c.l.bf16 %v1006_v14  ;;  %v999_v19 = vld [vmem:[%s1082_s23 + $0x30] sm:$0xff]  }
  0x14   : > { %v909_v30 = vunpack.c.h.bf16 %v998_v21  ;;  %v260_v31 = vmul.f32 %v904_v22, %v1084_v8  ;;  %v261_v32 = vmul.f32 %v905_v23, %v1084_v8  ;;  %v262_v33 = vmul.f32 %v1084_v8, %v226_v24  ;;  %v1008_v24 = vld [vmem:[%s1077_s20 + $0x20] sm:$0xff]  }
  0x15   : > { %v263_v34 = vmul.f32 %v1084_v8, %v227_v25  ;;  %v264_v36 = vmul.f32 %v908_v28, %v1084_v8  ;;  %v945_v38 = vunpack.c.h.bf16 %v1006_v14  ;;  %v230_v39 = vunpack.c.l.bf16 %v198_v26 }
  0x16   : > { %v265_v37 = vmul.f32 %v909_v30, %v1084_v8  ;;  %v296_v40 = vadd.f32 %v1086_v9, %v260_v31  ;;  %v297_v41 = vadd.f32 %v1086_v9, %v261_v32  ;;  %v298_v42 = vadd.f32 %v1086_v9, %v262_v33  ;;  %v202_v33 = vld [vmem:[%s1082_s23 + $0x3c] sm:$0xff]  }
  0x17   : > { %v299_v43 = vadd.f32 %v1086_v9, %v263_v34  ;;  %v300_v44 = vadd.f32 %v1086_v9, %v264_v36  ;;  %v266_v46 = vmul.f32 %v1084_v8, %v230_v39  ;;  %v948_v47 = vunpack.c.l.bf16 %v1106_v35  ;;  %v1009_v34 = vld [vmem:[%s1077_s20 + $0x28] sm:$0xff]  }
  0x18   : > { %v301_v45 = vadd.f32 %v1086_v9, %v265_v37  ;;  %v392_v48 = vadd.f32 %v936_v16, %v296_v40  ;;  %v393_v49 = vadd.f32 %v937_v18, %v297_v41  ;;  %v394_v50 = vadd.f32 %v940_v20, %v298_v42  ;;  %v1000_v42 = vld [vmem:[%s1082_s23 + $0x48] sm:$0xff]  }
  0x19   : > { %v395_v51 = vadd.f32 %v941_v27, %v299_v43  ;;  %v396_v52 = vadd.f32 %v944_v29, %v300_v44  ;;  %v302_v54 = vadd.f32 %v1086_v9, %v266_v46  ;;  %v231_v55 = vunpack.c.h.bf16 %v198_v26 }
  0x1a   : > { %v397_v53 = vadd.f32 %v945_v38, %v301_v45  ;;  %v428_v56 = vadd.f32 %v1089_v11, %v392_v48  ;;  %v429_v57 = vadd.f32 %v1089_v11, %v393_v49  ;;  %v430_v58 = vadd.f32 %v1089_v11, %v394_v50 }
  0x1b   : > { %v431_v59 = vadd.f32 %v1089_v11, %v395_v51  ;;  %v432_v60 = vadd.f32 %v1089_v11, %v396_v52  ;;  %v398_v62 = vadd.f32 %v948_v47, %v302_v54  ;;  %v267_v63 = vmul.f32 %v1084_v8, %v231_v55  ;;  %v1010_v55 = vld [vmem:[%s1077_s20 + $0x30] sm:$0xff]  }
  0x1c   : > { %v433_v61 = vadd.f32 %v1089_v11, %v397_v53  ;;  %vm460_vm1 = vcmp.ge.f32.partialorder %v428_v56, 0.0  ;;  %v496_v0 = vmul.f32 %v1091_v12, %v428_v56  ;;  %vm461_vm2 = vcmp.ge.f32.partialorder %v429_v57, 0.0 }
  0x1d   : > { %v497_v1 = vmul.f32 %v1091_v12, %v429_v57  ;;  %vm462_vm3 = vcmp.ge.f32.partialorder %v430_v58, 0.0  ;;  %v498_v2 = vmul.f32 %v1091_v12, %v430_v58  ;;  %vm463_vm4 = vcmp.ge.f32.partialorder %v431_v59, 0.0 }
  0x1e   : > { %v499_v3 = vmul.f32 %v1091_v12, %v431_v59  ;;  %v528_v4 = vsel %vm460_vm1, %v428_v56, %v496_v0  ;;  %vm464_vm5 = vcmp.ge.f32.partialorder %v432_v60, 0.0  ;;  %v500_v6 = vmul.f32 %v1091_v12, %v432_v60 }
  0x1f   : > { %v529_v5 = vsel %vm461_vm2, %v429_v57, %v497_v1  ;;  %v564_v7 = vadd.f32 %v1096_v17, %v528_v4  ;;  %v530_v13 = vsel %vm462_vm3, %v430_v58, %v498_v2  ;;  %vm465_vm6 = vcmp.ge.f32.partialorder %v433_v61, 0.0 }
  0x20   : > { %v565_v10 = vadd.f32 %v1096_v17, %v529_v5  ;;  %v531_v14 = vsel %vm463_vm4, %v431_v59, %v499_v3  ;;  %v566_v15 = vadd.f32 %v1096_v17, %v530_v13  ;;  %v532_v18 = vsel %vm464_vm5, %v432_v60, %v500_v6 }
  0x21   : > { %v567_v16 = vadd.f32 %v1096_v17, %v531_v14  ;;  %v870_v20 = vpack.c.bf16 %v564_v7, %v564_v7  ;;  %v568_v22 = vadd.f32 %v1096_v17, %v532_v18  ;;  %v501_v23 = vmul.f32 %v1091_v12, %v433_v61 }
  0x22   : > { %v871_v21 = vpack.c.bf16 %v565_v10, %v565_v10  ;;  %v872_v25 = vpack.c.bf16 %v566_v15, %v566_v15  ;;  %v434_v27 = vadd.f32 %v1089_v11, %v398_v62  ;;  %v303_v28 = vadd.f32 %v1086_v9, %v267_v63 }
  0x23   : > { %v873_v26 = vpack.c.bf16 %v567_v16, %v567_v16  ;;  %725 = vst.msk [vmem:[%s1138_s26] sm:$0xf] %vm724_vm0, %v870_v20  ;;  %v874_v29 = vpack.c.bf16 %v568_v22, %v568_v22  ;;  %v533_v30 = vsel %vm465_vm6, %v433_v61, %v501_v23  ;;  %v949_v31 = vunpack.c.h.bf16 %v1106_v35  ;;  %v206_v23 = vld [vmem:[%s1082_s23 + $0x54] sm:$0xff]  }
  0x24   : > { %726 = vst.msk [vmem:[%s1138_s26 + $0x4] sm:$0xf] %vm724_vm0, %v871_v21  ;;  %v912_v32 = vunpack.c.l.bf16 %v999_v19  ;;  %727 = vst.msk [vmem:[%s1138_s26 + $0x8] sm:$0xf] %vm724_vm0, %v872_v25  ;;  %v569_v36 = vadd.f32 %v1096_v17, %v533_v30  ;;  %vm466_vm7 = vcmp.ge.f32.partialorder %v434_v27, 0.0  ;;  %v502_v37 = vmul.f32 %v1091_v12, %v434_v27 }
  0x25   : > { %728 = vst.msk [vmem:[%s1138_s26 + $0xc] sm:$0xf] %vm724_vm0, %v873_v26  ;;  %v952_v38 = vunpack.c.l.bf16 %v1008_v24  ;;  %729 = vst.msk [vmem:[%s1138_s26 + $0x10] sm:$0xf] %vm724_vm0, %v874_v29  ;;  %v399_v39 = vadd.f32 %v949_v31, %v303_v28  ;;  %v913_v35 = vunpack.c.h.bf16 %v999_v19  ;;  %v953_v41 = vunpack.c.h.bf16 %v1008_v24  ;;  %v1011_v24 = vld [vmem:[%s1077_s20 + $0x38] sm:$0xff]  }
  0x26   : > { %v268_v40 = vmul.f32 %v912_v32, %v1084_v8  ;;  %v875_v43 = vpack.c.bf16 %v569_v36, %v569_v36  ;;  %v534_v44 = vsel %vm466_vm7, %v434_v27, %v502_v37  ;;  %v234_v45 = vunpack.c.l.bf16 %v202_v33 }
  0x27   : > { %v956_v46 = vunpack.c.l.bf16 %v1009_v34  ;;  %v570_v47 = vadd.f32 %v1096_v17, %v534_v44  ;;  %v435_v48 = vadd.f32 %v1089_v11, %v399_v39  ;;  %v269_v50 = vmul.f32 %v913_v35, %v1084_v8 }
  0x28   : > { %v304_v49 = vadd.f32 %v1086_v9, %v268_v40  ;;  %730 = vst.msk [vmem:[%s1138_s26 + $0x14] sm:$0xf] %vm724_vm0, %v875_v43  ;;  %v270_v51 = vmul.f32 %v1084_v8, %v234_v45  ;;  %v235_v52 = vunpack.c.h.bf16 %v202_v33  ;;  %v957_v53 = vunpack.c.h.bf16 %v1009_v34  ;;  %v1001_v45 = vld [vmem:[%s1082_s23 + $0x60] sm:$0xff]  }
  0x29   : > { %v916_v54 = vunpack.c.l.bf16 %v1000_v42  ;;  %v876_v56 = vpack.c.bf16 %v570_v47, %v570_v47  ;;  %vm467_vm8 = vcmp.ge.f32.partialorder %v435_v48, 0.0  ;;  %v503_v57 = vmul.f32 %v1091_v12, %v435_v48 }
  0x2a   : > { %v400_v58 = vadd.f32 %v952_v38, %v304_v49  ;;  %v305_v59 = vadd.f32 %v1086_v9, %v269_v50  ;;  %v306_v60 = vadd.f32 %v1086_v9, %v270_v51  ;;  %v271_v61 = vmul.f32 %v1084_v8, %v235_v52 }
  0x2b   : > { %v272_v62 = vmul.f32 %v916_v54, %v1084_v8  ;;  %731 = vst.msk [vmem:[%s1138_s26 + $0x18] sm:$0xf] %vm724_vm0, %v876_v56  ;;  %v535_v63 = vsel %vm467_vm8, %v435_v48, %v503_v57  ;;  %v960_v1 = vunpack.c.l.bf16 %v1010_v55  ;;  %v917_v2 = vunpack.c.h.bf16 %v1000_v42 }
  0x2c   : > { %v436_v0 = vadd.f32 %v1089_v11, %v400_v58  ;;  %v571_v3 = vadd.f32 %v1096_v17, %v535_v63  ;;  %v401_v4 = vadd.f32 %v953_v41, %v305_v59  ;;  %v402_v5 = vadd.f32 %v956_v46, %v306_v60  ;;  %v1012_v46 = vld [vmem:[%s1077_s20 + $0x40] sm:$0xff]   ;;  %v210_v58 = vld [vmem:[%s1082_s23 + $0x6c] sm:$0xff]  }
  0x2d   : > { %v307_v6 = vadd.f32 %v1086_v9, %v271_v61  ;;  %v308_v10 = vadd.f32 %v1086_v9, %v272_v62  ;;  %v273_v13 = vmul.f32 %v917_v2, %v1084_v8  ;;  %v961_v22 = vunpack.c.h.bf16 %v1010_v55  ;;  %v1013_v59 = vld [vmem:[%s1077_s20 + $0x48] sm:$0xff]  }
  0x2e   : > { %vm468_vm9 = vcmp.ge.f32.partialorder %v436_v0, 0.0  ;;  %v504_v7 = vmul.f32 %v1091_v12, %v436_v0  ;;  %v877_v14 = vpack.c.bf16 %v571_v3, %v571_v3  ;;  %v437_v15 = vadd.f32 %v1089_v11, %v401_v4 }
  0x2f   : > { %v438_v16 = vadd.f32 %v1089_v11, %v402_v5  ;;  %v403_v18 = vadd.f32 %v957_v53, %v307_v6  ;;  %v404_v20 = vadd.f32 %v960_v1, %v308_v10  ;;  %v309_v21 = vadd.f32 %v1086_v9, %v273_v13 }
  0x30   : > { %v536_v19 = vsel %vm468_vm9, %v436_v0, %v504_v7  ;;  %732 = vst.msk [vmem:[%s1138_s26 + $0x1c] sm:$0xf] %vm724_vm0, %v877_v14  ;;  %vm469_vm10 = vcmp.ge.f32.partialorder %v437_v15, 0.0  ;;  %v505_v26 = vmul.f32 %v1091_v12, %v437_v15  ;;  %v238_v33 = vunpack.c.l.bf16 %v206_v23 }
  0x31   : > { %v572_v25 = vadd.f32 %v1096_v17, %v536_v19  ;;  %vm470_vm11 = vcmp.ge.f32.partialorder %v438_v16, 0.0  ;;  %v506_v27 = vmul.f32 %v1091_v12, %v438_v16  ;;  %v439_v28 = vadd.f32 %v1089_v11, %v403_v18 }
  0x32   : > { %v440_v29 = vadd.f32 %v1089_v11, %v404_v20  ;;  %v405_v30 = vadd.f32 %v961_v22, %v309_v21  ;;  %v537_v32 = vsel %vm469_vm10, %v437_v15, %v505_v26  ;;  %v964_v34 = vunpack.c.l.bf16 %v1011_v24 }
  0x33   : > { %v878_v31 = vpack.c.bf16 %v572_v25, %v572_v25  ;;  %v573_v36 = vadd.f32 %v1096_v17, %v537_v32  ;;  %v538_v37 = vsel %vm470_vm11, %v438_v16, %v506_v27  ;;  %vm471_vm12 = vcmp.ge.f32.partialorder %v439_v28, 0.0  ;;  %v1014_v25 = vld [vmem:[%s1077_s20 + $0x50] sm:$0xff]  }
  0x34   : > { %v507_v38 = vmul.f32 %v1091_v12, %v439_v28  ;;  %v574_v39 = vadd.f32 %v1096_v17, %v538_v37  ;;  %vm472_vm13 = vcmp.ge.f32.partialorder %v440_v29, 0.0  ;;  %v508_v40 = vmul.f32 %v1091_v12, %v440_v29 }
  0x35   : > { %733 = vst.msk [vmem:[%s1138_s26 + $0x20] sm:$0xf] %vm724_vm0, %v878_v31  ;;  %v441_v35 = vadd.f32 %v1089_v11, %v405_v30  ;;  %v879_v41 = vpack.c.bf16 %v573_v36, %v573_v36  ;;  %v274_v43 = vmul.f32 %v1084_v8, %v238_v33  ;;  %v239_v44 = vunpack.c.h.bf16 %v206_v23 }
  0x36   : > { %v539_v42 = vsel %vm471_vm12, %v439_v28, %v507_v38  ;;  %v880_v47 = vpack.c.bf16 %v574_v39, %v574_v39  ;;  %v540_v49 = vsel %vm472_vm13, %v440_v29, %v508_v40  ;;  %v965_v55 = vunpack.c.h.bf16 %v1011_v24  ;;  %v1002_v24 = vld [vmem:[%s1082_s23 + $0x78] sm:$0xff]  }
  0x37   : > { %v575_v48 = vadd.f32 %v1096_v17, %v539_v42  ;;  %vm473_vm14 = vcmp.ge.f32.partialorder %v441_v35, 0.0  ;;  %734 = vst.msk [vmem:[%s1138_s26 + $0x24] sm:$0xf] %vm724_vm0, %v879_v41  ;;  %v576_v50 = vadd.f32 %v1096_v17, %v540_v49  ;;  %v509_v51 = vmul.f32 %v1091_v12, %v441_v35  ;;  %v1015_v49 = vld [vmem:[%s1077_s20 + $0x58] sm:$0xff]  }
  0x38   : > { %v310_v52 = vadd.f32 %v1086_v9, %v274_v43  ;;  %v275_v53 = vmul.f32 %v1084_v8, %v239_v44  ;;  %735 = vst.msk [vmem:[%s1138_s26 + $0x28] sm:$0xf] %vm724_vm0, %v880_v47  ;;  %v920_v56 = vunpack.c.l.bf16 %v1001_v45  ;;  %v968_v57 = vunpack.c.l.bf16 %v1012_v46 }
  0x39   : > { %v881_v54 = vpack.c.bf16 %v575_v48, %v575_v48  ;;  %v882_v60 = vpack.c.bf16 %v576_v50, %v576_v50  ;;  %v541_v61 = vsel %vm473_vm14, %v441_v35, %v509_v51  ;;  %v921_v2 = vunpack.c.h.bf16 %v1001_v45  ;;  %v214_v48 = vld [vmem:[%s1082_s23 + $0x84] sm:$0xff]  }
  0x3a   : > { %v406_v62 = vadd.f32 %v964_v34, %v310_v52  ;;  %v311_v63 = vadd.f32 %v1086_v9, %v275_v53  ;;  %v577_v0 = vadd.f32 %v1096_v17, %v541_v61  ;;  %v276_v1 = vmul.f32 %v920_v56, %v1084_v8 }
  0x3b   : > { %736 = vst.msk [vmem:[%s1138_s26 + $0x2c] sm:$0xf] %vm724_vm0, %v881_v54  ;;  %v969_v3 = vunpack.c.h.bf16 %v1012_v46  ;;  %737 = vst.msk [vmem:[%s1138_s26 + $0x30] sm:$0xf] %vm724_vm0, %v882_v60  ;;  %v242_v6 = vunpack.c.l.bf16 %v210_v58  ;;  %v972_v7 = vunpack.c.l.bf16 %v1013_v59  ;;  %v277_v14 = vmul.f32 %v921_v2, %v1084_v8 }
  0x3c   : > { %v442_v4 = vadd.f32 %v1089_v11, %v406_v62  ;;  %v407_v5 = vadd.f32 %v965_v55, %v311_v63  ;;  %v883_v10 = vpack.c.bf16 %v577_v0, %v577_v0  ;;  %v312_v13 = vadd.f32 %v1086_v9, %v276_v1 }
  0x3d   : > { %v243_v15 = vunpack.c.h.bf16 %v210_v58  ;;  %v278_v19 = vmul.f32 %v1084_v8, %v242_v6  ;;  %v313_v21 = vadd.f32 %v1086_v9, %v277_v14  ;;  %v973_v23 = vunpack.c.h.bf16 %v1013_v59 }
  0x3e   : > { %vm474_vm15 = vcmp.ge.f32.partialorder %v442_v4, 0.0  ;;  %v510_v16 = vmul.f32 %v1091_v12, %v442_v4  ;;  %v443_v18 = vadd.f32 %v1089_v11, %v407_v5  ;;  %738 = vst.msk [vmem:[%s1138_s26 + $0x34] sm:$0xf] %vm724_vm0, %v883_v10  ;;  %v408_v20 = vadd.f32 %v968_v57, %v312_v13 }
  0x3f   : > { %v279_v22 = vmul.f32 %v1084_v8, %v243_v15  ;;  %v314_v28 = vadd.f32 %v1086_v9, %v278_v19  ;;  %v409_v31 = vadd.f32 %v969_v3, %v313_v21  ;;  %v924_v36 = vunpack.c.l.bf16 %v1002_v24  ;;  %v1003_v3 = vld [vmem:[%s1082_s23 + $0x90] sm:$0xff]  }
  0x40   : > { %v542_v26 = vsel %vm474_vm15, %v442_v4, %v510_v16  ;;  %vm475_vm1 = vcmp.ge.f32.partialorder %v443_v18, 0.0  ;;  %v511_v27 = vmul.f32 %v1091_v12, %v443_v18  ;;  %v444_v30 = vadd.f32 %v1089_v11, %v408_v20  ;;  %v1016_v4 = vld [vmem:[%s1077_s20 + $0x60] sm:$0xff]  }
  0x41   : > { %v578_v29 = vadd.f32 %v1096_v17, %v542_v26  ;;  %v315_v32 = vadd.f32 %v1086_v9, %v279_v22  ;;  %v410_v34 = vadd.f32 %v972_v7, %v314_v28  ;;  %v976_v37 = vunpack.c.l.bf16 %v1014_v25 }
  0x42   : > { %v543_v33 = vsel %vm475_vm1, %v443_v18, %v511_v27  ;;  %vm476_vm2 = vcmp.ge.f32.partialorder %v444_v30, 0.0  ;;  %v512_v40 = vmul.f32 %v1091_v12, %v444_v30  ;;  %v445_v35 = vadd.f32 %v1089_v11, %v409_v31 }
  0x43   : > { %v884_v38 = vpack.c.bf16 %v578_v29, %v578_v29  ;;  %v579_v39 = vadd.f32 %v1096_v17, %v543_v33  ;;  %v446_v41 = vadd.f32 %v1089_v11, %v410_v34  ;;  %v411_v42 = vadd.f32 %v973_v23, %v315_v32  ;;  %v218_v29 = vld [vmem:[%s1082_s23 + $0x9c] sm:$0xff]  }
  0x44   : > { %v280_v43 = vmul.f32 %v924_v36, %v1084_v8  ;;  %v544_v45 = vsel %vm476_vm2, %v444_v30, %v512_v40  ;;  %v925_v46 = vunpack.c.h.bf16 %v1002_v24  ;;  %v977_v47 = vunpack.c.h.bf16 %v1014_v25  ;;  %v1017_v30 = vld [vmem:[%s1077_s20 + $0x68] sm:$0xff]  }
  0x45   : > { %739 = vst.msk [vmem:[%s1138_s26 + $0x38] sm:$0xf] %vm724_vm0, %v884_v38  ;;  %v885_v44 = vpack.c.bf16 %v579_v39, %v579_v39  ;;  %v580_v50 = vadd.f32 %v1096_v17, %v544_v45  ;;  %vm477_vm3 = vcmp.ge.f32.partialorder %v445_v35, 0.0  ;;  %v513_v51 = vmul.f32 %v1091_v12, %v445_v35 }
  0x46   : > { %vm478_vm4 = vcmp.ge.f32.partialorder %v446_v41, 0.0  ;;  %v514_v52 = vmul.f32 %v1091_v12, %v446_v41  ;;  %v447_v53 = vadd.f32 %v1089_v11, %v411_v42  ;;  %v316_v54 = vadd.f32 %v1086_v9, %v280_v43 }
  0x47   : > { %740 = vst.msk [vmem:[%s1138_s26 + $0x3c] sm:$0xf] %vm724_vm0, %v885_v44  ;;  %v281_v55 = vmul.f32 %v925_v46, %v1084_v8  ;;  %v886_v56 = vpack.c.bf16 %v580_v50, %v580_v50  ;;  %v545_v57 = vsel %vm477_vm3, %v445_v35, %v513_v51  ;;  %v246_v58 = vunpack.c.l.bf16 %v214_v48 }
  0x48   : > { %v980_v59 = vunpack.c.l.bf16 %v1015_v49  ;;  %v581_v60 = vadd.f32 %v1096_v17, %v545_v57  ;;  %v546_v61 = vsel %vm478_vm4, %v446_v41, %v514_v52  ;;  %vm479_vm5 = vcmp.ge.f32.partialorder %v447_v53, 0.0 }
  0x49   : > { %v515_v62 = vmul.f32 %v1091_v12, %v447_v53  ;;  %741 = vst.msk [vmem:[%s1138_s26 + $0x40] sm:$0xf] %vm724_vm0, %v886_v56  ;;  %v582_v63 = vadd.f32 %v1096_v17, %v546_v61  ;;  %v412_v0 = vadd.f32 %v976_v37, %v316_v54  ;;  %v317_v1 = vadd.f32 %v1086_v9, %v281_v55  ;;  %v1018_v61 = vld [vmem:[%s1077_s20 + $0x70] sm:$0xff]  }
  0x4a   : > { %v282_v2 = vmul.f32 %v1084_v8, %v246_v58  ;;  %v887_v5 = vpack.c.bf16 %v581_v60, %v581_v60  ;;  %v247_v7 = vunpack.c.h.bf16 %v214_v48  ;;  %v981_v10 = vunpack.c.h.bf16 %v1015_v49  ;;  %v1004_v49 = vld [vmem:[%s1082_s23 + $0xa8] sm:$0xff]  }
  0x4b   : > { %v547_v6 = vsel %vm479_vm5, %v447_v53, %v515_v62  ;;  %v888_v13 = vpack.c.bf16 %v582_v63, %v582_v63  ;;  %v448_v15 = vadd.f32 %v1089_v11, %v412_v0  ;;  %v413_v16 = vadd.f32 %v977_v47, %v317_v1 }
  0x4c   : > { %v583_v14 = vadd.f32 %v1096_v17, %v547_v6  ;;  %742 = vst.msk [vmem:[%s1138_s26 + $0x44] sm:$0xf] %vm724_vm0, %v887_v5  ;;  %v318_v18 = vadd.f32 %v1086_v9, %v282_v2  ;;  %v283_v19 = vmul.f32 %v1084_v8, %v247_v7  ;;  %v928_v20 = vunpack.c.l.bf16 %v1003_v3 }
  0x4d   : > { %v984_v21 = vunpack.c.l.bf16 %v1016_v4  ;;  %743 = vst.msk [vmem:[%s1138_s26 + $0x48] sm:$0xf] %vm724_vm0, %v888_v13  ;;  %vm480_vm6 = vcmp.ge.f32.partialorder %v448_v15, 0.0  ;;  %v516_v23 = vmul.f32 %v1091_v12, %v448_v15  ;;  %v449_v24 = vadd.f32 %v1089_v11, %v413_v16  ;;  %v222_v13 = vld [vmem:[%s1082_s23 + $0xb4] sm:$0xff]  }
  0x4e   : > { %v889_v22 = vpack.c.bf16 %v583_v14, %v583_v14  ;;  %v414_v25 = vadd.f32 %v980_v59, %v318_v18  ;;  %v319_v26 = vadd.f32 %v1086_v9, %v283_v19  ;;  %v284_v27 = vmul.f32 %v928_v20, %v1084_v8 }
  0x4f   : > { %v929_v28 = vunpack.c.h.bf16 %v1003_v3  ;;  %v548_v31 = vsel %vm480_vm6, %v448_v15, %v516_v23  ;;  %vm481_vm7 = vcmp.ge.f32.partialorder %v449_v24, 0.0  ;;  %v517_v32 = vmul.f32 %v1091_v12, %v449_v24 }
  0x50   : > { %744 = vst.msk [vmem:[%s1138_s26 + $0x4c] sm:$0xf] %vm724_vm0, %v889_v22  ;;  %v985_v33 = vunpack.c.h.bf16 %v1016_v4  ;;  %v584_v34 = vadd.f32 %v1096_v17, %v548_v31  ;;  %v450_v36 = vadd.f32 %v1089_v11, %v414_v25  ;;  %v415_v37 = vadd.f32 %v981_v10, %v319_v26  ;;  %v1019_v22 = vld [vmem:[%s1077_s20 + $0x78] sm:$0xff]  }
  0x51   : > { %v320_v38 = vadd.f32 %v1086_v9, %v284_v27  ;;  %v549_v39 = vsel %vm481_vm7, %v449_v24, %v517_v32  ;;  %v285_v40 = vmul.f32 %v929_v28, %v1084_v8  ;;  %v250_v35 = vunpack.c.l.bf16 %v218_v29 }
  0x52   : > { %v988_v41 = vunpack.c.l.bf16 %v1017_v30  ;;  %v890_v42 = vpack.c.bf16 %v584_v34, %v584_v34  ;;  %v585_v43 = vadd.f32 %v1096_v17, %v549_v39  ;;  %vm482_vm8 = vcmp.ge.f32.partialorder %v450_v36, 0.0 }
  0x53   : > { %v518_v44 = vmul.f32 %v1091_v12, %v450_v36  ;;  %v451_v45 = vadd.f32 %v1089_v11, %v415_v37  ;;  %v416_v46 = vadd.f32 %v984_v21, %v320_v38  ;;  %v321_v47 = vadd.f32 %v1086_v9, %v285_v40 }
  0x54   : > { %v286_v48 = vmul.f32 %v1084_v8, %v250_v35  ;;  %745 = vst.msk [vmem:[%s1138_s26 + $0x50] sm:$0xf] %vm724_vm0, %v890_v42  ;;  %v891_v50 = vpack.c.bf16 %v585_v43, %v585_v43  ;;  %v251_v52 = vunpack.c.h.bf16 %v218_v29  ;;  %v989_v53 = vunpack.c.h.bf16 %v1017_v30 }
  0x55   : > { %v550_v51 = vsel %vm482_vm8, %v450_v36, %v518_v44  ;;  %vm483_vm9 = vcmp.ge.f32.partialorder %v451_v45, 0.0  ;;  %v519_v55 = vmul.f32 %v1091_v12, %v451_v45  ;;  %v452_v56 = vadd.f32 %v1089_v11, %v416_v46 }
  0x56   : > { %v586_v54 = vadd.f32 %v1096_v17, %v550_v51  ;;  %746 = vst.msk [vmem:[%s1138_s26 + $0x54] sm:$0xf] %vm724_vm0, %v891_v50  ;;  %v417_v57 = vadd.f32 %v985_v33, %v321_v47  ;;  %v322_v58 = vadd.f32 %v1086_v9, %v286_v48  ;;  %v287_v59 = vmul.f32 %v1084_v8, %v251_v52 }
  0x57   : > { %v932_v60 = vunpack.c.l.bf16 %v1004_v49  ;;  %v551_v63 = vsel %vm483_vm9, %v451_v45, %v519_v55  ;;  %vm484_vm10 = vcmp.ge.f32.partialorder %v452_v56, 0.0  ;;  %v520_v0 = vmul.f32 %v1091_v12, %v452_v56 }
  0x58   : > { %v892_v62 = vpack.c.bf16 %v586_v54, %v586_v54  ;;  %v587_v1 = vadd.f32 %v1096_v17, %v551_v63  ;;  %v453_v2 = vadd.f32 %v1089_v11, %v417_v57  ;;  %v418_v3 = vadd.f32 %v988_v41, %v322_v58 }
  0x59   : > { %v323_v4 = vadd.f32 %v1086_v9, %v287_v59  ;;  %v552_v5 = vsel %vm484_vm10, %v452_v56, %v520_v0  ;;  %v288_v6 = vmul.f32 %v932_v60, %v1084_v8  ;;  %v992_v7 = vunpack.c.l.bf16 %v1018_v61 }
  0x5a   : > { %747 = vst.msk [vmem:[%s1138_s26 + $0x58] sm:$0xf] %vm724_vm0, %v892_v62  ;;  %v933_v10 = vunpack.c.h.bf16 %v1004_v49  ;;  %v893_v14 = vpack.c.bf16 %v587_v1, %v587_v1  ;;  %v588_v15 = vadd.f32 %v1096_v17, %v552_v5  ;;  %vm485_vm11 = vcmp.ge.f32.partialorder %v453_v2, 0.0 }
  0x5b   : > { %v521_v16 = vmul.f32 %v1091_v12, %v453_v2  ;;  %v454_v18 = vadd.f32 %v1089_v11, %v418_v3  ;;  %v419_v19 = vadd.f32 %v989_v53, %v323_v4  ;;  %v324_v20 = vadd.f32 %v1086_v9, %v288_v6 }
  0x5c   : > { %v289_v21 = vmul.f32 %v933_v10, %v1084_v8  ;;  %748 = vst.msk [vmem:[%s1138_s26 + $0x5c] sm:$0xf] %vm724_vm0, %v893_v14  ;;  %v894_v23 = vpack.c.bf16 %v588_v15, %v588_v15  ;;  %v993_v25 = vunpack.c.h.bf16 %v1018_v61  ;;  %v254_v26 = vunpack.c.l.bf16 %v222_v13 }
  0x5d   : > { %v553_v24 = vsel %vm485_vm11, %v453_v2, %v521_v16  ;;  %vm486_vm12 = vcmp.ge.f32.partialorder %v454_v18, 0.0  ;;  %v522_v28 = vmul.f32 %v1091_v12, %v454_v18  ;;  %v455_v29 = vadd.f32 %v1089_v11, %v419_v19 }
  0x5e   : > { %v589_v27 = vadd.f32 %v1096_v17, %v553_v24  ;;  %749 = vst.msk [vmem:[%s1138_s26 + $0x60] sm:$0xf] %vm724_vm0, %v894_v23  ;;  %v420_v30 = vadd.f32 %v992_v7, %v324_v20  ;;  %v325_v31 = vadd.f32 %v1086_v9, %v289_v21  ;;  %v290_v32 = vmul.f32 %v1084_v8, %v254_v26 }
  0x5f   : > { %v996_v33 = vunpack.c.l.bf16 %v1019_v22  ;;  %v554_v36 = vsel %vm486_vm12, %v454_v18, %v522_v28  ;;  %vm487_vm13 = vcmp.ge.f32.partialorder %v455_v29, 0.0  ;;  %v523_v37 = vmul.f32 %v1091_v12, %v455_v29 }
  0x60   : > { %v895_v34 = vpack.c.bf16 %v589_v27, %v589_v27  ;;  %v590_v38 = vadd.f32 %v1096_v17, %v554_v36  ;;  %v456_v39 = vadd.f32 %v1089_v11, %v420_v30  ;;  %v421_v40 = vadd.f32 %v993_v25, %v325_v31 }
  0x61   : > { %v326_v35 = vadd.f32 %v1086_v9, %v290_v32  ;;  %v555_v41 = vsel %vm487_vm13, %v455_v29, %v523_v37  ;;  %v255_v42 = vunpack.c.h.bf16 %v222_v13  ;;  %v997_v51 = vunpack.c.h.bf16 %v1019_v22 }
  0x62   : > { %750 = vst.msk [vmem:[%s1138_s26 + $0x64] sm:$0xf] %vm724_vm0, %v895_v34  ;;  %v896_v43 = vpack.c.bf16 %v590_v38, %v590_v38  ;;  %v591_v44 = vadd.f32 %v1096_v17, %v555_v41  ;;  %vm488_vm14 = vcmp.ge.f32.partialorder %v456_v39, 0.0  ;;  %v524_v45 = vmul.f32 %v1091_v12, %v456_v39 }
  0x63   : > { %v457_v46 = vadd.f32 %v1089_v11, %v421_v40  ;;  %v422_v47 = vadd.f32 %v996_v33, %v326_v35  ;;  %v291_v48 = vmul.f32 %v1084_v8, %v255_v42 }
  0x64   : > { %751 = vst.msk [vmem:[%s1138_s26 + $0x68] sm:$0xf] %vm724_vm0, %v896_v43  ;;  %v897_v49 = vpack.c.bf16 %v591_v44, %v591_v44  ;;  %v556_v50 = vsel %vm488_vm14, %v456_v39, %v524_v45 }
  0x65   : > { %v592_v52 = vadd.f32 %v1096_v17, %v556_v50  ;;  %vm489_vm15 = vcmp.ge.f32.partialorder %v457_v46, 0.0  ;;  %v525_v53 = vmul.f32 %v1091_v12, %v457_v46  ;;  %v458_v54 = vadd.f32 %v1089_v11, %v422_v47 }
  0x66   : > { %752 = vst.msk [vmem:[%s1138_s26 + $0x6c] sm:$0xf] %vm724_vm0, %v897_v49  ;;  %v327_v55 = vadd.f32 %v1086_v9, %v291_v48 }
  0x67   : > { %v898_v8 = vpack.c.bf16 %v592_v52, %v592_v52  ;;  %v557_v56 = vsel %vm489_vm15, %v457_v46, %v525_v53  ;;  %vm490_vm1 = vcmp.ge.f32.partialorder %v458_v54, 0.0  ;;  %v526_v57 = vmul.f32 %v1091_v12, %v458_v54 }
  0x68   : > { %v593_v58 = vadd.f32 %v1096_v17, %v557_v56  ;;  %v423_v59 = vadd.f32 %v997_v51, %v327_v55 }
  0x69   : > { %753 = vst.msk [vmem:[%s1138_s26 + $0x70] sm:$0xf] %vm724_vm0, %v898_v8  ;;  %v558_v60 = vsel %vm490_vm1, %v458_v54, %v526_v57 }
  0x6a   : > { %v899_v61 = vpack.c.bf16 %v593_v58, %v593_v58  ;;  %v594_v62 = vadd.f32 %v1096_v17, %v558_v60  ;;  %v459_v63 = vadd.f32 %v1089_v11, %v423_v59 }
  0x6c   : > { %754 = vst.msk [vmem:[%s1138_s26 + $0x74] sm:$0xf] %vm724_vm0, %v899_v61  ;;  %v900_v9 = vpack.c.bf16 %v594_v62, %v594_v62  ;;  %vm491_vm2 = vcmp.ge.f32.partialorder %v459_v63, 0.0  ;;  %v527_v0 = vmul.f32 %v1091_v12, %v459_v63 }
  0x6e   : > { %755 = vst.msk [vmem:[%s1138_s26 + $0x78] sm:$0xf] %vm724_vm0, %v900_v9  ;;  %v559_v1 = vsel %vm491_vm2, %v459_v63, %v527_v0 }
  0x6f   : > { %v595_v2 = vadd.f32 %v1096_v17, %v559_v1 }
  0x71   : > { %v901_v3 = vpack.c.bf16 %v595_v2, %v595_v2 }
  0x73   : > { %756 = vst.msk [vmem:[%s1138_s26 + $0x7c] sm:$0xf] %vm724_vm0, %v901_v3 }
  0x74 PF: > { %s13_s12 = sadd.s32 1, %s1035_s12  }
  0x75   : > { %p10_p4 = scmp.ge.s32.totalorder %s13_s12, 4  }
  0x77   :  { %12 = sbr.rel (!%p10_p4) target bundleno = 1 (0x1), region = 65 }

// kernel: basic_block_forward.4
= control target key start
LH: loop header
LB: loop body
LE: loop exit
PB: predicated region body
PF: predicated region fallthrough
CT: control target
= control target key end

     0   :  { %12 = vsyncpa [#allocation4], 0  ;;  %s6125_s21 = smov 0   ;;  %s9381_s0 = inlined_call_operand.vmem [shape: bf16[2,16,18,8], index: 0, kind: input, shape index: {}]   ;;  %s9382_s1 = inlined_call_operand.vmem [shape: f32[5,8], index: 1, kind: input, shape index: {}]   ;;  %s9383_s2 = inlined_call_operand.vmem [shape: f32[8], index: 2, kind: input, shape index: {}]   ;;  %s9384_s3 = inlined_call_operand.vmem [shape: bf16[72,8], index: 3, kind: input, shape index: {}]   ;;  %s9385_s4 = inlined_call_operand.vmem [shape: bf16[2,288,8], index: 4, kind: output, shape index: {0}]   ;;  %s9386_s5 = inlined_call_operand.vmem [shape: f32[2,1,8], index: 5, kind: output, shape index: {1}]   ;;  %s9387_s6 = inlined_call_operand.vmem [shape: f32[2,1,8], index: 6, kind: output, shape index: {2}]  }
   0x1 LB: > { %s6131_s22 = sadd.s32 4294967295, %s6075_s21   ;;  %p5581_p0 = scmp.ge.s32.totalorder %s6075_s21, 1  ;;  %s6075_s21 = sphi %s6125_s21, %s18_s21  }
   0x2   : > { %p190_p1 = scmp.lt.s32.totalorder %s6075_s21, 3  ;;  %s206_s25 = sshll.u32 %s9383_s2, 4  ;;  %s207_s25 = int_to_ptr.vmem [resolvable:$true] %s206_s25 }
   0x3   : > { %p5977_p3 = scmp.eq.s32.totalorder %s6131_s22, 0  ;;  %s6050_s27 = scalar_lea.vmem %s207_s25, 16 }
   0x4   : > { %p6138_p2 = pnand %p5581_p0, %p190_p1  ;;  %p6051_p6 = scmp.ne.s32.totalorder %s207_s25, %s6050_s27 }
   0x5   : > { %p6058_p10 = scmp.lt.s32.totalorder %s207_s25, %s207_s25  ;;  %p6059_p11 = scmp.lt.s32.totalorder %s6050_s27, %s6050_s27 }
   0x6   : > { %p5973_p4 = pneg %p6138_p2 }
   0x7   : > { %p6060_p12 = por %p6059_p11, %p6058_p10 }
   0x8   : > { %p5974_p5 = pnand %p5977_p3, %p5973_p4 }
   0xa   : > { %p6052_p7 = pneg %p5974_p5 }
   0xc   : > { %p6053_p8 = pnand %p6052_p7, %p6051_p6 }
   0xe   : > { %p6054_p9 = pneg %p6053_p8 }
  0x10   : > { %p6061_p13 = pnand %p6060_p12, %p6054_p9 }
  0x12   : > { %6064 = shalt.err (!%p6061_p13)
}
  0x13   : > { %s6077_s28 = smov [#allocation3]   ;;  %230 = sbr.rel (%p6138_p2) target bundleno = 821 (0x335), region = 36 }
  0x14   : > { %5976 = dma.vmem_to_smem (!%p5974_p5), %s207_s25, 16, %s6077_s28, [#allocation4]  }
  0x18   : > { %6070 = dma.done.wait (%p5977_p3), [#allocation4], 16  }
  0x19   : > { %6072 = vsyncadd (%p5977_p3), [#allocation4], 4294967280 }
  0x1a   : > { %236 = sfence }
  0x1b   : > { %p267_p0 = scmp.lt.s32.totalorder %s6131_s22, 1  ;;  %v349_v0 = vlaneseq  ;;  %s6154_s29 = sld [smem:[#allocation3]]  ;;  %vm9411_vm0 = vcmask 60416   ;;  %vm886_vm1 = vcmask 58368   ;;  %vm888_vm2 = vcmask 60418  }
  0x1c   : > { %s6156_s30 = sld [smem:[#allocation3 + $0x2]]  ;;  %v6078_v2 = vmov 0   ;;  %v284_v3 = vld [vmem:[%s9382_s1] sm:$0x1f]  ;;  %v6079_v4 = vmov 1966171168  }
  0x1d   : > { %s9625_s22 = smov (!%p267_p0, %s6131_s22), 1  ;;  %v6161_v1 = vshrl.u32 %v349_v0, 7  ;;  %887 = vst.msk [vmem:[#allocation2 + $0x10] sm:$0x3] %vm886_vm1, %v6078_v2  ;;  %s6178_s9 = sld [smem:[#allocation3 + $0x5]]  ;;  %v913_v5 = vunpack.c.l.s4 %v6079_v4 }
  0x1e   : > { %889 = vst.msk [vmem:[#allocation2 + $0xa0] sm:$0xc] %vm888_vm2, %v6078_v2  ;;  %v6080_v6 = vmov 1935823168   ;;  %s5895_s10 = smul.u32 192, %s9625_s22  ;;  %s6186_s11 = sld [smem:[#allocation3 + $0x3]] }
  0x1f   : > { %9415 = vst [vmem:[#allocation6_spill] sm:$0xff] %v6161_v1  ;;  %884 = vst.msk [vmem:[#allocation2 + $0x8] sm:$0xf] %vm9411_vm0, %v6078_v2  ;;  %v1712_v7 = vunpack.c.l.s4 %v6080_v6  ;;  %v351_v8 = vsub.s32 0, %v6161_v1  ;;  %v387_v9 = vsub.s32 1, %v6161_v1  ;;  %v423_v10 = vsub.s32 2, %v6161_v1 }
  0x20   : > { %885 = vst.msk [vmem:[#allocation2 + $0xc] sm:$0xf] %vm9411_vm0, %v6078_v2  ;;  %890 = vst.msk [vmem:[#allocation2 + $0xa4] sm:$0xf] %vm9411_vm0, %v6078_v2  ;;  %v491_v11 = vsub.s32 3, %v6161_v1  ;;  %v559_v12 = vsub.s32 4, %v6161_v1  ;;  %v914_v13 = vunpack.c.0.s8 %v913_v5  ;;  %s6191_s14 = scalar_lea.vmem %s9381_s0, %s5895_s10 }
  0x21   : > { %891 = vst.msk [vmem:[#allocation2 + $0xa8] sm:$0xf] %vm9411_vm0, %v6078_v2  ;;  %v6193_v14 = vrot.slane %v284_v3, %v351_v8  ;;  %v1713_v15 = vunpack.c.0.s8 %v1712_v7  ;;  %v5776_v16 = vld [vmem:[%s6191_s14] sm:$0xff]   ;;  %v287_v17 = vld [vmem:[%s6191_s14 + $0xc] sm:$0xff]   ;;  %v315_v18 = vld [vmem:[%s6191_s14 + $0xb4] sm:$0xff]   ;;  %v6198_v19 = vrot.slane %v284_v3, %v387_v9  ;;  %v6200_v20 = vrot.slane %v284_v3, %v423_v10  ;;  %s6206_s15 = sld [smem:[#allocation3 + $0x6]] }
  0x22   : > { %v6202_v21 = vrot.slane %v284_v3, %v491_v11  ;;  %v6204_v22 = vrot.slane %v284_v3, %v559_v12  ;;  %v5777_v23 = vunpack.c.l.bf16 %v5776_v16  ;;  %v5778_v24 = vunpack.c.h.bf16 %v5776_v16  ;;  %s6211_s16 = sld [smem:[#allocation3 + $0x4]]  ;;  %v5807_v10 = vld [vmem:[%s6191_s14 + $0x18] sm:$0xff]   ;;  %s6081_s19 = smov 16  }
  0x23   : > { %v319_v25 = vunpack.c.l.bf16 %v287_v17  ;;  %v320_v26 = vunpack.c.h.bf16 %v287_v17  ;;  %v347_v27 = vunpack.c.l.bf16 %v315_v18  ;;  %v348_v28 = vunpack.c.h.bf16 %v315_v18  ;;  %s6220_s17 = sld [smem:[#allocation3 + $0x7]]  ;;  %s6082_s20 = smov 24  }
  0x24   : > { %v6209_v29 = vstv %s6154_s29  ;;  %v6214_v30 = vsub.s32 %v914_v13, %v6161_v1  ;;  %v353_v31 = vmul.f32 %v5777_v23, %v6193_v14  ;;  %v354_v32 = vmul.f32 %v5778_v24, %v6193_v14  ;;  %s6246_s18 = sld [smem:[#allocation3 + $0x1]]  ;;  %s6083_s23 = smov 40  }
  0x25   : > { %v355_v33 = vmul.f32 %v6193_v14, %v319_v25  ;;  %v356_v34 = vmul.f32 %v6193_v14, %v320_v26  ;;  %v383_v35 = vmul.f32 %v6193_v14, %v347_v27  ;;  %v384_v36 = vmul.f32 %v6193_v14, %v348_v28  ;;  %s6084_s24 = smov 48   ;;  %s6085_s25 = smov 64  }
  0x26   : > { %v6225_v37 = vstv %s6156_s30  ;;  %v6228_v38 = vsub.s32 %v1713_v15, %v6161_v1  ;;  %v389_v39 = vadd.f32 %v6198_v19, %v353_v31  ;;  %v390_v40 = vadd.f32 %v6198_v19, %v354_v32  ;;  %s6086_s26 = smov 8   ;;  %s6087_s27 = smov 32  }
  0x27   : > { %v391_v41 = vadd.f32 %v6198_v19, %v355_v33  ;;  %v392_v42 = vadd.f32 %v6198_v19, %v356_v34  ;;  %v419_v43 = vadd.f32 %v6198_v19, %v383_v35  ;;  %v420_v44 = vadd.f32 %v6198_v19, %v384_v36  ;;  %s6088_s28 = smov 56  }
  0x28   : > { %v6237_v45 = vstv %s6178_s9  ;;  %v6240_v46 = vstv %s6186_s11  ;;  %v425_v47 = vadd.f32 %v6200_v20, %v389_v39  ;;  %v426_v48 = vadd.f32 %v6200_v20, %v390_v40 }
  0x29   : > { %v427_v49 = vadd.f32 %v6200_v20, %v391_v41  ;;  %v428_v50 = vadd.f32 %v6200_v20, %v392_v42  ;;  %v455_v51 = vadd.f32 %v6200_v20, %v419_v43  ;;  %v456_v52 = vadd.f32 %v6200_v20, %v420_v44 }
  0x2a   : > { %v6251_v53 = vstv %s6206_s15  ;;  %v966_v54 = vrot.slane %v6078_v2, %v6214_v30  ;;  %vm457_vm3 = vcmp.ge.f32.partialorder %v425_v47, 0.0  ;;  %vm458_vm4 = vcmp.ge.f32.partialorder %v426_v48, 0.0 }
  0x2b   : > { %vm459_vm5 = vcmp.ge.f32.partialorder %v427_v49, 0.0  ;;  %vm460_vm6 = vcmp.ge.f32.partialorder %v428_v50, 0.0  ;;  %vm487_vm7 = vcmp.ge.f32.partialorder %v455_v51, 0.0  ;;  %vm488_vm8 = vcmp.ge.f32.partialorder %v456_v52, 0.0 }
  0x2c   : > { %v493_v55 = vmul.f32 %v6202_v21, %v425_v47  ;;  %v494_v56 = vmul.f32 %v6202_v21, %v426_v48  ;;  %v495_v57 = vmul.f32 %v6202_v21, %v427_v49  ;;  %v496_v58 = vmul.f32 %v6202_v21, %v428_v50 }
  0x2d   : > { %v523_v59 = vmul.f32 %v6202_v21, %v455_v51  ;;  %v524_v60 = vmul.f32 %v6202_v21, %v456_v52  ;;  %v6262_v63 = vstv %s6211_s16  ;;  %v6265_v0 = vstv %s6220_s17 }
  0x2e   : > { %v525_v61 = vsel %vm457_vm3, %v425_v47, %v493_v55  ;;  %v526_v62 = vsel %vm458_vm4, %v426_v48, %v494_v56  ;;  %v527_v2 = vsel %vm459_vm5, %v427_v49, %v495_v57  ;;  %v528_v3 = vsel %vm460_vm6, %v428_v50, %v496_v58 }
  0x2f   : > { %v555_v4 = vsel %vm487_vm7, %v455_v51, %v523_v59  ;;  %v556_v5 = vsel %vm488_vm8, %v456_v52, %v524_v60  ;;  %v561_v6 = vadd.f32 %v6204_v22, %v525_v61  ;;  %v562_v7 = vadd.f32 %v6204_v22, %v526_v62 }
  0x30   : > { %v563_v8 = vadd.f32 %v6204_v22, %v527_v2  ;;  %v564_v9 = vadd.f32 %v6204_v22, %v528_v3  ;;  %v591_v11 = vadd.f32 %v6204_v22, %v555_v4  ;;  %v592_v12 = vadd.f32 %v6204_v22, %v556_v5  ;;  %v2679_v4 = vld [vmem:[#allocation2 + $0xc] sm:$0xf]  ;;  %v2715_v5 = vld [vmem:[#allocation2 + $0x8] sm:$0xe] }
  0x31   : > { %v6275_v13 = vstv %s6246_s18  ;;  %v6278_v15 = vrot.slane %v966_v54, %v6214_v30  ;;  %v595_v16 = vmul.f32 %v6209_v29, %v561_v6  ;;  %v596_v17 = vmul.f32 %v6209_v29, %v562_v7 }
  0x32   : > { %v597_v18 = vmul.f32 %v6209_v29, %v563_v8  ;;  %v598_v23 = vmul.f32 %v6209_v29, %v564_v9  ;;  %v625_v24 = vmul.f32 %v6209_v29, %v591_v11  ;;  %v626_v25 = vmul.f32 %v6209_v29, %v592_v12 }
  0x33   : > { %v5781_v26 = vunpack.c.l.bf16 %v5807_v10  ;;  %v5782_v27 = vunpack.c.h.bf16 %v5807_v10  ;;  %vm629_vm9 = vcmp.gt.f32.partialorder %v595_v16, %v6225_v37  ;;  %vm630_vm10 = vcmp.gt.f32.partialorder %v596_v17, %v6225_v37 }
  0x34   : > { %vm631_vm11 = vcmp.gt.f32.partialorder %v597_v18, %v6225_v37  ;;  %vm632_vm12 = vcmp.gt.f32.partialorder %v598_v23, %v6225_v37  ;;  %vm659_vm13 = vcmp.gt.f32.partialorder %v625_v24, %v6225_v37  ;;  %vm660_vm14 = vcmp.gt.f32.partialorder %v626_v25, %v6225_v37 }
  0x35   : > { %v663_v28 = vsel %vm629_vm9, %v6237_v45, 0.0  ;;  %v664_v31 = vsel %vm630_vm10, %v6237_v45, 0.0  ;;  %v665_v32 = vsel %vm631_vm11, %v6237_v45, 0.0  ;;  %v666_v33 = vsel %vm632_vm12, %v6237_v45, 0.0 }
  0x36   : > { %v693_v34 = vsel %vm659_vm13, %v6237_v45, 0.0  ;;  %v694_v35 = vsel %vm660_vm14, %v6237_v45, 0.0  ;;  %vm697_vm15 = vcmp.gt.f32.partialorder %v595_v16, %v6240_v46  ;;  %vm698_vm3 = vcmp.gt.f32.partialorder %v596_v17, %v6240_v46 }
  0x37   : > { %vm699_vm4 = vcmp.gt.f32.partialorder %v597_v18, %v6240_v46  ;;  %vm700_vm5 = vcmp.gt.f32.partialorder %v598_v23, %v6240_v46  ;;  %vm727_vm6 = vcmp.gt.f32.partialorder %v625_v24, %v6240_v46  ;;  %vm728_vm7 = vcmp.gt.f32.partialorder %v626_v25, %v6240_v46 }
  0x38   : > { %v731_v36 = vsel %vm697_vm15, %v6251_v53, %v663_v28  ;;  %v732_v39 = vsel %vm698_vm3, %v6251_v53, %v664_v31  ;;  %v733_v40 = vsel %vm699_vm4, %v6251_v53, %v665_v32  ;;  %v734_v41 = vsel %vm700_vm5, %v6251_v53, %v666_v33 }
  0x39   : > { %v761_v42 = vsel %vm727_vm6, %v6251_v53, %v693_v34  ;;  %v762_v43 = vsel %vm728_vm7, %v6251_v53, %v694_v35  ;;  %vm765_vm8 = vcmp.gt.f32.partialorder %v595_v16, %v6262_v63  ;;  %vm766_vm9 = vcmp.gt.f32.partialorder %v596_v17, %v6262_v63 }
  0x3a   : > { %vm767_vm10 = vcmp.gt.f32.partialorder %v597_v18, %v6262_v63  ;;  %vm768_vm11 = vcmp.gt.f32.partialorder %v598_v23, %v6262_v63  ;;  %vm795_vm12 = vcmp.gt.f32.partialorder %v625_v24, %v6262_v63  ;;  %vm796_vm13 = vcmp.gt.f32.partialorder %v626_v25, %v6262_v63 }
  0x3b   : > { %v799_v44 = vsel %vm765_vm8, %v6265_v0, %v731_v36  ;;  %v800_v47 = vsel %vm766_vm9, %v6265_v0, %v732_v39  ;;  %v801_v48 = vsel %vm767_vm10, %v6265_v0, %v733_v40  ;;  %v802_v49 = vsel %vm768_vm11, %v6265_v0, %v734_v41 }
  0x3c   : > { %v829_v50 = vsel %vm795_vm12, %v6265_v0, %v761_v42  ;;  %v830_v51 = vsel %vm796_vm13, %v6265_v0, %v762_v43  ;;  %v833_v52 = vmul.f32 %v6275_v13, %v799_v44  ;;  %v834_v54 = vmul.f32 %v6275_v13, %v800_v47 }
  0x3d   : > { %v835_v55 = vmul.f32 %v6275_v13, %v801_v48  ;;  %v836_v56 = vmul.f32 %v6275_v13, %v802_v49  ;;  %v863_v57 = vmul.f32 %v6275_v13, %v829_v50  ;;  %v864_v58 = vmul.f32 %v6275_v13, %v830_v51 }
  0x3e   : > { %v357_v59 = vmul.f32 %v5781_v26, %v6193_v14  ;;  %v358_v60 = vmul.f32 %v5782_v27, %v6193_v14  ;;  %v865_v61 = vpack.c.bf16 %v834_v54, %v833_v52  ;;  %v5595_v2 = vpack.c.bf16 %v834_v54, %v834_v54 }
  0x3f   : > { %v866_v62 = vpack.c.bf16 %v836_v56, %v835_v55  ;;  %v5596_v3 = vpack.c.bf16 %v836_v56, %v836_v56  ;;  %v880_v6 = vpack.c.bf16 %v864_v58, %v863_v57  ;;  %v5610_v7 = vpack.c.bf16 %v864_v58, %v864_v58 }
  0x40   : > { %v393_v8 = vadd.f32 %v6198_v19, %v357_v59  ;;  %v394_v9 = vadd.f32 %v6198_v19, %v358_v60  ;;  %v918_v10 = vrot.slane %v865_v61, %v6214_v30  ;;  %v925_v11 = vrot.slane %v5595_v2, %v6214_v30 }
  0x41   : > { %v981_v12 = vrot.slane %v866_v62, %v6214_v30  ;;  %v6336_v16 = vrot.slane %v5596_v3, %v6214_v30  ;;  %v6339_v17 = vrot.slane %v880_v6, %v6214_v30  ;;  %v1674_v18 = vrot.slane %v5610_v7, %v6214_v30 }
  0x42   : > { %v2586_v23 = vrot.slane %v6278_v15, %v6228_v38  ;;  %v6344_v24 = vcombine.low %v2715_v5, %v2679_v4  ;;  %v926_v25 = vcombine.high %v918_v10, %v918_v10  ;;  %v927_v26 = vcombine.high %v925_v11, %v925_v11 }
  0x43   : > { %9416 = vst [vmem:[#allocation7_spill] sm:$0xff] %v6339_v17  ;;  %v934_v27 = vrot.slane %v918_v10, %v6214_v30  ;;  %v941_v28 = vrot.slane %v925_v11, %v6214_v30  ;;  %v989_v31 = vcombine.high %v981_v12, %v981_v12  ;;  %v997_v32 = vrot.slane %v981_v12, %v6214_v30 }
  0x44   : > { %v6350_v33 = vadd.f32 %v6200_v20, %v393_v8  ;;  %v6353_v34 = vadd.f32 %v6200_v20, %v394_v9  ;;  %v948_v35 = vrot.slane %v926_v25, %v6214_v30  ;;  %v955_v36 = vrot.slane %v927_v26, %v6214_v30 }
  0x45   : > { %v956_v39 = vcombine.high %v934_v27, %v934_v27  ;;  %v990_v40 = vcombine.high %v6336_v16, %v6336_v16  ;;  %v957_v41 = vcombine.high %v941_v28, %v941_v28  ;;  %v1004_v42 = vrot.slane %v6336_v16, %v6214_v30 }
  0x46   : > { %v1011_v43 = vrot.slane %v989_v31, %v6214_v30  ;;  %v1675_v44 = vcombine.high %v6339_v17, %v6339_v17  ;;  %v958_v47 = vcombine.high %v948_v35, %v948_v35  ;;  %v959_v48 = vcombine.high %v955_v36, %v955_v36 }
  0x47   : > { %v1019_v49 = vcombine.high %v997_v32, %v997_v32  ;;  %v1676_v50 = vcombine.high %v1674_v18, %v1674_v18  ;;  %v1690_v52 = vrot.slane %v1674_v18, %v6214_v30  ;;  %v1709_v55 = vcombine.low %v934_v27, %v934_v27 }
  0x48   : > { %v1021_v51 = vcombine.high %v1011_v43, %v1011_v43  ;;  %v6366_v54 = vrot.slane %v1675_v44, %v6214_v30  ;;  %v1710_v57 = vcombine.low %v948_v35, %v948_v35  ;;  %v1733_v58 = vcombine.low %v956_v39, %v941_v28 }
  0x49   : > { %v1704_v56 = vrot.slane %v1676_v50, %v6214_v30  ;;  %v1734_v59 = vcombine.low %v958_v47, %v955_v36  ;;  %v1706_v60 = vcombine.high %v1690_v52, %v1690_v52  ;;  %v1717_v62 = vrot.slane %v1709_v55, %v6228_v38 }
  0x4a   : > { %9417 = vst [vmem:[#allocation8_spill] sm:$0xff] %v6366_v54  ;;  %v1707_v61 = vcombine.high %v6366_v54, %v6366_v54  ;;  %v1757_v2 = vcombine.low %v957_v41, %v6278_v15  ;;  %v1724_v4 = vrot.slane %v1710_v57, %v6228_v38  ;;  %v1741_v5 = vrot.slane %v1733_v58, %v6228_v38 }
  0x4b   : > { %v1708_v3 = vcombine.high %v1704_v56, %v1704_v56  ;;  %v1748_v6 = vrot.slane %v1734_v59, %v6228_v38  ;;  %v1758_v7 = vcombine.low %v959_v48, %v997_v32  ;;  %v1781_v9 = vcombine.low %v1011_v43, %v1021_v51  ;;  %v291_v48 = vld [vmem:[%s6191_s14 + $0x24] sm:$0xff]  }
  0x4c   : > { %v1765_v8 = vrot.slane %v1757_v2, %v6228_v38  ;;  %v1782_v10 = vcombine.low %v1019_v49, %v1004_v42  ;;  %v1020_v11 = vcombine.high %v1004_v42, %v1004_v42  ;;  %v1725_v12 = vcombine.low %v1717_v62, %v1724_v4  ;;  %v5808_v62 = vld [vmem:[%s6191_s14 + $0x30] sm:$0xff]  }
  0x4d   : > { %v1749_v16 = vcombine.low %v1741_v5, %v1748_v6  ;;  %v2549_v18 = vcombine.low %v1707_v61, %v1704_v56  ;;  %v1772_v25 = vrot.slane %v1758_v7, %v6228_v38  ;;  %v1789_v26 = vrot.slane %v1781_v9, %v6228_v38 }
  0x4e   : > { %v1796_v27 = vrot.slane %v1782_v10, %v6228_v38  ;;  %v2550_v28 = vcombine.low %v1690_v52, %v1706_v60  ;;  %v1732_v31 = vrot.slane %v1725_v12, %v6228_v38  ;;  %v2579_v36 = vrot.slane %v1708_v3, %v6228_v38 }
  0x4f   : > { %v1756_v32 = vrot.slane %v1749_v16, %v6228_v38  ;;  %v2557_v35 = vrot.slane %v2549_v18, %v6228_v38  ;;  %v1773_v39 = vcombine.low %v1765_v8, %v1772_v25  ;;  %vm461_vm14 = vcmp.ge.f32.partialorder %v6350_v33, 0.0 }
  0x50   : > { %v1797_v41 = vcombine.low %v1789_v26, %v1796_v27  ;;  %v2564_v42 = vrot.slane %v2550_v28, %v6228_v38  ;;  %v2587_v43 = vcombine.low %v2579_v36, %v2586_v23  ;;  %2632 = vst.msk [vmem:[#allocation2 + $0x10] sm:$0xc] %vm888_vm2, %v1732_v31  ;;  %vm462_vm15 = vcmp.ge.f32.partialorder %v6353_v34, 0.0 }
  0x51   : > { %2633 = vst.msk [vmem:[#allocation2 + $0x14] sm:$0xf] %vm9411_vm0, %v1756_v32  ;;  %v497_v44 = vmul.f32 %v6202_v21, %v6350_v33  ;;  %v498_v47 = vmul.f32 %v6202_v21, %v6353_v34  ;;  %v1780_v49 = vrot.slane %v1773_v39, %v6228_v38  ;;  %v1018_v23 = vrot.slane %v990_v40, %v6214_v30 }
  0x52   : > { %v1804_v50 = vrot.slane %v1797_v41, %v6228_v38  ;;  %v6396_v51 = vcombine.low %v2557_v35, %v2564_v42  ;;  %v2594_v52 = vrot.slane %v2587_v43, %v6228_v38  ;;  %v1806_v57 = vcombine.low %v1020_v11, %v6278_v15 }
  0x53   : > { %v529_v55 = vsel %vm461_vm14, %v6350_v33, %v497_v44  ;;  %v530_v56 = vsel %vm462_vm15, %v6353_v34, %v498_v47  ;;  %2634 = vst.msk [vmem:[#allocation2 + $0x18] sm:$0xf] %vm9411_vm0, %v1780_v49  ;;  %v1022_v60 = vcombine.high %v1018_v23, %v1018_v23  ;;  %v323_v61 = vunpack.c.l.bf16 %v291_v48 }
  0x54   : > { %9418 = vst [vmem:[#allocation9_spill] sm:$0xff] %v6396_v51  ;;  %2635 = vst.msk [vmem:[#allocation2 + $0x1c] sm:$0xf] %vm9411_vm0, %v1804_v50  ;;  %v565_v58 = vadd.f32 %v6204_v22, %v529_v55  ;;  %v566_v59 = vadd.f32 %v6204_v22, %v530_v56  ;;  %vm9405_vm2 = vcmask 1046528   ;;  %v324_v40 = vunpack.c.h.bf16 %v291_v48 }
  0x55   : > { %2668 = vst.msk [vmem:[#allocation2 + $0xa0] sm:$0x3] %vm886_vm1, %v2594_v52  ;;  %v3018_v33 = vrot.slane %v6344_v24, 1  ;;  %v1820_v3 = vrot.slane %v1806_v57, %v6228_v38  ;;  %v1805_v4 = vcombine.low %v1018_v23, %v1022_v60  ;;  %v359_v5 = vmul.f32 %v6193_v14, %v323_v61 }
  0x56   : > { %v599_v34 = vmul.f32 %v6209_v29, %v565_v58  ;;  %v600_v2 = vmul.f32 %v6209_v29, %v566_v59  ;;  %v360_v6 = vmul.f32 %v6193_v14, %v324_v40  ;;  %v5785_v7 = vunpack.c.l.bf16 %v5808_v62 }
  0x57   : > { %v2680_v8 = vld [vmem:[#allocation2 + $0x10] sm:$0xf]  ;;  %v5786_v27 = vunpack.c.h.bf16 %v5808_v62  ;;  %v1813_v43 = vrot.slane %v1805_v4, %v6228_v38  ;;  %v395_v48 = vadd.f32 %v6198_v19, %v359_v5 }
  0x58   : > { %v2681_v9 = vld [vmem:[#allocation2 + $0x14] sm:$0xf]  ;;  %v2717_v10 = vld [vmem:[#allocation2 + $0x10] sm:$0xe]  ;;  %vm633_vm1 = vcmp.gt.f32.partialorder %v599_v34, %v6225_v37  ;;  %vm634_vm3 = vcmp.gt.f32.partialorder %v600_v2, %v6225_v37  ;;  %vm701_vm4 = vcmp.gt.f32.partialorder %v599_v34, %v6240_v46  ;;  %vm702_vm5 = vcmp.gt.f32.partialorder %v600_v2, %v6240_v46 }
  0x59   : > { %v5632_v11 = vcombine.low %v2717_v10, %v2681_v9  ;;  %v6419_v12 = vcombine.low %v2680_v8, %v2681_v9  ;;  %v667_v16 = vsel %vm633_vm1, %v6237_v45, 0.0  ;;  %v668_v18 = vsel %vm634_vm3, %v6237_v45, 0.0 }
  0x5a   : > { %v735_v25 = vsel %vm701_vm4, %v6251_v53, %v667_v16  ;;  %v736_v26 = vsel %vm702_vm5, %v6251_v53, %v668_v18  ;;  %vm769_vm6 = vcmp.gt.f32.partialorder %v599_v34, %v6262_v63  ;;  %v2682_v28 = vld [vmem:[#allocation2 + $0x18] sm:$0xf]  ;;  %vm770_vm7 = vcmp.gt.f32.partialorder %v600_v2, %v6262_v63  ;;  %v2721_v34 = vld [vmem:[#allocation2 + $0x10] sm:$0xc] }
  0x5b   : > { %v6426_v31 = vld [vmem:[#allocation2 + $0x1c] sm:$0xf]  ;;  %v3104_v32 = vrot.slane %v5632_v11, 1  ;;  %v3019_v35 = vrot.slane %v6419_v12, 1  ;;  %v803_v36 = vsel %vm769_vm6, %v6265_v0, %v735_v25  ;;  %v804_v41 = vsel %vm770_vm7, %v6265_v0, %v736_v26 }
  0x5c   : > { %v6432_v39 = vcombine.low %v2682_v28, %v6426_v31  ;;  %v837_v42 = vmul.f32 %v6275_v13, %v803_v36  ;;  %v838_v47 = vmul.f32 %v6275_v13, %v804_v41  ;;  %v396_v49 = vadd.f32 %v6198_v19, %v360_v6 }
  0x5d   : > { %v3020_v44 = vsel %vm9405_vm2, %v3018_v33, %v3019_v35  ;;  %v1821_v23 = vcombine.low %v1813_v43, %v1820_v3  ;;  %v361_v52 = vmul.f32 %v5785_v7, %v6193_v14  ;;  %v362_v55 = vmul.f32 %v5786_v27, %v6193_v14 }
  0x5e   : > { %v6442_v50 = vrot.slane %v6432_v39, 1  ;;  %3055 = vrot.lane.b32.xlu1 %v3020_v44, %s6081_s19  ;;  %v867_v56 = vpack.c.bf16 %v838_v47, %v837_v42  ;;  %v431_v57 = vadd.f32 %v6200_v20, %v395_v48  ;;  %v432_v58 = vadd.f32 %v6200_v20, %v396_v49 }
  0x5f   : > { %v5597_v59 = vpack.c.bf16 %v838_v47, %v838_v47  ;;  %v1828_v61 = vrot.slane %v1821_v23, %v6228_v38  ;;  %v397_v4 = vadd.f32 %v6198_v19, %v361_v52  ;;  %v398_v8 = vadd.f32 %v6198_v19, %v362_v55 }
  0x60   : > { %v3105_v60 = vsel %vm9405_vm2, %v3104_v32, %v6442_v50  ;;  %v3022_v62 = vsel %vm9405_vm2, %v3019_v35, %v6442_v50  ;;  %v1030_v40 = vrot.slane %v867_v56, %v6214_v30  ;;  %vm463_vm8 = vcmp.ge.f32.partialorder %v431_v57, 0.0 }
  0x61   : > { %3110 = vrot.lane.b32.xlu0 %v3105_v60, %s6082_s20  ;;  %vm464_vm9 = vcmp.ge.f32.partialorder %v432_v58, 0.0  ;;  %v499_v33 = vmul.f32 %v6202_v21, %v431_v57  ;;  %2636 = vst.msk [vmem:[#allocation2 + $0x20] sm:$0xf] %vm9411_vm0, %v1828_v61  ;;  %v500_v2 = vmul.f32 %v6202_v21, %v432_v58  ;;  %v1037_v3 = vrot.slane %v5597_v59, %v6214_v30  ;;  %v295_v60 = vld [vmem:[%s6191_s14 + $0x3c] sm:$0xff]  }
  0x62   : > { %3057 = vrot.lane.b32.xlu1 %v3022_v62, %s6081_s19  ;;  %v1038_v5 = vcombine.high %v1030_v40, %v1030_v40  ;;  %v1046_v6 = vrot.slane %v1030_v40, %v6214_v30  ;;  %v6466_v25 = vcombine.low %v2721_v34, %v2681_v9  ;;  %v433_v41 = vadd.f32 %v6200_v20, %v397_v4 }
  0x63   : > { %v531_v7 = vsel %vm463_vm8, %v431_v57, %v499_v33  ;;  %v532_v10 = vsel %vm464_vm9, %v432_v58, %v500_v2  ;;  %v1039_v16 = vcombine.high %v1037_v3, %v1037_v3  ;;  %v1053_v18 = vrot.slane %v1037_v3, %v6214_v30 }
  0x64   : > { %v567_v11 = vadd.f32 %v6204_v22, %v531_v7  ;;  %v1060_v26 = vrot.slane %v1038_v5, %v6214_v30  ;;  %v1068_v27 = vcombine.high %v1046_v6, %v1046_v6  ;;  %v568_v28 = vadd.f32 %v6204_v22, %v532_v10 }
  0x65   : > { %v1067_v35 = vrot.slane %v1039_v16, %v6214_v30  ;;  %v1069_v36 = vcombine.high %v1053_v18, %v1053_v18  ;;  %v434_v47 = vadd.f32 %v6200_v20, %v398_v8  ;;  %vm465_vm1 = vcmp.ge.f32.partialorder %v433_v41, 0.0 }
  0x66   : > { %v601_v32 = vmul.f32 %v6209_v29, %v567_v11  ;;  %v1070_v42 = vcombine.high %v1060_v26, %v1060_v26  ;;  %v1829_v43 = vcombine.low %v1046_v6, %v1068_v27  ;;  %v602_v44 = vmul.f32 %v6209_v29, %v568_v28  ;;  %v6498_v11 = vld [vmem:[#allocation2 + $0x18] sm:$0xc] }
  0x67   : > { %v1071_v9 = vcombine.high %v1067_v35, %v1067_v35  ;;  %v1853_v59 = vcombine.low %v1053_v18, %v1069_v36  ;;  %vm466_vm3 = vcmp.ge.f32.partialorder %v434_v47, 0.0  ;;  %v501_v4 = vmul.f32 %v6202_v21, %v433_v41 }
  0x68   : > { %vm635_vm10 = vcmp.gt.f32.partialorder %v601_v32, %v6225_v37  ;;  %vm703_vm11 = vcmp.gt.f32.partialorder %v601_v32, %v6240_v46  ;;  %vm771_vm12 = vcmp.gt.f32.partialorder %v601_v32, %v6262_v63  ;;  %v1830_v48 = vcombine.low %v1060_v26, %v1070_v42 }
  0x69   : > { %v1837_v49 = vrot.slane %v1829_v43, %v6228_v38  ;;  %vm636_vm13 = vcmp.gt.f32.partialorder %v602_v44, %v6225_v37  ;;  %v669_v23 = vsel %vm635_vm10, %v6237_v45, 0.0  ;;  %vm704_vm14 = vcmp.gt.f32.partialorder %v602_v44, %v6240_v46 }
  0x6a   : > { %v670_v52 = vsel %vm636_vm13, %v6237_v45, 0.0  ;;  %v737_v55 = vsel %vm703_vm11, %v6251_v53, %v669_v23  ;;  %vm772_vm15 = vcmp.gt.f32.partialorder %v602_v44, %v6262_v63  ;;  %v1844_v56 = vrot.slane %v1830_v48, %v6228_v38 }
  0x6b   : > { %v738_v57 = vsel %vm704_vm14, %v6251_v53, %v670_v52  ;;  %v805_v58 = vsel %vm771_vm12, %v6265_v0, %v737_v55  ;;  %v1854_v40 = vcombine.low %v1067_v35, %v1071_v9  ;;  %v1861_v2 = vrot.slane %v1853_v59, %v6228_v38 }
  0x6c   : > { %v806_v61 = vsel %vm772_vm15, %v6265_v0, %v738_v57  ;;  %v839_v62 = vmul.f32 %v6275_v13, %v805_v58  ;;  %v1845_v33 = vcombine.low %v1837_v49, %v1844_v56  ;;  %v502_v5 = vmul.f32 %v6202_v21, %v434_v47 }
  0x6d   : > { %v840_v34 = vmul.f32 %v6275_v13, %v806_v61  ;;  %v1868_v3 = vrot.slane %v1854_v40, %v6228_v38  ;;  %v327_v6 = vunpack.c.l.bf16 %v295_v60  ;;  %v3284_v10 = vrot.slane %v6466_v25, 2 }
  0x6e   : > { %v1852_v7 = vrot.slane %v1845_v33, %v6228_v38  ;;  %v533_v26 = vsel %vm465_vm1, %v433_v41, %v501_v4  ;;  %v534_v27 = vsel %vm466_vm3, %v434_v47, %v502_v5  ;;  %v328_v28 = vunpack.c.h.bf16 %v295_v60  ;;  %v2727_v5 = vld [vmem:[#allocation2 + $0x18] sm:$0x8] }
  0x6f   : > { %v868_v8 = vpack.c.bf16 %v840_v34, %v839_v62  ;;  %v5598_v16 = vpack.c.bf16 %v840_v34, %v840_v34  ;;  %v1869_v18 = vcombine.low %v1861_v2, %v1868_v3  ;;  %vm3283_vm4 = vcmask 1045504  }
  0x70   : > { %2637 = vst.msk [vmem:[#allocation2 + $0x24] sm:$0xf] %vm9411_vm0, %v1852_v7  ;;  %v569_v35 = vadd.f32 %v6204_v22, %v533_v26  ;;  %v570_v36 = vadd.f32 %v6204_v22, %v534_v27  ;;  %v3285_v44 = vrot.slane %v6432_v39, 2  ;;  %v5637_v41 = vcombine.low %v6498_v11, %v6426_v31 }
  0x71   : > { %v1079_v32 = vrot.slane %v868_v8, %v6214_v30  ;;  %v1086_v42 = vrot.slane %v5598_v16, %v6214_v30  ;;  %v1876_v43 = vrot.slane %v1869_v18, %v6228_v38  ;;  %v363_v47 = vmul.f32 %v6193_v14, %v327_v6 }
  0x72   : > { %v603_v49 = vmul.f32 %v6209_v29, %v569_v35  ;;  %v604_v23 = vmul.f32 %v6209_v29, %v570_v36  ;;  %v364_v56 = vmul.f32 %v6193_v14, %v328_v28  ;;  %v6541_v36 = vcombine.low %v2727_v5, %v6426_v31 }
  0x73   : > { %v1087_v9 = vcombine.high %v1079_v32, %v1079_v32  ;;  %v1095_v48 = vrot.slane %v1079_v32, %v6214_v30  ;;  %2638 = vst.msk [vmem:[#allocation2 + $0x28] sm:$0xf] %vm9411_vm0, %v1876_v43  ;;  %v1088_v52 = vcombine.high %v1086_v42, %v1086_v42  ;;  %v1102_v55 = vrot.slane %v1086_v42, %v6214_v30 }
  0x74   : > { %v399_v57 = vadd.f32 %v6198_v19, %v363_v47  ;;  %vm637_vm5 = vcmp.gt.f32.partialorder %v603_v49, %v6225_v37  ;;  %vm638_vm6 = vcmp.gt.f32.partialorder %v604_v23, %v6225_v37  ;;  %vm705_vm7 = vcmp.gt.f32.partialorder %v603_v49, %v6240_v46 }
  0x75   : > { %v1109_v58 = vrot.slane %v1087_v9, %v6214_v30  ;;  %v1117_v59 = vcombine.high %v1095_v48, %v1095_v48  ;;  %v671_v60 = vsel %vm637_vm5, %v6237_v45, 0.0  ;;  %v672_v61 = vsel %vm638_vm6, %v6237_v45, 0.0 }
  0x76   : > { %vm706_vm8 = vcmp.gt.f32.partialorder %v604_v23, %v6240_v46  ;;  %v739_v33 = vsel %vm705_vm7, %v6251_v53, %v671_v60  ;;  %vm773_vm9 = vcmp.gt.f32.partialorder %v603_v49, %v6262_v63  ;;  %vm774_vm10 = vcmp.gt.f32.partialorder %v604_v23, %v6262_v63 }
  0x77   : > { %v1877_v62 = vcombine.low %v6278_v15, %v1109_v58  ;;  %v1878_v40 = vcombine.low %v1095_v48, %v1117_v59  ;;  %v740_v34 = vsel %vm706_vm8, %v6251_v53, %v672_v61  ;;  %v6527_v2 = vld [vmem:[#allocation2 + $0x20] sm:$0xff]   ;;  %v1116_v3 = vrot.slane %v1088_v52, %v6214_v30 }
  0x78   : > { %v1118_v4 = vcombine.high %v1102_v55, %v1102_v55  ;;  %v807_v8 = vsel %vm773_vm9, %v6265_v0, %v739_v33  ;;  %v808_v11 = vsel %vm774_vm10, %v6265_v0, %v740_v34  ;;  %v3023_v16 = vrot.slane %v6527_v2, 1 }
  0x79   : > { %v1885_v6 = vrot.slane %v1877_v62, %v6228_v38  ;;  %v1892_v7 = vrot.slane %v1878_v40, %v6228_v38  ;;  %v841_v18 = vmul.f32 %v6275_v13, %v807_v8  ;;  %v842_v26 = vmul.f32 %v6275_v13, %v808_v11 }
  0x7a   : > { %v400_v27 = vadd.f32 %v6198_v19, %v364_v56  ;;  %v1119_v32 = vcombine.high %v1109_v58, %v1109_v58  ;;  %v1902_v35 = vcombine.low %v1102_v55, %v1118_v4  ;;  %v3024_v42 = vsel %vm9405_vm2, %v6442_v50, %v3023_v16 }
  0x7b   : > { %v1893_v28 = vcombine.low %v1885_v6, %v1892_v7  ;;  %v3286_v43 = vsel %vm3283_vm4, %v3284_v10, %v3285_v44  ;;  %v869_v47 = vpack.c.bf16 %v842_v26, %v841_v18  ;;  %3112 = vrot.lane.b32.xlu0 %v3024_v42, %s6082_s20  ;;  %v1120_v48 = vcombine.high %v1116_v3, %v1116_v3 }
  0x7c   : > { %v1901_v49 = vcombine.low %v1119_v32, %v1116_v3  ;;  %v1916_v23 = vrot.slane %v1902_v35, %v6228_v38  ;;  %v435_v52 = vadd.f32 %v6200_v20, %v399_v57  ;;  %v436_v55 = vadd.f32 %v6200_v20, %v400_v27 }
  0x7d   : > { %v1900_v9 = vrot.slane %v1893_v28, %v6228_v38  ;;  %v1128_v31 = vrot.slane %v869_v47, %v6214_v30  ;;  %v5599_v50 = vpack.c.bf16 %v842_v26, %v842_v26  ;;  %v6558_v10 = vrot.slane %v6527_v2, 2 }
  0x7e   : > { %v3370_v56 = vrot.slane %v5637_v41, 2  ;;  %v1909_v58 = vrot.slane %v1901_v49, %v6228_v38  ;;  %v3550_v59 = vrot.slane %v6541_v36, 3  ;;  %vm467_vm11 = vcmp.ge.f32.partialorder %v435_v52, 0.0 }
  0x7f   : > { %2639 = vst.msk [vmem:[#allocation2 + $0x2c] sm:$0xf] %vm9411_vm0, %v1900_v9  ;;  %v1136_v60 = vcombine.high %v1128_v31, %v1128_v31  ;;  %v1144_v61 = vrot.slane %v1128_v31, %v6214_v30  ;;  %vm468_vm12 = vcmp.ge.f32.partialorder %v436_v55, 0.0  ;;  %3059 = vrot.lane.b32.xlu0 %v3024_v42, %s6081_s19  ;;  %v503_v62 = vmul.f32 %v6202_v21, %v435_v52 }
  0x80   : > { %v1917_v57 = vcombine.low %v1909_v58, %v1916_v23  ;;  %v504_v40 = vmul.f32 %v6202_v21, %v436_v55  ;;  %v1135_v33 = vrot.slane %v5599_v50, %v6214_v30  ;;  %v2829_v4 = vshll.u32 %v6344_v24, 16 }
  0x81   : > { %v1158_v41 = vrot.slane %v1136_v60, %v6214_v30  ;;  %v1925_v34 = vcombine.low %v1120_v48, %v1144_v61  ;;  %v1166_v3 = vcombine.high %v1144_v61, %v1144_v61  ;;  %v535_v6 = vsel %vm467_vm11, %v435_v52, %v503_v62 }
  0x82   : > { %v1924_v5 = vrot.slane %v1917_v57, %v6228_v38  ;;  %v536_v7 = vsel %vm468_vm12, %v436_v55, %v504_v40  ;;  %v1137_v8 = vcombine.high %v1135_v33, %v1135_v33  ;;  %v571_v26 = vadd.f32 %v6204_v22, %v535_v6 }
  0x83   : > { %v1926_v11 = vcombine.low %v6278_v15, %v1158_v41  ;;  %v1933_v18 = vrot.slane %v1925_v34, %v6228_v38  ;;  %v572_v27 = vadd.f32 %v6204_v22, %v536_v7  ;;  %3321 = vrot.lane.b32.xlu0 %v3286_v43, %s6083_s23  ;;  %v3371_v28 = vsel %vm3283_vm4, %v3370_v56, %v6558_v10 }
  0x84   : > { %v3288_v32 = vsel %vm3283_vm4, %v3285_v44, %v6558_v10  ;;  %2640 = vst.msk [vmem:[#allocation2 + $0x30] sm:$0xf] %vm9411_vm0, %v1924_v5  ;;  %v1151_v35 = vrot.slane %v1135_v33, %v6214_v30  ;;  %v1168_v42 = vcombine.high %v1158_v41, %v1158_v41  ;;  %vm9407_vm13 = vcmask 1044480  }
  0x85   : > { %v1940_v9 = vrot.slane %v1926_v11, %v6228_v38  ;;  %v605_v43 = vmul.f32 %v6209_v29, %v571_v26  ;;  %v606_v48 = vmul.f32 %v6209_v29, %v572_v27  ;;  %v6589_v49 = vrot.slane %v1137_v8, %v6214_v30 }
  0x86   : > { %v6583_v47 = vld [vmem:[#allocation2 + $0x28] sm:$0xff]   ;;  %v3551_v23 = vrot.slane %v6527_v2, 3  ;;  %v2827_v44 = vshrl.u32 %v6344_v24, 16  ;;  %v2831_v31 = vrot.slane %v2829_v4, 1  ;;  %v2834_v52 = vshll.u32 %v6419_v12, 16 }
  0x87   : > { %v3025_v55 = vrot.slane %v6583_v47, 1  ;;  %v1941_v50 = vcombine.low %v1933_v18, %v1940_v9  ;;  %v1949_v56 = vcombine.low %v1166_v3, %v1151_v35  ;;  %v1950_v58 = vcombine.low %v1168_v42, %v6589_v49  ;;  %3323 = vrot.lane.b32.xlu0 %v3288_v32, %s6083_s23 }
  0x88   : > { %vm639_vm14 = vcmp.gt.f32.partialorder %v605_v43, %v6225_v37  ;;  %vm640_vm15 = vcmp.gt.f32.partialorder %v606_v48, %v6225_v37  ;;  %vm707_vm1 = vcmp.gt.f32.partialorder %v605_v43, %v6240_v46  ;;  %vm708_vm3 = vcmp.gt.f32.partialorder %v606_v48, %v6240_v46 }
  0x89   : > { %vm9410_vm5 = vsmask.f32 7424  ;;  %v6606_v24 = vsel %vm9405_vm2, %v3023_v16, %v3025_v55  ;;  %v3289_v60 = vrot.slane %v6583_v47, 2  ;;  %v1948_v61 = vrot.slane %v1941_v50, %v6228_v38 }
  0x8a   : > { %v1167_v57 = vcombine.high %v1151_v35, %v1151_v35  ;;  %3114 = vrot.lane.b32.xlu1 %v6606_v24, %s6082_s20  ;;  %v673_v62 = vsel %vm639_vm14, %v6237_v45, 0.0  ;;  %v674_v40 = vsel %vm640_vm15, %v6237_v45, 0.0  ;;  %vm775_vm6 = vcmp.gt.f32.partialorder %v605_v43, %v6262_v63 }
  0x8b   : > { %vm776_vm7 = vcmp.gt.f32.partialorder %v606_v48, %v6262_v63  ;;  %2641 = vst.msk [vmem:[#allocation2 + $0x34] sm:$0xf] %vm9411_vm0, %v1948_v61  ;;  %v741_v16 = vsel %vm707_vm1, %v6251_v53, %v673_v62  ;;  %v742_v33 = vsel %vm708_vm3, %v6251_v53, %v674_v40  ;;  %v1957_v41 = vrot.slane %v1949_v56, %v6228_v38 }
  0x8c   : > { %v1964_v34 = vrot.slane %v1950_v58, %v6228_v38  ;;  %v9389_v3 = vrot.slane %v6583_v47, 3  ;;  %v809_v4 = vsel %vm775_vm6, %v6265_v0, %v741_v16  ;;  %v810_v5 = vsel %vm776_vm7, %v6265_v0, %v742_v33 }
  0x8d   : > { %v2832_v6 = vor.u32 %v2831_v31, %v2827_v44  ;;  %v3290_v7 = vsel %vm3283_vm4, %v6558_v10, %v3289_v60  ;;  %v843_v8 = vmul.f32 %v6275_v13, %v809_v4  ;;  %v6628_v11 = vmul.f32 %v6275_v13, %v810_v5 }
  0x8e   : > { %v1965_v18 = vcombine.low %v1957_v41, %v1964_v34  ;;  %3376 = vrot.lane.b32.xlu1 %v3371_v28, %s6084_s24  ;;  %v1973_v26 = vcombine.low %v1167_v57, %v6278_v15  ;;  %v2836_v27 = vrot.slane %v2834_v52, 1  ;;  %v2838_v32 = vshrl.u32 %v6419_v12, 16 }
  0x8f   : > { %v6634_v35 = vshll.u32 %v6527_v2, 16  ;;  %v870_v42 = vpack.c.bf16 %v6628_v11, %v843_v8  ;;  %v2842_v9 = vshll.u32 %v6432_v39, 16  ;;  %v6640_v43 = vshrl.u32 %v6527_v2, 16 }
  0x90   : > { %v1972_v10 = vrot.slane %v1965_v18, %v6228_v38  ;;  %v3552_v28 = vsel %vm9407_vm13, %v3550_v59, %v3551_v23  ;;  %v1169_v48 = vcombine.high %v6589_v49, %v6589_v49  ;;  %v6648_v44 = vshll.u32 %v6583_v47, 16 }
  0x91   : > { %v6651_v31 = vshrl.u32 %v6583_v47, 16  ;;  %v6654_v52 = vrot.slane %v870_v42, %v6214_v30  ;;  %v3164_v2 = vrot.slane %v6640_v43, 1  ;;  %v3165_v50 = vrot.slane %v6634_v35, 2 }
  0x92   : > { %2642 = vst.msk [vmem:[#allocation2 + $0x38] sm:$0xf] %vm9411_vm0, %v1972_v10  ;;  %v2846_v59 = vshrl.u32 %v6432_v39, 16  ;;  %3378 = vrot.lane.b32.xlu1 %v3290_v7, %s6084_s24  ;;  %v6661_v49 = vld [vmem:[#allocation2 + $0x30] sm:$0xff]   ;;  %v3554_v56 = vsel %vm9407_vm13, %v3551_v23, %v9389_v3  ;;  %v1981_v58 = vrot.slane %v1973_v26, %v6228_v38  ;;  %v3169_v57 = vrot.slane %v6648_v44, 2 }
  0x93   : > { %v3168_v61 = vrot.slane %v6651_v31, 1  ;;  %v6671_v62 = vrot.slane %v6654_v52, %v6214_v30  ;;  %v6674_v40 = vsel %vm9410_vm5, %v2832_v6, %v2836_v27  ;;  %v2840_v16 = vor.u32 %v2838_v32, %v2836_v27 }
  0x94   : > { %v2844_v33 = vrot.slane %v2842_v9, 1  ;;  %v9388_v41 = vrot.slane %v6661_v49, 2  ;;  %vm9404_vm8 = vsmask.f32 6400  ;;  %v3166_v34 = vor.u32 %v3165_v50, %v3164_v2 }
  0x95   : > { %v2852_v23 = vrot.slane %v6634_v35, 1  ;;  %v1974_v4 = vcombine.low %v1169_v48, %v6671_v62  ;;  %v3419_v8 = vshrl.u32 %v6541_v36, 16  ;;  %v3422_v18 = vshll.u32 %v6541_v36, 16 }
  0x96   : > { %v2848_v5 = vor.u32 %v2846_v59, %v2844_v33  ;;  %v6684_v6 = vsel %vm3283_vm4, %v3289_v60, %v9388_v41  ;;  %3325 = vrot.lane.b32.xlu1 %v3290_v7, %s6083_s23  ;;  %v3027_v26 = vrot.slane %v6661_v49, 1  ;;  %v6689_v32 = vor.u32 %v3169_v57, %v3168_v61 }
  0x97   : > { %3380 = vrot.lane.b32.xlu0 %v6684_v6, %s6084_s24  ;;  %v1988_v42 = vrot.slane %v1974_v4, %v6228_v38  ;;  %v3421_v10 = vrot.slane %v3419_v8, 2  ;;  %v3424_v36 = vrot.slane %v3422_v18, 3  ;;  %v3426_v48 = vrot.slane %v6640_v43, 2 }
  0x98   : > { %v3427_v60 = vrot.slane %v6634_v35, 3  ;;  %v3153_v2 = vshrl.u32 %v6466_v25, 16  ;;  %v3156_v7 = vshll.u32 %v6466_v25, 16  ;;  %v3160_v50 = vrot.slane %v2846_v59, 1 }
  0x99   : > { %v1989_v41 = vcombine.low %v1981_v58, %v1988_v42  ;;  %v3425_v3 = vor.u32 %v3424_v36, %v3421_v10  ;;  %v3161_v61 = vrot.slane %v2842_v9, 2  ;;  %v3430_v57 = vrot.slane %v6651_v31, 2 }
  0x9a   : > { %3587 = vrot.lane.b32.xlu1 %v3552_v28, %s6085_s25  ;;  %v3428_v4 = vor.u32 %v3427_v60, %v3426_v48  ;;  %v3155_v8 = vrot.slane %v3153_v2, 1  ;;  %v3158_v18 = vrot.slane %v3156_v7, 2  ;;  %v3431_v27 = vrot.slane %v6648_v44, 3  ;;  %v5809_v48 = vld [vmem:[%s6191_s14 + $0x48] sm:$0xff]  }
  0x9b   : > { %3061 = vrot.lane.b32.xlu0 %v6606_v24, %s6081_s19  ;;  %v1996_v35 = vrot.slane %v1989_v41, %v6228_v38  ;;  %v6705_v25 = vsel %vm9410_vm5, %v2840_v16, %v2844_v33  ;;  %v6708_v9 = vsel %vm9410_vm5, %v2848_v5, %v2852_v23  ;;  %vm9406_vm9 = vsmask.f32 5376 }
  0x9c   : > { %v3028_v28 = vsel %vm9405_vm2, %v3025_v55, %v3027_v26  ;;  %v9419_v59 = vrot.slane %v6661_v49, 3  ;;  %v9420_v24 = vrot.slane %v6583_v47, 3  ;;  %v2860_v16 = vrot.slane %v6648_v44, 1 }
  0x9d   : > { %v2866_v33 = vshll.u32 %v6661_v49, 16  ;;  %2643 = vst.msk [vmem:[#allocation2 + $0x3c] sm:$0xf] %vm9411_vm0, %v1996_v35  ;;  %v6725_v41 = vsel %vm9404_vm8, %v3166_v34, %v6689_v32  ;;  %v3162_v5 = vor.u32 %v3161_v61, %v3160_v50  ;;  %v2856_v42 = vor.u32 %v6640_v43, %v2852_v23 }
  0x9e   : > { %v3556_v58 = vsel %vm9407_vm13, %v9420_v24, %v9419_v59  ;;  %v2870_v55 = vshrl.u32 %v6661_v49, 16  ;;  %3589 = vrot.lane.b32.xlu1 %v3554_v56, %s6085_s25  ;;  %v6731_v47 = vsel %vm9406_vm9, %v3425_v3, %v3428_v4  ;;  %v3159_v10 = vor.u32 %v3158_v18, %v3155_v8  ;;  %v299_v8 = vld [vmem:[%s6191_s14 + $0x54] sm:$0xff]  }
  0x9f   : > { %v3432_v44 = vor.u32 %v3431_v27, %v3430_v57  ;;  %v2864_v36 = vor.u32 %v6651_v31, %v2860_v16  ;;  %3063 = vrot.lane.b32.xlu0 %v3028_v28, %s6081_s19  ;;  %v3435_v2 = vrot.slane %v2866_v33, 3  ;;  %v2868_v7 = vrot.slane %v2866_v33, 1 }
  0xa0   : > { %v3434_v60 = vrot.slane %v2870_v55, 2  ;;  %v5600_v43 = vpack.c.bf16 %v6628_v11, %v6628_v11  ;;  %v6739_v23 = vsel %vm9404_vm8, %v3162_v5, %v3166_v34  ;;  %v3172_v56 = vrot.slane %v2870_v55, 1 }
  0xa1   : > { %v3173_v3 = vrot.slane %v2866_v33, 2  ;;  %v1185_v27 = vcombine.high %v6654_v52, %v6654_v52  ;;  %v6744_v50 = vsel %vm9410_vm5, %v2856_v42, %v2860_v16  ;;  %v1215_v61 = vcombine.high %v6671_v62, %v6671_v62 }
  0xa2   : > { %v1184_v31 = vrot.slane %v5600_v43, %v6214_v30  ;;  %v5789_v57 = vunpack.c.l.bf16 %v5809_v48  ;;  %3591 = vrot.lane.b32.xlu1 %v3556_v58, %s6085_s25  ;;  %v6752_v11 = vsel %vm9404_vm8, %v3159_v10, %v3162_v5  ;;  %v6755_v34 = vsel %vm9406_vm9, %v3428_v4, %v3432_v44 }
  0xa3   : > { %v1207_v52 = vrot.slane %v1185_v27, %v6214_v30  ;;  %v5790_v18 = vunpack.c.h.bf16 %v5809_v48  ;;  %v6758_v35 = vor.u32 %v3435_v2, %v3434_v60  ;;  %v6761_v59 = vsel %vm9410_vm5, %v2864_v36, %v2868_v7 }
  0xa4   : > { %v1186_v24 = vcombine.high %v1184_v31, %v1184_v31  ;;  %v1200_v62 = vrot.slane %v1184_v31, %v6214_v30  ;;  %v6764_v16 = vld [vmem:[#allocation2 + $0x38] sm:$0xff]   ;;  %v6766_v58 = vor.u32 %v3173_v3, %v3172_v56  ;;  %v331_v5 = vunpack.c.l.bf16 %v299_v8 }
  0xa5   : > { %v1217_v33 = vcombine.high %v1207_v52, %v1207_v52  ;;  %v332_v42 = vunpack.c.h.bf16 %v299_v8  ;;  %v365_v48 = vmul.f32 %v5789_v57, %v6193_v14  ;;  %v366_v60 = vmul.f32 %v5790_v18, %v6193_v14 }
  0xa6   : > { %v1214_v4 = vrot.slane %v1186_v24, %v6214_v30  ;;  %v1998_v10 = vcombine.low %v1215_v61, %v1200_v62  ;;  %v9390_v36 = vrot.slane %v6764_v16, 1  ;;  %3116 = vrot.lane.b32.xlu1 %v3028_v28, %s6082_s20  ;;  %v6774_v2 = vshll.u32 %v6764_v16, 16 }
  0xa7   : > { %v6777_v43 = vshrl.u32 %v6764_v16, 16  ;;  %v1216_v56 = vcombine.high %v1200_v62, %v1200_v62  ;;  %v3293_v3 = vrot.slane %v6764_v16, 2  ;;  %v1997_v31 = vcombine.low %v1207_v52, %v1217_v33 }
  0xa8   : > { %v1218_v27 = vcombine.high %v1214_v4, %v1214_v4  ;;  %v2012_v61 = vrot.slane %v1998_v10, %v6228_v38  ;;  %v6786_v57 = vsel %vm9405_vm2, %v3027_v26, %v9390_v36  ;;  %v6790_v28 = vsel %vm9406_vm9, %v3432_v44, %v6758_v35 }
  0xa9   : > { %v6795_v8 = vsel %vm9404_vm8, %v6689_v32, %v6766_v58  ;;  %v6797_v18 = vor.u32 %v2870_v55, %v2868_v7  ;;  %3118 = vrot.lane.b32.xlu0 %v6786_v57, %s6082_s20  ;;  %v3176_v52 = vrot.slane %v6777_v43, 1  ;;  %v3177_v24 = vrot.slane %v6774_v2, 2 }
  0xaa   : > { %v2005_v44 = vrot.slane %v1997_v31, %v6228_v38  ;;  %3327 = vrot.lane.b32.xlu1 %v6684_v6, %s6083_s23  ;;  %v2021_v62 = vcombine.low %v1214_v4, %v1218_v27  ;;  %v2022_v32 = vcombine.low %v1216_v56, %v6278_v15  ;;  %v367_v55 = vmul.f32 %v6193_v14, %v331_v5  ;;  %v5810_v56 = vld [vmem:[%s6191_s14 + $0x60] sm:$0xff]  }
  0xab   : > { %v368_v7 = vmul.f32 %v6193_v14, %v332_v42  ;;  %v9421_v33 = vrot.slane %v6661_v49, 2  ;;  %v401_v31 = vadd.f32 %v6198_v19, %v365_v48  ;;  %v402_v26 = vadd.f32 %v6198_v19, %v366_v60 }
  0xac   : > { %v2013_v36 = vcombine.low %v2005_v44, %v2012_v61  ;;  %v3438_v6 = vrot.slane %v6777_v43, 2  ;;  %v3439_v4 = vrot.slane %v6774_v2, 3  ;;  %v2029_v5 = vrot.slane %v2021_v62, %v6228_v38 }
  0xad   : > { %v6815_v10 = vsel %vm3283_vm4, %v9421_v33, %v3293_v3  ;;  %v2036_v42 = vrot.slane %v2022_v32, %v6228_v38  ;;  %2976 = vrot.lane.b32.xlu0 %v6674_v40, %s6086_s26  ;;  %v6826_v27 = vor.u32 %v3177_v24, %v3176_v52  ;;  %v9422_v61 = vrot.slane %v6764_v16, 3 }
  0xae   : > { %v9423_v48 = vrot.slane %v6661_v49, 3  ;;  %v2020_v44 = vrot.slane %v2013_v36, %v6228_v38  ;;  %v437_v62 = vadd.f32 %v6200_v20, %v401_v31  ;;  %3382 = vrot.lane.b32.xlu1 %v6815_v10, %s6084_s24  ;;  %v438_v33 = vadd.f32 %v6200_v20, %v402_v26 }
  0xaf   : > { %v2037_v32 = vcombine.low %v2029_v5, %v2036_v42  ;;  %v403_v40 = vadd.f32 %v6198_v19, %v367_v55  ;;  %v404_v52 = vadd.f32 %v6198_v19, %v368_v7  ;;  %v5793_v24 = vunpack.c.l.bf16 %v5810_v56 }
  0xb0   : > { %v6833_v60 = vsel %vm9407_vm13, %v9423_v48, %v9422_v61  ;;  %2644 = vst.msk [vmem:[#allocation2 + $0x40] sm:$0xf] %vm9411_vm0, %v2020_v44  ;;  %vm469_vm10 = vcmp.ge.f32.partialorder %v437_v62, 0.0  ;;  %v505_v49 = vmul.f32 %v6202_v21, %v437_v62  ;;  %v5794_v61 = vunpack.c.h.bf16 %v5810_v56 }
  0xb1   : > { %v2044_v36 = vrot.slane %v2037_v32, %v6228_v38  ;;  %vm470_vm11 = vcmp.ge.f32.partialorder %v438_v33, 0.0  ;;  %v506_v31 = vmul.f32 %v6202_v21, %v438_v33  ;;  %v439_v5 = vadd.f32 %v6200_v20, %v403_v40  ;;  %2978 = vrot.lane.b32.xlu0 %v6705_v25, %s6086_s26 }
  0xb2   : > { %v9394_v26 = vrot.slane %v6774_v2, 1  ;;  %v537_v55 = vsel %vm469_vm10, %v437_v62, %v505_v49  ;;  %v440_v7 = vadd.f32 %v6200_v20, %v404_v52  ;;  %v369_v42 = vmul.f32 %v5793_v24, %v6193_v14  ;;  %2980 = vrot.lane.b32.xlu1 %v6708_v9, %s6086_s26 }
  0xb3   : > { %2645 = vst.msk [vmem:[#allocation2 + $0x44] sm:$0xf] %vm9411_vm0, %v2044_v36  ;;  %v538_v56 = vsel %vm470_vm11, %v438_v33, %v506_v31  ;;  %v573_v48 = vadd.f32 %v6204_v22, %v537_v55  ;;  %vm471_vm12 = vcmp.ge.f32.partialorder %v439_v5, 0.0  ;;  %v507_v44 = vmul.f32 %v6202_v21, %v439_v5 }
  0xb4   : > { %v6857_v32 = vor.u32 %v3439_v4, %v3438_v6  ;;  %v574_v25 = vadd.f32 %v6204_v22, %v538_v56  ;;  %vm472_vm14 = vcmp.ge.f32.partialorder %v440_v7, 0.0  ;;  %v508_v62 = vmul.f32 %v6202_v21, %v440_v7 }
  0xb5   : > { %v6864_v40 = vsel %vm9404_vm8, %v6766_v58, %v6826_v27  ;;  %v607_v9 = vmul.f32 %v6209_v29, %v573_v48  ;;  %v539_v33 = vsel %vm471_vm12, %v439_v5, %v507_v44  ;;  %v370_v52 = vmul.f32 %v5794_v61, %v6193_v14  ;;  %3246 = vrot.lane.b32.xlu0 %v6725_v41, %s6087_s27 }
  0xb6   : > { %v608_v6 = vmul.f32 %v6209_v29, %v574_v25  ;;  %v540_v4 = vsel %vm472_vm14, %v440_v7, %v508_v62  ;;  %v575_v49 = vadd.f32 %v6204_v22, %v539_v33  ;;  %v405_v24 = vadd.f32 %v6198_v19, %v369_v42  ;;  %3242 = vrot.lane.b32.xlu1 %v6752_v11, %s6087_s27 }
  0xb7   : > { %vm641_vm15 = vcmp.gt.f32.partialorder %v607_v9, %v6225_v37  ;;  %vm709_vm1 = vcmp.gt.f32.partialorder %v607_v9, %v6240_v46  ;;  %vm777_vm3 = vcmp.gt.f32.partialorder %v607_v9, %v6262_v63  ;;  %v576_v58 = vadd.f32 %v6204_v22, %v540_v4 }
  0xb8   : > { %vm642_vm6 = vcmp.gt.f32.partialorder %v608_v6, %v6225_v37  ;;  %v675_v41 = vsel %vm641_vm15, %v6237_v45, 0.0  ;;  %vm710_vm7 = vcmp.gt.f32.partialorder %v608_v6, %v6240_v46  ;;  %vm778_vm10 = vcmp.gt.f32.partialorder %v608_v6, %v6262_v63 }
  0xb9   : > { %v676_v61 = vsel %vm642_vm6, %v6237_v45, 0.0  ;;  %v743_v11 = vsel %vm709_vm1, %v6251_v53, %v675_v41  ;;  %v609_v36 = vmul.f32 %v6209_v29, %v575_v49  ;;  %v610_v31 = vmul.f32 %v6209_v29, %v576_v58  ;;  %3508 = vrot.lane.b32.xlu0 %v6731_v47, %s6088_s28 }
  0xba   : > { %v6889_v5 = vld [vmem:[#allocation2 + $0x40] sm:$0xff]   ;;  %v6895_v55 = vsel %vm9410_vm5, %v6797_v18, %v9394_v26  ;;  %v744_v7 = vsel %vm710_vm7, %v6251_v53, %v676_v61  ;;  %v811_v42 = vsel %vm777_vm3, %v6265_v0, %v743_v11  ;;  %v406_v56 = vadd.f32 %v6198_v19, %v370_v52  ;;  %3244 = vrot.lane.b32.xlu1 %v6739_v23, %s6087_s27  ;;  %v6909_v18 = vld [vmem:[%s6191_s14 + $0x6c] sm:$0xff]  }
  0xbb   : > { %v3441_v47 = vsel %vm9406_vm9, %v6758_v35, %v6857_v32  ;;  %v812_v48 = vsel %vm778_vm10, %v6265_v0, %v744_v7  ;;  %vm643_vm11 = vcmp.gt.f32.partialorder %v609_v36, %v6225_v37  ;;  %vm644_vm12 = vcmp.gt.f32.partialorder %v610_v31, %v6225_v37 }
  0xbc   : > { %v6912_v44 = vshll.u32 %v6889_v5, 16  ;;  %v6915_v25 = vshrl.u32 %v6889_v5, 16  ;;  %v845_v23 = vmul.f32 %v6275_v13, %v811_v42  ;;  %v441_v62 = vadd.f32 %v6200_v20, %v405_v24 }
  0xbd   : > { %v9391_v35 = vrot.slane %v6889_v5, 2  ;;  %v9392_v9 = vrot.slane %v6889_v5, 3  ;;  %v9393_v33 = vrot.slane %v6889_v5, 1  ;;  %v846_v52 = vmul.f32 %v6275_v13, %v812_v48  ;;  %3510 = vrot.lane.b32.xlu0 %v6755_v34, %s6088_s28 }
  0xbe   : > { %v677_v6 = vsel %vm643_vm11, %v6237_v45, 0.0  ;;  %v678_v4 = vsel %vm644_vm12, %v6237_v45, 0.0  ;;  %v442_v49 = vadd.f32 %v6200_v20, %v406_v56  ;;  %3512 = vrot.lane.b32.xlu1 %v6790_v28, %s6088_s28  ;;  %v3442_v24 = vrot.slane %v6915_v25, 2 }
  0xbf   : > { %v3443_v41 = vrot.slane %v6912_v44, 3  ;;  %v3180_v61 = vrot.slane %v6915_v25, 1  ;;  %v3181_v11 = vrot.slane %v6912_v44, 2  ;;  %v871_v34 = vpack.c.bf16 %v846_v52, %v845_v23 }
  0xc0   : > { %v5601_v7 = vpack.c.bf16 %v846_v52, %v846_v52  ;;  %vm711_vm14 = vcmp.gt.f32.partialorder %v609_v36, %v6240_v46  ;;  %vm473_vm15 = vcmp.ge.f32.partialorder %v441_v62, 0.0  ;;  %v6941_v42 = vsel %vm3283_vm4, %v3293_v3, %v9391_v35 }
  0xc1   : > { %v9424_v28 = vrot.slane %v6764_v16, 3  ;;  %v9425_v48 = vrot.slane %v6764_v16, 1  ;;  %vm712_vm1 = vcmp.gt.f32.partialorder %v610_v31, %v6240_v46  ;;  %2982 = vrot.lane.b32.xlu0 %v6744_v50, %s6086_s26  ;;  %v1226_v3 = vrot.slane %v871_v34, %v6214_v30 }
  0xc2   : > { %v1233_v52 = vrot.slane %v5601_v7, %v6214_v30  ;;  %v745_v35 = vsel %vm711_vm14, %v6251_v53, %v677_v6  ;;  %3248 = vrot.lane.b32.xlu1 %v6795_v8, %s6087_s27  ;;  %v6966_v16 = vor.u32 %v3443_v41, %v3442_v24  ;;  %vm779_vm3 = vcmp.gt.f32.partialorder %v609_v36, %v6262_v63 }
  0xc3   : > { %v6948_v56 = vsel %vm9407_vm13, %v9424_v28, %v9392_v9  ;;  %v6955_v23 = vsel %vm9405_vm2, %v9425_v48, %v9393_v33  ;;  %v746_v28 = vsel %vm712_vm1, %v6251_v53, %v678_v4  ;;  %v6968_v48 = vor.u32 %v3181_v11, %v3180_v61 }
  0xc4   : > { %vm780_vm6 = vcmp.gt.f32.partialorder %v610_v31, %v6262_v63  ;;  %v1234_v50 = vcombine.high %v1226_v3, %v1226_v3  ;;  %v1235_v9 = vcombine.high %v1233_v52, %v1233_v52  ;;  %v1242_v34 = vrot.slane %v1226_v3, %v6214_v30 }
  0xc5   : > { %v1249_v7 = vrot.slane %v1233_v52, %v6214_v30  ;;  %v813_v6 = vsel %vm779_vm3, %v6265_v0, %v745_v35  ;;  %v814_v4 = vsel %vm780_vm6, %v6265_v0, %v746_v28  ;;  %vm474_vm7 = vcmp.ge.f32.partialorder %v442_v49, 0.0  ;;  %2984 = vrot.lane.b32.xlu0 %v6761_v59, %s6086_s26 }
  0xc6   : > { %v509_v8 = vmul.f32 %v6202_v21, %v441_v62  ;;  %v1256_v36 = vrot.slane %v1234_v50, %v6214_v30  ;;  %v1263_v31 = vrot.slane %v1235_v9, %v6214_v30  ;;  %v1264_v24 = vcombine.high %v1242_v34, %v1242_v34  ;;  %3514 = vrot.lane.b32.xlu1 %v3441_v47, %s6088_s28 }
  0xc7   : > { %v1265_v41 = vcombine.high %v1249_v7, %v1249_v7  ;;  %v847_v61 = vmul.f32 %v6275_v13, %v813_v6  ;;  %v848_v35 = vmul.f32 %v6275_v13, %v814_v4  ;;  %v510_v11 = vmul.f32 %v6202_v21, %v442_v49 }
  0xc8   : > { %v541_v3 = vsel %vm473_vm15, %v441_v62, %v509_v8  ;;  %v1266_v52 = vcombine.high %v1256_v36, %v1256_v36  ;;  %v1267_v28 = vcombine.high %v1263_v31, %v1263_v31  ;;  %v2045_v33 = vcombine.low %v1242_v34, %v1264_v24 }
  0xc9   : > { %v2069_v59 = vcombine.low %v1249_v7, %v1265_v41  ;;  %v872_v26 = vpack.c.bf16 %v848_v35, %v847_v61  ;;  %v5602_v50 = vpack.c.bf16 %v848_v35, %v848_v35  ;;  %v542_v9 = vsel %vm474_vm7, %v442_v49, %v510_v11  ;;  %3250 = vrot.lane.b32.xlu0 %v6864_v40, %s6087_s27 }
  0xca   : > { %v577_v58 = vadd.f32 %v6204_v22, %v541_v3  ;;  %v2046_v47 = vcombine.low %v1256_v36, %v1266_v52  ;;  %v2053_v6 = vrot.slane %v2045_v33, %v6228_v38  ;;  %v2070_v4 = vcombine.low %v1263_v31, %v1267_v28  ;;  %3593 = vrot.lane.b32.xlu1 %v6833_v60, %s6085_s25 }
  0xcb   : > { %v2077_v1 = vrot.slane %v2069_v59, %v6228_v38  ;;  %v1275_v62 = vrot.slane %v872_v26, %v6214_v30  ;;  %v1282_v34 = vrot.slane %v5602_v50, %v6214_v30  ;;  %v578_v49 = vadd.f32 %v6204_v22, %v542_v9 }
  0xcc   : > { %v611_v7 = vmul.f32 %v6209_v29, %v577_v58  ;;  %v3445_v40 = vsel %vm9406_vm9, %v6857_v32, %v6966_v16  ;;  %v2060_v33 = vrot.slane %v2046_v47, %v6228_v38  ;;  %v2084_v8 = vrot.slane %v2070_v4, %v6228_v38 }
  0xcd   : > { %v336_v36 = vunpack.c.h.bf16 %v6909_v18  ;;  %v1283_v31 = vcombine.high %v1275_v62, %v1275_v62  ;;  %v1284_v60 = vcombine.high %v1282_v34, %v1282_v34  ;;  %v1291_v26 = vrot.slane %v1275_v62, %v6214_v30  ;;  %3329 = vrot.lane.b32.xlu0 %v6815_v10, %s6083_s23 }
  0xce   : > { %v1298_v24 = vrot.slane %v1282_v34, %v6214_v30  ;;  %v2061_v58 = vcombine.low %v2053_v6, %v2060_v33  ;;  %v2085_v41 = vcombine.low %v2077_v1, %v2084_v8  ;;  %v612_v61 = vmul.f32 %v6209_v29, %v578_v49  ;;  %3516 = vrot.lane.b32.xlu1 %v3445_v40, %s6088_s28 }
  0xcf   : > { %vm645_vm10 = vcmp.gt.f32.partialorder %v611_v7, %v6225_v37  ;;  %v1305_v32 = vrot.slane %v1283_v31, %v6214_v30  ;;  %v7013_v35 = vrot.slane %v1284_v60, %v6214_v30  ;;  %v1313_v11 = vcombine.high %v1291_v26, %v1291_v26 }
  0xd0   : > { %v1314_v3 = vcombine.high %v1298_v24, %v1298_v24  ;;  %v2068_v52 = vrot.slane %v2061_v58, %v6228_v38  ;;  %v2092_v28 = vrot.slane %v2085_v41, %v6228_v38  ;;  %vm646_vm11 = vcmp.gt.f32.partialorder %v612_v61, %v6225_v37 }
  0xd1   : > { %v679_v1 = vsel %vm645_vm10, %v6237_v45, 0.0  ;;  %v1315_v10 = vcombine.high %v1305_v32, %v1305_v32  ;;  %v2093_v59 = vcombine.low %v6278_v15, %v1305_v32  ;;  %v2094_v50 = vcombine.low %v1291_v26, %v1313_v11  ;;  %3384 = vrot.lane.b32.xlu0 %v6941_v42, %s6084_s24 }
  0xd2   : > { %v2118_v9 = vcombine.low %v1298_v24, %v1314_v3  ;;  %2646 = vst.msk [vmem:[#allocation2 + $0x48] sm:$0xf] %vm9411_vm0, %v2068_v52  ;;  %2647 = vst.msk [vmem:[#allocation2 + $0x4c] sm:$0xf] %vm9411_vm0, %v2092_v28  ;;  %v680_v47 = vsel %vm646_vm11, %v6237_v45, 0.0  ;;  %vm713_vm12 = vcmp.gt.f32.partialorder %v611_v7, %v6240_v46  ;;  %vm714_vm14 = vcmp.gt.f32.partialorder %v612_v61, %v6240_v46 }
  0xd3   : > { %vm781_vm15 = vcmp.gt.f32.partialorder %v611_v7, %v6262_v63  ;;  %3595 = vrot.lane.b32.xlu1 %v6948_v56, %s6085_s25  ;;  %v2101_v6 = vrot.slane %v2093_v59, %v6228_v38  ;;  %v2108_v4 = vrot.slane %v2094_v50, %v6228_v38  ;;  %v2117_v62 = vcombine.low %v1315_v10, %v7013_v35  ;;  %v7072_v10 = vld [vmem:[%s6191_s14 + $0x78] sm:$0xff]  }
  0xd4   : > { %v2132_v34 = vrot.slane %v2118_v9, %v6228_v38  ;;  %v747_v49 = vsel %vm713_vm12, %v6251_v53, %v679_v1  ;;  %v748_v40 = vsel %vm714_vm14, %v6251_v53, %v680_v47  ;;  %vm782_vm1 = vcmp.gt.f32.partialorder %v612_v61, %v6262_v63 }
  0xd5   : > { %v9426_v33 = vunpack.c.l.bf16 %v6909_v18  ;;  %v2109_v8 = vcombine.low %v2101_v6, %v2108_v4  ;;  %v2125_v56 = vrot.slane %v2117_v62, %v6228_v38  ;;  %v815_v31 = vsel %vm781_vm15, %v6265_v0, %v747_v49  ;;  %2986 = vrot.lane.b32.xlu0 %v6895_v55, %s6086_s26 }
  0xd6   : > { %v816_v60 = vsel %vm782_vm1, %v6265_v0, %v748_v40  ;;  %v9427_v26 = vrot.slane %v6774_v2, 1  ;;  %v2884_v58 = vrot.slane %v6912_v44, 1  ;;  %v849_v18 = vmul.f32 %v6275_v13, %v815_v31 }
  0xd7   : > { %v371_v7 = vmul.f32 %v6193_v14, %v9426_v33  ;;  %v850_v41 = vmul.f32 %v6275_v13, %v816_v60  ;;  %3120 = vrot.lane.b32.xlu1 %v6955_v23, %s6082_s20  ;;  %v2116_v61 = vrot.slane %v2109_v8, %v6228_v38  ;;  %v2133_v32 = vcombine.low %v2125_v56, %v2132_v34 }
  0xd8   : > { %v2880_v24 = vor.u32 %v6777_v43, %v9427_v26  ;;  %v372_v11 = vmul.f32 %v6193_v14, %v336_v36  ;;  %v3183_v2 = vsel %vm9404_vm8, %v6826_v27, %v6968_v48  ;;  %v7067_v36 = vor.u32 %v6915_v25, %v2884_v58 }
  0xd9   : > { %v873_v43 = vpack.c.bf16 %v850_v41, %v849_v18  ;;  %v5603_v55 = vpack.c.bf16 %v850_v41, %v850_v41  ;;  %v7058_v44 = vld [vmem:[#allocation2 + $0x48] sm:$0xff]   ;;  %v2140_v3 = vrot.slane %v2133_v32, %v6228_v38  ;;  %2648 = vst.msk [vmem:[#allocation2 + $0x50] sm:$0xf] %vm9411_vm0, %v2116_v61  ;;  %v407_v52 = vadd.f32 %v6198_v19, %v371_v7 }
  0xda   : > { %3065 = vrot.lane.b32.xlu0 %v6786_v57, %s6081_s19  ;;  %v2885_v28 = vsel %vm9410_vm5, %v2880_v24, %v2884_v58  ;;  %v7076_v59 = vshll.u32 %v7058_v44, 16  ;;  %v7079_v50 = vshrl.u32 %v7058_v44, 16  ;;  %v1316_v57 = vcombine.high %v7013_v35, %v7013_v35 }
  0xdb   : > { %v1324_v27 = vrot.slane %v873_v43, %v6214_v30  ;;  %v1331_v1 = vrot.slane %v5603_v55, %v6214_v30  ;;  %3252 = vrot.lane.b32.xlu1 %v3183_v2, %s6087_s27  ;;  %2649 = vst.msk [vmem:[#allocation2 + $0x54] sm:$0xf] %vm9411_vm0, %v2140_v3  ;;  %v408_v25 = vadd.f32 %v6198_v19, %v372_v11  ;;  %v3297_v9 = vrot.slane %v7058_v44, 2 }
  0xdc   : > { %v3033_v62 = vrot.slane %v7058_v44, 1  ;;  %v443_v34 = vadd.f32 %v6200_v20, %v407_v52  ;;  %v5797_v49 = vunpack.c.l.bf16 %v7072_v10  ;;  %v5798_v40 = vunpack.c.h.bf16 %v7072_v10 }
  0xdd   : > { %v1332_v47 = vcombine.high %v1324_v27, %v1324_v27  ;;  %v1333_v6 = vcombine.high %v1331_v1, %v1331_v1  ;;  %v1340_v4 = vrot.slane %v1324_v27, %v6214_v30  ;;  %v3184_v35 = vrot.slane %v7079_v50, 1 }
  0xde   : > { %2988 = vrot.lane.b32.xlu0 %v2885_v28, %s6086_s26  ;;  %v3446_v33 = vrot.slane %v7079_v50, 2  ;;  %v3447_v7 = vrot.slane %v7076_v59, 3  ;;  %v3561_v8 = vrot.slane %v7058_v44, 3  ;;  %v3185_v56 = vrot.slane %v7076_v59, 2 }
  0xdf   : > { %3331 = vrot.lane.b32.xlu1 %v6941_v42, %s6083_s23  ;;  %v7100_v31 = vrot.slane %v1331_v1, %v6214_v30  ;;  %v1354_v60 = vrot.slane %v1332_v47, %v6214_v30  ;;  %v7104_v26 = vrot.slane %v1333_v6, %v6214_v30  ;;  %v9428_v24 = vrot.slane %v6889_v5, 2 }
  0xe0   : > { %v3448_v18 = vor.u32 %v3447_v7, %v3446_v33  ;;  %v1362_v41 = vcombine.high %v1340_v4, %v1340_v4  ;;  %v444_v42 = vadd.f32 %v6200_v20, %v408_v25  ;;  %v2141_v32 = vcombine.low %v1316_v57, %v1340_v4 }
  0xe1   : > { %v7111_v58 = vsel %vm3283_vm4, %v9428_v24, %v3297_v9  ;;  %v1364_v61 = vcombine.high %v1354_v60, %v1354_v60  ;;  %v2142_v11 = vcombine.low %v6278_v15, %v1354_v60  ;;  %vm475_vm3 = vcmp.ge.f32.partialorder %v443_v34, 0.0 }
  0xe2   : > { %3067 = vrot.lane.b32.xlu0 %v6955_v23, %s6081_s19  ;;  %v9429_v2 = vrot.slane %v6889_v5, 1  ;;  %v9430_v55 = vrot.slane %v6889_v5, 3  ;;  %v7127_v52 = vld [vmem:[#allocation2 + $0x50] sm:$0xff]   ;;  %v2892_v28 = vrot.slane %v7076_v59, 1  ;;  %v2165_v27 = vcombine.low %v1362_v41, %v7100_v31 }
  0xe3   : > { %3386 = vrot.lane.b32.xlu1 %v7111_v58, %s6084_s24  ;;  %v7133_v23 = vor.u32 %v3185_v56, %v3184_v35  ;;  %v2149_v1 = vrot.slane %v2141_v32, %v6228_v38  ;;  %v2156_v57 = vrot.slane %v2142_v11, %v6228_v38  ;;  %v2166_v25 = vcombine.low %v1364_v61, %v7104_v26 }
  0xe4   : > { %v7122_v43 = vsel %vm9405_vm2, %v9429_v2, %v3033_v62  ;;  %v3562_v3 = vsel %vm9407_vm13, %v9430_v55, %v3561_v8  ;;  %v3449_v5 = vsel %vm9406_vm9, %v6966_v16, %v3448_v18  ;;  %v7141_v47 = vshll.u32 %v7127_v52, 16 }
  0xe5   : > { %v7144_v59 = vshrl.u32 %v7127_v52, 16  ;;  %v511_v6 = vmul.f32 %v6202_v21, %v443_v34  ;;  %v2157_v4 = vcombine.low %v2149_v1, %v2156_v57  ;;  %v2173_v35 = vrot.slane %v2165_v27, %v6228_v38 }
  0xe6   : > { %v2180_v33 = vrot.slane %v2166_v25, %v6228_v38  ;;  %v512_v7 = vmul.f32 %v6202_v21, %v444_v42  ;;  %3122 = vrot.lane.b32.xlu0 %v7122_v43, %s6082_s20  ;;  %v3299_v16 = vrot.slane %v7127_v52, 2  ;;  %v3451_v60 = vrot.slane %v7141_v47, 3 }
  0xe7   : > { %v3450_v56 = vrot.slane %v7144_v59, 2  ;;  %vm476_vm6 = vcmp.ge.f32.partialorder %v444_v42, 0.0  ;;  %v3187_v24 = vsel %vm9404_vm8, %v6968_v48, %v7133_v23  ;;  %3518 = vrot.lane.b32.xlu1 %v3449_v5, %s6088_s28  ;;  %v7161_v41 = vsel %vm9410_vm5, %v7067_v36, %v2892_v28 }
  0xe8   : > { %v3563_v61 = vrot.slane %v7127_v52, 3  ;;  %v3035_v32 = vrot.slane %v7127_v52, 1  ;;  %v2164_v2 = vrot.slane %v2157_v4, %v6228_v38  ;;  %v2181_v55 = vcombine.low %v2173_v35, %v2180_v33  ;;  %v7199_v35 = vpop.permute.xlu0 %3110 }
  0xe9   : > { %v7165_v11 = vor.u32 %v3451_v60, %v3450_v56  ;;  %v543_v27 = vsel %vm475_vm3, %v443_v34, %v511_v6  ;;  %v3188_v1 = vrot.slane %v7144_v59, 1  ;;  %v3189_v48 = vrot.slane %v7141_v47, 2 }
  0xea   : > { %v544_v57 = vsel %vm476_vm6, %v444_v42, %v512_v7  ;;  %v579_v25 = vadd.f32 %v6204_v22, %v543_v27  ;;  %3254 = vrot.lane.b32.xlu0 %v3187_v24, %s6087_s27  ;;  %v7178_v36 = vsel %vm3283_vm4, %v3297_v9, %v3299_v16  ;;  %v2896_v5 = vor.u32 %v7079_v50, %v2892_v28  ;;  %v7235_v24 = vpop.permute.xlu1 %3055 }
  0xeb   : > { %v2188_v34 = vrot.slane %v2181_v55, %v6228_v38  ;;  %2650 = vst.msk [vmem:[#allocation2 + $0x58] sm:$0xf] %vm9411_vm0, %v2164_v2  ;;  %v580_v6 = vadd.f32 %v6204_v22, %v544_v57  ;;  %3597 = vrot.lane.b32.xlu1 %v3562_v3, %s6085_s25  ;;  %v3564_v42 = vsel %vm9407_vm13, %v3561_v8, %v3563_v61  ;;  %v2900_v50 = vrot.slane %v7141_v47, 1 }
  0xec   : > { %v7193_v9 = vsel %vm9405_vm2, %v3033_v62, %v3035_v32  ;;  %v613_v28 = vmul.f32 %v6209_v29, %v579_v25  ;;  %v3453_v4 = vsel %vm9406_vm9, %v3448_v18, %v7165_v11  ;;  %v373_v44 = vmul.f32 %v5797_v49, %v6193_v14  ;;  %v6015_v18 = vld [vmem:[%s9384_s3 + $0x20] ss:$0 sps:$4 sm:$0xff]  }
  0xed   : > { %2651 = vst.msk [vmem:[#allocation2 + $0x5c] sm:$0xf] %vm9411_vm0, %v2188_v34  ;;  %v614_v8 = vmul.f32 %v6209_v29, %v580_v6  ;;  %v374_v62 = vmul.f32 %v5798_v40, %v6193_v14  ;;  %v7209_v3 = vor.u32 %v3189_v48, %v3188_v1  ;;  %v1363_v47 = vcombine.high %v7100_v31, %v7100_v31  ;;  %v7245_v48 = vpop.permute.xlu0 %3112 }
  0xee   : > { %vm647_vm7 = vcmp.gt.f32.partialorder %v613_v28, %v6225_v37  ;;  %vm715_vm10 = vcmp.gt.f32.partialorder %v613_v28, %v6240_v46  ;;  %vm783_vm11 = vcmp.gt.f32.partialorder %v613_v28, %v6262_v63  ;;  %3333 = vrot.lane.b32.xlu0 %v7111_v58, %s6083_s23  ;;  %v409_v33 = vadd.f32 %v6198_v19, %v373_v44  ;;  %v6016_v58 = vld [vmem:[%s9384_s3 + $0x18] sm:$0xff]  }
  0xef   : > { %vm648_vm12 = vcmp.gt.f32.partialorder %v614_v8, %v6225_v37  ;;  %v681_v10 = vsel %vm647_vm7, %v6237_v45, 0.0  ;;  %vm716_vm14 = vcmp.gt.f32.partialorder %v614_v8, %v6240_v46  ;;  %vm784_vm15 = vcmp.gt.f32.partialorder %v614_v8, %v6262_v63  ;;  %3520 = vrot.lane.b32.xlu1 %v3453_v4, %s6088_s28  ;;  %v7261_v4 = vld [vmem:[%s9384_s3 + $0x10] sm:$0xff]  }
  0xf0   : > { %v682_v49 = vsel %vm648_vm12, %v6237_v45, 0.0  ;;  %v749_v40 = vsel %vm715_vm10, %v6251_v53, %v681_v10  ;;  %v410_v60 = vadd.f32 %v6198_v19, %v374_v62  ;;  %vm4149_vm1 = vcmask 1043456  }
  0xf1   : > { %v750_v7 = vsel %vm716_vm14, %v6251_v53, %v682_v49  ;;  %v817_v56 = vsel %vm783_vm11, %v6265_v0, %v749_v40  ;;  %v445_v31 = vadd.f32 %v6200_v20, %v409_v33  ;;  %5893 = vmatprep.subr.msk.bf16.mxu0 %vm4149_vm1, %v6015_v18  ;;  %v4151_v27 = vsel %vm4149_vm1, %v6015_v18, 0  ;;  %5894 = vmatprep.subr.msk.bf16.mxu1 %vm4149_vm1, %v6015_v18 }
  0xf2   : > { %v818_v2 = vsel %vm784_vm15, %v6265_v0, %v750_v7  ;;  %v851_v55 = vmul.f32 %v6275_v13, %v817_v56  ;;  %3388 = vrot.lane.b32.xlu0 %v7178_v36, %s6084_s24  ;;  %v7243_v1 = vsel %vm9410_vm5, %v2896_v5, %v2900_v50  ;;  %v446_v25 = vadd.f32 %v6200_v20, %v410_v60  ;;  %v7292_v7 = vpop.permute.xlu0 %3059 }
  0xf3   : > { %v852_v57 = vmul.f32 %v6275_v13, %v818_v2  ;;  %5838 = vmatpush3.bf16.msra.mxu0 %v4151_v27  ;;  %3599 = vrot.lane.b32.xlu1 %v3564_v42, %s6085_s25  ;;  %v3191_v34 = vsel %vm9404_vm8, %v7133_v23, %v7209_v3  ;;  %v1365_v28 = vcombine.high %v7104_v26, %v7104_v26  ;;  %vm477_vm3 = vcmp.ge.f32.partialorder %v445_v31, 0.0 }
  0xf4   : > { %v7253_v6 = vld [vmem:[#allocation2 + $0x58] sm:$0xff]   ;;  %v513_v5 = vmul.f32 %v6202_v21, %v445_v31  ;;  %5839 = vmatprep.subr.bf16.mxu0 %v6016_v58  ;;  %v7264_v42 = vcombine.low %v1363_v47, %v6278_v15  ;;  %5888 = vmatpush3.bf16.msra.mxu1 %v4151_v27  ;;  %v7274_v18 = vor.u32 %v7144_v59, %v2900_v50  ;;  %vm478_vm6 = vcmp.ge.f32.partialorder %v446_v25, 0.0  ;;  %v7285_v47 = vpop.permute.xlu1 %3057 }
  0xf5   : > { %v874_v8 = vpack.c.bf16 %v852_v57, %v851_v55  ;;  %v5604_v44 = vpack.c.bf16 %v852_v57, %v852_v57  ;;  %v9397_v23 = vrot.slane %v7253_v6, 1  ;;  %v7268_v62 = vshll.u32 %v7253_v6, 16  ;;  %5884 = vmatprep.subr.bf16.mxu1 %v6016_v58 }
  0xf6   : > { %v7271_v26 = vshrl.u32 %v7253_v6, 16  ;;  %2990 = vrot.lane.b32.xlu0 %v7161_v41, %s6086_s26  ;;  %v514_v40 = vmul.f32 %v6202_v21, %v446_v25  ;;  %v9398_v59 = vrot.slane %v7253_v6, 2  ;;  %v545_v33 = vsel %vm477_vm3, %v445_v31, %v513_v5 }
  0xf7   : > { %v1373_v10 = vrot.slane %v874_v8, %v6214_v30  ;;  %v7280_v49 = vrot.slane %v5604_v44, %v6214_v30  ;;  %5840 = vmatpush3.bf16.msra.mxu0 %v6016_v58  ;;  %3124 = vrot.lane.b32.xlu1 %v7193_v9, %s6082_s20  ;;  %v3193_v41 = vrot.slane %v7268_v62, 2  ;;  %v3455_v60 = vrot.slane %v7268_v62, 3  ;;  %v7312_v8 = vld [vmem:[%s9384_s3 + $0x8] sm:$0xff]  }
  0xf8   : > { %v3192_v50 = vrot.slane %v7271_v26, 1  ;;  %5841 = vmatprep.subr.bf16.mxu0 %v7261_v4  ;;  %v3454_v56 = vrot.slane %v7271_v26, 2  ;;  %v2197_v55 = vrot.slane %v7264_v42, %v6228_v38  ;;  %5889 = vmatpush3.bf16.msra.mxu1 %v6016_v58  ;;  %v7303_v27 = vsel %vm9405_vm2, %v3035_v32, %v9397_v23 }
  0xf9   : > { %v1381_v2 = vcombine.high %v1373_v10, %v1373_v10  ;;  %v9399_v31 = vrot.slane %v7253_v6, 3  ;;  %v1389_v57 = vrot.slane %v1373_v10, %v6214_v30  ;;  %v1396_v5 = vrot.slane %v7280_v49, %v6214_v30  ;;  %5885 = vmatprep.subr.bf16.mxu1 %v7261_v4 }
  0xfa   : > { %3069 = vrot.lane.b32.xlu0 %v7122_v43, %s6081_s19  ;;  %v7317_v32 = vor.u32 %v3455_v60, %v3454_v56  ;;  %v546_v44 = vsel %vm478_vm6, %v446_v25, %v514_v40  ;;  %v581_v42 = vadd.f32 %v6204_v22, %v545_v33  ;;  %v7328_v10 = vsel %vm3283_vm4, %v3299_v16, %v9398_v59  ;;  %v7333_v60 = vld [vmem:[%s6191_s14 + $0x84] sm:$0xff]  }
  0xfb   : > { %v1403_v58 = vrot.slane %v1381_v2, %v6214_v30  ;;  %3256 = vrot.lane.b32.xlu1 %v3191_v34, %s6087_s27  ;;  %v7330_v23 = vor.u32 %v3193_v41, %v3192_v50  ;;  %v1411_v43 = vcombine.high %v1389_v57, %v1389_v57  ;;  %v2190_v56 = vcombine.low %v1365_v28, %v1389_v57  ;;  %v7357_v57 = vpop.permute.xlu0 %3321 }
  0xfc   : > { %v7338_v25 = vsel %vm9406_vm9, %v7165_v11, %v7317_v32  ;;  %v2908_v34 = vrot.slane %v7268_v62, 1  ;;  %v582_v33 = vadd.f32 %v6204_v22, %v546_v44  ;;  %5842 = vmatpush3.bf16.msra.mxu0 %v7261_v4  ;;  %v7343_v16 = vpop.permute.xlu1 %3114  ;;  %v615_v28 = vmul.f32 %v6209_v29, %v581_v42  ;;  %v7353_v11 = vld [vmem:[%s9384_s3] sm:$0xff]   ;;  %5890 = vmatpush3.bf16.msra.mxu1 %v7261_v4 }
  0xfd   : > { %v1413_v40 = vcombine.high %v1403_v58, %v1403_v58  ;;  %v2204_v50 = vrot.slane %v2190_v56, %v6228_v38  ;;  %v2214_v41 = vcombine.low %v1411_v43, %v1396_v5  ;;  %v1382_v2 = vcombine.high %v7280_v49, %v7280_v49  ;;  %5843 = vmatprep.subr.bf16.mxu0 %v7312_v8 }
  0xfe   : > { %2992 = vrot.lane.b32.xlu0 %v7243_v1, %s6086_s26  ;;  %v616_v43 = vmul.f32 %v6209_v29, %v582_v33  ;;  %v1412_v56 = vcombine.high %v1396_v5, %v1396_v5  ;;  %v339_v42 = vunpack.c.l.bf16 %v7333_v60  ;;  %vm649_vm7 = vcmp.gt.f32.partialorder %v615_v28, %v6225_v37  ;;  %5886 = vmatprep.subr.bf16.mxu1 %v7312_v8  ;;  %v7382_v33 = vld [vmem:[#allocation2 + $0x8] sm:$0xf] }
  0xff   : > { %v2213_v44 = vcombine.low %v1403_v58, %v1413_v40  ;;  %3335 = vrot.lane.b32.xlu1 %v7178_v36, %s6083_s23  ;;  %v2205_v49 = vcombine.low %v2197_v55, %v2204_v50  ;;  %v2228_v59 = vrot.slane %v2214_v41, %v6228_v38  ;;  %vm717_vm10 = vcmp.gt.f32.partialorder %v615_v28, %v6240_v46 }
 0x100   : > { %vm650_vm11 = vcmp.gt.f32.partialorder %v616_v43, %v6225_v37  ;;  %v683_v5 = vsel %vm649_vm7, %v6237_v45, 0.0  ;;  %vm718_vm12 = vcmp.gt.f32.partialorder %v616_v43, %v6240_v46  ;;  %5844 = vmatpush3.bf16.msra.mxu0 %v7312_v8  ;;  %v7373_v36 = vpop.permute.xlu1 %3376  ;;  %vm785_vm14 = vcmp.gt.f32.partialorder %v615_v28, %v6262_v63  ;;  %5891 = vmatpush3.bf16.msra.mxu1 %v7312_v8 }
 0x101   : > { %v2221_v1 = vrot.slane %v2213_v44, %v6228_v38  ;;  %v2212_v4 = vrot.slane %v2205_v49, %v6228_v38  ;;  %v684_v55 = vsel %vm650_vm11, %v6237_v45, 0.0  ;;  %v751_v58 = vsel %vm717_vm10, %v6251_v53, %v683_v5  ;;  %5845 = vmatprep.subr.bf16.mxu0 %v7353_v11  ;;  %v7394_v49 = vpop.permute.xlu0 %3323  ;;  %5887 = vmatprep.subr.bf16.mxu1 %v7353_v11 }
 0x102   : > { %3071 = vrot.lane.b32.xlu0 %v7193_v9, %s6081_s19  ;;  %v752_v50 = vsel %vm718_vm12, %v6251_v53, %v684_v55  ;;  %vm786_vm15 = vcmp.gt.f32.partialorder %v616_v43, %v6262_v63  ;;  %v819_v41 = vsel %vm785_vm14, %v6265_v0, %v751_v58  ;;  %v1410_v9 = vrot.slane %v1382_v2, %v6214_v30 }
 0x103   : > { %v2229_v40 = vcombine.low %v2221_v1, %v2228_v59  ;;  %3390 = vrot.lane.b32.xlu1 %v7328_v10, %s6084_s24  ;;  %2652 = vst.msk [vmem:[#allocation2 + $0x60] sm:$0xf] %vm9411_vm0, %v2212_v4  ;;  %v820_v28 = vsel %vm786_vm15, %v6265_v0, %v752_v50  ;;  %v853_v44 = vmul.f32 %v6275_v13, %v819_v41  ;;  %9431 = vst [vmem:[#allocation10_spill] sm:$0xff] %v7394_v49  ;;  %v7412_v4 = vld [vmem:[#allocation2 + $0xc] sm:$0xf]  ;;  %v7424_v50 = vld [vmem:[%s6191_s14 + $0x9c] sm:$0xff]  }
 0x104   : > { %v2238_v59 = vcombine.low %v1412_v56, %v6278_v15  ;;  %v854_v43 = vmul.f32 %v6275_v13, %v820_v28  ;;  %v340_v5 = vunpack.c.h.bf16 %v7333_v60  ;;  %v375_v55 = vmul.f32 %v6193_v14, %v339_v42  ;;  %5846 = vmatpush3.bf16.msra.mxu0 %v7353_v11  ;;  %v7405_v56 = vpop.permute.xlu1 %3378  ;;  %5892 = vmatpush3.bf16.msra.mxu1 %v7353_v11 }
 0x105   : > { %v2236_v1 = vrot.slane %v2229_v40, %v6228_v38  ;;  %v3195_v2 = vsel %vm9404_vm8, %v7209_v3, %v7330_v23  ;;  %9432 = vst [vmem:[#allocation11_spill] sm:$0xff] %v7405_v56  ;;  %v3566_v60 = vsel %vm9407_vm13, %v3563_v61, %v9399_v31  ;;  %v1414_v58 = vcombine.high %v1410_v9, %v1410_v9  ;;  %v5812_v61 = vld [vmem:[%s6191_s14 + $0x90] sm:$0xff]  }
 0x106   : > { %3126 = vrot.lane.b32.xlu0 %v7303_v27, %s6082_s20  ;;  %v875_v3 = vpack.c.bf16 %v854_v43, %v853_v44  ;;  %v376_v8 = vmul.f32 %v6193_v14, %v340_v5  ;;  %v411_v52 = vadd.f32 %v6198_v19, %v375_v55  ;;  %v5605_v40 = vpack.c.bf16 %v854_v43, %v854_v43 }
 0x107   : > { %2653 = vst.msk [vmem:[#allocation2 + $0x64] sm:$0xf] %vm9411_vm0, %v2236_v1  ;;  %3522 = vrot.lane.b32.xlu1 %v7338_v25, %s6088_s28  ;;  %v7432_v41 = vsel %vm9410_vm5, %v7274_v18, %v2908_v34  ;;  %v7437_v28 = vor.u32 %v7271_v26, %v2908_v34  ;;  %v2237_v44 = vcombine.low %v1410_v9, %v1414_v58  ;;  %v5801_v42 = vunpack.c.l.bf16 %v5812_v61 }
 0x108   : > { %v2252_v1 = vrot.slane %v2238_v59, %v6228_v38  ;;  %v1422_v43 = vrot.slane %v875_v3, %v6214_v30  ;;  %v412_v5 = vadd.f32 %v6198_v19, %v376_v8  ;;  %v447_v25 = vadd.f32 %v6200_v20, %v411_v52  ;;  %v7445_v18 = vpop.permute.xlu1 %3325 }
 0x109   : > { %v1429_v55 = vrot.slane %v5605_v40, %v6214_v30  ;;  %v2245_v62 = vrot.slane %v2237_v44, %v6228_v38  ;;  %v5802_v26 = vunpack.c.h.bf16 %v5812_v61  ;;  %v7450_v9 = vpop.permute.xlu0 %3380  ;;  %vm3625_vm10 = vcmask 64512  }
 0x10a   : > { %3258 = vrot.lane.b32.xlu0 %v3195_v2, %s6087_s27  ;;  %9433 = vst [vmem:[#allocation12_spill] sm:$0xff] %v7450_v9  ;;  %v1430_v59 = vcombine.high %v1422_v43, %v1422_v43  ;;  %v1438_v58 = vrot.slane %v1422_v43, %v6214_v30  ;;  %v448_v3 = vadd.f32 %v6200_v20, %v412_v5  ;;  %vm479_vm1 = vcmp.ge.f32.partialorder %v447_v25, 0.0 }
 0x10b   : > { %3601 = vrot.lane.b32.xlu1 %v3566_v60, %s6085_s25  ;;  %v2253_v11 = vcombine.low %v2245_v62, %v2252_v1  ;;  %v515_v8 = vmul.f32 %v6202_v21, %v447_v25  ;;  %v1431_v52 = vcombine.high %v1429_v55, %v1429_v55  ;;  %v1445_v40 = vrot.slane %v1429_v55, %v6214_v30 }
 0x10c   : > { %v1452_v61 = vrot.slane %v1430_v59, %v6214_v30  ;;  %v1460_v44 = vcombine.high %v1438_v58, %v1438_v58  ;;  %vm480_vm3 = vcmp.ge.f32.partialorder %v448_v3, 0.0  ;;  %v516_v2 = vmul.f32 %v6202_v21, %v448_v3  ;;  %v7461_v43 = vpop.permute.xlu1 %3587 }
 0x10d   : > { %9434 = vst [vmem:[#allocation13_spill] sm:$0xff] %v7461_v43  ;;  %v2260_v5 = vrot.slane %v2253_v11, %v6228_v38  ;;  %v547_v31 = vsel %vm479_vm1, %v447_v25, %v515_v8  ;;  %v1459_v60 = vrot.slane %v1431_v52, %v6214_v30  ;;  %v7466_v1 = vmul.f32 %v5801_v42, %v6193_v14  ;;  %v7480_v42 = vpop.permute.xlu0 %3061 }
 0x10e   : > { %v7459_v34 = vld [vmem:[#allocation2 + $0x60] sm:$0xff]   ;;  %3337 = vrot.lane.b32.xlu0 %v7328_v10, %s6083_s23  ;;  %v1462_v55 = vcombine.high %v1452_v61, %v1452_v61  ;;  %v2261_v62 = vcombine.low %v1438_v58, %v1460_v44  ;;  %v548_v59 = vsel %vm480_vm3, %v448_v3, %v516_v2  ;;  %v583_v54 = vadd.f32 %v6204_v22, %v547_v31 }
 0x10f   : > { %v9402_v17 = vrot.slane %v7459_v34, 2  ;;  %v7473_v51 = vshll.u32 %v7459_v34, 16  ;;  %v7476_v25 = vshrl.u32 %v7459_v34, 16  ;;  %2654 = vst.msk [vmem:[#allocation2 + $0x68] sm:$0xf] %vm9411_vm0, %v2260_v5  ;;  %9435 = vst [vmem:[#allocation14_spill] sm:$0xff] %v7480_v42  ;;  %v584_v3 = vadd.f32 %v6204_v22, %v548_v59 }
 0x110   : > { %v3039_v10 = vrot.slane %v7459_v34, 1  ;;  %v2262_v58 = vcombine.low %v1452_v61, %v1462_v55  ;;  %v1461_v31 = vcombine.high %v1445_v40, %v1445_v40  ;;  %v9436_v8 = vrot.slane %v7253_v6, 2  ;;  %v7493_v5 = vpop.permute.xlu1 %3589 }
 0x111   : > { %v3458_v44 = vrot.slane %v7476_v25, 2  ;;  %v3459_v2 = vrot.slane %v7473_v51, 3  ;;  %9437 = vst [vmem:[#allocation15_spill] sm:$0xff] %v7493_v5  ;;  %v2269_v11 = vrot.slane %v2261_v62, %v6228_v38  ;;  %v9438_v61 = vrot.slane %v7459_v34, 3 }
 0x112   : > { %v7489_v52 = vsel %vm3283_vm4, %v9436_v8, %v9402_v17  ;;  %v9439_v55 = vrot.slane %v7253_v6, 3  ;;  %v9440_v8 = vrot.slane %v7253_v6, 1  ;;  %v378_v42 = vmul.f32 %v5802_v26, %v6193_v14 }
 0x113   : > { %3392 = vrot.lane.b32.xlu0 %v7489_v52, %s6084_s24  ;;  %v344_v62 = vunpack.c.h.bf16 %v7424_v50  ;;  %v7512_v5 = vor.u32 %v3459_v2, %v3458_v44  ;;  %v2276_v56 = vrot.slane %v2262_v58, %v6228_v38  ;;  %v617_v49 = vmul.f32 %v6209_v29, %v583_v54  ;;  %v7529_v54 = vpop.permute.xlu0 %3063 }
 0x114   : > { %v3568_v59 = vsel %vm9407_vm13, %v9439_v55, %v9438_v61  ;;  %v7508_v17 = vsel %vm9405_vm2, %v9440_v8, %v3039_v10  ;;  %v618_v43 = vmul.f32 %v6209_v29, %v584_v3  ;;  %v2916_v61 = vrot.slane %v7473_v51, 1  ;;  %v7522_v8 = vpop.permute.xlu1 %3591 }
 0x115   : > { %v3196_v55 = vrot.slane %v7476_v25, 1  ;;  %v1463_v6 = vcombine.high %v1459_v60, %v1459_v60  ;;  %v2285_v9 = vcombine.low %v1445_v40, %v1461_v31  ;;  %v3461_v26 = vsel %vm9406_vm9, %v7317_v32, %v7512_v5 }
 0x116   : > { %v2277_v44 = vcombine.low %v2269_v11, %v2276_v56  ;;  %vm651_vm6 = vcmp.gt.f32.partialorder %v617_v49, %v6225_v37  ;;  %vm652_vm7 = vcmp.gt.f32.partialorder %v618_v43, %v6225_v37  ;;  %3524 = vrot.lane.b32.xlu1 %v3461_v26, %s6088_s28  ;;  %v3197_v40 = vrot.slane %v7473_v51, 2 }
 0x117   : > { %2994 = vrot.lane.b32.xlu0 %v7432_v41, %s6086_s26  ;;  %v685_v58 = vsel %vm651_vm6, %v6237_v45, 0.0  ;;  %v686_v32 = vsel %vm652_vm7, %v6237_v45, 0.0  ;;  %vm719_vm11 = vcmp.gt.f32.partialorder %v617_v49, %v6240_v46  ;;  %vm720_vm12 = vcmp.gt.f32.partialorder %v618_v43, %v6240_v46 }
 0x118   : > { %v2284_v56 = vrot.slane %v2277_v44, %v6228_v38  ;;  %v753_v11 = vsel %vm719_vm11, %v6251_v53, %v685_v58  ;;  %vm787_vm14 = vcmp.gt.f32.partialorder %v617_v49, %v6262_v63  ;;  %v754_v41 = vsel %vm720_vm12, %v6251_v53, %v686_v32  ;;  %v7546_v26 = vpop.permute.xlu1 %3116 }
 0x119   : > { %vm788_vm15 = vcmp.gt.f32.partialorder %v618_v43, %v6262_v63  ;;  %v821_v3 = vsel %vm787_vm14, %v6265_v0, %v753_v11  ;;  %v2286_v31 = vcombine.low %v1459_v60, %v1463_v6  ;;  %v2917_v2 = vsel %vm9410_vm5, %v7437_v28, %v2916_v61 }
 0x11a   : > { %2655 = vst.msk [vmem:[#allocation2 + $0x6c] sm:$0xf] %vm9411_vm0, %v2284_v56  ;;  %v822_v44 = vsel %vm788_vm15, %v6265_v0, %v754_v41  ;;  %v855_v49 = vmul.f32 %v6275_v13, %v821_v3  ;;  %v2293_v58 = vrot.slane %v2285_v9, %v6228_v38  ;;  %3603 = vrot.lane.b32.xlu1 %v3568_v59, %s6085_s25  ;;  %vm3665_vm1 = vcmask 130048  }
 0x11b   : > { %3073 = vrot.lane.b32.xlu0 %v7303_v27, %s6081_s19  ;;  %v856_v43 = vmul.f32 %v6275_v13, %v822_v44  ;;  %v2300_v28 = vrot.slane %v2286_v31, %v6228_v38  ;;  %v413_v60 = vadd.f32 %v6198_v19, %v7466_v1  ;;  %v7559_v6 = vor.u32 %v3197_v40, %v3196_v55  ;;  %v7566_v11 = vpop.permute.xlu0 %3118 }
 0x11c   : > { %v414_v32 = vadd.f32 %v6198_v19, %v378_v42  ;;  %v9441_v56 = vunpack.c.l.bf16 %v7424_v50  ;;  %v380_v59 = vmul.f32 %v6193_v14, %v344_v62  ;;  %v7569_v44 = vpop.permute.xlu1 %3327  ;;  %vm9413_vm3 = vcmask 195584  }
 0x11d   : > { %v876_v27 = vpack.c.bf16 %v856_v43, %v855_v49  ;;  %v2301_v41 = vcombine.low %v2293_v58, %v2300_v28  ;;  %v449_v3 = vadd.f32 %v6200_v20, %v413_v60  ;;  %v5606_v31 = vpack.c.bf16 %v856_v43, %v856_v43 }
 0x11e   : > { %v379_v9 = vmul.f32 %v6193_v14, %v9441_v56  ;;  %v450_v1 = vadd.f32 %v6200_v20, %v414_v32  ;;  %v416_v50 = vadd.f32 %v6198_v19, %v380_v59  ;;  %3128 = vrot.lane.b32.xlu1 %v7508_v17, %s6082_s20  ;;  %vm3743_vm6 = vcmask 261120  }
 0x11f   : > { %2996 = vrot.lane.b32.xlu0 %v2917_v2, %s6086_s26  ;;  %v1471_v62 = vrot.slane %v876_v27, %v6214_v30  ;;  %v2308_v55 = vrot.slane %v2301_v41, %v6228_v38  ;;  %vm481_vm7 = vcmp.ge.f32.partialorder %v449_v3, 0.0  ;;  %v517_v40 = vmul.f32 %v6202_v21, %v449_v3  ;;  %v2977_v2 = vpop.permute.xlu0 %2976 }
 0x120   : > { %v415_v42 = vadd.f32 %v6198_v19, %v379_v9  ;;  %v3199_v49 = vsel %vm9404_vm8, %v7330_v23, %v7559_v6  ;;  %vm3782_vm11 = vcmask 326656   ;;  %vm482_vm12 = vcmp.ge.f32.partialorder %v450_v1, 0.0  ;;  %v7602_v27 = vpop.permute.xlu1 %3382 }
 0x121   : > { %v518_v58 = vmul.f32 %v6202_v21, %v450_v1  ;;  %v7585_v43 = vrot.slane %v5606_v31, %v6214_v30  ;;  %v7587_v28 = vld [vmem:[#allocation2 + $0x68] sm:$0xff]   ;;  %v1479_v60 = vcombine.high %v1471_v62, %v1471_v62  ;;  %2656 = vst.msk [vmem:[#allocation2 + $0x70] sm:$0xf] %vm9411_vm0, %v2308_v55  ;;  %v7593_v32 = vor.u32 %v7476_v25, %v2916_v61 }
 0x122   : > { %v549_v56 = vsel %vm481_vm7, %v449_v3, %v517_v40  ;;  %v7596_v23 = vadd.f32 %v6200_v20, %v415_v42  ;;  %v9442_v9 = vcombine.low %v7382_v33, %v7412_v4  ;;  %vm3821_vm14 = vcmask 392192   ;;  %3260 = vrot.lane.b32.xlu1 %v3199_v49, %s6087_s27 }
 0x123   : > { %v1487_v41 = vrot.slane %v1471_v62, %v6214_v30  ;;  %v550_v31 = vsel %vm482_vm12, %v450_v1, %v518_v58  ;;  %v7606_v51 = vadd.f32 %v6200_v20, %v416_v50  ;;  %3075 = vrot.lane.b32.xlu0 %v7508_v17, %s6081_s19  ;;  %v9403_v33 = vrot.slane %v7587_v28, 1  ;;  %v2979_v50 = vpop.permute.xlu0 %2978 }
 0x124   : > { %v3628_v59 = vsel %vm3625_vm10, %v9442_v9, %v2977_v2  ;;  %v3305_v4 = vrot.slane %v7587_v28, 2  ;;  %v2922_v61 = vshll.u32 %v7587_v28, 16  ;;  %v2926_v3 = vshrl.u32 %v7587_v28, 16  ;;  %v2981_v2 = vpop.permute.xlu1 %2980 }
 0x125   : > { %v3667_v25 = vsel %vm3665_vm1, %v3628_v59, %v7235_v24  ;;  %v7618_v1 = vrot.slane %v1479_v60, %v6214_v30  ;;  %v585_v42 = vadd.f32 %v6204_v22, %v549_v56  ;;  %v7628_v17 = vsel %vm9405_vm2, %v3039_v10, %v9403_v33 }
 0x126   : > { %v3201_v62 = vrot.slane %v2922_v61, 2  ;;  %v3463_v55 = vrot.slane %v2922_v61, 3  ;;  %v3706_v40 = vsel %vm9413_vm3, %v3667_v25, %v7199_v35  ;;  %v3630_v49 = vsel %vm3625_vm10, %v6419_v12, %v2979_v50  ;;  %3339 = vrot.lane.b32.xlu1 %v7489_v52, %s6083_s23 }
 0x127   : > { %v3200_v58 = vrot.slane %v2926_v3, 1  ;;  %v3462_v60 = vrot.slane %v2926_v3, 2  ;;  %v3569_v56 = vrot.slane %v7587_v28, 3  ;;  %3130 = vrot.lane.b32.xlu0 %v7628_v17, %s6082_s20  ;;  %v9443_v10 = vrot.slane %v7459_v34, 2  ;;  %v3247_v24 = vpop.permute.xlu0 %3246 }
 0x128   : > { %v3632_v12 = vsel %vm3625_vm10, %v6432_v39, %v2981_v2  ;;  %vm9412_vm15 = vcmask 457728   ;;  %v1509_v9 = vcombine.high %v1487_v41, %v1487_v41  ;;  %v2309_v50 = vcombine.low %v6278_v15, %v7618_v1 }
 0x129   : > { %v3306_v35 = vsel %vm3283_vm4, %v9443_v10, %v3305_v4  ;;  %v7646_v59 = vor.u32 %v3201_v62, %v3200_v58  ;;  %v3671_v25 = vsel %vm3665_vm1, %v3632_v12, %v7292_v7  ;;  %v7650_v52 = vor.u32 %v3463_v55, %v3462_v60  ;;  %v3243_v58 = vpop.permute.xlu1 %3242 }
 0x12a   : > { %v3669_v33 = vsel %vm3665_vm1, %v3630_v49, %v7285_v47  ;;  %v3710_v10 = vsel %vm9413_vm3, %v3671_v25, %v7343_v16  ;;  %v2310_v39 = vcombine.low %v1487_v41, %v1509_v9  ;;  %v2924_v2 = vrot.slane %v2922_v61, 1  ;;  %3394 = vrot.lane.b32.xlu1 %v3306_v35, %s6084_s24 }
 0x12b   : > { %v3203_v62 = vsel %vm9404_vm8, %v7559_v6, %v7646_v59  ;;  %v9444_v7 = vrot.slane %v7459_v34, 3  ;;  %v2317_v60 = vrot.slane %v2309_v50, %v6228_v38  ;;  %v3749_v47 = vsel %vm3743_vm6, %v3710_v10, %v3247_v24  ;;  %v3509_v12 = vpop.permute.xlu0 %3508 }
 0x12c   : > { %3262 = vrot.lane.b32.xlu0 %v3203_v62, %s6087_s27  ;;  %v3745_v16 = vsel %vm3743_vm6, %v3706_v40, %v3243_v58  ;;  %v2324_v41 = vrot.slane %v2310_v39, %v6228_v38  ;;  %vm9408_vm7 = vcmask 523264   ;;  %v3788_v6 = vsel %vm3782_vm11, %v3749_v47, %v7445_v18  ;;  %v9447_v39 = vld [vmem:[#allocation10_spill] sm:$0xff] }
 0x12d   : > { %v3570_v55 = vsel %vm9407_vm13, %v9444_v7, %v3569_v56  ;;  %v3465_v34 = vsel %vm9406_vm9, %v7512_v5, %v7650_v52  ;;  %v3784_v61 = vsel %vm3782_vm11, %v3745_v16, %v7357_v57  ;;  %v3708_v24 = vsel %vm9413_vm3, %v3669_v33, %v7245_v48  ;;  %v3245_v50 = vpop.permute.xlu1 %3244  ;;  %v9445_v57 = vld [vmem:[#allocation12_spill] sm:$0xff]  ;;  %v9446_v33 = vld [vmem:[#allocation13_spill] sm:$0xff]  ;;  %v9448_v7 = vld [vmem:[#allocation11_spill] sm:$0xff] }
 0x12e   : > { %v586_v49 = vadd.f32 %v6204_v22, %v550_v31  ;;  %v3823_v40 = vsel %vm3821_vm14, %v3784_v61, %v7373_v36  ;;  %v2325_v9 = vcombine.low %v2317_v60, %v2324_v41  ;;  %v7686_v18 = vsel %vm9410_vm5, %v7593_v32, %v2924_v2  ;;  %3526 = vrot.lane.b32.xlu1 %v3465_v34, %s6088_s28  ;;  %v9449_v61 = vld [vmem:[#allocation15_spill] sm:$0xff] }
 0x12f   : > { %v619_v25 = vmul.f32 %v6209_v29, %v585_v42  ;;  %v3862_v5 = vsel %vm9412_vm15, %v3823_v40, %v3509_v12  ;;  %v3827_v10 = vsel %vm3821_vm14, %v3788_v6, %v9445_v57  ;;  %v7692_v48 = vor.u32 %v2926_v3, %v2924_v2  ;;  %v3511_v2 = vpop.permute.xlu0 %3510 }
 0x130   : > { %v620_v31 = vmul.f32 %v6209_v29, %v586_v49  ;;  %3341 = vrot.lane.b32.xlu0 %v3306_v35, %s6083_s23  ;;  %v2332_v36 = vrot.slane %v2325_v9, %v6228_v38  ;;  %v3747_v32 = vsel %vm3743_vm6, %v3708_v24, %v3245_v50  ;;  %v3901_v42 = vsel %vm9408_vm7, %v3862_v5, %v9446_v33 }
 0x131   : > { %vm9409_vm12 = vcmask 588800   ;;  %v3786_v62 = vsel %vm3782_vm11, %v3747_v32, %v9447_v39  ;;  %v3938_v58 = vshrl.u32 %v3901_v42, 16  ;;  %v3940_v3 = vshll.u32 %v3901_v42, 16  ;;  %v3513_v16 = vpop.permute.xlu1 %3512  ;;  %v6034_v32 = vld [vmem:[#allocation2 + $0x20] sm:$0xff]  }
 0x132   : > { %vm653_vm8 = vcmp.gt.f32.partialorder %v619_v25, %v6225_v37  ;;  %2657 = vst.msk [vmem:[#allocation2 + $0x74] sm:$0xf] %vm9411_vm0, %v2332_v36  ;;  %v3825_v35 = vsel %vm3821_vm14, %v3786_v62, %v9448_v7  ;;  %vm654_vm2 = vcmp.gt.f32.partialorder %v620_v31, %v6225_v37  ;;  %vm721_vm9 = vcmp.gt.f32.partialorder %v619_v25, %v6240_v46 }
 0x133   : > { %v687_v60 = vsel %vm653_vm8, %v6237_v45, 0.0  ;;  %v3864_v47 = vsel %vm9412_vm15, %v3825_v35, %v3511_v2  ;;  %v3942_v41 = vrot.slane %v3940_v3, 1  ;;  %v688_v6 = vsel %vm654_vm2, %v6237_v45, 0.0  ;;  %3605 = vrot.lane.b32.xlu1 %v3570_v55, %s6085_s25  ;;  %v2983_v57 = vpop.permute.xlu0 %2982  ;;  %v9451_v3 = vld [vmem:[#allocation14_spill] sm:$0xff] }
 0x134   : > { %vm722_vm13 = vcmp.gt.f32.partialorder %v620_v31, %v6240_v46  ;;  %v3866_v34 = vsel %vm9412_vm15, %v3827_v10, %v3513_v16  ;;  %v3903_v24 = vsel %vm9408_vm7, %v3864_v47, %v9449_v61  ;;  %v755_v49 = vsel %vm721_vm9, %v6251_v53, %v687_v60 }
 0x135   : > { %v756_v12 = vsel %vm722_vm13, %v6251_v53, %v688_v6  ;;  %v3905_v40 = vsel %vm9408_vm7, %v3866_v34, %v7522_v8  ;;  %v3944_v9 = vshll.u32 %v3903_v24, 16  ;;  %v7723_v5 = vrot.slane %v7585_v43, %v6214_v30  ;;  %v3249_v33 = vpop.permute.xlu1 %3248 }
 0x136   : > { %v9450_v55 = vcombine.high %v7585_v43, %v7585_v43  ;;  %v3951_v10 = vshll.u32 %v3905_v40, 16  ;;  %v3943_v36 = vor.u32 %v3942_v41, %v3938_v58  ;;  %vm789_vm2 = vcmp.gt.f32.partialorder %v619_v25, %v6262_v63 }
 0x137   : > { %vm790_vm13 = vcmp.gt.f32.partialorder %v620_v31, %v6262_v63  ;;  %v3634_v8 = vsel %vm3625_vm10, %v6034_v32, %v2983_v57  ;;  %v3946_v42 = vrot.slane %v3944_v9, 1  ;;  %v823_v39 = vsel %vm789_vm2, %v6265_v0, %v755_v49  ;;  %v2985_v41 = vpop.permute.xlu0 %2984 }
 0x138   : > { %v7729_v50 = vrot.slane %v9450_v55, %v6214_v30  ;;  %v824_v62 = vsel %vm790_vm13, %v6265_v0, %v756_v12  ;;  %v3673_v43 = vsel %vm3665_vm1, %v3634_v8, %v9451_v3  ;;  %v3948_v2 = vshrl.u32 %v3903_v24, 16  ;;  %v6035_v12 = vld [vmem:[#allocation2 + $0x28] sm:$0xff]  }
 0x139   : > { %v857_v7 = vmul.f32 %v6275_v13, %v823_v39  ;;  %v7740_v58 = vmul.f32 %v6275_v13, %v824_v62  ;;  %v7742_v25 = vld [vmem:[#allocation2 + $0x70] sm:$0xff]   ;;  %v3955_v31 = vshrl.u32 %v3905_v40, 16  ;;  %v3712_v35 = vsel %vm9413_vm3, %v3673_v43, %v7546_v26  ;;  %v3515_v40 = vpop.permute.xlu1 %3514 }
 0x13a   : > { %v3947_v60 = vsel %vm9410_vm5, %v3943_v36, %v3946_v42  ;;  %v1511_v47 = vcombine.high %v7618_v1, %v7618_v1  ;;  %v3953_v16 = vrot.slane %v3951_v10, 1  ;;  %v3751_v6 = vsel %vm3743_vm6, %v3712_v35, %v3249_v33 }
 0x13b   : > { %v3950_v34 = vor.u32 %v3948_v2, %v3946_v42  ;;  %5847 = vmatprep.mubr.msk.bf16.mxu0 %vm9409_vm12, %v3947_v60  ;;  %v1510_v61 = vcombine.high %v7723_v5, %v7723_v5  ;;  %v3307_v24 = vrot.slane %v7742_v25, 2  ;;  %v7755_v49 = vshll.u32 %v7742_v25, 16  ;;  %v3251_v42 = vpop.permute.xlu0 %3250 }
 0x13c   : > { %v7758_v26 = vshrl.u32 %v7742_v25, 16  ;;  %v3636_v1 = vsel %vm3625_vm10, %v6035_v12, %v2985_v41  ;;  %vm483_vm8 = vcmp.ge.f32.partialorder %v7596_v23, 0.0  ;;  %v3571_v55 = vrot.slane %v7742_v25, 3 }
 0x13d   : > { %v3675_v9 = vsel %vm3665_vm1, %v3636_v1, %v7529_v54  ;;  %v3790_v57 = vsel %vm3782_vm11, %v3751_v6, %v7569_v44  ;;  %v877_v10 = vpack.c.bf16 %v7740_v58, %v857_v7  ;;  %v7773_v36 = vsel %vm3283_vm4, %v3305_v4, %v3307_v24  ;;  %v3594_v7 = vpop.permute.xlu1 %3593 }
 0x13e   : > { %v3466_v32 = vrot.slane %v7758_v26, 2  ;;  %v3467_v8 = vrot.slane %v7755_v49, 3  ;;  %v3043_v54 = vrot.slane %v7742_v25, 1  ;;  %3396 = vrot.lane.b32.xlu0 %v7773_v36, %s6084_s24  ;;  %v3957_v33 = vor.u32 %v3955_v31, %v3953_v16 }
 0x13f   : > { %v3714_v44 = vsel %vm9413_vm3, %v3675_v9, %v7566_v11  ;;  %v3829_v39 = vsel %vm3821_vm14, %v3790_v57, %v7602_v27  ;;  %v1512_v4 = vcombine.high %v7729_v50, %v7729_v50  ;;  %v2932_v3 = vrot.slane %v7755_v49, 1  ;;  %v3330_v12 = vpop.permute.xlu0 %3329 }
 0x140   : > { %v7786_v62 = vor.u32 %v3467_v8, %v3466_v32  ;;  %v3868_v43 = vsel %vm9412_vm15, %v3829_v39, %v3515_v40  ;;  %v3954_v2 = vsel %vm9410_vm5, %v3950_v34, %v3953_v16  ;;  %vm9452_vm9 = vcmask 1044480  }
 0x141   : > { %v3572_v11 = vsel %vm9452_vm9, %v3569_v56, %v3571_v55  ;;  %5848 = vmatmul.mubr.msk.bf16.vlgmr.msra.gmra.mxu0 %vm9409_vm12, %v3954_v2  ;;  %v3204_v27 = vrot.slane %v7758_v26, 1  ;;  %v3205_v31 = vrot.slane %v7755_v49, 2  ;;  %v7800_v35 = vsel %vm9408_vm7, %v3868_v43, %v3594_v7 }
 0x142   : > { %vm9453_vm2 = vsmask.f32 5376  ;;  %v9454_v16 = vrot.slane %v7587_v28, 1  ;;  %vm9455_vm13 = vcmask 1046528   ;;  %v3958_v56 = vshll.u32 %v7800_v35, 16  ;;  %2998 = vrot.lane.b32.xlu0 %v7686_v18, %s6086_s26  ;;  %v3517_v18 = vpop.permute.xlu1 %3516 }
 0x143   : > { %v3469_v60 = vsel %vm9453_vm2, %v7650_v52, %v7786_v62  ;;  %v1520_v6 = vrot.slane %v877_v10, %v6214_v30  ;;  %v3753_v34 = vsel %vm3743_vm6, %v3714_v44, %v3251_v42  ;;  %v2333_v52 = vcombine.low %v1511_v47, %v7729_v50  ;;  %v3385_v44 = vpop.permute.xlu0 %3384 }
 0x144   : > { %v7810_v41 = vsel %vm9455_vm13, %v9454_v16, %v3043_v54  ;;  %3528 = vrot.lane.b32.xlu1 %v3469_v60, %s6088_s28  ;;  %v2334_v1 = vcombine.low %v7723_v5, %v1510_v61  ;;  %vm484_vm9 = vcmp.ge.f32.partialorder %v7606_v51, 0.0  ;;  %v2933_v28 = vsel %vm9410_vm5, %v7692_v48, %v2932_v3 }
 0x145   : > { %v3960_v40 = vrot.slane %v3958_v56, 1  ;;  %v1528_v9 = vcombine.high %v1520_v6, %v1520_v6  ;;  %v7826_v57 = vrot.slane %v1520_v6, %v6214_v30  ;;  %v7828_v10 = vor.u32 %v3205_v31, %v3204_v27 }
 0x146   : > { %v2341_v32 = vrot.slane %v2333_v52, %v6228_v38  ;;  %v2348_v50 = vrot.slane %v2334_v1, %v6228_v38  ;;  %v519_v5 = vmul.f32 %v6202_v21, %v7596_v23  ;;  %v3792_v47 = vsel %vm3782_vm11, %v3753_v34, %v3330_v12  ;;  %3077 = vrot.lane.b32.xlu0 %v7628_v17, %s6081_s19  ;;  %v3596_v7 = vpop.permute.xlu1 %3595 }
 0x147   : > { %v7836_v61 = vrot.slane %v1528_v9, %v6214_v30  ;;  %v2357_v48 = vcombine.low %v1512_v4, %v7826_v57  ;;  %v3961_v8 = vsel %vm9410_vm5, %v3957_v33, %v3960_v40  ;;  %v520_v39 = vmul.f32 %v6202_v21, %v7606_v51  ;;  %v2987_v34 = vpop.permute.xlu0 %2986 }
 0x148   : > { %3607 = vrot.lane.b32.xlu1 %v3572_v11, %s6085_s25  ;;  %v2349_v42 = vcombine.low %v2341_v32, %v2348_v50  ;;  %v551_v43 = vsel %vm483_vm8, %v7596_v23, %v519_v5  ;;  %v3831_v2 = vsel %vm3821_vm14, %v3792_v47, %v3385_v44  ;;  %5851 = vmatprep.mubr.msk.bf16.mxu0 %vm9409_vm12, %v3961_v8  ;;  %vm9456_vm8 = vsmask.f32 6400 }
 0x149   : > { %v2358_v4 = vcombine.low %v6278_v15, %v7836_v61  ;;  %v2365_v33 = vrot.slane %v2357_v48, %v6228_v38  ;;  %v587_v17 = vadd.f32 %v6204_v22, %v551_v43  ;;  %v3870_v27 = vsel %vm9412_vm15, %v3831_v2, %v3517_v18 }
 0x14a   : > { %v2356_v11 = vrot.slane %v2349_v42, %v6228_v38  ;;  %v552_v23 = vsel %vm484_vm9, %v7606_v51, %v520_v39  ;;  %v5607_v31 = vpack.c.bf16 %v7740_v58, %v7740_v58  ;;  %v7863_v16 = vsel %vm9408_vm7, %v3870_v27, %v3596_v7  ;;  %3000 = vrot.lane.b32.xlu0 %v2933_v28, %s6086_s26  ;;  %v3121_v1 = vpop.permute.xlu1 %3120 }
 0x14b   : > { %v2372_v60 = vrot.slane %v2358_v4, %v6228_v38  ;;  %v588_v56 = vadd.f32 %v6204_v22, %v552_v23  ;;  %v621_v6 = vmul.f32 %v6209_v29, %v587_v17  ;;  %v3207_v51 = vsel %vm9456_vm8, %v7646_v59, %v7828_v10  ;;  %v6036_v17 = vld [vmem:[#allocation2 + $0x30] sm:$0xff]  }
 0x14c   : > { %3132 = vrot.lane.b32.xlu1 %v7810_v41, %s6082_s20  ;;  %v3962_v58 = vshrl.u32 %v7800_v35, 16  ;;  %2658 = vst.msk [vmem:[#allocation2 + $0x78] sm:$0xf] %vm9411_vm0, %v2356_v11  ;;  %v3965_v12 = vshll.u32 %v7863_v16, 16  ;;  %v1527_v18 = vrot.slane %v5607_v31, %v6214_v30  ;;  %v3066_v50 = vpop.permute.xlu0 %3065  ;;  %v1558_v48 = vcombine.high %v7826_v57, %v7826_v57 }
 0x14d   : > { %v2373_v52 = vcombine.low %v2365_v33, %v2372_v60  ;;  %v622_v9 = vmul.f32 %v6209_v29, %v588_v56  ;;  %vm655_vm2 = vcmp.gt.f32.partialorder %v621_v6, %v6225_v37  ;;  %vm723_vm13 = vcmp.gt.f32.partialorder %v621_v6, %v6240_v46 }
 0x14e   : > { %v3967_v28 = vrot.slane %v3965_v12, 1  ;;  %v689_v32 = vsel %vm655_vm2, %v6237_v45, 0.0  ;;  %vm791_vm9 = vcmp.gt.f32.partialorder %v621_v6, %v6262_v63  ;;  %3079 = vrot.lane.b32.xlu0 %v7810_v41, %s6081_s19  ;;  %v3964_v8 = vor.u32 %v3962_v58, %v3960_v40  ;;  %v3253_v43 = vpop.permute.xlu1 %3252  ;;  %v7898_v41 = vld [vmem:[%s6191_s14 + $0xa8] sm:$0xff]   ;;  %s5896_s14 = smul.u32 144, %s9625_s22 }
 0x14f   : > { %v2380_v59 = vrot.slane %v2373_v52, %v6228_v38  ;;  %vm656_vm8 = vcmp.gt.f32.partialorder %v622_v9, %v6225_v37  ;;  %vm724_vm7 = vcmp.gt.f32.partialorder %v622_v9, %v6240_v46  ;;  %v757_v35 = vsel %vm723_vm13, %v6251_v53, %v689_v32 }
 0x150   : > { %3264 = vrot.lane.b32.xlu1 %v3207_v51, %s6087_s27  ;;  %v690_v5 = vsel %vm656_vm8, %v6237_v45, 0.0  ;;  %vm792_vm2 = vcmp.gt.f32.partialorder %v622_v9, %v6262_v63  ;;  %v825_v47 = vsel %vm791_vm9, %v6265_v0, %v757_v35  ;;  %v1529_v39 = vcombine.high %v1527_v18, %v1527_v18  ;;  %v2989_v27 = vpop.permute.xlu0 %2988  ;;  %s8552_s18 = scalar_lea.vmem %s9385_s4, %s5896_s14 }
 0x151   : > { %2659 = vst.msk [vmem:[#allocation2 + $0x7c] sm:$0xf] %vm9411_vm0, %v2380_v59  ;;  %v758_v44 = vsel %vm724_vm7, %v6251_v53, %v690_v5  ;;  %v859_v42 = vmul.f32 %v6275_v13, %v825_v47  ;;  %v1543_v4 = vrot.slane %v1527_v18, %v6214_v30  ;;  %v1560_v33 = vcombine.high %v7836_v61, %v7836_v61  ;;  %v6037_v47 = vld [vmem:[#allocation2 + $0x38] sm:$0xff]  }
 0x152   : > { %v826_v2 = vsel %vm792_vm2, %v6265_v0, %v758_v44  ;;  %v1557_v40 = vrot.slane %v1529_v39, %v6214_v30  ;;  %v3968_v7 = vsel %vm9410_vm5, %v3964_v8, %v3967_v28  ;;  %v3638_v11 = vsel %vm3625_vm10, %v6036_v17, %v2987_v34  ;;  %v3332_v51 = vpop.permute.xlu1 %3331 }
 0x153   : > { %v860_v57 = vmul.f32 %v6275_v13, %v826_v2  ;;  %v1559_v23 = vcombine.high %v1543_v4, %v1543_v4  ;;  %v2381_v31 = vcombine.low %v1558_v48, %v1543_v4  ;;  %5852 = vmatmul.mubr.msk.bf16.gmra.mxu0 %vm9409_vm12, %v3968_v7  ;;  %v5805_v60 = vunpack.c.l.bf16 %v7898_v41 }
 0x154   : > { %3343 = vrot.lane.b32.xlu1 %v7773_v36, %s6083_s23  ;;  %v3677_v61 = vsel %vm3665_vm1, %v3638_v11, %v3066_v50  ;;  %v2382_v6 = vcombine.low %v1560_v33, %v1557_v40  ;;  %v3969_v58 = vshrl.u32 %v7863_v16, 16  ;;  %v1561_v52 = vcombine.high %v1557_v40, %v1557_v40  ;;  %v3068_v5 = vpop.permute.xlu0 %3067 }
 0x155   : > { %v878_v56 = vpack.c.bf16 %v860_v57, %v859_v42  ;;  %v3716_v12 = vsel %vm9413_vm3, %v3677_v61, %v3121_v1  ;;  %v2389_v36 = vrot.slane %v2381_v31, %v6228_v38  ;;  %v2405_v34 = vcombine.low %v1559_v23, %v6278_v15 }
 0x156   : > { %v2396_v18 = vrot.slane %v2382_v6, %v6228_v38  ;;  %v5608_v32 = vpack.c.bf16 %v860_v57, %v860_v57  ;;  %v7921_v35 = vor.u32 %v3969_v58, %v3967_v28  ;;  %v3755_v50 = vsel %vm3743_vm6, %v3716_v12, %v3253_v43  ;;  %v3387_v39 = vpop.permute.xlu1 %3386 }
 0x157   : > { %v1569_v9 = vrot.slane %v878_v56, %v6214_v30  ;;  %v5806_v16 = vunpack.c.h.bf16 %v7898_v41  ;;  %v381_v1 = vmul.f32 %v5805_v60, %v6193_v14  ;;  %v3640_v48 = vsel %vm3625_vm10, %v6037_v47, %v2989_v27 }
 0x158   : > { %v7919_v59 = vld [vmem:[#allocation2 + $0x78] sm:$0xff]   ;;  %v2397_v44 = vcombine.low %v2389_v36, %v2396_v18  ;;  %v2413_v42 = vrot.slane %v2405_v34, %v6228_v38  ;;  %v1576_v57 = vrot.slane %v5608_v32, %v6214_v30  ;;  %vm9457_vm7 = vcmask 1046528   ;;  %v3123_v23 = vpop.permute.xlu0 %3122 }
 0x159   : > { %v1585_v8 = vrot.slane %v1569_v9, %v6214_v30  ;;  %v3045_v2 = vrot.slane %v7919_v59, 1  ;;  %v3309_v28 = vrot.slane %v7919_v59, 2  ;;  %v7932_v43 = vshll.u32 %v7919_v59, 16 }
 0x15a   : > { %v7935_v41 = vshrl.u32 %v7919_v59, 16  ;;  %v2404_v4 = vrot.slane %v2397_v44, %v6228_v38  ;;  %v1577_v40 = vcombine.high %v1569_v9, %v1569_v9  ;;  %v3519_v61 = vpop.permute.xlu1 %3518  ;;  %v3573_v6 = vrot.slane %v7919_v59, 3 }
 0x15b   : > { %v2406_v33 = vcombine.low %v1561_v52, %v1585_v8  ;;  %v7944_v7 = vsel %vm9457_vm7, %v3043_v54, %v3045_v2  ;;  %v3310_v17 = vsel %vm3283_vm4, %v3307_v24, %v3309_v28  ;;  %v3209_v27 = vrot.slane %v7932_v43, 2 }
 0x15c   : > { %v3208_v11 = vrot.slane %v7935_v41, 1  ;;  %3134 = vrot.lane.b32.xlu0 %v7944_v7, %s6082_s20  ;;  %3398 = vrot.lane.b32.xlu1 %v3310_v17, %s6084_s24  ;;  %v3470_v31 = vrot.slane %v7935_v41, 2  ;;  %v3471_v54 = vrot.slane %v7932_v43, 3  ;;  %2660 = vst.msk [vmem:[#allocation2 + $0x80] sm:$0xf] %vm9411_vm0, %v2404_v4  ;;  %v3794_v24 = vsel %vm3782_vm11, %v3755_v50, %v3332_v51  ;;  %v3255_v50 = vpop.permute.xlu0 %3254 }
 0x15d   : > { %v2420_v60 = vrot.slane %v2406_v33, %v6228_v38  ;;  %v382_v58 = vmul.f32 %v5806_v16, %v6193_v14  ;;  %v417_v12 = vadd.f32 %v6198_v19, %v381_v1  ;;  %v1578_v52 = vcombine.high %v1576_v57, %v1576_v57 }
 0x15e   : > { %v7961_v56 = vor.u32 %v3209_v27, %v3208_v11  ;;  %v7966_v36 = vor.u32 %v3471_v54, %v3470_v31  ;;  %v1592_v9 = vrot.slane %v1576_v57, %v6214_v30  ;;  %vm9458_vm13 = vsmask.f32 6400  ;;  %v3598_v44 = vpop.permute.xlu1 %3597 }
 0x15f   : > { %v2421_v34 = vcombine.low %v2413_v42, %v2420_v60  ;;  %v3679_v51 = vsel %vm3665_vm1, %v3640_v48, %v3068_v5  ;;  %v3833_v32 = vsel %vm3821_vm14, %v3794_v24, %v3387_v39  ;;  %v1599_v47 = vrot.slane %v1577_v40, %v6214_v30 }
 0x160   : > { %v3211_v18 = vsel %vm9458_vm13, %v7828_v10, %v7961_v56  ;;  %vm9459_vm9 = vsmask.f32 5376  ;;  %v3872_v1 = vsel %vm9412_vm15, %v3833_v32, %v3519_v61  ;;  %v1606_v10 = vrot.slane %v1578_v52, %v6214_v30  ;;  %v3334_v40 = vpop.permute.xlu0 %3333 }
 0x161   : > { %3266 = vrot.lane.b32.xlu0 %v3211_v18, %s6087_s27  ;;  %v3473_v14 = vsel %vm9459_vm9, %v7786_v62, %v7966_v36  ;;  %v2428_v16 = vrot.slane %v2421_v34, %v6228_v38  ;;  %vm9460_vm8 = vcmask 523264   ;;  %v1607_v48 = vcombine.high %v1585_v8, %v1585_v8 }
 0x162   : > { %3530 = vrot.lane.b32.xlu1 %v3473_v14, %s6088_s28  ;;  %v7984_v5 = vsel %vm9460_vm8, %v3872_v1, %v3598_v44  ;;  %v1608_v42 = vcombine.high %v1592_v9, %v1592_v9  ;;  %v1609_v39 = vcombine.high %v1599_v47, %v1599_v47  ;;  %vm9461_vm2 = vcmask 1044480   ;;  %v3521_v60 = vpop.permute.xlu1 %3520  ;;  %vm9463_vm9 = vmmov %vm9460_vm8 }
 0x163   : > { %v3574_v62 = vsel %vm9461_vm2, %v3571_v55, %v3573_v6  ;;  %2661 = vst.msk [vmem:[#allocation2 + $0x84] sm:$0xf] %vm9411_vm0, %v2428_v16  ;;  %v3972_v4 = vshll.u32 %v7984_v5, 16  ;;  %v1610_v33 = vcombine.high %v1606_v10, %v1606_v10  ;;  %v418_v57 = vadd.f32 %v6198_v19, %v382_v58  ;;  %vm9465_vm8 = vmmov %vm9461_vm2 }
 0x164   : > { %v2429_v11 = vcombine.low %v1599_v47, %v1609_v39  ;;  %v2430_v27 = vcombine.low %v1607_v48, %v1592_v9  ;;  %v2454_v8 = vcombine.low %v1608_v42, %v6278_v15  ;;  %v453_v31 = vadd.f32 %v6200_v20, %v417_v12  ;;  %v3389_v34 = vpop.permute.xlu0 %3388  ;;  %v9462_v47 = vld [vmem:[#allocation9_spill] sm:$0xff] }
 0x165   : > { %3345 = vrot.lane.b32.xlu0 %v3310_v17, %s6083_s23  ;;  %v3718_v25 = vsel %vm9413_vm3, %v3679_v51, %v3123_v23  ;;  %v7998_v54 = vrot.slane %v3972_v4, 1  ;;  %v2453_v55 = vcombine.low %v1606_v10, %v1610_v33  ;;  %v454_v24 = vadd.f32 %v6200_v20, %v418_v57 }
 0x166   : > { %3609 = vrot.lane.b32.xlu1 %v3574_v62, %s6085_s25  ;;  %v3757_v19 = vsel %vm3743_vm6, %v3718_v25, %v3255_v50  ;;  %v2437_v61 = vrot.slane %v2429_v11, %v6228_v38  ;;  %v2444_v58 = vrot.slane %v2430_v27, %v6228_v38  ;;  %v2468_v12 = vrot.slane %v2454_v8, %v6228_v38  ;;  %v9464_v8 = vld [vmem:[#allocation7_spill] sm:$0xff] }
 0x167   : > { %v2461_v17 = vrot.slane %v2453_v55, %v6228_v38  ;;  %v3975_v23 = vsel %vm9410_vm5, %v7921_v35, %v7998_v54  ;;  %vm485_vm7 = vcmp.ge.f32.partialorder %v453_v31, 0.0  ;;  %vm486_vm13 = vcmp.ge.f32.partialorder %v454_v24, 0.0  ;;  %v3600_v35 = vpop.permute.xlu1 %3599 }
 0x168   : > { %v3796_v20 = vsel %vm3782_vm11, %v3757_v19, %v3334_v40  ;;  %v2445_v52 = vcombine.low %v2437_v61, %v2444_v58  ;;  %5855 = vmatprep.mubr.msk.bf16.mxu0 %vm9409_vm12, %v3975_v23  ;;  %v521_v9 = vmul.f32 %v6202_v21, %v453_v31  ;;  %v522_v18 = vmul.f32 %v6202_v21, %v454_v24 }
 0x169   : > { %v2936_v51 = vor.u32 %v7758_v26, %v2932_v3  ;;  %v3835_v32 = vsel %vm3821_vm14, %v3796_v20, %v3389_v34  ;;  %v2469_v50 = vcombine.low %v2461_v17, %v2468_v12  ;;  %v2572_v14 = vrot.slane %v9462_v47, %v6228_v38 }
 0x16a   : > { %v8020_v16 = vld [vmem:[#allocation2 + $0x80] sm:$0xff]   ;;  %v2452_v1 = vrot.slane %v2445_v52, %v6228_v38  ;;  %v3874_v44 = vsel %vm9412_vm15, %v3835_v32, %v3521_v60  ;;  %v553_v10 = vsel %vm485_vm7, %v453_v31, %v521_v9  ;;  %v554_v21 = vsel %vm486_vm13, %v454_v24, %v522_v18 }
 0x16b   : > { %v2940_v49 = vrot.slane %v7932_v43, 1  ;;  %v2476_v26 = vrot.slane %v2469_v50, %v6228_v38  ;;  %v8029_v3 = vsel %vm9463_vm9, %v3874_v44, %v3600_v35  ;;  %v589_v48 = vadd.f32 %v6204_v22, %v553_v10  ;;  %2667 = vst.msk [vmem:[#allocation2 + $0x9c] sm:$0xf] %vm9411_vm0, %v2572_v14  ;;  %v2991_v43 = vpop.permute.xlu0 %2990  ;;  %v8044_v57 = vpop.permute.xlu1 %3124  ;;  %v9467_v50 = vld [vmem:[#allocation8_spill] sm:$0xff] }
 0x16c   : > { %v3311_v42 = vrot.slane %v8020_v16, 2  ;;  %v8035_v39 = vshll.u32 %v8020_v16, 16  ;;  %v8038_v62 = vshrl.u32 %v8020_v16, 16  ;;  %2662 = vst.msk [vmem:[#allocation2 + $0x88] sm:$0xf] %vm9411_vm0, %v2452_v1  ;;  %v590_v4 = vadd.f32 %v6204_v22, %v554_v21  ;;  %v6038_v44 = vld [vmem:[#allocation2 + $0x40] sm:$0xff]  }
 0x16d   : > { %v3575_v33 = vrot.slane %v8020_v16, 3  ;;  %2663 = vst.msk [vmem:[#allocation2 + $0x8c] sm:$0xf] %vm9411_vm0, %v2476_v26  ;;  %v1683_v22 = vrot.slane %v9464_v8, %v6214_v30  ;;  %v2941_v31 = vsel %vm9410_vm5, %v2936_v51, %v2940_v49  ;;  %v3979_v25 = vshll.u32 %v8029_v3, 16 }
 0x16e   : > { %v8051_v40 = vsel %vm3283_vm4, %v3309_v28, %v3311_v42  ;;  %v3474_v11 = vrot.slane %v8038_v62, 2  ;;  %v3475_v27 = vrot.slane %v8035_v39, 3  ;;  %v2944_v60 = vor.u32 %v7935_v41, %v2940_v49 }
 0x16f   : > { %3400 = vrot.lane.b32.xlu0 %v8051_v40, %s6084_s24  ;;  %v3070_v28 = vpop.permute.xlu0 %3069  ;;  %v623_v24 = vmul.f32 %v6209_v29, %v589_v48  ;;  %v624_v19 = vmul.f32 %v6209_v29, %v590_v4  ;;  %v3576_v61 = vsel %vm9465_vm8, %v3573_v6, %v3575_v33  ;;  %v3047_v58 = vrot.slane %v8020_v16, 1  ;;  %v3257_v23 = vpop.permute.xlu1 %3256 }
 0x170   : > { %v8061_v55 = vor.u32 %v3475_v27, %v3474_v11  ;;  %v2948_v12 = vrot.slane %v8035_v39, 1  ;;  %v3976_v17 = vshrl.u32 %v7984_v5, 16  ;;  %vm9466_vm2 = vsmask.f32 5376 }
 0x171   : > { %v3212_v20 = vrot.slane %v8038_v62, 1  ;;  %v3213_v29 = vrot.slane %v8035_v39, 2  ;;  %vm657_vm7 = vcmp.gt.f32.partialorder %v623_v24, %v6225_v37  ;;  %v8082_v6 = vrot.slane %v3979_v25, 1 }
 0x172   : > { %v3477_v41 = vsel %vm9466_vm2, %v7966_v36, %v8061_v55  ;;  %vm658_vm13 = vcmp.gt.f32.partialorder %v624_v19, %v6225_v37  ;;  %v691_v5 = vsel %vm657_vm7, %v6237_v45, 0.0  ;;  %vm725_vm9 = vcmp.gt.f32.partialorder %v623_v24, %v6240_v46 }
 0x173   : > { %3532 = vrot.lane.b32.xlu1 %v3477_v41, %s6088_s28  ;;  %3002 = vrot.lane.b32.xlu0 %v2941_v31, %s6086_s26  ;;  %v8089_v36 = vpop.permute.xlu0 %2992  ;;  %v692_v52 = vsel %vm658_vm13, %v6237_v45, 0.0  ;;  %vm726_vm8 = vcmp.gt.f32.partialorder %v624_v19, %v6240_v46  ;;  %v759_v9 = vsel %vm725_vm9, %v6251_v53, %v691_v5  ;;  %vm793_vm2 = vcmp.gt.f32.partialorder %v623_v24, %v6262_v63  ;;  %v3336_v32 = vpop.permute.xlu1 %3335 }
 0x174   : > { %v8087_v34 = vld [vmem:[#allocation2 + $0x88] sm:$0xff]   ;;  %v3978_v18 = vor.u32 %v3976_v17, %v7998_v54  ;;  %v760_v37 = vsel %vm726_vm8, %v6251_v53, %v692_v52  ;;  %vm794_vm7 = vcmp.gt.f32.partialorder %v624_v19, %v6262_v63  ;;  %v827_v51 = vsel %vm793_vm2, %v6265_v0, %v759_v9 }
 0x175   : > { %v2525_v35 = vcombine.low %v6278_v15, %v9467_v50  ;;  %vm9468_vm13 = vcmask 1046528   ;;  %v1705_v46 = vcombine.high %v1683_v22, %v1683_v22  ;;  %v828_v53 = vsel %vm794_vm7, %v6265_v0, %v760_v37 }
 0x176   : > { %v3048_v45 = vsel %vm9468_vm13, %v3045_v2, %v3047_v58  ;;  %v861_v63 = vmul.f32 %v6275_v13, %v827_v51  ;;  %v3982_v54 = vsel %vm9410_vm5, %v3978_v18, %v8082_v6  ;;  %v2949_v15 = vsel %vm9410_vm5, %v2944_v60, %v2948_v12  ;;  %vm9470_vm8 = vmmov %vm9468_vm13 }
 0x177   : > { %3611 = vrot.lane.b32.xlu1 %v3576_v61, %s6085_s25  ;;  %3081 = vrot.lane.b32.xlu0 %v7944_v7, %s6081_s19  ;;  %v3214_v59 = vor.u32 %v3213_v29, %v3212_v20  ;;  %v8115_v2 = vshll.u32 %v8087_v34, 16  ;;  %v8118_v47 = vshrl.u32 %v8087_v34, 16  ;;  %v8121_v7 = vpop.permute.xlu0 %3071  ;;  %v862_v0 = vmul.f32 %v6275_v13, %v828_v53  ;;  %v3391_v14 = vpop.permute.xlu1 %3390 }
 0x178   : > { %5856 = vmatmul.mubr.msk.bf16.gmra.mxu0 %vm9409_vm12, %v3982_v54  ;;  %v3049_v1 = vrot.slane %v8087_v34, 1  ;;  %v3642_v10 = vsel %vm3625_vm10, %v6038_v44, %v2991_v43  ;;  %v2526_v21 = vcombine.low %v1683_v22, %v1705_v46  ;;  %v2533_v49 = vrot.slane %v2525_v35, %v6228_v38 }
 0x179   : > { %v3681_v26 = vsel %vm3665_vm1, %v3642_v10, %v3070_v28  ;;  %v879_v48 = vpack.c.bf16 %v862_v0, %v861_v63  ;;  %v5609_v4 = vpack.c.bf16 %v862_v0, %v862_v0  ;;  %vm9469_vm9 = vsmask.f32 6400 }
 0x17a   : > { %v3215_v13 = vsel %vm9469_vm9, %v7961_v56, %v3214_v59  ;;  %v3216_v11 = vrot.slane %v8118_v47, 1  ;;  %v3217_v27 = vrot.slane %v8115_v2, 2  ;;  %v3720_v43 = vsel %vm9413_vm3, %v3681_v26, %v8044_v57  ;;  %vm9472_vm7 = vmmov %vm9469_vm9 }
 0x17b   : > { %3136 = vrot.lane.b32.xlu1 %v3048_v45, %s6082_s20  ;;  %3004 = vrot.lane.b32.xlu0 %v2949_v15, %s6086_s26  ;;  %v8136_v8 = vpop.permute.xlu0 %3126  ;;  %v3313_v22 = vrot.slane %v8087_v34, 2  ;;  %v1618_v31 = vrot.slane %v879_v48, %v6214_v30  ;;  %v1625_v25 = vrot.slane %v5609_v4, %v6214_v30  ;;  %v3759_v60 = vsel %vm3743_vm6, %v3720_v43, %v3257_v23  ;;  %v3523_v28 = vpop.permute.xlu1 %3522 }
 0x17c   : > { %v8145_v56 = vsel %vm9470_vm8, %v3047_v58, %v3049_v1  ;;  %v3478_v24 = vrot.slane %v8118_v47, 2  ;;  %v3798_v57 = vsel %vm3782_vm11, %v3759_v60, %v3336_v32  ;;  %v2540_v19 = vrot.slane %v2526_v21, %v6228_v38 }
 0x17d   : > { %v3479_v61 = vrot.slane %v8115_v2, 3  ;;  %v1626_v17 = vcombine.high %v1618_v31, %v1618_v31  ;;  %v1627_v23 = vcombine.high %v1625_v25, %v1625_v25  ;;  %v1634_v41 = vrot.slane %v1618_v31, %v6214_v30  ;;  %v6039_v31 = vld [vmem:[#allocation2 + $0x48] sm:$0xff]  }
 0x17e   : > { %v8154_v20 = vor.u32 %v3217_v27, %v3216_v11  ;;  %v1641_v58 = vrot.slane %v1625_v25, %v6214_v30  ;;  %v3837_v29 = vsel %vm3821_vm14, %v3798_v57, %v3391_v14  ;;  %v2541_v52 = vcombine.low %v2533_v49, %v2540_v19 }
 0x17f   : > { %3268 = vrot.lane.b32.xlu1 %v3215_v13, %s6087_s27  ;;  %3083 = vrot.lane.b32.xlu0 %v3048_v45, %s6081_s19  ;;  %v3259_v5 = vpop.permute.xlu0 %3258  ;;  %v1648_v9 = vrot.slane %v1626_v17, %v6214_v30  ;;  %v1655_v18 = vrot.slane %v1627_v23, %v6214_v30  ;;  %v1656_v37 = vcombine.high %v1634_v41, %v1634_v41  ;;  %v3602_v32 = vpop.permute.xlu1 %3601  ;;  %v3983_v50 = vshrl.u32 %v8029_v3, 16 }
 0x180   : > { %v3876_v51 = vsel %vm9412_vm15, %v3837_v29, %v3523_v28  ;;  %v1657_v35 = vcombine.high %v1641_v58, %v1641_v58  ;;  %vm9471_vm2 = vcmask 523264   ;;  %v2548_v46 = vrot.slane %v2541_v52, %v6228_v38 }
 0x181   : > { %v3915_v45 = vsel %vm9471_vm2, %v3876_v51, %v3602_v32  ;;  %v1658_v53 = vcombine.high %v1648_v9, %v1648_v9  ;;  %v1659_v63 = vcombine.high %v1655_v18, %v1655_v18  ;;  %v2477_v30 = vcombine.low %v1634_v41, %v1656_v37  ;;  %vm9475_vm8 = vmmov %vm9471_vm2 }
 0x182   : > { %v3986_v54 = vshll.u32 %v3915_v45, 16  ;;  %v3314_v3 = vsel %vm3283_vm4, %v3311_v42, %v3313_v22  ;;  %v3219_v15 = vsel %vm9472_vm7, %v3214_v59, %v8154_v20  ;;  %v8175_v0 = vor.u32 %v3479_v61, %v3478_v24  ;;  %2666 = vst.msk [vmem:[#allocation2 + $0x98] sm:$0xf] %vm9411_vm0, %v2548_v46 }
 0x183   : > { %3347 = vrot.lane.b32.xlu1 %v8051_v40, %s6083_s23  ;;  %3138 = vrot.lane.b32.xlu0 %v8145_v56, %s6082_s20  ;;  %v2501_v14 = vcombine.low %v1641_v58, %v1657_v35  ;;  %v3338_v40 = vpop.permute.xlu0 %3337  ;;  %v2478_v44 = vcombine.low %v1648_v9, %v1658_v53  ;;  %v2485_v10 = vrot.slane %v2477_v30, %v6228_v38  ;;  %vm9473_vm13 = vsmask.f32 5376 }
 0x184   : > { %v2502_v21 = vcombine.low %v1655_v18, %v1659_v63  ;;  %v3985_v49 = vor.u32 %v3983_v50, %v8082_v6  ;;  %v3988_v48 = vrot.slane %v3986_v54, 1  ;;  %v3481_v4 = vsel %vm9473_vm13, %v8061_v55, %v8175_v0  ;;  %vm9476_vm2 = vmmov %vm9473_vm13 }
 0x185   : > { %v2509_v26 = vrot.slane %v2501_v14, %v6228_v38  ;;  %v2492_v42 = vrot.slane %v2478_v44, %v6228_v38  ;;  %v3577_v13 = vrot.slane %v8087_v34, 3  ;;  %v3644_v25 = vsel %vm3625_vm10, %v6039_v31, %v8089_v36 }
 0x186   : > { %v2516_v59 = vrot.slane %v2502_v21, %v6228_v38  ;;  %v3989_v6 = vsel %vm9410_vm5, %v3985_v49, %v3988_v48  ;;  %v3683_v28 = vsel %vm3665_vm1, %v3644_v25, %v8121_v7  ;;  %vm9474_vm9 = vcmask 1044480  }
 0x187   : > { %3402 = vrot.lane.b32.xlu1 %v3314_v3, %s6084_s24  ;;  %3270 = vrot.lane.b32.xlu0 %v3219_v15, %s6087_s27  ;;  %v3393_v11 = vpop.permute.xlu0 %3392  ;;  %v2493_v27 = vcombine.low %v2485_v10, %v2492_v42  ;;  %v3578_v24 = vsel %vm9474_vm9, %v3575_v33, %v3577_v13  ;;  %v3722_v57 = vsel %vm9413_vm3, %v3683_v28, %v8136_v8  ;;  %v3990_v41 = vshrl.u32 %v3915_v45, 16  ;;  %vm9477_vm7 = vmmov %vm9474_vm9 }
 0x188   : > { %v2517_v43 = vcombine.low %v2509_v26, %v2516_v59  ;;  %5859 = vmatprep.mubr.msk.bf16.mxu0 %vm9409_vm12, %v3989_v6  ;;  %v3525_v19 = vpop.permute.xlu1 %3524  ;;  %v3761_v61 = vsel %vm3743_vm6, %v3722_v57, %v3259_v5  ;;  %v2952_v9 = vor.u32 %v8038_v62, %v2948_v12  ;;  %v2956_v50 = vrot.slane %v8115_v2, 1 }
 0x189   : > { %v2500_v60 = vrot.slane %v2493_v27, %v6228_v38  ;;  %v3992_v18 = vor.u32 %v3990_v41, %v3988_v48  ;;  %v8258_v15 = vld [vmem:[#allocation2 + $0x98] sm:$0xff]   ;;  %vm9478_vm13 = vcmask 1046528   ;;  %vm9479_vm9 = vsmask.f32 6400 }
 0x18a   : > { %v2524_v55 = vrot.slane %v2517_v43, %v6228_v38  ;;  %v3800_v38 = vsel %vm3782_vm11, %v3761_v61, %v3338_v40  ;;  %v2957_v2 = vsel %vm9410_vm5, %v2952_v9, %v2956_v50  ;;  %v3225_v26 = vshrl.u32 %v8258_v15, 16 }
 0x18b   : > { %3534 = vrot.lane.b32.xlu1 %v3481_v4, %s6088_s28  ;;  %3349 = vrot.lane.b32.xlu0 %v3314_v3, %s6083_s23  ;;  %v2995_v36 = vpop.permute.xlu0 %2994  ;;  %2664 = vst.msk [vmem:[#allocation2 + $0x90] sm:$0xf] %vm9411_vm0, %v2500_v60  ;;  %v3839_v7 = vsel %vm3821_vm14, %v3800_v38, %v3393_v11  ;;  %v2960_v3 = vor.u32 %v8118_v47, %v2956_v50  ;;  %v6040_v47 = vld [vmem:[#allocation2 + $0x50] sm:$0xff]   ;;  %v3228_v4 = vshll.u32 %v8258_v15, 16  ;;  %v3106_v34 = vrot.slane %v8258_v15, 1 }
 0x18c   : > { %2665 = vst.msk [vmem:[#allocation2 + $0x94] sm:$0xf] %vm9411_vm0, %v2524_v55  ;;  %v3878_v16 = vsel %vm9412_vm15, %v3839_v7, %v3525_v19  ;;  %v3604_v33 = vpop.permute.xlu1 %3603  ;;  %v3646_v49 = vsel %vm3625_vm10, %v6040_v47, %v2995_v36  ;;  %v3227_v27 = vrot.slane %v3225_v26, 1  ;;  %v3486_v57 = vrot.slane %v3225_v26, 2 }
 0x18d   : > { %v8212_v8 = vsel %vm9475_vm8, %v3878_v16, %v3604_v33  ;;  %v3230_v43 = vrot.slane %v3228_v4, 2  ;;  %v3487_v19 = vrot.slane %v3228_v4, 3 }
 0x18e   : > { %v3993_v23 = vshll.u32 %v8212_v8, 16  ;;  %v3997_v7 = vshrl.u32 %v8212_v8, 16 }
 0x18f   : > { %3613 = vrot.lane.b32.xlu1 %v3578_v24, %s6085_s25  ;;  %v3074_v17 = vpop.permute.xlu0 %3073  ;;  %v8295_v24 = vrot.slane %v8258_v15, 2  ;;  %v8306_v38 = vor.u32 %v3230_v43, %v3227_v27 }
 0x190   : > { %v8217_v29 = vrot.slane %v3993_v23, 1  ;;  %v3129_v5 = vpop.permute.xlu1 %3128 }
 0x192   : > { %v3996_v35 = vsel %vm9410_vm5, %v3992_v18, %v8217_v29  ;;  %v3999_v33 = vor.u32 %v3997_v7, %v8217_v29  ;;  %v3488_v18 = vor.u32 %v3487_v19, %v3486_v57  ;;  %v8321_v29 = vld [vmem:[#allocation2 + $0x98] ss:$0 sps:$4 sm:$0x11]  }
 0x193   : > { %v8215_v58 = vld [vmem:[#allocation2 + $0x90] sm:$0xff]   ;;  %v8219_v52 = vpop.permute.xlu0 %2996  ;;  %5860 = vmatmul.mubr.msk.bf16.gmra.mxu0 %vm9409_vm12, %v3996_v35 }
 0x194   : > { %v3315_v37 = vrot.slane %v8215_v58, 2  ;;  %v8226_v51 = vshll.u32 %v8215_v58, 16  ;;  %v8229_v32 = vshrl.u32 %v8215_v58, 16  ;;  %v3261_v45 = vpop.permute.xlu1 %3260  ;;  %v3579_v53 = vrot.slane %v8215_v58, 3 }
 0x195   : > { %v8255_v54 = vrot.slane %v8215_v58, 1 }
 0x196   : > { %v3316_v39 = vsel %vm3283_vm4, %v3313_v22, %v3315_v37  ;;  %v3482_v62 = vrot.slane %v8229_v32, 2  ;;  %v3483_v12 = vrot.slane %v8226_v51, 3  ;;  %v3580_v14 = vsel %vm9477_vm7, %v3577_v13, %v3579_v53  ;;  %vm9481_vm7 = vmmov %vm9479_vm9 }
 0x197   : > { %3404 = vrot.lane.b32.xlu0 %v3316_v39, %s6084_s24  ;;  %v8247_v63 = vpop.permute.xlu0 %3075  ;;  %v2964_v40 = vrot.slane %v8226_v51, 1  ;;  %v3221_v44 = vrot.slane %v8226_v51, 2  ;;  %v3052_v48 = vsel %vm9478_vm13, %v3049_v1, %v8255_v54  ;;  %v3685_v13 = vsel %vm3665_vm1, %v3646_v49, %v3074_v17  ;;  %v6028_v49 = vld [vmem:[#allocation2 + $0x98] ss:$0 sps:$4 sm:$0x33]  }
 0x198   : > { %v8243_v46 = vor.u32 %v3483_v12, %v3482_v62  ;;  %v3340_v30 = vpop.permute.xlu1 %3339  ;;  %v3318_v9 = vsel %vm3283_vm4, %v3315_v37, %v8295_v24  ;;  %v3581_v12 = vrot.slane %v8258_v15, 3 }
 0x199   : > { %v2965_v42 = vsel %vm9410_vm5, %v2960_v3, %v2964_v40 }
 0x19a   : > { %v3485_v22 = vsel %vm9476_vm2, %v8175_v0, %v8243_v46  ;;  %v3220_v0 = vrot.slane %v8229_v32, 1  ;;  %vm9480_vm2 = vmmov %vm9478_vm13  ;;  %vm9482_vm13 = vsmask.f32 5376 }
 0x19b   : > { %3536 = vrot.lane.b32.xlu1 %v3485_v22, %s6088_s28  ;;  %3006 = vrot.lane.b32.xlu0 %v2957_v2, %s6086_s26  ;;  %v8266_v10 = vpop.permute.xlu0 %3130  ;;  %v3107_v61 = vsel %vm9480_vm2, %v8255_v54, %v3106_v34  ;;  %v3489_v37 = vsel %vm9482_vm13, %v8243_v46, %v3488_v18  ;;  %v6041_v22 = vld [vmem:[#allocation2 + $0x58] sm:$0xff]   ;;  %vm9485_vm2 = vcmask 523264  }
 0x19c   : > { %v3395_v21 = vpop.permute.xlu1 %3394  ;;  %v3222_v59 = vor.u32 %v3221_v44, %v3220_v0  ;;  %v6029_v0 = vld [vmem:[#allocation2 + $0xa0] ss:$0 sps:$4 sm:$0x33]  }
 0x19d   : > { %v3234_v51 = vshrl.u32 %v6029_v0, 16 }
 0x19e   : > { %v3223_v6 = vsel %vm9479_vm9, %v8154_v20, %v3222_v59  ;;  %v8297_v20 = vld [vmem:[#allocation2 + $0xa0] sm:$0xff]   ;;  %v3232_v8 = vsel %vm9481_vm7, %v3222_v59, %v8306_v38  ;;  %vm9483_vm9 = vcmask 1044480   ;;  %v3053_v59 = vrot.slane %v6028_v49, 1 }
 0x19f   : > { %3615 = vrot.lane.b32.xlu1 %v3580_v14, %s6085_s25  ;;  %3085 = vrot.lane.b32.xlu0 %v8145_v56, %s6081_s19  ;;  %v3724_v56 = vsel %vm9413_vm3, %v3685_v13, %v3129_v5  ;;  %v3263_v25 = vpop.permute.xlu0 %3262  ;;  %v3491_v41 = vshrl.u32 %v8297_v20, 16  ;;  %v3494_v5 = vshll.u32 %v8297_v20, 16  ;;  %v3372_v35 = vrot.slane %v8297_v20, 2  ;;  %vm9486_vm7 = vmmov %vm9483_vm9 }
 0x1a0   : > { %v3527_v11 = vpop.permute.xlu1 %3526  ;;  %v3763_v1 = vsel %vm3743_vm6, %v3724_v56, %v3261_v45  ;;  %v2970_v45 = vshll.u32 %v8321_v29, 16  ;;  %v3582_v44 = vsel %vm9483_vm9, %v3579_v53, %v3581_v12  ;;  %v3583_v58 = vrot.slane %v8297_v20, 3 }
 0x1a1   : > { %v3802_v31 = vsel %vm3782_vm11, %v3763_v1, %v3340_v30  ;;  %v3496_v62 = vrot.slane %v3494_v5, 3  ;;  %v3648_v30 = vsel %vm3625_vm10, %v6041_v22, %v8219_v52  ;;  %v3373_v3 = vsel %vm3283_vm4, %v8295_v24, %v3372_v35 }
 0x1a2   : > { %v3841_v60 = vsel %vm3821_vm14, %v3802_v31, %v3395_v21  ;;  %v3687_v46 = vsel %vm3665_vm1, %v3648_v30, %v8247_v63  ;;  %v2968_v52 = vor.u32 %v8229_v32, %v2964_v40  ;;  %v2972_v21 = vrot.slane %v2970_v45, 1 }
 0x1a3   : > { %3140 = vrot.lane.b32.xlu1 %v3052_v48, %s6082_s20  ;;  %3008 = vrot.lane.b32.xlu0 %v2965_v42, %s6086_s26  ;;  %v3880_v55 = vsel %vm9412_vm15, %v3841_v60, %v3527_v11  ;;  %v3342_v17 = vpop.permute.xlu0 %3341  ;;  %v3726_v47 = vsel %vm9413_vm3, %v3687_v46, %v8266_v10  ;;  %v3237_v32 = vshll.u32 %v6029_v0, 16  ;;  %v3236_v27 = vrot.slane %v3234_v51, 1  ;;  %v9493_v51 = vld [vmem:[#allocation6_spill] sm:$0xff] }
 0x1a4   : > { %v2973_v10 = vsel %vm9410_vm5, %v2968_v52, %v2972_v21 }
 0x1a5   : > { %v3606_v28 = vpop.permute.xlu1 %3605  ;;  %v3239_v43 = vrot.slane %v3237_v32, 2  ;;  %v4333_v32 = vadd.s32 16, %v9493_v51 }
 0x1a6   : > { %v8300_v36 = vsel %vm9475_vm8, %v3880_v55, %v3606_v28  ;;  %vm9484_vm8 = vmmov %vm9482_vm13  ;;  %vm9487_vm13 = vcmask 1046528  }
 0x1a7   : > { %3272 = vrot.lane.b32.xlu1 %v3223_v6, %s6087_s27  ;;  %3087 = vrot.lane.b32.xlu0 %v3052_v48, %s6081_s19  ;;  %v4000_v16 = vshll.u32 %v8300_v36, 16  ;;  %v3765_v48 = vsel %vm3743_vm6, %v3726_v47, %v3263_v25  ;;  %v4004_v11 = vshrl.u32 %v8300_v36, 16  ;;  %v3108_v6 = vrot.slane %v6029_v0, 1  ;;  %vm9488_vm9 = vmmov %vm9487_vm13 }
 0x1a8   : > { %v3804_v42 = vsel %vm3782_vm11, %v3765_v48, %v3342_v17  ;;  %v3584_v25 = vsel %vm9486_vm7, %v3581_v12, %v3583_v58  ;;  %v3054_v60 = vsel %vm9487_vm13, %v8255_v54, %v3053_v59  ;;  %v2974_v36 = vshrl.u32 %v8321_v29, 16 }
 0x1a9   : > { %v4002_v23 = vrot.slane %v4000_v16, 1  ;;  %v3240_v7 = vor.u32 %v3239_v43, %v3236_v27  ;;  %v6030_v16 = vld [vmem:[#allocation2 + $0xa0] ss:$0 sps:$4 sm:$0x77]  }
 0x1ab   : > { %3351 = vrot.lane.b32.xlu1 %v3316_v39, %s6083_s23  ;;  %3142 = vrot.lane.b32.xlu0 %v3107_v61, %s6082_s20  ;;  %v4003_v50 = vsel %vm9410_vm5, %v3999_v33, %v4002_v23  ;;  %v3493_v39 = vrot.slane %v3491_v41, 2  ;;  %v4006_v55 = vor.u32 %v4004_v11, %v4002_v23  ;;  %v3109_v61 = vsel %vm9488_vm9, %v3106_v34, %v3108_v6  ;;  %v6031_v33 = vld [vmem:[#allocation2 + $0xa8] ss:$0 sps:$4 sm:$0x77]  }
 0x1ac   : > { %5863 = vmatprep.mubr.msk.bf16.mxu0 %vm9409_vm12, %v4003_v50  ;;  %v3319_v41 = vrot.slane %v6030_v16, 2  ;;  %v3500_v5 = vshrl.u32 %v6031_v33, 16  ;;  %v6043_v11 = vld [vmem:[#allocation2 + $0x68] sm:$0xff]  }
 0x1ad   : > { %v8342_v14 = vor.u32 %v3496_v62, %v3493_v39  ;;  %v6032_v62 = vld [vmem:[#allocation2 + $0xa8] ss:$0 sps:$4 sm:$0xff]  }
 0x1ae   : > { %v3502_v29 = vrot.slane %v3500_v5, 2  ;;  %v3585_v22 = vrot.slane %v6032_v62, 3 }
 0x1af   : > { %3406 = vrot.lane.b32.xlu1 %v3318_v9, %s6084_s24  ;;  %3274 = vrot.lane.b32.xlu0 %v3232_v8, %s6087_s27  ;;  %v3498_v40 = vsel %vm9484_vm8, %v3488_v18, %v8342_v14  ;;  %vm9489_vm8 = vsmask.f32 6400  ;;  %v3320_v8 = vsel %vm3283_vm4, %v8295_v24, %v3319_v41  ;;  %v3374_v18 = vrot.slane %v6031_v33, 2  ;;  %v6042_v24 = vld [vmem:[#allocation2 + $0x60] sm:$0xff]  }
 0x1b0   : > { %v3397_v2 = vpop.permute.xlu0 %3396  ;;  %v3241_v23 = vsel %vm9489_vm8, %v8306_v38, %v3240_v7 }
 0x1b1   : > { %v3843_v53 = vsel %vm3821_vm14, %v3804_v42, %v3397_v2  ;;  %v3375_v38 = vsel %vm3283_vm4, %v3372_v35, %v3374_v18  ;;  %vm9491_vm4 = vmmov %vm9486_vm7  ;;  %vm9492_vm7 = vcmask 523264  }
 0x1b2   : > { %vm9494_vm13 = vmmov %vm9492_vm7 }
 0x1b3   : > { %3538 = vrot.lane.b32.xlu1 %v3489_v37, %s6088_s28  ;;  %3353 = vrot.lane.b32.xlu0 %v3318_v9, %s6083_s23  ;;  %v3503_v9 = vshll.u32 %v6031_v33, 16 }
 0x1b4   : > { %v8353_v63 = vpop.permute.xlu0 %2998 }
 0x1b5   : > { %v3505_v50 = vrot.slane %v3503_v9, 3  ;;  %v3650_v45 = vsel %vm3625_vm10, %v6042_v24, %v8353_v63 }
 0x1b6   : > { %v3529_v26 = vpop.permute.xlu1 %3528 }
 0x1b7   : > { %3617 = vrot.lane.b32.xlu1 %v3582_v44, %s6085_s25  ;;  %3408 = vrot.lane.b32.xlu0 %v3373_v3, %s6084_s24  ;;  %v3882_v4 = vsel %vm9412_vm15, %v3843_v53, %v3529_v26  ;;  %v3506_v39 = vor.u32 %v3505_v50, %v3502_v29  ;;  %v3586_v44 = vsel %vm9491_vm4, %v3583_v58, %v3585_v22 }
 0x1b8   : > { %v3078_v31 = vpop.permute.xlu0 %3077 }
 0x1b9   : > { %v3689_v30 = vsel %vm3665_vm1, %v3650_v45, %v3078_v31 }
 0x1ba   : > { %v3608_v13 = vpop.permute.xlu1 %3607 }
 0x1bb   : > { %v8365_v56 = vsel %vm9485_vm2, %v3882_v4, %v3608_v13  ;;  %3540 = vrot.lane.b32.xlu1 %v3498_v40, %s6088_s28  ;;  %3010 = vrot.lane.b32.xlu0 %v2973_v10, %s6086_s26  ;;  %vm9490_vm2 = vsmask.f32 5376  ;;  %v8424_v53 = vmul.u32.u64.low 3817748708, %v9493_v51  ;;  %v8425_v40 = vmul.u32.u64.high 3817748708, %v9493_v51, %v8424_v53 }
 0x1bc   : > { %v4007_v1 = vshll.u32 %v8365_v56, 16  ;;  %v3001_v54 = vpop.permute.xlu0 %3000  ;;  %v3507_v2 = vsel %vm9490_vm2, %v8342_v14, %v3506_v39  ;;  %v4011_v26 = vshrl.u32 %v8365_v56, 16  ;;  %v4334_v10 = vadd.s32 24, %v9493_v51 }
 0x1bd   : > { %v8429_v13 = vmul.u32.u64.low 3817748708, %v4333_v32  ;;  %v8430_v56 = vmul.u32.u64.high 3817748708, %v4333_v32, %v8429_v13  ;;  %v8463_v39 = vadd.s32 32, %v9493_v51 }
 0x1be   : > { %v4009_v28 = vrot.slane %v4007_v1, 1  ;;  %v3133_v57 = vpop.permute.xlu1 %3132  ;;  %v3652_v1 = vsel %vm3625_vm10, %v6043_v11, %v3001_v54  ;;  %v6044_v11 = vld [vmem:[#allocation2 + $0x70] sm:$0xff]  }
 0x1bf   : > { %3619 = vrot.lane.b32.xlu1 %v3584_v25, %s6085_s25  ;;  %3089 = vrot.lane.b32.xlu0 %v3054_v60, %s6081_s19  ;;  %v3728_v35 = vsel %vm9413_vm3, %v3689_v30, %v3133_v57 }
 0x1c0   : > { %v4010_v19 = vsel %vm9410_vm5, %v4006_v55, %v4009_v28  ;;  %v3080_v15 = vpop.permute.xlu0 %3079  ;;  %v4013_v20 = vor.u32 %v4011_v26, %v4009_v28 }
 0x1c1   : > { %5864 = vmatmul.mubr.msk.bf16.gmra.mxu0 %vm9409_vm12, %v4010_v19  ;;  %v3691_v43 = vsel %vm3665_vm1, %v3652_v1, %v3080_v15 }
 0x1c2   : > { %v3265_v17 = vpop.permute.xlu1 %3264 }
 0x1c3   : > { %3144 = vrot.lane.b32.xlu1 %v3109_v61, %s6082_s20  ;;  %3012 = vrot.lane.b32.xlu0 %v2974_v36, %s6086_s26  ;;  %v3767_v46 = vsel %vm3743_vm6, %v3728_v35, %v3265_v17  ;;  %v4373_v36 = vshrl.u32 %v8425_v40, 4  ;;  %v4395_v17 = vshrl.u32 %v8430_v56, 4  ;;  %s282_s26 = scalar_lea.vmem %s9387_s6, %s9625_s22 }
 0x1c5   : > { %v4374_v5 = vmul.u32 18, %v4373_v36 }
 0x1c6   : > { %v3344_v34 = vpop.permute.xlu1 %3343 }
 0x1c7   : > { %3276 = vrot.lane.b32.xlu1 %v3241_v23, %s6087_s27  ;;  %3091 = vrot.lane.b32.xlu0 %v3053_v59, %s6081_s19  ;;  %v3806_v52 = vsel %vm3782_vm11, %v3767_v46, %v3344_v34  ;;  %v4332_v59 = vadd.s32 8, %v9493_v51  ;;  %v8456_v34 = vadd.s32 48, %v9493_v51 }
 0x1c9   : > { %v8437_v31 = vmul.u32.u64.low 3817748708, %v4332_v59  ;;  %v8438_v25 = vmul.u32.u64.high 3817748708, %v4332_v59, %v8437_v31 }
 0x1cb   : > { %3355 = vrot.lane.b32.xlu1 %v3320_v8, %s6083_s23  ;;  %3146 = vrot.lane.b32.xlu0 %v3108_v6, %s6082_s20  ;;  %v4384_v15 = vshrl.u32 %v8438_v25, 4 }
 0x1cd   : > { %v4385_v24 = vmul.u32 18, %v4384_v15 }
 0x1ce   : > { %v3135_v37 = vpop.permute.xlu0 %3134  ;;  %v3399_v12 = vpop.permute.xlu1 %3398 }
 0x1cf   : > { %3410 = vrot.lane.b32.xlu1 %v3375_v38, %s6084_s24  ;;  %3278 = vrot.lane.b32.xlu0 %v3236_v27, %s6087_s27  ;;  %v3845_v14 = vsel %vm3821_vm14, %v3806_v52, %v3399_v12  ;;  %v8433_v6 = vmul.u32.u64.low 3817748708, %v4334_v10  ;;  %v8434_v27 = vmul.u32.u64.high 3817748708, %v4334_v10, %v8433_v6  ;;  %v3730_v60 = vsel %vm9413_vm3, %v3691_v43, %v3135_v37 }
 0x1d0   : > { %v4396_v38 = vmul.u32 18, %v4395_v17  ;;  %v4375_v37 = vsub.s32 %v9493_v51, %v4374_v5 }
 0x1d1   : > { %v4406_v9 = vshrl.u32 %v8434_v27, 4 }
 0x1d2   : > { %v4397_v35 = vsub.s32 %v4333_v32, %v4396_v38  ;;  %vm4763_vm9 = vcmp.ne.s32.totalorder %v4375_v37, 0  ;;  %vm4799_vm8 = vcmp.lt.s32.totalorder %v4375_v37, 0  ;;  %v4871_v26 = vadd.s32 18, %v4375_v37 }
 0x1d3   : > { %3542 = vrot.lane.b32.xlu1 %v3507_v2, %s6088_s28  ;;  %3357 = vrot.lane.b32.xlu0 %v3319_v41, %s6083_s23  ;;  %v3267_v0 = vpop.permute.xlu0 %3266  ;;  %v4407_v12 = vmul.u32 18, %v4406_v9  ;;  %v8470_v45 = vmul.u32.u64.low 3817748708, %v8456_v34  ;;  %v8471_v2 = vmul.u32.u64.high 3817748708, %v8456_v34, %v8470_v45  ;;  %s279_s23 = scalar_lea.vmem %s9386_s5, %s9625_s22 }
 0x1d4   : > { %v3531_v3 = vpop.permute.xlu1 %3530  ;;  %v3769_v57 = vsel %vm3743_vm6, %v3730_v60, %v3267_v0  ;;  %v8481_v0 = vadd.s32 40, %v9493_v51  ;;  %vm4765_vm2 = vcmp.ne.s32.totalorder %v4397_v35, 0  ;;  %vm4801_vm4 = vcmp.lt.s32.totalorder %v4397_v35, 0 }
 0x1d5   : > { %v3884_v21 = vsel %vm9412_vm15, %v3845_v14, %v3531_v3  ;;  %v8477_v3 = vmul.u32.u64.low 3817748708, %v8463_v39  ;;  %v8478_v46 = vmul.u32.u64.high 3817748708, %v8463_v39, %v8477_v3  ;;  %v4408_v52 = vsub.s32 %v4334_v10, %v4407_v12 }
 0x1d6   : > { %v4386_v14 = vsub.s32 %v4332_v59, %v4385_v24 }
 0x1d7   : > { %3621 = vrot.lane.b32.xlu1 %v3586_v44, %s6085_s25  ;;  %3412 = vrot.lane.b32.xlu0 %v3374_v18, %s6084_s24  ;;  %v3346_v63 = vpop.permute.xlu0 %3345  ;;  %v4874_v10 = vadd.s32 18, %v4408_v52  ;;  %v4417_v56 = vshrl.u32 %v8478_v46, 4 }
 0x1d8   : > { %v3610_v47 = vpop.permute.xlu1 %3609  ;;  %v3808_v19 = vsel %vm3782_vm11, %v3769_v57, %v3346_v63  ;;  %vm4800_vm0 = vcmp.lt.s32.totalorder %v4386_v14, 0  ;;  %v4872_v13 = vadd.s32 18, %v4386_v14 }
 0x1d9   : > { %v3923_v49 = vsel %vm9492_vm7, %v3884_v21, %v3610_v47  ;;  %vm8493_vm7 = vmand %vm4799_vm8, %vm4763_vm9 }
 0x1da   : > { %v4014_v48 = vshll.u32 %v3923_v49, 16  ;;  %v4018_v23 = vshrl.u32 %v3923_v49, 16  ;;  %v4907_v59 = vsel %vm8493_vm7, %v4871_v26, %v4375_v37 }
 0x1db   : > { %3544 = vrot.lane.b32.xlu0 %v3502_v29, %s6088_s28  ;;  %3623 = vrot.lane.b32.xlu1 %v3585_v22, %s6085_s25  ;;  %v8474_v22 = vadd.s32 56, %v9493_v51 }
 0x1dc   : > { %v4016_v42 = vrot.slane %v4014_v48, 1  ;;  %v8490_v48 = vmul.u32.u64.low 3817748708, %v8481_v0  ;;  %v8491_v63 = vmul.u32.u64.high 3817748708, %v8481_v0, %v8490_v48 }
 0x1dd   : > { %v8486_v21 = vmul.u32.u64.low 3817748708, %v8474_v22  ;;  %v8487_v47 = vmul.u32.u64.high 3817748708, %v8474_v22, %v8486_v21 }
 0x1de   : > { %v4017_v58 = vsel %vm9410_vm5, %v4013_v20, %v4016_v42  ;;  %v4020_v8 = vor.u32 %v4018_v23, %v4016_v42  ;;  %v4873_v42 = vadd.s32 18, %v4397_v35 }
 0x1df   : > { %5867 = vmatprep.mubr.msk.bf16.mxu1 %vm9409_vm12, %v4017_v58  ;;  %v4439_v58 = vshrl.u32 %v8471_v2, 4  ;;  %v4450_v25 = vshrl.u32 %v8487_v47, 4 }
 0x1e1   : > { %v3401_v4 = vpop.permute.xlu0 %3400  ;;  %v4440_v31 = vmul.u32 18, %v4439_v58  ;;  %v4451_v5 = vmul.u32 18, %v4450_v25 }
 0x1e2   : > { %v3847_v61 = vsel %vm3821_vm14, %v3808_v19, %v3401_v4 }
 0x1e5   : > { %v3533_v55 = vpop.permute.xlu1 %3532  ;;  %v8441_v28 = vpop.permute.xlu0 %3002 }
 0x1e6   : > { %v3886_v7 = vsel %vm9412_vm15, %v3847_v61, %v3533_v55  ;;  %vm8500_vm15 = vmand %vm4801_vm4, %vm4765_vm2  ;;  %v3654_v1 = vsel %vm3625_vm10, %v6044_v11, %v8441_v28  ;;  %v4418_v61 = vmul.u32 18, %v4417_v56  ;;  %vm9508_vm4 = vcmask 523264  }
 0x1e7   : > { %v4909_v43 = vsel %vm8500_vm15, %v4873_v42, %v4397_v35  ;;  %vm9507_vm15 = vcmask 457728  }
 0x1e8   : > { %v8559_v37 = vsub.s32 %v8463_v39, %v4418_v61  ;;  %v8570_v39 = vsub.s32 %v8474_v22, %v4451_v5 }
 0x1e9   : > { %v3612_v16 = vpop.permute.xlu1 %3611  ;;  %v3082_v33 = vpop.permute.xlu0 %3081 }
 0x1ea   : > { %v8449_v54 = vsel %vm9494_vm13, %v3886_v7, %v3612_v16  ;;  %vm4766_vm13 = vcmp.ne.s32.totalorder %v4408_v52, 0  ;;  %v3693_v27 = vsel %vm3665_vm1, %v3654_v1, %v3082_v33  ;;  %v4428_v7 = vshrl.u32 %v8491_v63, 4 }
 0x1eb   : > { %v4021_v41 = vshll.u32 %v8449_v54, 16  ;;  %v4025_v24 = vshrl.u32 %v8449_v54, 16  ;;  %v4875_v20 = vadd.s32 18, %v8559_v37  ;;  %v4878_v4 = vadd.s32 18, %v8570_v39 }
 0x1ec   : > { %v4429_v12 = vmul.u32 18, %v4428_v7 }
 0x1ed   : > { %v8458_v18 = vrot.slane %v4021_v41, 1  ;;  %v3137_v29 = vpop.permute.xlu1 %3136  ;;  %v8460_v50 = vpop.permute.xlu0 %3004  ;;  %v8543_v41 = vsub.s32 %v8456_v34, %v4440_v31 }
 0x1ee   : > { %v3732_v60 = vsel %vm9413_vm3, %v3693_v27, %v3137_v29  ;;  %v8581_v22 = vsub.s32 %v8481_v0, %v4429_v12 }
 0x1ef   : > { %v4024_v62 = vsel %vm9410_vm5, %v4020_v8, %v8458_v18  ;;  %vm4764_vm5 = vcmp.ne.s32.totalorder %v4386_v14, 0  ;;  %v6089_v8 = vmov 0.0   ;;  %vm4769_vm7 = vcmp.ne.s32.totalorder %v8543_v41, 0 }
 0x1f0   : > { %5868 = vmatmul.mubr.msk.bf16.vlgmr.msra.gmra.mxu1 %vm9409_vm12, %v4024_v62  ;;  %vm4802_vm12 = vcmp.lt.s32.totalorder %v4408_v52, 0  ;;  %vm8514_vm8 = vmand %vm4800_vm0, %vm4764_vm5  ;;  %vm4945_vm0 = vcmp.lt.s32.totalorder %v4909_v43, 16  ;;  %v4027_v54 = vor.u32 %v4025_v24, %v8458_v18  ;;  %v4877_v21 = vadd.s32 18, %v8543_v41  ;;  %v6045_v43 = vld [vmem:[#allocation2 + $0x78] sm:$0xff]  }
 0x1f1   : > { %v3269_v30 = vpop.permute.xlu1 %3268  ;;  %v8483_v44 = vpop.permute.xlu0 %3083  ;;  %vm8506_vm9 = vmand %vm4802_vm12, %vm4766_vm13  ;;  %vm8523_vm12 = vcmp.lt.s32.totalorder %v4907_v59, 16  ;;  %v4908_v36 = vsel %vm8514_vm8, %v4872_v13, %v4386_v14  ;;  %v5667_v62 = vsel %vm4945_vm0, 1.0, %v6089_v8  ;;  %vm4805_vm13 = vcmp.lt.s32.totalorder %v8543_v41, 0 }
 0x1f2   : > { %v4910_v28 = vsel %vm8506_vm9, %v4874_v10, %v4408_v52  ;;  %v3771_v19 = vsel %vm3743_vm6, %v3732_v60, %v3269_v30  ;;  %v5665_v29 = vsel %vm8523_vm12, 1.0, %v6089_v8  ;;  %vm4944_vm2 = vcmp.lt.s32.totalorder %v4908_v36, 16 }
 0x1f3   : > { %vm8538_vm5 = vcmp.lt.s32.totalorder %v4910_v28, 16  ;;  %v5666_v3 = vsel %vm4944_vm2, 1.0, %v6089_v8  ;;  %vm9509_vm9 = vcmask 60416   ;;  %vm4767_vm8 = vcmp.ne.s32.totalorder %v8559_v37, 0 }
 0x1f4   : > { %v5668_v30 = vsel %vm8538_vm5, 1.0, %v6089_v8  ;;  %vm4803_vm12 = vcmp.lt.s32.totalorder %v8559_v37, 0  ;;  %vm9510_vm0 = vsmask.f32 7424  ;;  %vm8589_vm5 = vmand %vm4805_vm13, %vm4769_vm7  ;;  %v3656_v31 = vsel %vm3625_vm10, %v6045_v43, %v8460_v50 }
 0x1f5   : > { %v3348_v49 = vpop.permute.xlu1 %3347  ;;  %v8498_v32 = vpop.permute.xlu0 %3138  ;;  %vm9514_vm2 = vmmov %vm9509_vm9  ;;  %v4913_v59 = vsel %vm8589_vm5, %v4877_v21, %v8543_v41  ;;  %v3695_v61 = vsel %vm3665_vm1, %v3656_v31, %v8483_v44 }
 0x1f6   : > { %v3810_v16 = vsel %vm3782_vm11, %v3771_v19, %v3348_v49  ;;  %vm8603_vm7 = vmand %vm4803_vm12, %vm4767_vm8  ;;  %v3734_v23 = vsel %vm9413_vm3, %v3695_v61, %v8498_v32 }
 0x1f7   : > { %vm9517_vm13 = vmmov %vm9514_vm2  ;;  %v4911_v60 = vsel %vm8603_vm7, %v4875_v20, %v8559_v37  ;;  %vm9529_vm7 = vcmask 457728  }
 0x1f8   : > { %vm9518_vm8 = vmmov %vm9514_vm2 }
 0x1f9   : > { %v3403_v53 = vpop.permute.xlu1 %3402  ;;  %v8535_v33 = vpop.permute.xlu0 %3270 }
 0x1fa   : > { %v3849_v17 = vsel %vm3821_vm14, %v3810_v16, %v3403_v53 }
 0x1fd   : > { %v3535_v55 = vpop.permute.xlu1 %3534  ;;  %v3350_v46 = vpop.permute.xlu0 %3349 }
 0x1fe   : > { %v3888_v9 = vsel %vm9507_vm15, %v3849_v17, %v3535_v55  ;;  %vm9513_vm15 = vcmask 588800   ;;  %v4876_v55 = vadd.s32 18, %v8581_v22 }
 0x201   : > { %v3614_v15 = vpop.permute.xlu1 %3613  ;;  %v5849_v34 = vpop.f32.mrf.mxu0 }
 0x202   : > { %v8555_v38 = vsel %vm9508_vm4, %v3888_v9, %v3614_v15  ;;  %v5741_v2 = vpack.c.bf16 %v5849_v34, %v5849_v34  ;;  %v5053_v26 = vmul.f32 %v5849_v34, %v5667_v62  ;;  %vm4770_vm4 = vcmp.ne.s32.totalorder %v8570_v39, 0 }
 0x203   : > { %v4028_v45 = vshll.u32 %v8555_v38, 16  ;;  %v4187_v35 = vpop.f32.mrf.mxu0 }
 0x204   : > { %5425 = vst.msk [vmem:[%s8552_s18 + $0x8] sm:$0xf] %vm9509_vm9, %v5741_v2  ;;  %v5051_v14 = vmul.f32 %v5665_v29, %v4187_v35  ;;  %v5739_v47 = vpack.c.bf16 %v4187_v35, %v4187_v35  ;;  %vm4806_vm9 = vcmp.lt.s32.totalorder %v8570_v39, 0  ;;  %v5167_v56 = vmul.f32 %v5849_v34, %v5053_v26 }
 0x205   : > { %v8573_v52 = vrot.slane %v4028_v45, 1  ;;  %v5850_v49 = vpop.f32.mrf.mxu0  ;;  %vm8623_vm12 = vmand %vm4806_vm9, %vm4770_vm4  ;;  %v5090_v57 = vsel %vm3625_vm10, %v5053_v26, 0.0  ;;  %v3773_v29 = vsel %vm3743_vm6, %v3734_v23, %v8535_v33  ;;  %vm8661_vm4 = vcmp.lt.s32.totalorder %v4911_v60, 16 }
 0x206   : > { %5423 = vst.msk [vmem:[%s8552_s18] sm:$0xf] %vm9514_vm2, %v5739_v47  ;;  %v5742_v63 = vpack.c.bf16 %v5850_v49, %v5850_v49  ;;  %v5165_v42 = vmul.f32 %v5051_v14, %v4187_v35  ;;  %v5054_v58 = vmul.f32 %v5850_v49, %v5668_v30  ;;  %v5087_v11 = vsel %vm3625_vm10, %v5051_v14, 0.0 }
 0x207   : > { %v4031_v18 = vsel %vm9510_vm0, %v4027_v54, %v8573_v52  ;;  %v4190_v0 = vpop.f32.mrf.mxu0  ;;  %vm4768_vm0 = vcmp.ne.s32.totalorder %v8581_v22, 0  ;;  %v4914_v50 = vsel %vm8623_vm12, %v4878_v4, %v8570_v39  ;;  %v5204_v44 = vsel %vm3625_vm10, %v5167_v56, 0.0 }
 0x208   : > { %5871 = vmatprep.mubr.msk.bf16.mxu1 %vm9513_vm15, %v4031_v18  ;;  %v5052_v53 = vmul.f32 %v5666_v3, %v4190_v0  ;;  %v5740_v40 = vpack.c.bf16 %v4190_v0, %v4190_v0  ;;  %5426 = vst.msk [vmem:[%s8552_s18 + $0xc] sm:$0xf] %vm9517_vm13, %v5742_v63  ;;  %vm4804_vm15 = vcmp.lt.s32.totalorder %v8581_v22, 0  ;;  %v5201_v28 = vsel %vm3625_vm10, %v5165_v42, 0.0 }
 0x209   : > { %v3405_v13 = vpop.permute.xlu0 %3404  ;;  %v5168_v19 = vmul.f32 %v5850_v49, %v5054_v58  ;;  %vm8645_vm5 = vmand %vm4804_vm15, %vm4768_vm0  ;;  %v5092_v9 = vsel %vm3625_vm10, %v5054_v58, 0.0  ;;  %vm8655_vm2 = vcmp.lt.s32.totalorder %v4913_v59, 16  ;;  %v3812_v37 = vsel %vm3782_vm11, %v3773_v29, %v3350_v46 }
 0x20a   : > { %v5088_v1 = vsel %vm3625_vm10, %v5052_v53, 0.0  ;;  %v5166_v6 = vmul.f32 %v5052_v53, %v4190_v0  ;;  %5424 = vst.msk [vmem:[%s8552_s18 + $0x4] sm:$0xf] %vm9518_vm8, %v5740_v40  ;;  %vm8667_vm9 = vcmp.lt.s32.totalorder %v4914_v50, 16  ;;  %v4912_v45 = vsel %vm8645_vm5, %v4876_v55, %v8581_v22  ;;  %vm9531_vm15 = vmmov %vm9518_vm8 }
 0x20b   : > { %v5089_v25 = vadd.f32 %v5088_v1, %v5087_v11  ;;  %v5206_v12 = vsel %vm3625_vm10, %v5168_v19, 0.0  ;;  %v3851_v33 = vsel %vm3821_vm14, %v3812_v37, %v3405_v13  ;;  %v8676_v30 = vadd.s32 80, %v9493_v51  ;;  %vm9534_vm5 = vmmov %vm9531_vm15 }
 0x20c   : > { %v5202_v36 = vsel %vm3625_vm10, %v5166_v6, 0.0  ;;  %v8679_v35 = vadd.s32 64, %v9493_v51  ;;  %v5671_v46 = vsel %vm8655_vm2, 1.0, %v6089_v8  ;;  %vm9530_vm13 = vcmask 523264   ;;  %vm9535_vm2 = vmmov %vm9534_vm5 }
 0x20d   : > { %v5091_v7 = vadd.f32 %v5090_v57, %v5089_v25  ;;  %v5203_v16 = vadd.f32 %v5202_v36, %v5201_v28  ;;  %v3537_v41 = vpop.permute.xlu1 %3536  ;;  %v8651_v5 = vpop.permute.xlu0 %3006  ;;  %v5669_v47 = vsel %vm8661_vm4, 1.0, %v6089_v8  ;;  %vm4948_vm0 = vcmp.lt.s32.totalorder %v4912_v45, 16  ;;  %vm9536_vm4 = vmmov %vm9535_vm2 }
 0x20e   : > { %v3890_v3 = vsel %vm9529_vm7, %v3851_v33, %v3537_v41  ;;  %v8694_v49 = vadd.s32 88, %v9493_v51  ;;  %v4032_v22 = vshrl.u32 %v8555_v38, 16  ;;  %v5672_v48 = vsel %vm8667_vm9, 1.0, %v6089_v8  ;;  %vm9537_vm9 = vmmov %vm9529_vm7 }
 0x20f   : > { %v5205_v34 = vadd.f32 %v5204_v44, %v5203_v16  ;;  %v5093_v32 = vadd.f32 %v5092_v9, %v5091_v7  ;;  %v8702_v0 = vmul.u32.u64.low 3817748708, %v8676_v30  ;;  %v8703_v20 = vmul.u32.u64.high 3817748708, %v8676_v30, %v8702_v0 }
 0x210   : > { %v8706_v42 = vmul.u32.u64.low 3817748708, %v8679_v35  ;;  %v8707_v58 = vmul.u32.u64.high 3817748708, %v8679_v35, %v8706_v42  ;;  %v4034_v53 = vor.u32 %v4032_v22, %v8573_v52  ;;  %v5670_v4 = vsel %vm4948_vm0, 1.0, %v6089_v8  ;;  %v6046_v0 = vld [vmem:[#allocation2 + $0x80] sm:$0xff]  }
 0x211   : > { %v5207_v2 = vadd.f32 %v5206_v12, %v5205_v34  ;;  %v3616_v39 = vpop.permute.xlu1 %3615  ;;  %v8682_v54 = vpop.permute.xlu0 %3085  ;;  %v8718_v11 = vmul.u32.u64.low 3817748708, %v8694_v49  ;;  %v8719_v1 = vmul.u32.u64.high 3817748708, %v8694_v49, %v8718_v11  ;;  %v8722_v6 = vadd.s32 72, %v9493_v51 }
 0x212   : > { %v8688_v14 = vsel %vm9530_vm13, %v3890_v3, %v3616_v39  ;;  %vm9532_vm8 = vsmask.f32 7424  ;;  %vm9533_vm12 = vcmask 588800   ;;  %v4483_v37 = vshrl.u32 %v8703_v20, 4 }
 0x213   : > { %v5853_v21 = vpop.f32.mrf.mxu0  ;;  %v4035_v18 = vshll.u32 %v8688_v14, 16  ;;  %v8736_v16 = vmul.u32.u64.low 3817748708, %v8722_v6  ;;  %v8737_v50 = vmul.u32.u64.high 3817748708, %v8722_v6, %v8736_v16  ;;  %v4461_v45 = vshrl.u32 %v8707_v58, 4 }
 0x214   : > { %v5745_v26 = vpack.c.bf16 %v5853_v21, %v5853_v21  ;;  %v5057_v27 = vmul.f32 %v5853_v21, %v5671_v46  ;;  %v4494_v46 = vshrl.u32 %v8719_v1, 4  ;;  %v3658_v20 = vsel %vm3625_vm10, %v6046_v0, %v8651_v5 }
 0x215   : > { %v4203_v63 = vpop.f32.mrf.mxu0  ;;  %v8710_v40 = vrot.slane %v4035_v18, 1  ;;  %v3141_v38 = vpop.permute.xlu1 %3140  ;;  %v4484_v18 = vmul.u32 18, %v4483_v37  ;;  %v3697_v42 = vsel %vm3665_vm1, %v3658_v20, %v8682_v54  ;;  %v8817_v37 = vadd.s32 96, %v9493_v51 }
 0x216   : > { %v8712_v10 = vpop.permute.xlu0 %3008  ;;  %5429 = vst.msk [vmem:[%s8552_s18 + $0x18] sm:$0xf] %vm9531_vm15, %v5745_v26  ;;  %v5055_v59 = vmul.f32 %v5669_v47, %v4203_v63  ;;  %v5743_v13 = vpack.c.bf16 %v4203_v63, %v4203_v63  ;;  %v5171_v17 = vmul.f32 %v5853_v21, %v5057_v27  ;;  %v5098_v34 = vsel %vm3625_vm10, %v5057_v27, 0.0 }
 0x217   : > { %v5854_v56 = vpop.f32.mrf.mxu0  ;;  %v4038_v52 = vsel %vm9532_vm8, %v4034_v53, %v8710_v40  ;;  %v4462_v26 = vmul.u32 18, %v4461_v45  ;;  %v4495_v58 = vmul.u32 18, %v4494_v46  ;;  %v3736_v53 = vsel %vm9413_vm3, %v3697_v42, %v3141_v38 }
 0x218   : > { %v5094_v43 = vsel %vm3625_vm10, %v5055_v59, 0.0  ;;  %5872 = vmatmul.mubr.msk.bf16.gmra.mxu1 %vm9533_vm12, %v4038_v52  ;;  %v5169_v25 = vmul.f32 %v5055_v59, %v4203_v63  ;;  %5427 = vst.msk [vmem:[%s8552_s18 + $0x10] sm:$0xf] %vm9534_vm5, %v5743_v13  ;;  %v5746_v60 = vpack.c.bf16 %v5854_v56, %v5854_v56  ;;  %v5058_v19 = vmul.f32 %v5854_v56, %v5672_v48 }
 0x219   : > { %v5095_v31 = vadd.f32 %v5094_v43, %v5093_v32  ;;  %v4206_v55 = vpop.f32.mrf.mxu0  ;;  %v3273_v57 = vpop.permute.xlu1 %3272  ;;  %v5212_v33 = vsel %vm3625_vm10, %v5171_v17, 0.0  ;;  %v4472_v63 = vshrl.u32 %v8737_v50, 4  ;;  %v4485_v13 = vsub.s32 %v8676_v30, %v4484_v18 }
 0x21a   : > { %v8730_v28 = vpop.permute.xlu0 %3087  ;;  %v5056_v36 = vmul.f32 %v5670_v4, %v4206_v55  ;;  %v5744_v61 = vpack.c.bf16 %v4206_v55, %v4206_v55  ;;  %v5208_v7 = vsel %vm3625_vm10, %v5169_v25, 0.0  ;;  %5430 = vst.msk [vmem:[%s8552_s18 + $0x1c] sm:$0xf] %vm9535_vm2, %v5746_v60  ;;  %v5172_v62 = vmul.f32 %v5854_v56, %v5058_v19  ;;  %v6047_v25 = vld [vmem:[#allocation2 + $0x88] sm:$0xff]  }
 0x21b   : > { %v5209_v23 = vadd.f32 %v5208_v7, %v5207_v2  ;;  %v5100_v2 = vsel %vm3625_vm10, %v5058_v19, 0.0  ;;  %v3775_v56 = vsel %vm3743_vm6, %v3736_v53, %v3273_v57  ;;  %v4463_v11 = vsub.s32 %v8679_v35, %v4462_v26 }
 0x21c   : > { %v5096_v41 = vsel %vm3625_vm10, %v5056_v36, 0.0  ;;  %v5170_v44 = vmul.f32 %v5056_v36, %v4206_v55  ;;  %5428 = vst.msk [vmem:[%s8552_s18 + $0x14] sm:$0xf] %vm9536_vm4, %v5744_v61  ;;  %v5214_v22 = vsel %vm3625_vm10, %v5172_v62, 0.0  ;;  %v4473_v1 = vmul.u32 18, %v4472_v63 }
 0x21d   : > { %v5097_v9 = vadd.f32 %v5096_v41, %v5095_v31  ;;  %v3352_v15 = vpop.permute.xlu1 %3351  ;;  %v8766_v5 = vsub.s32 %v8694_v49, %v4495_v58  ;;  %vm4773_vm7 = vcmp.ne.s32.totalorder %v4485_v13, 0  ;;  %vm4771_vm0 = vcmp.ne.s32.totalorder %v4463_v11, 0 }
 0x21e   : > { %v3143_v29 = vpop.permute.xlu0 %3142  ;;  %v5210_v32 = vsel %vm3625_vm10, %v5170_v44, 0.0  ;;  %v3814_v52 = vsel %vm3782_vm11, %v3775_v56, %v3352_v15  ;;  %vm4807_vm15 = vcmp.lt.s32.totalorder %v4463_v11, 0  ;;  %v4474_v30 = vsub.s32 %v8722_v6, %v4473_v1 }
 0x21f   : > { %v5099_v12 = vadd.f32 %v5098_v34, %v5097_v9  ;;  %v5211_v24 = vadd.f32 %v5210_v32, %v5209_v23  ;;  %v4039_v35 = vshrl.u32 %v8688_v14, 16  ;;  %v3660_v60 = vsel %vm3625_vm10, %v6047_v25, %v8712_v10  ;;  %vm8783_vm5 = vmand %vm4807_vm15, %vm4771_vm0 }
 0x220   : > { %vm4809_vm8 = vcmp.lt.s32.totalorder %v4485_v13, 0  ;;  %v3699_v49 = vsel %vm3665_vm1, %v3660_v60, %v8730_v28  ;;  %v4881_v57 = vadd.s32 18, %v4485_v13  ;;  %v4879_v19 = vadd.s32 18, %v4463_v11 }
 0x221   : > { %v5213_v3 = vadd.f32 %v5212_v33, %v5211_v24  ;;  %v8748_v39 = vadd.f32 %v5100_v2, %v5099_v12  ;;  %v3407_v21 = vpop.permute.xlu1 %3406  ;;  %vm4774_vm12 = vcmp.ne.s32.totalorder %v8766_v5, 0  ;;  %v4041_v36 = vor.u32 %v4039_v35, %v8710_v40  ;;  %vm8790_vm4 = vmand %vm4809_vm8, %vm4773_vm7 }
 0x222   : > { %v3275_v47 = vpop.permute.xlu0 %3274  ;;  %v3853_v27 = vsel %vm3821_vm14, %v3814_v52, %v3407_v21  ;;  %v3738_v61 = vsel %vm9413_vm3, %v3699_v49, %v3143_v29  ;;  %vm4810_vm2 = vcmp.lt.s32.totalorder %v8766_v5, 0  ;;  %vm9542_vm3 = vsmask.f32 7424 }
 0x223   : > { %v8752_v48 = vadd.f32 %v5214_v22, %v5213_v3  ;;  %v3777_v28 = vsel %vm3743_vm6, %v3738_v61, %v3275_v47  ;;  %vm9543_vm0 = vcmask 588800   ;;  %v4915_v23 = vsel %vm8783_vm5, %v4879_v19, %v4463_v11  ;;  %vm8802_vm15 = vmand %vm4810_vm2, %vm4774_vm12 }
 0x224   : > { %v4882_v44 = vadd.s32 18, %v8766_v5  ;;  %v4880_v9 = vadd.s32 18, %v4474_v30  ;;  %vm9546_vm7 = vcmask 457728   ;;  %v4917_v62 = vsel %vm8790_vm4, %v4881_v57, %v4485_v13 }
 0x225   : > { %v3539_v59 = vpop.permute.xlu1 %3538  ;;  %vm9549_vm8 = vcmask 523264   ;;  %v8823_v24 = vadd.s32 112, %v9493_v51  ;;  %vm4951_vm12 = vcmp.lt.s32.totalorder %v4915_v23, 16  ;;  %vm8826_vm5 = vcmp.lt.s32.totalorder %v4917_v62, 16 }
 0x226   : > { %v3354_v4 = vpop.permute.xlu0 %3353  ;;  %v3892_v54 = vsel %vm9537_vm9, %v3853_v27, %v3539_v59  ;;  %vm4772_vm9 = vcmp.ne.s32.totalorder %v4474_v30, 0  ;;  %v4918_v3 = vsel %vm8802_vm15, %v4882_v44, %v8766_v5  ;;  %v8836_v21 = vadd.s32 120, %v9493_v51 }
 0x227   : > { %v3816_v40 = vsel %vm3782_vm11, %v3777_v28, %v3354_v4  ;;  %v8845_v63 = vmul.u32.u64.low 3817748708, %v8817_v37  ;;  %v8846_v0 = vmul.u32.u64.high 3817748708, %v8817_v37, %v8845_v63  ;;  %v5673_v42 = vsel %vm4951_vm12, 1.0, %v6089_v8 }
 0x228   : > { %v8850_v58 = vmul.u32.u64.low 3817748708, %v8823_v24  ;;  %v8851_v53 = vmul.u32.u64.high 3817748708, %v8823_v24, %v8850_v58  ;;  %v8854_v59 = vadd.s32 104, %v9493_v51  ;;  %vm9552_vm2 = vsmask.f32 7424 }
 0x229   : > { %v3618_v43 = vpop.permute.xlu1 %3617  ;;  %vm4954_vm4 = vcmp.lt.s32.totalorder %v4918_v3, 16  ;;  %v5675_v56 = vsel %vm8826_vm5, 1.0, %v6089_v8  ;;  %v8863_v1 = vmul.u32.u64.low 3817748708, %v8836_v21  ;;  %v8864_v52 = vmul.u32.u64.high 3817748708, %v8836_v21, %v8863_v1 }
 0x22a   : > { %v3409_v38 = vpop.permute.xlu0 %3408  ;;  %v3931_v31 = vsel %vm9530_vm13, %v3892_v54, %v3618_v43  ;;  %vm4808_vm13 = vcmp.lt.s32.totalorder %v4474_v30, 0  ;;  %v8873_v35 = vmul.u32.u64.low 3817748708, %v8854_v59  ;;  %v8874_v25 = vmul.u32.u64.high 3817748708, %v8854_v59, %v8873_v35 }
 0x22b   : > { %v4042_v55 = vshll.u32 %v3931_v31, 16  ;;  %v3855_v17 = vsel %vm3821_vm14, %v3816_v40, %v3409_v38  ;;  %v4046_v45 = vshrl.u32 %v3931_v31, 16  ;;  %v5676_v31 = vsel %vm4954_vm4, 1.0, %v6089_v8 }
 0x22c   : > { %v4505_v16 = vshrl.u32 %v8846_v0, 4  ;;  %v4527_v41 = vshrl.u32 %v8851_v53, 4  ;;  %v4516_v3 = vshrl.u32 %v8874_v25, 4  ;;  %vm9559_vm12 = vcmask 457728  }
 0x22d   : > { %v4044_v6 = vrot.slane %v4042_v55, 1  ;;  %v3541_v7 = vpop.permute.xlu1 %3540 }
 0x22e   : > { %v8779_v14 = vpop.permute.xlu0 %3010  ;;  %v3894_v15 = vsel %vm9546_vm7, %v3855_v17, %v3541_v7 }
 0x22f   : > { %v4045_v50 = vsel %vm9542_vm3, %v4041_v36, %v4044_v6  ;;  %vm8812_vm3 = vmand %vm4808_vm13, %vm4772_vm9  ;;  %v4048_v47 = vor.u32 %v4046_v45, %v4044_v6  ;;  %v4506_v45 = vmul.u32 18, %v4505_v16 }
 0x230   : > { %5875 = vmatprep.mubr.msk.bf16.mxu1 %vm9543_vm0, %v4045_v50  ;;  %v4916_v46 = vsel %vm8812_vm3, %v4880_v9, %v4474_v30  ;;  %vm9553_vm13 = vmmov %vm9543_vm0  ;;  %vm9554_vm0 = vcmask 60416   ;;  %v4538_v9 = vshrl.u32 %v8864_v52, 4 }
 0x231   : > { %v3620_v29 = vpop.permute.xlu1 %3619  ;;  %vm4952_vm9 = vcmp.lt.s32.totalorder %v4916_v46, 16  ;;  %vm9555_vm15 = vmmov %vm9554_vm0  ;;  %v6048_v46 = vld [vmem:[#allocation2 + $0x90] sm:$0xff]  }
 0x232   : > { %v8808_v34 = vpop.permute.xlu0 %3089  ;;  %v8820_v12 = vsel %vm9549_vm8, %v3894_v15, %v3620_v29  ;;  %v5674_v30 = vsel %vm4952_vm9, 1.0, %v6089_v8  ;;  %vm9556_vm7 = vmmov %vm9554_vm0  ;;  %vm9558_vm8 = vcmask 195584   ;;  %vm9561_vm9 = vcmask 523264  }
 0x233   : > { %v4049_v33 = vshll.u32 %v8820_v12, 16  ;;  %vm9557_vm3 = vmmov %vm9554_vm0 }
 0x234   : > { %vm9560_vm4 = vmmov %vm9558_vm8 }
 0x235   : > { %v8838_v22 = vrot.slane %v4049_v33, 1  ;;  %v8840_v18 = vpop.permute.xlu1 %3144 }
 0x236   : > { %v8842_v26 = vpop.permute.xlu0 %3012 }
 0x237   : > { %v4052_v4 = vsel %vm9552_vm2, %v4048_v47, %v8838_v22  ;;  %v3662_v47 = vsel %vm3625_vm10, %v6048_v46, %v8779_v14  ;;  %v4507_v14 = vsub.s32 %v8817_v37, %v4506_v45 }
 0x238   : > { %v5857_v20 = vpop.f32.mrf.mxu0  ;;  %5876 = vmatmul.mubr.msk.bf16.gmra.mxu1 %vm9553_vm13, %v4052_v4  ;;  %v4539_v4 = vmul.u32 18, %v4538_v9 }
 0x239   : > { %v5749_v13 = vpack.c.bf16 %v5857_v20, %v5857_v20  ;;  %v3277_v27 = vpop.permute.xlu1 %3276  ;;  %v5061_v60 = vmul.f32 %v5857_v20, %v5675_v56  ;;  %vm4775_vm5 = vcmp.ne.s32.totalorder %v4507_v14, 0  ;;  %vm4811_vm2 = vcmp.lt.s32.totalorder %v4507_v14, 0 }
 0x23a   : > { %v4219_v11 = vpop.f32.mrf.mxu0  ;;  %v8866_v5 = vpop.permute.xlu0 %3091  ;;  %v4540_v35 = vsub.s32 %v8836_v21, %v4539_v4 }
 0x23b   : > { %5433 = vst.msk [vmem:[%s8552_s18 + $0x28] sm:$0xf] %vm9554_vm0, %v5749_v13  ;;  %v5059_v54 = vmul.f32 %v5673_v42, %v4219_v11  ;;  %v5747_v43 = vpack.c.bf16 %v4219_v11, %v4219_v11  ;;  %v5175_v17 = vmul.f32 %v5857_v20, %v5061_v60  ;;  %v5106_v62 = vsel %vm3625_vm10, %v5061_v60, 0.0  ;;  %vm8923_vm0 = vmand %vm4811_vm2, %vm4775_vm5 }
 0x23c   : > { %v5858_v38 = vpop.f32.mrf.mxu0  ;;  %v4528_v20 = vmul.u32 18, %v4527_v41  ;;  %v3701_v42 = vsel %vm3665_vm1, %v3662_v47, %v8808_v34  ;;  %v4886_v41 = vadd.s32 18, %v4540_v35 }
 0x23d   : > { %v5102_v55 = vsel %vm3625_vm10, %v5059_v54, 0.0  ;;  %v5173_v49 = vmul.f32 %v5059_v54, %v4219_v11  ;;  %5431 = vst.msk [vmem:[%s8552_s18 + $0x20] sm:$0xf] %vm9555_vm15, %v5747_v43  ;;  %v5750_v19 = vpack.c.bf16 %v5858_v38, %v5858_v38  ;;  %v3356_v61 = vpop.permute.xlu1 %3355  ;;  %v5062_v10 = vmul.f32 %v5858_v38, %v5676_v31 }
 0x23e   : > { %v5103_v57 = vadd.f32 %v5102_v55, %v8748_v39  ;;  %v4222_v36 = vpop.f32.mrf.mxu0  ;;  %v3147_v6 = vpop.permute.xlu0 %3146  ;;  %v5220_v63 = vsel %vm3625_vm10, %v5175_v17, 0.0  ;;  %v3740_v13 = vsel %vm9558_vm8, %v3701_v42, %v8840_v18  ;;  %v4517_v43 = vmul.u32 18, %v4516_v3  ;;  %vm9565_vm8 = vmmov %vm9561_vm9 }
 0x23f   : > { %v5216_v7 = vsel %vm3625_vm10, %v5173_v49, 0.0  ;;  %v5060_v28 = vmul.f32 %v5674_v30, %v4222_v36  ;;  %5434 = vst.msk [vmem:[%s8552_s18 + $0x2c] sm:$0xf] %vm9556_vm7, %v5750_v19  ;;  %v5748_v50 = vpack.c.bf16 %v4222_v36, %v4222_v36  ;;  %v5176_v32 = vmul.f32 %v5858_v38, %v5062_v10  ;;  %v6049_v38 = vld [vmem:[#allocation2 + $0x98] ss:$0 sps:$4 sm:$0x11]  }
 0x240   : > { %v5217_v40 = vadd.f32 %v5216_v7, %v8752_v48  ;;  %v5108_v0 = vsel %vm3625_vm10, %v5062_v10, 0.0  ;;  %v3779_v52 = vsel %vm3743_vm6, %v3740_v13, %v3277_v27  ;;  %v3664_v31 = vsel %vm3625_vm10, %v6049_v38, %v8842_v26 }
 0x241   : > { %v5104_v23 = vsel %vm3625_vm10, %v5060_v28, 0.0  ;;  %v5174_v39 = vmul.f32 %v5060_v28, %v4222_v36  ;;  %5432 = vst.msk [vmem:[%s8552_s18 + $0x24] sm:$0xf] %vm9557_vm3, %v5748_v50  ;;  %v3411_v15 = vpop.permute.xlu1 %3410  ;;  %v5222_v1 = vsel %vm3625_vm10, %v5176_v32, 0.0  ;;  %v3818_v34 = vsel %vm3782_vm11, %v3779_v52, %v3356_v61 }
 0x242   : > { %v5105_v44 = vadd.f32 %v5104_v23, %v5103_v57  ;;  %v3279_v29 = vpop.permute.xlu0 %3278  ;;  %v3857_v30 = vsel %vm3821_vm14, %v3818_v34, %v3411_v15  ;;  %v4529_v18 = vsub.s32 %v8823_v24, %v4528_v20  ;;  %v3703_v37 = vsel %vm3665_vm1, %v3664_v31, %v8866_v5 }
 0x243   : > { %v5218_v48 = vsel %vm3625_vm10, %v5174_v39, 0.0  ;;  %v3742_v55 = vsel %vm9560_vm4, %v3703_v37, %v3147_v6  ;;  %v4518_v26 = vsub.s32 %v8854_v59, %v4517_v43  ;;  %v4053_v57 = vshrl.u32 %v8820_v12, 16 }
 0x244   : > { %v5107_v33 = vadd.f32 %v5106_v62, %v5105_v44  ;;  %v5219_v2 = vadd.f32 %v5218_v48, %v5217_v40  ;;  %v3781_v24 = vsel %vm3743_vm6, %v3742_v55, %v3279_v29  ;;  %v4883_v19 = vadd.s32 18, %v4507_v14  ;;  %vm9564_vm6 = vmmov %vm9559_vm12 }
 0x245   : > { %v3543_v56 = vpop.permute.xlu1 %3542  ;;  %vm4777_vm1 = vcmp.ne.s32.totalorder %v4529_v18, 0  ;;  %vm4813_vm13 = vcmp.lt.s32.totalorder %v4529_v18, 0  ;;  %vm4778_vm15 = vcmp.ne.s32.totalorder %v4540_v35, 0  ;;  %v4055_v61 = vor.u32 %v4053_v57, %v8838_v22 }
 0x246   : > { %v5221_v58 = vadd.f32 %v5220_v63, %v5219_v2  ;;  %v8899_v53 = vadd.f32 %v5108_v0, %v5107_v33  ;;  %v3358_v11 = vpop.permute.xlu0 %3357  ;;  %v3896_v27 = vsel %vm9559_vm12, %v3857_v30, %v3543_v56  ;;  %vm4814_vm7 = vcmp.lt.s32.totalorder %v4540_v35, 0  ;;  %vm8934_vm5 = vmand %vm4813_vm13, %vm4777_vm1 }
 0x247   : > { %v3820_v5 = vsel %vm3782_vm11, %v3781_v24, %v3358_v11  ;;  %v4885_v28 = vadd.s32 18, %v4529_v18  ;;  %vm4776_vm3 = vcmp.ne.s32.totalorder %v4518_v26, 0  ;;  %vm4812_vm11 = vcmp.lt.s32.totalorder %v4518_v26, 0  ;;  %vm8942_vm2 = vmand %vm4814_vm7, %vm4778_vm15 }
 0x248   : > { %v8906_v54 = vadd.f32 %v5222_v1, %v5221_v58  ;;  %vm9566_vm12 = vsmask.f32 7424  ;;  %v4919_v22 = vsel %vm8923_vm0, %v4883_v19, %v4507_v14  ;;  %v4884_v44 = vadd.s32 18, %v4518_v26  ;;  %vm4848_vm4 = vmand %vm4812_vm11, %vm4776_vm3 }
 0x249   : > { %v3622_v25 = vpop.permute.xlu1 %3621  ;;  %v4921_v29 = vsel %vm8934_vm5, %v4885_v28, %v4529_v18  ;;  %vm9572_vm1 = vmmov %vm9566_vm12  ;;  %v4922_v32 = vsel %vm8942_vm2, %v4886_v41, %v4540_v35  ;;  %v4347_v14 = vadd.s32 128, %v9493_v51  ;;  %v4349_v30 = vadd.s32 144, %v9493_v51 }
 0x24a   : > { %v3413_v60 = vpop.permute.xlu0 %3412  ;;  %v3935_v49 = vsel %vm9561_vm9, %v3896_v27, %v3622_v25  ;;  %vm4955_vm9 = vcmp.lt.s32.totalorder %v4919_v22, 16  ;;  %v4920_v48 = vsel %vm4848_vm4, %v4884_v44, %v4518_v26  ;;  %vm4957_vm0 = vcmp.lt.s32.totalorder %v4921_v29, 16 }
 0x24b   : > { %v4056_v21 = vshll.u32 %v3935_v49, 16  ;;  %v3859_v59 = vsel %vm3821_vm14, %v3820_v5, %v3413_v60  ;;  %v4060_v17 = vshrl.u32 %v3935_v49, 16  ;;  %vm9569_vm14 = vcmask 588800  }
 0x24c   : > { %vm9573_vm13 = vmmov %vm9569_vm14  ;;  %v5677_v33 = vsel %vm4955_vm9, 1.0, %v6089_v8  ;;  %vm4958_vm15 = vcmp.lt.s32.totalorder %v4922_v32, 16  ;;  %vm4956_vm7 = vcmp.lt.s32.totalorder %v4920_v48, 16  ;;  %v5679_v3 = vsel %vm4957_vm0, 1.0, %v6089_v8 }
 0x24d   : > { %v4058_v6 = vrot.slane %v4056_v21, 1  ;;  %v3624_v12 = vpop.permute.xlu1 %3623  ;;  %v5680_v20 = vsel %vm4958_vm15, 1.0, %v6089_v8  ;;  %v5678_v42 = vsel %vm4956_vm7, 1.0, %v6089_v8  ;;  %v4350_v37 = vadd.s32 152, %v9493_v51 }
 0x24e   : > { %v3545_v7 = vpop.permute.xlu0 %3544  ;;  %v8972_v25 = vmul.u32.u64.low 3817748708, %v4347_v14  ;;  %v8973_v60 = vmul.u32.u64.high 3817748708, %v4347_v14, %v8972_v25  ;;  %v4348_v55 = vadd.s32 136, %v9493_v51 }
 0x24f   : > { %v3898_v10 = vsel %vm9564_vm6, %v3859_v59, %v3545_v7  ;;  %v4059_v40 = vsel %vm9566_vm12, %v4055_v61, %v4058_v6  ;;  %v4062_v9 = vor.u32 %v4060_v17, %v4058_v6  ;;  %vm9574_vm6 = vcmask 60416  }
 0x250   : > { %v3937_v16 = vsel %vm9565_vm8, %v3898_v10, %v3624_v12  ;;  %5879 = vmatprep.mubr.msk.bf16.mxu1 %vm9569_vm14, %v4059_v40  ;;  %vm9575_vm3 = vmmov %vm9574_vm6  ;;  %v8978_v21 = vmul.u32.u64.low 3817748708, %v4349_v30  ;;  %v8979_v19 = vmul.u32.u64.high 3817748708, %v4349_v30, %v8978_v21  ;;  %v4549_v40 = vshrl.u32 %v8973_v60, 4 }
 0x251   : > { %v4063_v23 = vshll.u32 %v3937_v16, 16  ;;  %vm9576_vm11 = vmmov %vm9575_vm3  ;;  %v8983_v61 = vmul.u32.u64.low 3817748708, %v4350_v37  ;;  %v8984_v6 = vmul.u32.u64.high 3817748708, %v4350_v37, %v8983_v61 }
 0x252   : > { %vm9577_vm8 = vmmov %vm9575_vm3  ;;  %v8986_v12 = vmul.u32.u64.low 3817748708, %v4348_v55  ;;  %v8987_v10 = vmul.u32.u64.high 3817748708, %v4348_v55, %v8986_v12  ;;  %v4571_v50 = vshrl.u32 %v8979_v19, 4  ;;  %v4550_v17 = vmul.u32 18, %v4549_v40 }
 0x253   : > { %v4065_v15 = vrot.slane %v4063_v23, 1  ;;  %v5861_v45 = vpop.f32.mrf.mxu0  ;;  %v4582_v22 = vshrl.u32 %v8984_v6, 4  ;;  %v4353_v19 = vadd.s32 176, %v9493_v51 }
 0x254   : > { %v5753_v2 = vpack.c.bf16 %v5861_v45, %v5861_v45  ;;  %v5065_v58 = vmul.f32 %v5861_v45, %v5679_v3  ;;  %v4560_v23 = vshrl.u32 %v8987_v10, 4  ;;  %v4572_v39 = vmul.u32 18, %v4571_v50 }
 0x255   : > { %v4066_v62 = vsel %vm9572_vm1, %v4062_v9, %v4065_v15  ;;  %v4235_v46 = vpop.f32.mrf.mxu0  ;;  %v4583_v41 = vmul.u32 18, %v4582_v22  ;;  %v4551_v44 = vsub.s32 %v4347_v14, %v4550_v17  ;;  %v4352_v10 = vadd.s32 168, %v9493_v51 }
 0x256   : > { %5880 = vmatmul.mubr.msk.bf16.gmra.mxu1 %vm9573_vm13, %v4066_v62  ;;  %5437 = vst.msk [vmem:[%s8552_s18 + $0x38] sm:$0xf] %vm9574_vm6, %v5753_v2  ;;  %v5063_v47 = vmul.f32 %v5677_v33, %v4235_v46  ;;  %v5751_v63 = vpack.c.bf16 %v4235_v46, %v4235_v46  ;;  %v5179_v18 = vmul.f32 %v5861_v45, %v5065_v58  ;;  %v4561_v9 = vmul.u32 18, %v4560_v23 }
 0x257   : > { %v5862_v0 = vpop.f32.mrf.mxu0  ;;  %v4573_v15 = vsub.s32 %v4349_v30, %v4572_v39  ;;  %v4584_v29 = vsub.s32 %v4350_v37, %v4583_v41  ;;  %vm4779_vm12 = vcmp.ne.s32.totalorder %v4551_v44, 0  ;;  %vm4815_vm5 = vcmp.lt.s32.totalorder %v4551_v44, 0 }
 0x258   : > { %v5110_v4 = vsel %vm3625_vm10, %v5063_v47, 0.0  ;;  %v5177_v13 = vmul.f32 %v5063_v47, %v4235_v46  ;;  %5435 = vst.msk [vmem:[%s8552_s18 + $0x30] sm:$0xf] %vm9575_vm3, %v5751_v63  ;;  %v5754_v11 = vpack.c.bf16 %v5862_v0, %v5862_v0  ;;  %v5066_v43 = vmul.f32 %v5862_v0, %v5680_v20  ;;  %vm4851_vm4 = vmand %vm4815_vm5, %vm4779_vm12 }
 0x259   : > { %v5111_v56 = vadd.f32 %v5110_v4, %v8899_v53  ;;  %v4238_v1 = vpop.f32.mrf.mxu0  ;;  %v5228_v5 = vsel %vm3625_vm10, %v5179_v18, 0.0  ;;  %v4562_v62 = vsub.s32 %v4348_v55, %v4561_v9  ;;  %vm4781_vm14 = vcmp.ne.s32.totalorder %v4573_v15, 0 }
 0x25a   : > { %v5224_v52 = vsel %vm3625_vm10, %v5177_v13, 0.0  ;;  %v5064_v34 = vmul.f32 %v5678_v42, %v4238_v1  ;;  %5438 = vst.msk [vmem:[%s8552_s18 + $0x3c] sm:$0xf] %vm9576_vm11, %v5754_v11  ;;  %v5752_v31 = vpack.c.bf16 %v4238_v1, %v4238_v1  ;;  %v5180_v49 = vmul.f32 %v5862_v0, %v5066_v43 }
 0x25b   : > { %v5225_v38 = vadd.f32 %v5224_v52, %v8906_v54  ;;  %v5114_v54 = vsel %vm3625_vm10, %v5065_v58, 0.0  ;;  %v5116_v36 = vsel %vm3625_vm10, %v5066_v43, 0.0  ;;  %vm4817_vm2 = vcmp.lt.s32.totalorder %v4573_v15, 0 }
 0x25c   : > { %v5112_v35 = vsel %vm3625_vm10, %v5064_v34, 0.0  ;;  %v5178_v53 = vmul.f32 %v5064_v34, %v4238_v1  ;;  %5436 = vst.msk [vmem:[%s8552_s18 + $0x34] sm:$0xf] %vm9577_vm8, %v5752_v31  ;;  %v5230_v28 = vsel %vm3625_vm10, %v5180_v49, 0.0  ;;  %v4887_v32 = vadd.s32 18, %v4551_v44  ;;  %vm4853_vm15 = vmand %vm4817_vm2, %vm4781_vm14 }
 0x25d   : > { %v5113_v27 = vadd.f32 %v5112_v35, %v5111_v56  ;;  %vm4782_vm9 = vcmp.ne.s32.totalorder %v4584_v29, 0  ;;  %vm4818_vm1 = vcmp.lt.s32.totalorder %v4584_v29, 0  ;;  %v4889_v48 = vadd.s32 18, %v4573_v15 }
 0x25e   : > { %v5226_v26 = vsel %vm3625_vm10, %v5178_v53, 0.0  ;;  %vm4780_vm13 = vcmp.ne.s32.totalorder %v4562_v62, 0  ;;  %vm4816_vm0 = vcmp.lt.s32.totalorder %v4562_v62, 0  ;;  %v4923_v45 = vsel %vm4851_vm4, %v4887_v32, %v4551_v44  ;;  %vm4854_vm7 = vmand %vm4818_vm1, %vm4782_vm9 }
 0x25f   : > { %v5115_v57 = vadd.f32 %v5114_v54, %v5113_v27  ;;  %v5227_v24 = vadd.f32 %v5226_v26, %v5225_v38  ;;  %v4890_v33 = vadd.s32 18, %v4584_v29  ;;  %v4888_v2 = vadd.s32 18, %v4562_v62  ;;  %vm4852_vm6 = vmand %vm4816_vm0, %vm4780_vm13 }
 0x260   : > { %v4925_v3 = vsel %vm4853_vm15, %v4889_v48, %v4573_v15  ;;  %vm4959_vm3 = vcmp.lt.s32.totalorder %v4923_v45, 16  ;;  %vm9578_vm5 = vcmask 60416   ;;  %v4351_v55 = vadd.s32 160, %v9493_v51 }
 0x261   : > { %v5229_v59 = vadd.f32 %v5228_v5, %v5227_v24  ;;  %v5117_v7 = vadd.f32 %v5116_v36, %v5115_v57  ;;  %v4926_v46 = vsel %vm4854_vm7, %v4890_v33, %v4584_v29  ;;  %v4924_v47 = vsel %vm4852_vm6, %v4888_v2, %v4562_v62  ;;  %vm9579_vm14 = vmmov %vm9578_vm5 }
 0x262   : > { %vm4961_vm11 = vcmp.lt.s32.totalorder %v4925_v3, 16  ;;  %v5681_v0 = vsel %vm4959_vm3, 1.0, %v6089_v8  ;;  %vm4962_vm8 = vcmp.lt.s32.totalorder %v4926_v46, 16  ;;  %vm4960_vm12 = vcmp.lt.s32.totalorder %v4924_v47, 16  ;;  %vm9580_vm2 = vmmov %vm9578_vm5 }
 0x263   : > { %v5231_v16 = vadd.f32 %v5230_v28, %v5229_v59  ;;  %v5683_v42 = vsel %vm4961_vm11, 1.0, %v6089_v8  ;;  %v5684_v11 = vsel %vm4962_vm8, 1.0, %v6089_v8  ;;  %v5682_v1 = vsel %vm4960_vm12, 1.0, %v6089_v8  ;;  %vm9581_vm4 = vmmov %vm9580_vm2 }
 0x264   : > { %v4354_v5 = vadd.s32 184, %v9493_v51  ;;  %v9016_v6 = vmul.u32.u64.low 3817748708, %v4351_v55  ;;  %v9017_v59 = vmul.u32.u64.high 3817748708, %v4351_v55, %v9016_v6 }
 0x265   : > { %v9029_v23 = vmul.u32.u64.low 3817748708, %v4352_v10  ;;  %v9030_v39 = vmul.u32.u64.high 3817748708, %v4352_v10, %v9029_v23 }
 0x266   : > { %v9026_v22 = vmul.u32.u64.low 3817748708, %v4354_v5  ;;  %v9027_v17 = vmul.u32.u64.high 3817748708, %v4354_v5, %v9026_v22  ;;  %v4593_v41 = vshrl.u32 %v9017_v59, 4 }
 0x267   : > { %v4604_v29 = vshrl.u32 %v9030_v39, 4  ;;  %v4357_v39 = vadd.s32 208, %v9493_v51 }
 0x268   : > { %v4626_v9 = vshrl.u32 %v9027_v17, 4  ;;  %v4594_v15 = vmul.u32 18, %v4593_v41 }
 0x269   : > { %v4605_v45 = vmul.u32 18, %v4604_v29 }
 0x26a   : > { %v4627_v32 = vmul.u32 18, %v4626_v9  ;;  %v4595_v48 = vsub.s32 %v4351_v55, %v4594_v15 }
 0x26b   : > { %v4606_v3 = vsub.s32 %v4352_v10, %v4605_v45 }
 0x26c   : > { %v4628_v2 = vsub.s32 %v4354_v5, %v4627_v32  ;;  %vm4783_vm9 = vcmp.ne.s32.totalorder %v4595_v48, 0  ;;  %vm4819_vm1 = vcmp.lt.s32.totalorder %v4595_v48, 0  ;;  %v4891_v46 = vadd.s32 18, %v4595_v48 }
 0x26d   : > { %vm4855_vm15 = vmand %vm4819_vm1, %vm4783_vm9  ;;  %vm4784_vm3 = vcmp.ne.s32.totalorder %v4606_v3, 0  ;;  %vm4820_vm11 = vcmp.lt.s32.totalorder %v4606_v3, 0  ;;  %vm9582_vm1 = vcmask 60416  }
 0x26e   : > { %vm4786_vm7 = vcmp.ne.s32.totalorder %v4628_v2, 0  ;;  %vm4822_vm6 = vcmp.lt.s32.totalorder %v4628_v2, 0 }
 0x26f   : > { %vm4858_vm12 = vmand %vm4822_vm6, %vm4786_vm7 }
 0x281   : > { %v5865_v63 = vpop.f32.mrf.mxu0 }
 0x282   : > { %v5757_v20 = vpack.c.bf16 %v5865_v63, %v5865_v63  ;;  %v5069_v14 = vmul.f32 %v5865_v63, %v5683_v42 }
 0x283   : > { %v4251_v58 = vpop.f32.mrf.mxu0 }
 0x284   : > { %5441 = vst.msk [vmem:[%s8552_s18 + $0x48] sm:$0xf] %vm9578_vm5, %v5757_v20  ;;  %v5067_v4 = vmul.f32 %v5681_v0, %v4251_v58  ;;  %v5755_v13 = vpack.c.bf16 %v4251_v58, %v4251_v58  ;;  %v5183_v27 = vmul.f32 %v5865_v63, %v5069_v14  ;;  %v5122_v49 = vsel %vm3625_vm10, %v5069_v14, 0.0  ;;  %vm4856_vm5 = vmand %vm4820_vm11, %vm4784_vm3 }
 0x285   : > { %v5866_v56 = vpop.f32.mrf.mxu0  ;;  %v4927_v63 = vsel %vm4855_vm15, %v4891_v46, %v4595_v48  ;;  %v4894_v0 = vadd.s32 18, %v4628_v2  ;;  %v4892_v20 = vadd.s32 18, %v4606_v3 }
 0x286   : > { %v5118_v52 = vsel %vm3625_vm10, %v5067_v4, 0.0  ;;  %v5181_v43 = vmul.f32 %v5067_v4, %v4251_v58  ;;  %5439 = vst.msk [vmem:[%s8552_s18 + $0x40] sm:$0xf] %vm9579_vm14, %v5755_v13  ;;  %v5758_v38 = vpack.c.bf16 %v5866_v56, %v5866_v56  ;;  %v5070_v18 = vmul.f32 %v5866_v56, %v5684_v11 }
 0x287   : > { %v5119_v34 = vadd.f32 %v5118_v52, %v5117_v7  ;;  %v4254_v31 = vpop.f32.mrf.mxu0  ;;  %v5236_v36 = vsel %vm3625_vm10, %v5183_v27, 0.0  ;;  %vm4963_vm14 = vcmp.lt.s32.totalorder %v4927_v63, 16  ;;  %v4930_v58 = vsel %vm4858_vm12, %v4894_v0, %v4628_v2 }
 0x288   : > { %v5232_v30 = vsel %vm3625_vm10, %v5181_v43, 0.0  ;;  %v5068_v35 = vmul.f32 %v5682_v1, %v4254_v31  ;;  %5442 = vst.msk [vmem:[%s8552_s18 + $0x4c] sm:$0xf] %vm9580_vm2, %v5758_v38  ;;  %v5756_v37 = vpack.c.bf16 %v4254_v31, %v4254_v31  ;;  %v5184_v26 = vmul.f32 %v5866_v56, %v5070_v18 }
 0x289   : > { %v5233_v53 = vadd.f32 %v5232_v30, %v5231_v16  ;;  %v5124_v61 = vsel %vm3625_vm10, %v5070_v18, 0.0  ;;  %v9021_v16 = vmul.u32.u64.low 3817748708, %v4353_v19  ;;  %v9022_v40 = vmul.u32.u64.high 3817748708, %v4353_v19, %v9021_v16 }
 0x28a   : > { %v5120_v25 = vsel %vm3625_vm10, %v5068_v35, 0.0  ;;  %v5182_v60 = vmul.f32 %v5068_v35, %v4254_v31  ;;  %5440 = vst.msk [vmem:[%s8552_s18 + $0x44] sm:$0xf] %vm9581_vm4, %v5756_v37  ;;  %v5238_v28 = vsel %vm3625_vm10, %v5184_v26, 0.0  ;;  %v4928_v4 = vsel %vm4856_vm5, %v4892_v20, %v4606_v3 }
 0x28b   : > { %v5121_v54 = vadd.f32 %v5120_v25, %v5119_v34  ;;  %v4615_v44 = vshrl.u32 %v9022_v40, 4  ;;  %v5685_v56 = vsel %vm4963_vm14, 1.0, %v6089_v8  ;;  %vm4966_vm4 = vcmp.lt.s32.totalorder %v4930_v58, 16 }
 0x28c   : > { %v5234_v57 = vsel %vm3625_vm10, %v5182_v60, 0.0  ;;  %vm4964_vm9 = vcmp.lt.s32.totalorder %v4928_v4, 16  ;;  %v5688_v38 = vsel %vm4966_vm4, 1.0, %v6089_v8  ;;  %v4355_v40 = vadd.s32 192, %v9493_v51 }
 0x28d   : > { %v5123_v24 = vadd.f32 %v5122_v49, %v5121_v54  ;;  %v5235_v21 = vadd.f32 %v5234_v57, %v5233_v53  ;;  %v4616_v62 = vmul.u32 18, %v4615_v44  ;;  %v5686_v31 = vsel %vm4964_vm9, 1.0, %v6089_v8 }
 0x28e   : > { %v9063_v22 = vmul.u32.u64.low 3817748708, %v4355_v40  ;;  %v9064_v17 = vmul.u32.u64.high 3817748708, %v4355_v40, %v9063_v22  ;;  %v4358_v44 = vadd.s32 216, %v9493_v51  ;;  %v4359_v0 = vadd.s32 224, %v9493_v51 }
 0x28f   : > { %v5237_v7 = vadd.f32 %v5236_v36, %v5235_v21  ;;  %v5125_v12 = vadd.f32 %v5124_v61, %v5123_v24  ;;  %v4617_v33 = vsub.s32 %v4353_v19, %v4616_v62  ;;  %v4360_v4 = vadd.s32 232, %v9493_v51 }
 0x290   : > { %v9083_v48 = vmul.u32.u64.low 3817748708, %v4357_v39  ;;  %v9084_v45 = vmul.u32.u64.high 3817748708, %v4357_v39, %v9083_v48 }
 0x291   : > { %v9024_v50 = vadd.f32 %v5238_v28, %v5237_v7  ;;  %vm4785_vm13 = vcmp.ne.s32.totalorder %v4617_v33, 0  ;;  %vm4821_vm0 = vcmp.lt.s32.totalorder %v4617_v33, 0  ;;  %v4893_v47 = vadd.s32 18, %v4617_v33 }
 0x292   : > { %vm4857_vm8 = vmand %vm4821_vm0, %vm4785_vm13 }
 0x293   : > { %v4929_v42 = vsel %vm4857_vm8, %v4893_v47, %v4617_v33  ;;  %vm9583_vm13 = vmmov %vm9582_vm1  ;;  %v9088_v33 = vmul.u32.u64.low 3817748708, %v4358_v44  ;;  %v9089_v2 = vmul.u32.u64.high 3817748708, %v4358_v44, %v9088_v33  ;;  %v4637_v47 = vshrl.u32 %v9064_v17, 4 }
 0x294   : > { %vm4965_vm2 = vcmp.lt.s32.totalorder %v4929_v42, 16  ;;  %vm9584_vm0 = vmmov %vm9582_vm1  ;;  %v4361_v42 = vadd.s32 240, %v9493_v51 }
 0x295   : > { %v5687_v1 = vsel %vm4965_vm2, 1.0, %v6089_v8  ;;  %vm9585_vm15 = vmmov %vm9584_vm0  ;;  %v4638_v58 = vmul.u32 18, %v4637_v47 }
 0x296   : > { %vm9586_vm7 = vmmov %vm9584_vm0 }
 0x297   : > { %vm9587_vm6 = vmmov %vm9584_vm0 }
 0x298   : > { %vm9588_vm3 = vmmov %vm9584_vm0 }
 0x299   : > { %vm9589_vm11 = vmmov %vm9584_vm0 }
 0x2b0   : > { %v5869_v13 = vpop.f32.mrf.mxu1 }
 0x2b1   : > { %v5761_v11 = vpack.c.bf16 %v5869_v13, %v5869_v13  ;;  %v5073_v30 = vmul.f32 %v5869_v13, %v5687_v1  ;;  %v4670_v1 = vshrl.u32 %v9089_v2, 4 }
 0x2b2   : > { %v4267_v14 = vpop.f32.mrf.mxu1 }
 0x2b3   : > { %5445 = vst.msk [vmem:[%s8552_s18 + $0x58] sm:$0xf] %vm9582_vm1, %v5761_v11  ;;  %v5071_v52 = vmul.f32 %v5685_v56, %v4267_v14  ;;  %v5759_v43 = vpack.c.bf16 %v4267_v14, %v4267_v14  ;;  %v5187_v26 = vmul.f32 %v5869_v13, %v5073_v30  ;;  %v5130_v19 = vsel %vm3625_vm10, %v5073_v30, 0.0 }
 0x2b4   : > { %v5870_v34 = vpop.f32.mrf.mxu1  ;;  %v9106_v13 = vmul.u32.u64.low 3817748708, %v4359_v0  ;;  %v9107_v56 = vmul.u32.u64.high 3817748708, %v4359_v0, %v9106_v13  ;;  %v4659_v11 = vshrl.u32 %v9084_v45, 4 }
 0x2b5   : > { %v5126_v18 = vsel %vm3625_vm10, %v5071_v52, 0.0  ;;  %v5185_v35 = vmul.f32 %v5071_v52, %v4267_v14  ;;  %5443 = vst.msk [vmem:[%s8552_s18 + $0x50] sm:$0xf] %vm9583_vm13, %v5759_v43  ;;  %v5762_v37 = vpack.c.bf16 %v5870_v34, %v5870_v34  ;;  %v5074_v60 = vmul.f32 %v5870_v34, %v5688_v38 }
 0x2b6   : > { %v5127_v53 = vadd.f32 %v5126_v18, %v5125_v12  ;;  %v4270_v27 = vpop.f32.mrf.mxu1  ;;  %v5244_v59 = vsel %vm3625_vm10, %v5187_v26, 0.0  ;;  %v9111_v52 = vmul.u32.u64.low 3817748708, %v4361_v42  ;;  %v9112_v43 = vmul.u32.u64.high 3817748708, %v4361_v42, %v9111_v52 }
 0x2b7   : > { %v5240_v25 = vsel %vm3625_vm10, %v5185_v35, 0.0  ;;  %v5072_v55 = vmul.f32 %v5686_v31, %v4270_v27  ;;  %5446 = vst.msk [vmem:[%s8552_s18 + $0x5c] sm:$0xf] %vm9584_vm0, %v5762_v37  ;;  %v5760_v49 = vpack.c.bf16 %v4270_v27, %v4270_v27  ;;  %v5188_v5 = vmul.f32 %v5870_v34, %v5074_v60 }
 0x2b8   : > { %v5241_v54 = vadd.f32 %v5240_v25, %v9024_v50  ;;  %v5132_v7 = vsel %vm3625_vm10, %v5074_v60, 0.0  ;;  %v4356_v50 = vadd.s32 200, %v9493_v51  ;;  %v4639_v34 = vsub.s32 %v4355_v40, %v4638_v58 }
 0x2b9   : > { %v5128_v57 = vsel %vm3625_vm10, %v5072_v55, 0.0  ;;  %v5186_v24 = vmul.f32 %v5072_v55, %v4270_v27  ;;  %5444 = vst.msk [vmem:[%s8552_s18 + $0x54] sm:$0xf] %vm9585_vm15, %v5760_v49  ;;  %v5246_v28 = vsel %vm3625_vm10, %v5188_v5, 0.0  ;;  %v4660_v30 = vmul.u32 18, %v4659_v11 }
 0x2ba   : > { %v5129_v21 = vadd.f32 %v5128_v57, %v5127_v53  ;;  %v9072_v9 = vmul.u32.u64.low 3817748708, %v4356_v50  ;;  %v9073_v15 = vmul.u32.u64.high 3817748708, %v4356_v50, %v9072_v9  ;;  %v4671_v18 = vmul.u32 18, %v4670_v1 }
 0x2bb   : > { %v5242_v36 = vsel %vm3625_vm10, %v5186_v24, 0.0  ;;  %v9114_v38 = vmul.u32.u64.low 3817748708, %v4360_v4  ;;  %v9115_v31 = vmul.u32.u64.high 3817748708, %v4360_v4, %v9114_v38  ;;  %v9118_v53 = vadd.s32 248, %v9493_v51 }
 0x2bc   : > { %v5131_v61 = vadd.f32 %v5130_v19, %v5129_v21  ;;  %v5243_v6 = vadd.f32 %v5242_v36, %v5241_v54  ;;  %v4648_v20 = vshrl.u32 %v9073_v15, 4  ;;  %vm4787_vm8 = vcmp.ne.s32.totalorder %v4639_v34, 0 }
 0x2bd   : > { %vm4823_vm12 = vcmp.lt.s32.totalorder %v4639_v34, 0  ;;  %v4681_v37 = vshrl.u32 %v9107_v56, 4  ;;  %v9121_v27 = vsub.s32 %v4357_v39, %v4660_v30  ;;  %v4895_v25 = vadd.s32 18, %v4639_v34 }
 0x2be   : > { %v5245_v12 = vadd.f32 %v5244_v59, %v5243_v6  ;;  %v9056_v10 = vadd.f32 %v5132_v7, %v5131_v61  ;;  %v4649_v14 = vmul.u32 18, %v4648_v20  ;;  %v9123_v60 = vsub.s32 %v4358_v44, %v4671_v18  ;;  %vm9125_vm14 = vmand %vm4823_vm12, %vm4787_vm8 }
 0x2bf   : > { %v4703_v54 = vshrl.u32 %v9112_v43, 4  ;;  %v9131_v49 = vmul.u32.u64.low 3817748708, %v9118_v53  ;;  %v9132_v26 = vmul.u32.u64.high 3817748708, %v9118_v53, %v9131_v49  ;;  %v4692_v57 = vshrl.u32 %v9115_v31, 4 }
 0x2c0   : > { %v9059_v16 = vadd.f32 %v5246_v28, %v5245_v12  ;;  %v4650_v35 = vsub.s32 %v4356_v50, %v4649_v14  ;;  %v4682_v21 = vmul.u32 18, %v4681_v37  ;;  %vm4789_vm4 = vcmp.ne.s32.totalorder %v9121_v27, 0 }
 0x2c1   : > { %vm4825_vm9 = vcmp.lt.s32.totalorder %v9121_v27, 0  ;;  %v4931_v19 = vsel %vm9125_vm14, %v4895_v25, %v4639_v34  ;;  %v9144_v36 = vadd.s32 256, %v9493_v51  ;;  %vm4790_vm13 = vcmp.ne.s32.totalorder %v9123_v60, 0 }
 0x2c2   : > { %vm4788_vm5 = vcmp.ne.s32.totalorder %v4650_v35, 0  ;;  %vm4824_vm2 = vcmp.lt.s32.totalorder %v4650_v35, 0  ;;  %v4896_v24 = vadd.s32 18, %v4650_v35  ;;  %vm4826_vm0 = vcmp.lt.s32.totalorder %v9123_v60, 0  ;;  %vm9154_vm15 = vmand %vm4825_vm9, %vm4789_vm4 }
 0x2c3   : > { %vm9139_vm1 = vmand %vm4824_vm2, %vm4788_vm5  ;;  %v4704_v61 = vmul.u32 18, %v4703_v54  ;;  %v9149_v6 = vadd.s32 272, %v9493_v51  ;;  %v4693_v59 = vmul.u32 18, %v4692_v57  ;;  %v9152_v7 = vadd.s32 280, %v9493_v51 }
 0x2c4   : > { %v4897_v28 = vadd.s32 18, %v9121_v27  ;;  %v4898_v40 = vadd.s32 18, %v9123_v60  ;;  %v4932_v50 = vsel %vm9139_vm1, %v4896_v24, %v4650_v35  ;;  %v4683_v22 = vsub.s32 %v4359_v0, %v4682_v21 }
 0x2c5   : > { %v9171_v44 = vadd.s32 264, %v9493_v51  ;;  %v4705_v9 = vsub.s32 %v4361_v42, %v4704_v61  ;;  %v4714_v15 = vshrl.u32 %v9132_v26, 4  ;;  %v9178_v45 = vsub.s32 %v4360_v4, %v4693_v59 }
 0x2c6   : > { %v9181_v33 = vmul.u32.u64.low 3817748708, %v9152_v7  ;;  %v9182_v2 = vmul.u32.u64.high 3817748708, %v9152_v7, %v9181_v33  ;;  %v4933_v51 = vsel %vm9154_vm15, %v4897_v28, %v9121_v27  ;;  %vm4827_vm8 = vcmp.lt.s32.totalorder %v4683_v22, 0 }
 0x2c7   : > { %v9196_v20 = vmul.u32.u64.low 3817748708, %v9171_v44  ;;  %v9197_v42 = vmul.u32.u64.high 3817748708, %v9171_v44, %v9196_v20  ;;  %vm4793_vm12 = vcmp.ne.s32.totalorder %v4705_v9, 0  ;;  %vm4829_vm5 = vcmp.lt.s32.totalorder %v4705_v9, 0 }
 0x2c8   : > { %v4715_v13 = vmul.u32 18, %v4714_v15  ;;  %vm9598_vm14 = vcmask 60416   ;;  %v4899_v56 = vadd.s32 18, %v4683_v22  ;;  %vm4792_vm2 = vcmp.ne.s32.totalorder %v9178_v45, 0 }
 0x2c9   : > { %vm4828_vm4 = vcmp.lt.s32.totalorder %v9178_v45, 0  ;;  %v4901_v14 = vadd.s32 18, %v4705_v9  ;;  %vm4969_vm1 = vcmp.lt.s32.totalorder %v4933_v51, 16  ;;  %v4900_v38 = vadd.s32 18, %v9178_v45 }
 0x2ca   : > { %v4758_v55 = vshrl.u32 %v9182_v2, 4  ;;  %v5691_v54 = vsel %vm4969_vm1, 1.0, %v6089_v8 }
 0x2cc   : > { %v4759_v12 = vmul.u32 18, %v4758_v55 }
 0x2d8   : > { %v9066_v23 = vpop.f32.mrf.mxu1 }
 0x2d9   : > { %v5765_v41 = vpack.c.bf16 %v9066_v23, %v9066_v23  ;;  %v5077_v28 = vmul.f32 %v9066_v23, %v5691_v54 }
 0x2da   : > { %v9075_v29 = vpop.f32.mrf.mxu1 }
 0x2db   : > { %5449 = vst.msk [vmem:[%s8552_s18 + $0x68] sm:$0xf] %vm9586_vm7, %v5765_v41  ;;  %v5763_v62 = vpack.c.bf16 %v9075_v29, %v9075_v29  ;;  %vm4967_vm7 = vcmp.lt.s32.totalorder %v4931_v19, 16  ;;  %v9167_v39 = vmul.u32.u64.low 3817748708, %v9144_v36  ;;  %v9168_v41 = vmul.u32.u64.high 3817748708, %v9144_v36, %v9167_v39 }
 0x2dc   : > { %v9081_v32 = vpop.f32.mrf.mxu1  ;;  %v4736_v19 = vshrl.u32 %v9197_v42, 4  ;;  %v5191_v33 = vmul.f32 %v9066_v23, %v5077_v28 }
 0x2dd   : > { %5447 = vst.msk [vmem:[%s8552_s18 + $0x60] sm:$0xf] %vm9587_vm6, %v5763_v62  ;;  %v5766_v3 = vpack.c.bf16 %v9081_v32, %v9081_v32  ;;  %vm9162_vm6 = vmand %vm4826_vm0, %vm4790_vm13  ;;  %v9175_v62 = vmul.u32.u64.low 3817748708, %v9149_v6  ;;  %v9176_v48 = vmul.u32.u64.high 3817748708, %v9149_v6, %v9175_v62  ;;  %v4725_v31 = vshrl.u32 %v9168_v41, 4 }
 0x2de   : > { %v9093_v46 = vpop.f32.mrf.mxu1  ;;  %v4934_v47 = vsel %vm9162_vm6, %v4898_v40, %v9123_v60  ;;  %vm9219_vm13 = vmand %vm4829_vm5, %vm4793_vm12  ;;  %v9244_v60 = vsub.s32 %v9118_v53, %v4715_v13  ;;  %v4737_v39 = vmul.u32 18, %v4736_v19  ;;  %v5252_v42 = vsel %vm3625_vm10, %v5191_v33, 0.0 }
 0x2df   : > { %5450 = vst.msk [vmem:[%s8552_s18 + $0x6c] sm:$0xf] %vm9588_vm3, %v5766_v3  ;;  %v5764_v63 = vpack.c.bf16 %v9093_v46, %v9093_v46  ;;  %vm4968_vm3 = vcmp.lt.s32.totalorder %v4932_v50, 16  ;;  %v5689_v3 = vsel %vm4967_vm7, 1.0, %v6089_v8  ;;  %vm9603_vm0 = vmmov %vm9598_vm14  ;;  %vm4970_vm15 = vcmp.lt.s32.totalorder %v4934_v47, 16 }
 0x2e0   : > { %v5690_v58 = vsel %vm4968_vm3, 1.0, %v6089_v8  ;;  %v5075_v1 = vmul.f32 %v5689_v3, %v9075_v29  ;;  %vm9236_vm7 = vmand %vm4828_vm4, %vm4792_vm2  ;;  %v4747_v27 = vshrl.u32 %v9176_v48, 4  ;;  %v4937_v26 = vsel %vm9219_vm13, %v4901_v14, %v4705_v9 }
 0x2e1   : > { %5448 = vst.msk [vmem:[%s8552_s18 + $0x64] sm:$0xf] %vm9589_vm11, %v5764_v63  ;;  %vm4791_vm11 = vcmp.ne.s32.totalorder %v4683_v22, 0  ;;  %v5076_v30 = vmul.f32 %v5690_v58, %v9093_v46  ;;  %vm9606_vm6 = vmmov %vm9603_vm0  ;;  %v5692_v24 = vsel %vm4970_vm15, 1.0, %v6089_v8  ;;  %v4936_v53 = vsel %vm9236_vm7, %v4900_v38, %v9178_v45 }
 0x2e2   : > { %vm9211_vm9 = vmand %vm4827_vm8, %vm4791_vm11  ;;  %v5189_v49 = vmul.f32 %v5075_v1, %v9075_v29  ;;  %v4726_v21 = vmul.u32 18, %v4725_v31  ;;  %v5134_v5 = vsel %vm3625_vm10, %v5075_v1, 0.0  ;;  %v4748_v61 = vmul.u32 18, %v4747_v27 }
 0x2e3   : > { %v4935_v25 = vsel %vm9211_vm9, %v4899_v56, %v4683_v22  ;;  %v5190_v29 = vmul.f32 %v5076_v30, %v9093_v46  ;;  %vm9607_vm11 = vmmov %vm9603_vm0  ;;  %vm9264_vm8 = vcmp.lt.s32.totalorder %v4937_v26, 16  ;;  %vm4794_vm12 = vcmp.ne.s32.totalorder %v9244_v60, 0 }
 0x2e4   : > { %vm4971_vm3 = vcmp.lt.s32.totalorder %v4935_v25, 16  ;;  %vm4830_vm5 = vcmp.lt.s32.totalorder %v9244_v60, 0  ;;  %v5248_v40 = vsel %vm3625_vm10, %v5189_v49, 0.0  ;;  %v5136_v50 = vsel %vm3625_vm10, %v5076_v30, 0.0 }
 0x2e5   : > { %v5135_v46 = vadd.f32 %v5134_v5, %v9056_v10  ;;  %v5693_v22 = vsel %vm4971_vm3, 1.0, %v6089_v8  ;;  %v4727_v17 = vsub.s32 %v9144_v36, %v4726_v21  ;;  %v5250_v41 = vsel %vm3625_vm10, %v5190_v29, 0.0  ;;  %vm9284_vm2 = vmand %vm4830_vm5, %vm4794_vm12 }
 0x2e6   : > { %v4902_v9 = vadd.s32 18, %v9244_v60  ;;  %v4749_v15 = vsub.s32 %v9149_v6, %v4748_v61  ;;  %v5249_v62 = vadd.f32 %v5248_v40, %v9059_v16  ;;  %v4760_v45 = vsub.s32 %v9152_v7, %v4759_v12 }
 0x2e7   : > { %v5137_v48 = vadd.f32 %v5136_v50, %v5135_v46  ;;  %v5078_v2 = vmul.f32 %v9081_v32, %v5692_v24  ;;  %v5695_v16 = vsel %vm9264_vm8, 1.0, %v6089_v8  ;;  %vm4795_vm4 = vcmp.ne.s32.totalorder %v4727_v17, 0 }
 0x2e8   : > { %v5251_v51 = vadd.f32 %v5250_v41, %v5249_v62  ;;  %vm4831_vm9 = vcmp.lt.s32.totalorder %v4727_v17, 0  ;;  %v4738_v3 = vsub.s32 %v9171_v44, %v4737_v39  ;;  %v5138_v47 = vsel %vm3625_vm10, %v5077_v28, 0.0 }
 0x2e9   : > { %v4938_v7 = vsel %vm9284_vm2, %v4902_v9, %v9244_v60  ;;  %vm4797_vm1 = vcmp.ne.s32.totalorder %v4749_v15, 0  ;;  %vm4833_vm13 = vcmp.lt.s32.totalorder %v4749_v15, 0  ;;  %v4903_v20 = vadd.s32 18, %v4727_v17  ;;  %vm9305_vm15 = vmand %vm4831_vm9, %vm4795_vm4 }
 0x2ea   : > { %v5192_v58 = vmul.f32 %v9081_v32, %v5078_v2  ;;  %vm4834_vm7 = vcmp.lt.s32.totalorder %v4760_v45, 0  ;;  %v5253_v56 = vadd.f32 %v5252_v42, %v5251_v51  ;;  %vm4832_vm3 = vcmp.lt.s32.totalorder %v4738_v3, 0  ;;  %vm9314_vm8 = vmand %vm4833_vm13, %vm4797_vm1 }
 0x2eb   : > { %v5140_v1 = vsel %vm3625_vm10, %v5078_v2, 0.0  ;;  %v4939_v34 = vsel %vm9305_vm15, %v4903_v20, %v4727_v17  ;;  %v4906_v31 = vadd.s32 18, %v4760_v45  ;;  %v4904_v30 = vadd.s32 18, %v4738_v3 }
 0x2ec   : > { %vm9620_vm1 = vcmask 60416  }
 0x2ed   : > { %vm9621_vm13 = vmmov %vm9620_vm1 }
 0x2f8   : > { %v9191_v63 = vpop.f32.mrf.mxu1 }
 0x2f9   : > { %v5769_v0 = vpack.c.bf16 %v9191_v63, %v9191_v63 }
 0x2fa   : > { %v9200_v4 = vpop.f32.mrf.mxu1 }
 0x2fb   : > { %5453 = vst.msk [vmem:[%s8552_s18 + $0x78] sm:$0xf] %vm9598_vm14, %v5769_v0  ;;  %v5767_v11 = vpack.c.bf16 %v9200_v4, %v9200_v4  ;;  %vm4972_vm14 = vcmp.lt.s32.totalorder %v4936_v53, 16  ;;  %v5079_v6 = vmul.f32 %v5693_v22, %v9200_v4  ;;  %v5139_v0 = vadd.f32 %v5138_v47, %v5137_v48 }
 0x2fc   : > { %v9215_v43 = vpop.f32.mrf.mxu1  ;;  %v5694_v36 = vsel %vm4972_vm14, 1.0, %v6089_v8  ;;  %vm4975_vm14 = vcmp.lt.s32.totalorder %v4939_v34, 16 }
 0x2fd   : > { %5451 = vst.msk [vmem:[%s8552_s18 + $0x70] sm:$0xf] %vm9603_vm0, %v5767_v11  ;;  %v5770_v18 = vpack.c.bf16 %v9215_v43, %v9215_v43  ;;  %vm4798_vm0 = vcmp.ne.s32.totalorder %v4760_v45, 0  ;;  %v5193_v13 = vmul.f32 %v5079_v6, %v9200_v4  ;;  %v4905_v11 = vadd.s32 18, %v4749_v15 }
 0x2fe   : > { %v9230_v35 = vpop.f32.mrf.mxu1  ;;  %v5142_v14 = vsel %vm3625_vm10, %v5079_v6, 0.0  ;;  %v5141_v4 = vadd.f32 %v5140_v1, %v5139_v0  ;;  %vm9321_vm12 = vmand %vm4834_vm7, %vm4798_vm0  ;;  %v5697_v59 = vsel %vm4975_vm14, 1.0, %v6089_v8  ;;  %vm5459_vm7 = vcmask 57344  }
 0x2ff   : > { %5454 = vst.msk [vmem:[%s8552_s18 + $0x7c] sm:$0xf] %vm9606_vm6, %v5770_v18  ;;  %v5768_v57 = vpack.c.bf16 %v9230_v35, %v9230_v35  ;;  %v5080_v23 = vmul.f32 %v5694_v36, %v9230_v35  ;;  %vm4796_vm6 = vcmp.ne.s32.totalorder %v4738_v3, 0  ;;  %v5254_v18 = vsel %vm3625_vm10, %v5192_v58, 0.0  ;;  %vm9622_vm0 = vmmov %vm9620_vm1 }
 0x300   : > { %v5256_v37 = vsel %vm3625_vm10, %v5193_v13, 0.0  ;;  %vm9331_vm5 = vmand %vm4832_vm3, %vm4796_vm6  ;;  %v5143_v60 = vadd.f32 %v5142_v14, %v5141_v4  ;;  %v5255_v55 = vadd.f32 %v5254_v18, %v5253_v56  ;;  %v4941_v49 = vsel %vm9314_vm8, %v4905_v11, %v4749_v15 }
 0x301   : > { %5452 = vst.msk [vmem:[%s8552_s18 + $0x74] sm:$0xf] %vm9607_vm11, %v5768_v57  ;;  %vm4974_vm11 = vcmp.lt.s32.totalorder %v4938_v7, 16  ;;  %v5194_v52 = vmul.f32 %v5080_v23, %v9230_v35  ;;  %v5081_v35 = vmul.f32 %v9191_v63, %v5695_v16  ;;  %v5144_v27 = vsel %vm3625_vm10, %v5080_v23, 0.0  ;;  %vm9623_vm15 = vmmov %vm9622_vm0 }
 0x302   : > { %v5696_v54 = vsel %vm4974_vm11, 1.0, %v6089_v8  ;;  %v5257_v57 = vadd.f32 %v5256_v37, %v5255_v55  ;;  %v5145_v24 = vadd.f32 %v5144_v27, %v5143_v60  ;;  %v4942_v53 = vsel %vm9321_vm12, %v4906_v31, %v4760_v45 }
 0x303   : > { %v5258_v26 = vsel %vm3625_vm10, %v5194_v52, 0.0  ;;  %v4940_v21 = vsel %vm9331_vm5, %v4904_v30, %v4738_v3  ;;  %v5195_v19 = vmul.f32 %v9191_v63, %v5081_v35  ;;  %v5082_v5 = vmul.f32 %v9215_v43, %v5696_v54 }
 0x304   : > { %vm4977_vm2 = vcmp.lt.s32.totalorder %v4941_v49, 16  ;;  %v5259_v29 = vadd.f32 %v5258_v26, %v5257_v57  ;;  %v5146_v12 = vsel %vm3625_vm10, %v5081_v35, 0.0  ;;  %vm4978_vm4 = vcmp.lt.s32.totalorder %v4942_v53, 16 }
 0x305   : > { %vm4976_vm9 = vcmp.lt.s32.totalorder %v4940_v21, 16  ;;  %v5147_v40 = vadd.f32 %v5146_v12, %v5145_v24  ;;  %v5699_v50 = vsel %vm4977_vm2, 1.0, %v6089_v8  ;;  %v5260_v22 = vsel %vm3625_vm10, %v5195_v19, 0.0 }
 0x306   : > { %v5196_v63 = vmul.f32 %v9215_v43, %v5082_v5  ;;  %v5261_v41 = vadd.f32 %v5260_v22, %v5259_v29  ;;  %v5700_v15 = vsel %vm4978_vm4, 1.0, %v6089_v8  ;;  %v5698_v62 = vsel %vm4976_vm9, 1.0, %v6089_v8 }
 0x307   : > { %v5148_v48 = vsel %vm3625_vm10, %v5082_v5, 0.0 }
 0x308   : > { %v5149_v43 = vadd.f32 %v5148_v48, %v5147_v40  ;;  %v5262_v16 = vsel %vm3625_vm10, %v5196_v63, 0.0 }
 0x309   : > { %v5263_v8 = vadd.f32 %v5262_v16, %v5261_v41 }
 0x316   : > { %v5881_v61 = vpop.f32.mrf.mxu1 }
 0x317   : > { %v5773_v28 = vpack.c.bf16 %v5881_v61, %v5881_v61  ;;  %v5085_v10 = vmul.f32 %v5881_v61, %v5699_v50 }
 0x318   : > { %v4315_v46 = vpop.f32.mrf.mxu1 }
 0x319   : > { %5457 = vst.msk [vmem:[%s8552_s18 + $0x88] sm:$0xf] %vm9620_vm1, %v5773_v28  ;;  %v5083_v17 = vmul.f32 %v5697_v59, %v4315_v46  ;;  %v5771_v39 = vpack.c.bf16 %v4315_v46, %v4315_v46  ;;  %v5199_v23 = vmul.f32 %v5881_v61, %v5085_v10  ;;  %v5154_v13 = vsel %vm3625_vm10, %v5085_v10, 0.0 }
 0x31a   : > { %v5882_v9 = vpop.f32.mrf.mxu1 }
 0x31b   : > { %v5150_v36 = vsel %vm3625_vm10, %v5083_v17, 0.0  ;;  %v5197_v45 = vmul.f32 %v5083_v17, %v4315_v46  ;;  %5455 = vst.msk [vmem:[%s8552_s18 + $0x80] sm:$0xf] %vm9621_vm13, %v5771_v39  ;;  %v5774_v33 = vpack.c.bf16 %v5882_v9, %v5882_v9  ;;  %v5086_v51 = vmul.f32 %v5882_v9, %v5700_v15 }
 0x31c   : > { %v4318_v2 = vpop.f32.mrf.mxu1  ;;  %v5151_v47 = vadd.f32 %v5150_v36, %v5149_v43  ;;  %v5268_v14 = vsel %vm3625_vm10, %v5199_v23, 0.0 }
 0x31d   : > { %v5264_v6 = vsel %vm3625_vm10, %v5197_v45, 0.0  ;;  %v5084_v3 = vmul.f32 %v5698_v62, %v4318_v2  ;;  %5458 = vst.msk [vmem:[%s8552_s18 + $0x8c] sm:$0xf] %vm9622_vm0, %v5774_v33  ;;  %v5772_v7 = vpack.c.bf16 %v4318_v2, %v4318_v2  ;;  %v5200_v44 = vmul.f32 %v5882_v9, %v5086_v51 }
 0x31e   : > { %v5265_v42 = vadd.f32 %v5264_v6, %v5263_v8  ;;  %v5156_v52 = vsel %vm3625_vm10, %v5086_v51, 0.0 }
 0x31f   : > { %v5152_v0 = vsel %vm3625_vm10, %v5084_v3, 0.0  ;;  %v5198_v20 = vmul.f32 %v5084_v3, %v4318_v2  ;;  %5456 = vst.msk [vmem:[%s8552_s18 + $0x84] sm:$0xf] %vm9623_vm15, %v5772_v7  ;;  %v5270_v34 = vsel %vm3625_vm10, %v5200_v44, 0.0 }
 0x320   : > { %v5153_v58 = vadd.f32 %v5152_v0, %v5151_v47 }
 0x321   : > { %v5266_v56 = vsel %vm3625_vm10, %v5198_v20, 0.0 }
 0x322   : > { %v5155_v11 = vadd.f32 %v5154_v13, %v5153_v58  ;;  %v5267_v1 = vadd.f32 %v5266_v56, %v5265_v42 }
 0x324   : > { %v5157_v32 = vadd.f32 %v5156_v52, %v5155_v11  ;;  %v5269_v4 = vadd.f32 %v5268_v14, %v5267_v1 }
 0x326   : > { %v5158_v38 = vrot.slane %v5157_v32, 4  ;;  %v5271_v31 = vadd.f32 %v5270_v34, %v5269_v4 }
 0x328   : > { %v5159_v30 = vadd.f32 %v5158_v38, %v5157_v32  ;;  %v5272_v18 = vrot.slane %v5271_v31, 4 }
 0x32a   : > { %v5160_v35 = vrot.slane %v5159_v30, 2  ;;  %v5273_v37 = vadd.f32 %v5272_v18, %v5271_v31 }
 0x32c   : > { %v5161_v27 = vadd.f32 %v5160_v35, %v5159_v30  ;;  %v5274_v25 = vrot.slane %v5273_v37, 2 }
 0x32e   : > { %v5162_v60 = vrot.slane %v5161_v27, 1  ;;  %v5275_v55 = vadd.f32 %v5274_v25, %v5273_v37 }
 0x330   : > { %v5163_v54 = vadd.f32 %v5162_v60, %v5161_v27  ;;  %v5276_v49 = vrot.slane %v5275_v55, 1 }
 0x332   : > { %v5277_v26 = vadd.f32 %v5276_v49, %v5275_v55  ;;  %5460 = vst.msk [vmem:[%s279_s23] sm:$0x1] %vm5459_vm7, %v5163_v54 }
 0x334   : > { %5461 = vst.msk [vmem:[%s282_s26] sm:$0x1] %vm5459_vm7, %v5277_v26 }
 0x335 PF: > { %s18_s21 = sadd.s32 1, %s6075_s21  }
 0x336   : > { %p15_p1 = scmp.ge.s32.totalorder %s18_s21, 4  }
 0x338   :  { %17 = sbr.rel (!%p15_p1) target bundleno = 1 (0x1), region = 95 }
 0x33d   :  { %5507 = vsyncpa [#allocation4], 1 }
 0x33e   :  { %5509 = vsyncpa [#allocation4 + $0x1], 1 }

// kernel: basic_block_forward.3
= control target key start
LH: loop header
LB: loop body
LE: loop exit
PB: predicated region body
PF: predicated region fallthrough
CT: control target
= control target key end

     0   :  { %12 = vsyncpa [#allocation4], 0  ;;  %s5982_s21 = smov 0   ;;  %s9168_s0 = inlined_call_operand.vmem [shape: f32[2,16,16,8], index: 0, kind: input, shape index: {}]   ;;  %s9169_s1 = inlined_call_operand.vmem [shape: f32[5,8], index: 1, kind: input, shape index: {}]   ;;  %s9170_s2 = inlined_call_operand.vmem [shape: f32[8], index: 2, kind: input, shape index: {}]   ;;  %s9171_s3 = inlined_call_operand.vmem [shape: bf16[72,8], index: 3, kind: input, shape index: {}]   ;;  %s9172_s4 = inlined_call_operand.vmem [shape: bf16[2,288,8], index: 4, kind: output, shape index: {0}]   ;;  %s9173_s5 = inlined_call_operand.vmem [shape: f32[2,1,8], index: 5, kind: output, shape index: {1}]   ;;  %s9174_s6 = inlined_call_operand.vmem [shape: f32[2,1,8], index: 6, kind: output, shape index: {2}]  }
   0x1 LB: > { %s5988_s22 = sadd.s32 4294967295, %s5932_s21   ;;  %p5477_p0 = scmp.ge.s32.totalorder %s5932_s21, 1  ;;  %s5932_s21 = sphi %s5982_s21, %s18_s21  }
   0x2   : > { %p190_p1 = scmp.lt.s32.totalorder %s5932_s21, 3  ;;  %s206_s25 = sshll.u32 %s9170_s2, 4  ;;  %s207_s25 = int_to_ptr.vmem [resolvable:$true] %s206_s25 }
   0x3   : > { %p5835_p3 = scmp.eq.s32.totalorder %s5988_s22, 0  ;;  %s5907_s27 = scalar_lea.vmem %s207_s25, 16 }
   0x4   : > { %p5995_p2 = pnand %p5477_p0, %p190_p1  ;;  %p5908_p6 = scmp.ne.s32.totalorder %s207_s25, %s5907_s27 }
   0x5   : > { %p5915_p10 = scmp.lt.s32.totalorder %s207_s25, %s207_s25  ;;  %p5916_p11 = scmp.lt.s32.totalorder %s5907_s27, %s5907_s27 }
   0x6   : > { %p5831_p4 = pneg %p5995_p2 }
   0x7   : > { %p5917_p12 = por %p5916_p11, %p5915_p10 }
   0x8   : > { %p5832_p5 = pnand %p5835_p3, %p5831_p4 }
   0xa   : > { %p5909_p7 = pneg %p5832_p5 }
   0xc   : > { %p5910_p8 = pnand %p5909_p7, %p5908_p6 }
   0xe   : > { %p5911_p9 = pneg %p5910_p8 }
  0x10   : > { %p5918_p13 = pnand %p5917_p12, %p5911_p9 }
  0x12   : > { %5921 = shalt.err (!%p5918_p13)
}
  0x13   : > { %s5934_s28 = smov [#allocation3]   ;;  %230 = sbr.rel (%p5995_p2) target bundleno = 793 (0x319), region = 36 }
  0x14   : > { %5834 = dma.vmem_to_smem (!%p5832_p5), %s207_s25, 16, %s5934_s28, [#allocation4]  }
  0x18   : > { %5927 = dma.done.wait (%p5835_p3), [#allocation4], 16  }
  0x19   : > { %5929 = vsyncadd (%p5835_p3), [#allocation4], 4294967280 }
  0x1a   : > { %236 = sfence }
  0x1b   : > { %p267_p0 = scmp.lt.s32.totalorder %s5988_s22, 1  ;;  %v317_v0 = vlaneseq  ;;  %s6011_s29 = sld [smem:[#allocation3]]  ;;  %vm777_vm0 = vcmask 60416   ;;  %vm782_vm1 = vcmask 58368   ;;  %vm784_vm2 = vcmask 60418  }
  0x1c   : > { %s6013_s30 = sld [smem:[#allocation3 + $0x2]]  ;;  %v5935_v2 = vmov 0   ;;  %v284_v3 = vld [vmem:[%s9169_s1] sm:$0x1f]  ;;  %v5936_v4 = vmov 1966171168  }
  0x1d   : > { %s9427_s22 = smov (!%p267_p0, %s5988_s22), 1  ;;  %v6018_v1 = vshrl.u32 %v317_v0, 7  ;;  %783 = vst.msk [vmem:[#allocation2 + $0x10] sm:$0x3] %vm782_vm1, %v5935_v2  ;;  %s6029_s9 = sld [smem:[#allocation3 + $0x5]]  ;;  %v809_v5 = vunpack.c.l.s4 %v5936_v4 }
  0x1e   : > { %785 = vst.msk [vmem:[#allocation2 + $0xa0] sm:$0xc] %vm784_vm2, %v5935_v2  ;;  %v5937_v6 = vmov 1935823168   ;;  %s5636_s10 = sshll.u32 %s9427_s22, 8  ;;  %s6042_s14 = sld [smem:[#allocation3 + $0x3]] }
  0x1f   : > { %9196 = vst [vmem:[#allocation6_spill] sm:$0xff] %v6018_v1  ;;  %780 = vst.msk [vmem:[#allocation2 + $0x8] sm:$0xf] %vm777_vm0, %v5935_v2  ;;  %v6031_v7 = vunpack.c.l.s4 %v5937_v6  ;;  %v319_v8 = vsub.s32 2, %v6018_v1  ;;  %v387_v9 = vsub.s32 3, %v6018_v1  ;;  %v455_v10 = vsub.s32 4, %v6018_v1  ;;  %s6040_s13 = scalar_lea.vmem %s9168_s0, %s5636_s10 }
  0x20   : > { %781 = vst.msk [vmem:[#allocation2 + $0xc] sm:$0xf] %vm777_vm0, %v5935_v2  ;;  %786 = vst.msk [vmem:[#allocation2 + $0xa4] sm:$0xf] %vm777_vm0, %v5935_v2  ;;  %v810_v11 = vunpack.c.0.s8 %v809_v5  ;;  %v285_v12 = vld [vmem:[%s6040_s13] sm:$0xff]  ;;  %v286_v13 = vld [vmem:[%s6040_s13 + $0x8] sm:$0xff] }
  0x21   : > { %787 = vst.msk [vmem:[#allocation2 + $0xa8] sm:$0xf] %vm777_vm0, %v5935_v2  ;;  %v287_v14 = vld [vmem:[%s6040_s13 + $0x10] sm:$0xff]  ;;  %v6047_v15 = vrot.slane %v284_v3, %v319_v8  ;;  %v6050_v16 = vstv %s6011_s29  ;;  %v288_v17 = vld [vmem:[%s6040_s13 + $0x18] sm:$0xff]  ;;  %v6055_v20 = vrot.slane %v284_v3, %v387_v9  ;;  %v6057_v21 = vrot.slane %v284_v3, %v455_v10  ;;  %s6062_s15 = sld [smem:[#allocation3 + $0x6]]  ;;  %s5938_s19 = smov 16  }
  0x22   : > { %v315_v18 = vld [vmem:[%s6040_s13 + $0xf0] sm:$0xff]  ;;  %v316_v19 = vld [vmem:[%s6040_s13 + $0xf8] sm:$0xff]  ;;  %v6060_v22 = vstv %s6013_s30  ;;  %v1609_v23 = vunpack.c.0.s8 %v6031_v7  ;;  %s6069_s16 = sld [smem:[#allocation3 + $0x4]]  ;;  %v6079_v31 = vsub.s32 %v810_v11, %v6018_v1  ;;  %s5939_s20 = smov 24  }
  0x23   : > { %v321_v24 = vadd.f32 %v6047_v15, %v285_v12  ;;  %v322_v25 = vadd.f32 %v6047_v15, %v286_v13  ;;  %v323_v26 = vadd.f32 %v6047_v15, %v287_v14  ;;  %v324_v27 = vadd.f32 %v6047_v15, %v288_v17  ;;  %s6076_s17 = sld [smem:[#allocation3 + $0x7]]  ;;  %s5940_s23 = smov 40  }
  0x24   : > { %v351_v28 = vadd.f32 %v6047_v15, %v315_v18  ;;  %v352_v29 = vadd.f32 %v6047_v15, %v316_v19  ;;  %v6074_v30 = vstv %s6029_s9  ;;  %s6081_s18 = sld [smem:[#allocation3 + $0x1]]  ;;  %v6090_v40 = vstv %s6042_s14  ;;  %s5941_s24 = smov 48  }
  0x25   : > { %vm353_vm3 = vcmp.ge.f32.partialorder %v321_v24, 0.0  ;;  %vm354_vm4 = vcmp.ge.f32.partialorder %v322_v25, 0.0  ;;  %vm355_vm5 = vcmp.ge.f32.partialorder %v323_v26, 0.0  ;;  %vm356_vm6 = vcmp.ge.f32.partialorder %v324_v27, 0.0  ;;  %s5942_s25 = smov 64   ;;  %s5943_s26 = smov 8  }
  0x26   : > { %vm383_vm7 = vcmp.ge.f32.partialorder %v351_v28, 0.0  ;;  %vm384_vm8 = vcmp.ge.f32.partialorder %v352_v29, 0.0  ;;  %v389_v32 = vmul.f32 %v6055_v20, %v321_v24  ;;  %v390_v33 = vmul.f32 %v6055_v20, %v322_v25  ;;  %s5944_s27 = smov 32   ;;  %s5945_s28 = smov 56  }
  0x27   : > { %v391_v34 = vmul.f32 %v6055_v20, %v323_v26  ;;  %v392_v35 = vmul.f32 %v6055_v20, %v324_v27  ;;  %v419_v36 = vmul.f32 %v6055_v20, %v351_v28  ;;  %v420_v37 = vmul.f32 %v6055_v20, %v352_v29 }
  0x28   : > { %v421_v38 = vsel %vm353_vm3, %v321_v24, %v389_v32  ;;  %v422_v39 = vsel %vm354_vm4, %v322_v25, %v390_v33  ;;  %v6093_v41 = vrot.slane %v5935_v2, %v6079_v31  ;;  %v6102_v52 = vstv %s6062_s15 }
  0x29   : > { %v423_v42 = vsel %vm355_vm5, %v323_v26, %v391_v34  ;;  %v424_v43 = vsel %vm356_vm6, %v324_v27, %v392_v35  ;;  %v451_v44 = vsel %vm383_vm7, %v351_v28, %v419_v36  ;;  %v452_v45 = vsel %vm384_vm8, %v352_v29, %v420_v37  ;;  %v2575_v36 = vld [vmem:[#allocation2 + $0xc] sm:$0xf]  ;;  %v2611_v37 = vld [vmem:[#allocation2 + $0x8] sm:$0xe] }
  0x2a   : > { %v457_v46 = vadd.f32 %v6057_v21, %v421_v38  ;;  %v458_v47 = vadd.f32 %v6057_v21, %v422_v39  ;;  %v459_v48 = vadd.f32 %v6057_v21, %v423_v42  ;;  %v460_v49 = vadd.f32 %v6057_v21, %v424_v43 }
  0x2b   : > { %v487_v50 = vadd.f32 %v6057_v21, %v451_v44  ;;  %v488_v51 = vadd.f32 %v6057_v21, %v452_v45  ;;  %v6105_v53 = vstv %s6069_s16  ;;  %v6114_v60 = vstv %s6076_s17 }
  0x2c   : > { %v491_v54 = vmul.f32 %v6050_v16, %v457_v46  ;;  %v492_v55 = vmul.f32 %v6050_v16, %v458_v47  ;;  %v493_v56 = vmul.f32 %v6050_v16, %v459_v48  ;;  %v494_v57 = vmul.f32 %v6050_v16, %v460_v49  ;;  %v289_v48 = vld [vmem:[%s6040_s13 + $0x20] sm:$0xff]  ;;  %v290_v49 = vld [vmem:[%s6040_s13 + $0x28] sm:$0xff] }
  0x2d   : > { %v521_v58 = vmul.f32 %v6050_v16, %v487_v50  ;;  %v522_v59 = vmul.f32 %v6050_v16, %v488_v51  ;;  %v6117_v61 = vstv %s6081_s18  ;;  %v6163_v39 = vrot.slane %v6093_v41, %v6079_v31 }
  0x2e   : > { %vm525_vm9 = vcmp.gt.f32.partialorder %v491_v54, %v6060_v22  ;;  %vm526_vm10 = vcmp.gt.f32.partialorder %v492_v55, %v6060_v22  ;;  %vm527_vm11 = vcmp.gt.f32.partialorder %v493_v56, %v6060_v22  ;;  %vm528_vm12 = vcmp.gt.f32.partialorder %v494_v57, %v6060_v22 }
  0x2f   : > { %vm555_vm13 = vcmp.gt.f32.partialorder %v521_v58, %v6060_v22  ;;  %vm556_vm14 = vcmp.gt.f32.partialorder %v522_v59, %v6060_v22  ;;  %v559_v62 = vsel %vm525_vm9, %v6074_v30, 0.0  ;;  %v560_v63 = vsel %vm526_vm10, %v6074_v30, 0.0 }
  0x30   : > { %v561_v0 = vsel %vm527_vm11, %v6074_v30, 0.0  ;;  %v562_v2 = vsel %vm528_vm12, %v6074_v30, 0.0  ;;  %v589_v3 = vsel %vm555_vm13, %v6074_v30, 0.0  ;;  %v590_v4 = vsel %vm556_vm14, %v6074_v30, 0.0 }
  0x31   : > { %vm593_vm15 = vcmp.gt.f32.partialorder %v491_v54, %v6090_v40  ;;  %vm594_vm3 = vcmp.gt.f32.partialorder %v492_v55, %v6090_v40  ;;  %vm595_vm4 = vcmp.gt.f32.partialorder %v493_v56, %v6090_v40  ;;  %vm596_vm5 = vcmp.gt.f32.partialorder %v494_v57, %v6090_v40 }
  0x32   : > { %vm623_vm6 = vcmp.gt.f32.partialorder %v521_v58, %v6090_v40  ;;  %vm624_vm7 = vcmp.gt.f32.partialorder %v522_v59, %v6090_v40  ;;  %v627_v5 = vsel %vm593_vm15, %v6102_v52, %v559_v62  ;;  %v628_v6 = vsel %vm594_vm3, %v6102_v52, %v560_v63 }
  0x33   : > { %v629_v8 = vsel %vm595_vm4, %v6102_v52, %v561_v0  ;;  %v630_v9 = vsel %vm596_vm5, %v6102_v52, %v562_v2  ;;  %v657_v10 = vsel %vm623_vm6, %v6102_v52, %v589_v3  ;;  %v658_v11 = vsel %vm624_vm7, %v6102_v52, %v590_v4 }
  0x34   : > { %vm661_vm8 = vcmp.gt.f32.partialorder %v491_v54, %v6105_v53  ;;  %vm662_vm9 = vcmp.gt.f32.partialorder %v492_v55, %v6105_v53  ;;  %vm663_vm10 = vcmp.gt.f32.partialorder %v493_v56, %v6105_v53  ;;  %vm664_vm11 = vcmp.gt.f32.partialorder %v494_v57, %v6105_v53 }
  0x35   : > { %vm691_vm12 = vcmp.gt.f32.partialorder %v521_v58, %v6105_v53  ;;  %vm692_vm13 = vcmp.gt.f32.partialorder %v522_v59, %v6105_v53  ;;  %v695_v12 = vsel %vm661_vm8, %v6114_v60, %v627_v5  ;;  %v696_v13 = vsel %vm662_vm9, %v6114_v60, %v628_v6 }
  0x36   : > { %v697_v14 = vsel %vm663_vm10, %v6114_v60, %v629_v8  ;;  %v698_v17 = vsel %vm664_vm11, %v6114_v60, %v630_v9  ;;  %v725_v18 = vsel %vm691_vm12, %v6114_v60, %v657_v10  ;;  %v726_v19 = vsel %vm692_vm13, %v6114_v60, %v658_v11 }
  0x37   : > { %v729_v24 = vmul.f32 %v6117_v61, %v695_v12  ;;  %v730_v25 = vmul.f32 %v6117_v61, %v696_v13  ;;  %v731_v26 = vmul.f32 %v6117_v61, %v697_v14  ;;  %v732_v27 = vmul.f32 %v6117_v61, %v698_v17 }
  0x38   : > { %v759_v28 = vmul.f32 %v6117_v61, %v725_v18  ;;  %v760_v29 = vmul.f32 %v6117_v61, %v726_v19  ;;  %v6168_v43 = vsub.s32 %v1609_v23, %v6018_v1  ;;  %v6184_v23 = vcombine.low %v2611_v37, %v2575_v36 }
  0x39   : > { %v761_v32 = vpack.c.bf16 %v730_v25, %v729_v24  ;;  %v762_v33 = vpack.c.bf16 %v732_v27, %v731_v26  ;;  %v5492_v34 = vpack.c.bf16 %v730_v25, %v730_v25  ;;  %v5493_v35 = vpack.c.bf16 %v732_v27, %v732_v27 }
  0x3a   : > { %v776_v38 = vpack.c.bf16 %v760_v29, %v759_v28  ;;  %v5507_v42 = vpack.c.bf16 %v760_v29, %v760_v29  ;;  %v2482_v7 = vrot.slane %v6163_v39, %v6168_v43  ;;  %v6190_v59 = vadd.f32 %v6047_v15, %v289_v48 }
  0x3b   : > { %v814_v44 = vrot.slane %v761_v32, %v6079_v31  ;;  %v821_v45 = vrot.slane %v5492_v34, %v6079_v31  ;;  %v877_v46 = vrot.slane %v762_v33, %v6079_v31  ;;  %v6174_v47 = vrot.slane %v5493_v35, %v6079_v31 }
  0x3c   : > { %v6179_v41 = vrot.slane %v776_v38, %v6079_v31  ;;  %v1570_v50 = vrot.slane %v5507_v42, %v6079_v31  ;;  %v6193_v62 = vadd.f32 %v6047_v15, %v290_v49  ;;  %vm357_vm14 = vcmp.ge.f32.partialorder %v6190_v59, 0.0 }
  0x3d   : > { %v822_v51 = vcombine.high %v814_v44, %v814_v44  ;;  %v823_v54 = vcombine.high %v821_v45, %v821_v45  ;;  %v830_v55 = vrot.slane %v814_v44, %v6079_v31  ;;  %v837_v56 = vrot.slane %v821_v45, %v6079_v31 }
  0x3e   : > { %9197 = vst [vmem:[#allocation7_spill] sm:$0xff] %v6179_v41  ;;  %v885_v57 = vcombine.high %v877_v46, %v877_v46  ;;  %v893_v58 = vrot.slane %v877_v46, %v6079_v31  ;;  %v886_v3 = vcombine.high %v6174_v47, %v6174_v47  ;;  %v900_v5 = vrot.slane %v6174_v47, %v6079_v31 }
  0x3f   : > { %v844_v63 = vrot.slane %v822_v51, %v6079_v31  ;;  %v851_v0 = vrot.slane %v823_v54, %v6079_v31  ;;  %v852_v2 = vcombine.high %v830_v55, %v830_v55  ;;  %v853_v4 = vcombine.high %v837_v56, %v837_v56 }
  0x40   : > { %v907_v6 = vrot.slane %v885_v57, %v6079_v31  ;;  %v1571_v8 = vcombine.high %v6179_v41, %v6179_v41  ;;  %v915_v11 = vcombine.high %v893_v58, %v893_v58  ;;  %v1572_v12 = vcombine.high %v1570_v50, %v1570_v50 }
  0x41   : > { %v854_v9 = vcombine.high %v844_v63, %v844_v63  ;;  %v855_v10 = vcombine.high %v851_v0, %v851_v0  ;;  %v1586_v14 = vrot.slane %v1570_v50, %v6079_v31  ;;  %v1605_v18 = vcombine.low %v830_v55, %v830_v55 }
  0x42   : > { %v917_v13 = vcombine.high %v907_v6, %v907_v6  ;;  %v6206_v17 = vrot.slane %v1571_v8, %v6079_v31  ;;  %v1600_v19 = vrot.slane %v1572_v12, %v6079_v31  ;;  %v1606_v24 = vcombine.low %v844_v63, %v844_v63 }
  0x43   : > { %v1629_v25 = vcombine.low %v852_v2, %v837_v56  ;;  %v1630_v26 = vcombine.low %v854_v9, %v851_v0  ;;  %v1602_v27 = vcombine.high %v1586_v14, %v1586_v14  ;;  %v1613_v29 = vrot.slane %v1605_v18, %v6168_v43  ;;  %v291_v9 = vld [vmem:[%s6040_s13 + $0x30] sm:$0xff] }
  0x44   : > { %9198 = vst [vmem:[#allocation8_spill] sm:$0xff] %v6206_v17  ;;  %v1603_v28 = vcombine.high %v6206_v17, %v6206_v17  ;;  %v1653_v32 = vcombine.low %v853_v4, %v6163_v39  ;;  %v1604_v33 = vcombine.high %v1600_v19, %v1600_v19  ;;  %v1620_v34 = vrot.slane %v1606_v24, %v6168_v43 }
  0x45   : > { %v1637_v35 = vrot.slane %v1629_v25, %v6168_v43  ;;  %v1644_v36 = vrot.slane %v1630_v26, %v6168_v43  ;;  %v1654_v37 = vcombine.low %v855_v10, %v893_v58  ;;  %v1677_v42 = vcombine.low %v907_v6, %v917_v13  ;;  %v292_v13 = vld [vmem:[%s6040_s13 + $0x38] sm:$0xff] }
  0x46   : > { %v1661_v38 = vrot.slane %v1653_v32, %v6168_v43  ;;  %v1678_v44 = vcombine.low %v915_v11, %v900_v5  ;;  %v916_v45 = vcombine.high %v900_v5, %v900_v5  ;;  %v1621_v46 = vcombine.low %v1613_v29, %v1620_v34 }
  0x47   : > { %v1645_v47 = vcombine.low %v1637_v35, %v1644_v36  ;;  %v2445_v48 = vcombine.low %v1603_v28, %v1600_v19  ;;  %v1668_v49 = vrot.slane %v1654_v37, %v6168_v43  ;;  %v1685_v50 = vrot.slane %v1677_v42, %v6168_v43 }
  0x48   : > { %v1692_v51 = vrot.slane %v1678_v44, %v6168_v43  ;;  %v2446_v54 = vcombine.low %v1586_v14, %v1602_v27  ;;  %v1628_v55 = vrot.slane %v1621_v46, %v6168_v43  ;;  %v2475_v58 = vrot.slane %v1604_v33, %v6168_v43 }
  0x49   : > { %v1652_v56 = vrot.slane %v1645_v47, %v6168_v43  ;;  %v2453_v57 = vrot.slane %v2445_v48, %v6168_v43  ;;  %v1669_v63 = vcombine.low %v1661_v38, %v1668_v49  ;;  %vm358_vm15 = vcmp.ge.f32.partialorder %v6193_v62, 0.0 }
  0x4a   : > { %v1693_v0 = vcombine.low %v1685_v50, %v1692_v51  ;;  %v2460_v2 = vrot.slane %v2446_v54, %v6168_v43  ;;  %v2483_v4 = vcombine.low %v2475_v58, %v2482_v7  ;;  %2528 = vst.msk [vmem:[#allocation2 + $0x10] sm:$0xc] %vm784_vm2, %v1628_v55  ;;  %v393_v5 = vmul.f32 %v6055_v20, %v6190_v59 }
  0x4b   : > { %2529 = vst.msk [vmem:[#allocation2 + $0x14] sm:$0xf] %vm777_vm0, %v1652_v56  ;;  %v394_v6 = vmul.f32 %v6055_v20, %v6193_v62  ;;  %v914_v8 = vrot.slane %v886_v3, %v6079_v31  ;;  %v1676_v10 = vrot.slane %v1669_v63, %v6168_v43  ;;  %v1702_v7 = vcombine.low %v916_v45, %v6163_v39  ;;  %v293_v3 = vld [vmem:[%s6040_s13 + $0x40] sm:$0xff] }
  0x4c   : > { %v1700_v11 = vrot.slane %v1693_v0, %v6168_v43  ;;  %v6237_v12 = vcombine.low %v2453_v57, %v2460_v2  ;;  %v2490_v14 = vrot.slane %v2483_v4, %v6168_v43  ;;  %v425_v18 = vsel %vm357_vm14, %v6190_v59, %v393_v5 }
  0x4d   : > { %v426_v19 = vsel %vm358_vm15, %v6193_v62, %v394_v6  ;;  %v918_v24 = vcombine.high %v914_v8, %v914_v8  ;;  %2530 = vst.msk [vmem:[#allocation2 + $0x18] sm:$0xf] %vm777_vm0, %v1676_v10  ;;  %vm2913_vm2 = vcmask 1046528   ;;  %v461_v25 = vadd.f32 %v6057_v21, %v425_v18  ;;  %v294_v6 = vld [vmem:[%s6040_s13 + $0x48] sm:$0xff] }
  0x4e   : > { %9199 = vst [vmem:[#allocation9_spill] sm:$0xff] %v6237_v12  ;;  %2531 = vst.msk [vmem:[#allocation2 + $0x1c] sm:$0xf] %vm777_vm0, %v1700_v11  ;;  %v462_v26 = vadd.f32 %v6057_v21, %v426_v19  ;;  %v327_v27 = vadd.f32 %v6047_v15, %v291_v9  ;;  %v2914_v28 = vrot.slane %v6184_v23, 1  ;;  %v1716_v62 = vrot.slane %v1702_v7, %v6168_v43 }
  0x4f   : > { %2564 = vst.msk [vmem:[#allocation2 + $0xa0] sm:$0x3] %vm782_vm1, %v2490_v14  ;;  %v1701_v59 = vcombine.low %v914_v8, %v918_v24  ;;  %v328_v29 = vadd.f32 %v6047_v15, %v292_v13  ;;  %v495_v32 = vmul.f32 %v6050_v16, %v461_v25  ;;  %v6259_v34 = vadd.f32 %v6047_v15, %v293_v3 }
  0x50   : > { %v496_v33 = vmul.f32 %v6050_v16, %v462_v26  ;;  %vm359_vm3 = vcmp.ge.f32.partialorder %v327_v27, 0.0  ;;  %v395_v36 = vmul.f32 %v6055_v20, %v327_v27  ;;  %v330_v3 = vadd.f32 %v6047_v15, %v294_v6 }
  0x51   : > { %v1709_v35 = vrot.slane %v1701_v59, %v6168_v43  ;;  %vm360_vm4 = vcmp.ge.f32.partialorder %v328_v29, 0.0  ;;  %v396_v37 = vmul.f32 %v6055_v20, %v328_v29  ;;  %v2576_v38 = vld [vmem:[#allocation2 + $0x10] sm:$0xf]  ;;  %vm529_vm1 = vcmp.gt.f32.partialorder %v495_v32, %v6060_v22 }
  0x52   : > { %v2577_v42 = vld [vmem:[#allocation2 + $0x14] sm:$0xf]  ;;  %v2613_v44 = vld [vmem:[#allocation2 + $0x10] sm:$0xe]  ;;  %vm530_vm5 = vcmp.gt.f32.partialorder %v496_v33, %v6060_v22  ;;  %vm597_vm6 = vcmp.gt.f32.partialorder %v495_v32, %v6090_v40  ;;  %vm598_vm7 = vcmp.gt.f32.partialorder %v496_v33, %v6090_v40  ;;  %v563_v48 = vsel %vm529_vm1, %v6074_v30, 0.0 }
  0x53   : > { %v2617_v45 = vld [vmem:[#allocation2 + $0x10] sm:$0xc]  ;;  %v5529_v46 = vcombine.low %v2613_v44, %v2577_v42  ;;  %v6268_v47 = vcombine.low %v2576_v38, %v2577_v42  ;;  %v564_v49 = vsel %vm530_vm5, %v6074_v30, 0.0  ;;  %v631_v51 = vsel %vm597_vm6, %v6102_v52, %v563_v48 }
  0x54   : > { %v6272_v50 = vcombine.low %v2617_v45, %v2577_v42  ;;  %v632_v54 = vsel %vm598_vm7, %v6102_v52, %v564_v49  ;;  %vm665_vm8 = vcmp.gt.f32.partialorder %v495_v32, %v6105_v53  ;;  %v2578_v55 = vld [vmem:[#allocation2 + $0x18] sm:$0xf]  ;;  %vm666_vm9 = vcmp.gt.f32.partialorder %v496_v33, %v6105_v53 }
  0x55   : > { %v6277_v56 = vld [vmem:[#allocation2 + $0x1c] sm:$0xf]  ;;  %v3000_v57 = vrot.slane %v5529_v46, 1  ;;  %v2915_v58 = vrot.slane %v6268_v47, 1  ;;  %v699_v63 = vsel %vm665_vm8, %v6114_v60, %v631_v51  ;;  %v700_v2 = vsel %vm666_vm9, %v6114_v60, %v632_v54 }
  0x56   : > { %v6283_v0 = vcombine.low %v2578_v55, %v6277_v56  ;;  %v733_v4 = vmul.f32 %v6117_v61, %v699_v63  ;;  %v1717_v5 = vcombine.low %v1709_v35, %v1716_v62  ;;  %v734_v9 = vmul.f32 %v6117_v61, %v700_v2 }
  0x57   : > { %v2916_v8 = vsel %vm2913_vm2, %v2914_v28, %v2915_v58  ;;  %v427_v10 = vsel %vm359_vm3, %v327_v27, %v395_v36  ;;  %v428_v11 = vsel %vm360_vm4, %v328_v29, %v396_v37  ;;  %v3180_v29 = vrot.slane %v6272_v50, 2 }
  0x58   : > { %v6293_v7 = vrot.slane %v6283_v0, 1  ;;  %2951 = vrot.lane.b32.xlu1 %v2916_v8, %s5938_s19  ;;  %v1724_v13 = vrot.slane %v1717_v5, %v6168_v43  ;;  %v463_v14 = vadd.f32 %v6057_v21, %v427_v10  ;;  %v464_v18 = vadd.f32 %v6057_v21, %v428_v11 }
  0x59   : > { %v763_v19 = vpack.c.bf16 %v734_v9, %v733_v4  ;;  %v5494_v24 = vpack.c.bf16 %v734_v9, %v734_v9  ;;  %vm361_vm10 = vcmp.ge.f32.partialorder %v6259_v34, 0.0  ;;  %vm362_vm4 = vcmp.ge.f32.partialorder %v330_v3, 0.0 }
  0x5a   : > { %v3001_v25 = vsel %vm2913_vm2, %v3000_v57, %v6293_v7  ;;  %2532 = vst.msk [vmem:[#allocation2 + $0x20] sm:$0xf] %vm777_vm0, %v1724_v13  ;;  %v2918_v26 = vsel %vm2913_vm2, %v2915_v58, %v6293_v7  ;;  %v497_v27 = vmul.f32 %v6050_v16, %v463_v14  ;;  %v498_v28 = vmul.f32 %v6050_v16, %v464_v18 }
  0x5b   : > { %3006 = vrot.lane.b32.xlu0 %v3001_v25, %s5939_s20  ;;  %v926_v59 = vrot.slane %v763_v19, %v6079_v31  ;;  %v933_v62 = vrot.slane %v5494_v24, %v6079_v31  ;;  %v3181_v58 = vrot.slane %v6283_v0, 2  ;;  %v397_v5 = vmul.f32 %v6055_v20, %v6259_v34 }
  0x5c   : > { %2953 = vrot.lane.b32.xlu1 %v2918_v26, %s5938_s19  ;;  %vm531_vm11 = vcmp.gt.f32.partialorder %v497_v27, %v6060_v22  ;;  %vm532_vm12 = vcmp.gt.f32.partialorder %v498_v28, %v6060_v22  ;;  %vm599_vm13 = vcmp.gt.f32.partialorder %v497_v27, %v6090_v40  ;;  %vm600_vm14 = vcmp.gt.f32.partialorder %v498_v28, %v6090_v40 }
  0x5d   : > { %v934_v32 = vcombine.high %v926_v59, %v926_v59  ;;  %v942_v33 = vrot.slane %v926_v59, %v6079_v31  ;;  %v565_v35 = vsel %vm531_vm11, %v6074_v30, 0.0  ;;  %v566_v36 = vsel %vm532_vm12, %v6074_v30, 0.0 }
  0x5e   : > { %v633_v37 = vsel %vm599_vm13, %v6102_v52, %v565_v35  ;;  %v634_v38 = vsel %vm600_vm14, %v6102_v52, %v566_v36  ;;  %vm667_vm15 = vcmp.gt.f32.partialorder %v497_v27, %v6105_v53  ;;  %vm668_vm3 = vcmp.gt.f32.partialorder %v498_v28, %v6105_v53 }
  0x5f   : > { %v956_v42 = vrot.slane %v934_v32, %v6079_v31  ;;  %v964_v44 = vcombine.high %v942_v33, %v942_v33  ;;  %v701_v45 = vsel %vm667_vm15, %v6114_v60, %v633_v37  ;;  %v702_v46 = vsel %vm668_vm3, %v6114_v60, %v634_v38 }
  0x60   : > { %v735_v48 = vmul.f32 %v6117_v61, %v701_v45  ;;  %v736_v49 = vmul.f32 %v6117_v61, %v702_v46  ;;  %v935_v51 = vcombine.high %v933_v62, %v933_v62  ;;  %v949_v54 = vrot.slane %v933_v62, %v6079_v31 }
  0x61   : > { %v966_v55 = vcombine.high %v956_v42, %v956_v42  ;;  %v1725_v57 = vcombine.low %v942_v33, %v964_v44  ;;  %v398_v9 = vmul.f32 %v6055_v20, %v330_v3  ;;  %v429_v18 = vsel %vm361_vm10, %v6259_v34, %v397_v5 }
  0x62   : > { %v764_v63 = vpack.c.bf16 %v736_v49, %v735_v48  ;;  %v963_v2 = vrot.slane %v935_v51, %v6079_v31  ;;  %v965_v4 = vcombine.high %v949_v54, %v949_v54  ;;  %v5495_v10 = vpack.c.bf16 %v736_v49, %v736_v49  ;;  %v2619_v49 = vld [vmem:[#allocation2 + $0x18] sm:$0xc] }
  0x63   : > { %v1726_v6 = vcombine.low %v956_v42, %v966_v55  ;;  %v1733_v8 = vrot.slane %v1725_v57, %v6168_v43  ;;  %v430_v24 = vsel %vm362_vm4, %v330_v3, %v398_v9  ;;  %v465_v25 = vadd.f32 %v6057_v21, %v429_v18 }
  0x64   : > { %v967_v11 = vcombine.high %v963_v2, %v963_v2  ;;  %v975_v13 = vrot.slane %v764_v63, %v6079_v31  ;;  %v1749_v14 = vcombine.low %v949_v54, %v965_v4  ;;  %v982_v26 = vrot.slane %v5495_v10, %v6079_v31 }
  0x65   : > { %v1740_v19 = vrot.slane %v1726_v6, %v6168_v43  ;;  %v466_v33 = vadd.f32 %v6057_v21, %v430_v24  ;;  %v499_v35 = vmul.f32 %v6050_v16, %v465_v25  ;;  %v5534_v4 = vcombine.low %v2619_v49, %v6277_v56 }
  0x66   : > { %v983_v27 = vcombine.high %v975_v13, %v975_v13  ;;  %v991_v28 = vrot.slane %v975_v13, %v6079_v31  ;;  %v1750_v59 = vcombine.low %v963_v2, %v967_v11  ;;  %v1757_v62 = vrot.slane %v1749_v14, %v6168_v43 }
  0x67   : > { %v1741_v32 = vcombine.low %v1733_v8, %v1740_v19  ;;  %v984_v36 = vcombine.high %v982_v26, %v982_v26  ;;  %v998_v38 = vrot.slane %v982_v26, %v6079_v31  ;;  %v500_v44 = vmul.f32 %v6050_v16, %v466_v33  ;;  %v2623_v19 = vld [vmem:[#allocation2 + $0x18] sm:$0x8] }
  0x68   : > { %v1005_v34 = vrot.slane %v983_v27, %v6079_v31  ;;  %v1013_v37 = vcombine.high %v991_v28, %v991_v28  ;;  %v1764_v3 = vrot.slane %v1750_v59, %v6168_v43  ;;  %vm533_vm1 = vcmp.gt.f32.partialorder %v499_v35, %v6060_v22 }
  0x69   : > { %v1748_v42 = vrot.slane %v1741_v32, %v6168_v43  ;;  %vm601_vm5 = vcmp.gt.f32.partialorder %v499_v35, %v6090_v40  ;;  %v567_v51 = vsel %vm533_vm1, %v6074_v30, 0.0  ;;  %vm534_vm6 = vcmp.gt.f32.partialorder %v500_v44, %v6060_v22 }
  0x6a   : > { %v1765_v45 = vcombine.low %v1757_v62, %v1764_v3  ;;  %v1773_v46 = vcombine.low %v6163_v39, %v1005_v34  ;;  %v1774_v48 = vcombine.low %v991_v28, %v1013_v37  ;;  %vm602_vm7 = vcmp.gt.f32.partialorder %v500_v44, %v6090_v40 }
  0x6b   : > { %2533 = vst.msk [vmem:[#allocation2 + $0x24] sm:$0xf] %vm777_vm0, %v1748_v42  ;;  %v635_v54 = vsel %vm601_vm5, %v6102_v52, %v567_v51  ;;  %vm669_vm8 = vcmp.gt.f32.partialorder %v499_v35, %v6105_v53  ;;  %v568_v2 = vsel %vm534_vm6, %v6074_v30, 0.0  ;;  %vm670_vm9 = vcmp.gt.f32.partialorder %v500_v44, %v6105_v53 }
  0x6c   : > { %v1772_v55 = vrot.slane %v1765_v45, %v6168_v43  ;;  %v1781_v57 = vrot.slane %v1773_v46, %v6168_v43  ;;  %v1788_v63 = vrot.slane %v1774_v48, %v6168_v43  ;;  %v636_v5 = vsel %vm602_vm7, %v6102_v52, %v568_v2 }
  0x6d   : > { %v703_v6 = vsel %vm669_vm8, %v6114_v60, %v635_v54  ;;  %v704_v9 = vsel %vm670_vm9, %v6114_v60, %v636_v5  ;;  %v1014_v11 = vcombine.high %v998_v38, %v998_v38  ;;  %vm3179_vm10 = vcmask 1045504  }
  0x6e   : > { %v1789_v8 = vcombine.low %v1781_v57, %v1788_v63  ;;  %2534 = vst.msk [vmem:[#allocation2 + $0x28] sm:$0xf] %vm777_vm0, %v1772_v55  ;;  %v737_v10 = vmul.f32 %v6117_v61, %v703_v6  ;;  %v6373_v13 = vmul.f32 %v6117_v61, %v704_v9  ;;  %v1012_v14 = vrot.slane %v984_v36, %v6079_v31 }
  0x6f   : > { %v1015_v18 = vcombine.high %v1005_v34, %v1005_v34  ;;  %v1798_v25 = vcombine.low %v998_v38, %v1014_v11  ;;  %v2725_v26 = vshll.u32 %v6184_v23, 16  ;;  %vm9184_vm11 = vcmask 1044480  }
  0x70   : > { %v1796_v24 = vrot.slane %v1789_v8, %v6168_v43  ;;  %v765_v27 = vpack.c.bf16 %v6373_v13, %v737_v10  ;;  %v3182_v62 = vsel %vm3179_vm10, %v3180_v29, %v3181_v58  ;;  %v3266_v32 = vrot.slane %v5534_v4, 2 }
  0x71   : > { %v1797_v28 = vcombine.low %v1015_v18, %v1012_v14  ;;  %v1812_v33 = vrot.slane %v1798_v25, %v6168_v43  ;;  %v6389_v35 = vcombine.low %v2623_v19, %v6277_v56  ;;  %v1016_v36 = vcombine.high %v1012_v14, %v1012_v14 }
  0x72   : > { %v6379_v59 = vld [vmem:[#allocation2 + $0x20] sm:$0xff]   ;;  %2535 = vst.msk [vmem:[#allocation2 + $0x2c] sm:$0xf] %vm777_vm0, %v1796_v24  ;;  %v1024_v34 = vrot.slane %v765_v27, %v6079_v31  ;;  %v2730_v3 = vshll.u32 %v6268_v47, 16  ;;  %v2723_v42 = vshrl.u32 %v6184_v23, 16  ;;  %v2727_v44 = vrot.slane %v2725_v26, 1 }
  0x73   : > { %v1805_v37 = vrot.slane %v1797_v28, %v6168_v43  ;;  %v2919_v38 = vrot.slane %v6379_v59, 1  ;;  %v2734_v29 = vshrl.u32 %v6268_v47, 16  ;;  %v6398_v45 = vrot.slane %v6379_v59, 2 }
  0x74   : > { %v1032_v46 = vcombine.high %v1024_v34, %v1024_v34  ;;  %v6401_v56 = vrot.slane %v1024_v34, %v6079_v31  ;;  %v3446_v51 = vrot.slane %v6389_v35, 3  ;;  %v3447_v54 = vrot.slane %v6379_v59, 3 }
  0x75   : > { %v1813_v48 = vcombine.low %v1805_v37, %v1812_v33  ;;  %v2920_v49 = vsel %vm2913_vm2, %v6293_v7, %v2919_v38  ;;  %v2738_v23 = vshll.u32 %v6283_v0, 16  ;;  %v2732_v2 = vrot.slane %v2730_v3, 1 }
  0x76   : > { %3008 = vrot.lane.b32.xlu0 %v2920_v49, %s5939_s20  ;;  %v6410_v55 = vrot.slane %v1032_v46, %v6079_v31  ;;  %v1821_v63 = vcombine.low %v1016_v36, %v6401_v56  ;;  %vm9187_vm12 = vsmask.f32 7424  ;;  %v2728_v4 = vor.u32 %v2727_v44, %v2723_v42 }
  0x77   : > { %v1820_v57 = vrot.slane %v1813_v48, %v6168_v43  ;;  %v2742_v7 = vshrl.u32 %v6283_v0, 16  ;;  %v6416_v5 = vshll.u32 %v6379_v59, 16  ;;  %v6419_v6 = vshrl.u32 %v6379_v59, 16 }
  0x78   : > { %v3267_v9 = vsel %vm3179_vm10, %v3266_v32, %v6398_v45  ;;  %v1822_v10 = vcombine.low %v6163_v39, %v6410_v55  ;;  %v1829_v11 = vrot.slane %v1821_v63, %v6168_v43  ;;  %v2736_v14 = vor.u32 %v2734_v29, %v2732_v2 }
  0x79   : > { %v6421_v8 = vld [vmem:[#allocation2 + $0x28] sm:$0xff]   ;;  %2536 = vst.msk [vmem:[#allocation2 + $0x30] sm:$0xf] %vm777_vm0, %v1820_v57  ;;  %v3184_v18 = vsel %vm3179_vm10, %v3181_v58, %v6398_v45  ;;  %v6436_v19 = vsel %vm9184_vm11, %v3446_v51, %v3447_v54  ;;  %v2740_v24 = vrot.slane %v2738_v23, 1  ;;  %v3049_v25 = vshrl.u32 %v6272_v50, 16 }
  0x7a   : > { %2955 = vrot.lane.b32.xlu0 %v2920_v49, %s5938_s19  ;;  %v9175_v26 = vrot.slane %v6421_v8, 1  ;;  %v1836_v27 = vrot.slane %v1822_v10, %v6168_v43  ;;  %vm3047_vm13 = vsmask.f32 6400  ;;  %v3052_v28 = vshll.u32 %v6272_v50, 16 }
  0x7b   : > { %v3056_v32 = vrot.slane %v2742_v7, 1  ;;  %v6444_v58 = vshll.u32 %v6421_v8, 16  ;;  %v6447_v33 = vshrl.u32 %v6421_v8, 16  ;;  %v3060_v36 = vrot.slane %v6419_v6, 1 }
  0x7c   : > { %v3061_v34 = vrot.slane %v6416_v5, 2  ;;  %v6454_v37 = vsel %vm2913_vm2, %v2919_v38, %v9175_v26  ;;  %v1837_v3 = vcombine.low %v1829_v11, %v1836_v27  ;;  %v2744_v42 = vor.u32 %v2742_v7, %v2740_v24  ;;  %v295_v26 = vld [vmem:[%s6040_s13 + $0x50] sm:$0xff] }
  0x7d   : > { %v2748_v50 = vrot.slane %v6416_v5, 1  ;;  %3010 = vrot.lane.b32.xlu1 %v6454_v37, %s5939_s20  ;;  %v3185_v44 = vrot.slane %v6421_v8, 2  ;;  %v3064_v29 = vrot.slane %v6447_v33, 1  ;;  %v3065_v46 = vrot.slane %v6444_v58, 2 }
  0x7e   : > { %v3051_v48 = vrot.slane %v3049_v25, 1  ;;  %3217 = vrot.lane.b32.xlu0 %v3182_v62, %s5940_s23  ;;  %v1844_v38 = vrot.slane %v1837_v3, %v6168_v43  ;;  %v3449_v49 = vrot.slane %v6421_v8, 3  ;;  %v3054_v51 = vrot.slane %v3052_v28, 2 }
  0x7f   : > { %v3057_v57 = vrot.slane %v2738_v23, 2  ;;  %v3062_v63 = vor.u32 %v3061_v34, %v3060_v36  ;;  %v3315_v7 = vshrl.u32 %v6389_v35, 16  ;;  %v3318_v10 = vshll.u32 %v6389_v35, 16  ;;  %v296_v34 = vld [vmem:[%s6040_s13 + $0x58] sm:$0xff] }
  0x80   : > { %v3322_v11 = vrot.slane %v6419_v6, 2  ;;  %2537 = vst.msk [vmem:[#allocation2 + $0x34] sm:$0xf] %vm777_vm0, %v1844_v38  ;;  %v6469_v25 = vor.u32 %v3065_v46, %v3064_v29  ;;  %v3055_v27 = vor.u32 %v3054_v51, %v3051_v48  ;;  %v3323_v62 = vrot.slane %v6416_v5, 3 }
  0x81   : > { %v3326_v3 = vrot.slane %v6447_v33, 2  ;;  %3272 = vrot.lane.b32.xlu1 %v3267_v9, %s5941_s24  ;;  %v3058_v23 = vor.u32 %v3057_v57, %v3056_v32  ;;  %v3317_v28 = vrot.slane %v3315_v7, 2  ;;  %v3320_v36 = vrot.slane %v3318_v10, 3 }
  0x82   : > { %v3327_v35 = vrot.slane %v6444_v58, 3  ;;  %3219 = vrot.lane.b32.xlu0 %v3184_v18, %s5940_s23  ;;  %v3186_v29 = vsel %vm3179_vm10, %v6398_v45, %v3185_v44  ;;  %v6483_v5 = vsel %vm9187_vm12, %v2728_v4, %v2732_v2  ;;  %v6486_v46 = vsel %vm9187_vm12, %v2736_v14, %v2740_v24 }
  0x83   : > { %v6489_v9 = vsel %vm9187_vm12, %v2744_v42, %v2748_v50  ;;  %v6496_v18 = vsel %vm9184_vm11, %v3447_v54, %v3449_v49  ;;  %vm9188_vm14 = vsmask.f32 5376  ;;  %v3324_v32 = vor.u32 %v3323_v62, %v3322_v11 }
  0x84   : > { %v331_v45 = vadd.f32 %v6047_v15, %v295_v26  ;;  %v3321_v48 = vor.u32 %v3320_v36, %v3317_v28  ;;  %v6499_v2 = vor.u32 %v3327_v35, %v3326_v3  ;;  %v332_v4 = vadd.f32 %v6047_v15, %v296_v34  ;;  %v298_v3 = vld [vmem:[%s6040_s13 + $0x68] sm:$0xff] }
  0x85   : > { %v5496_v14 = vpack.c.bf16 %v6373_v13, %v6373_v13  ;;  %3274 = vrot.lane.b32.xlu1 %v3186_v29, %s5941_s24  ;;  %v6507_v59 = vsel %vm3047_vm13, %v3062_v63, %v6469_v25  ;;  %v6510_v54 = vsel %vm3047_vm13, %v3055_v27, %v3058_v23  ;;  %v6513_v24 = vsel %vm3047_vm13, %v3058_v23, %v3062_v63  ;;  %v297_v27 = vld [vmem:[%s6040_s13 + $0x60] sm:$0xff]  ;;  %v299_v23 = vld [vmem:[%s6040_s13 + $0x70] sm:$0xff] }
  0x86   : > { %v2752_v26 = vor.u32 %v6419_v6, %v2748_v50  ;;  %vm363_vm15 = vcmp.ge.f32.partialorder %v331_v45, 0.0  ;;  %vm364_vm3 = vcmp.ge.f32.partialorder %v332_v4, 0.0  ;;  %v399_v42 = vmul.f32 %v6055_v20, %v331_v45 }
  0x87   : > { %v400_v13 = vmul.f32 %v6055_v20, %v332_v4  ;;  %v6518_v38 = vld [vmem:[#allocation2 + $0x30] sm:$0xff]   ;;  %v2756_v51 = vrot.slane %v6444_v58, 1  ;;  %v1031_v57 = vrot.slane %v5496_v14, %v6079_v31  ;;  %v1062_v63 = vcombine.high %v6401_v56, %v6401_v56 }
  0x88   : > { %v1064_v6 = vcombine.high %v6410_v55, %v6410_v55  ;;  %v6527_v50 = vsel %vm9188_vm14, %v3321_v48, %v3324_v32  ;;  %v6531_v7 = vsel %vm9188_vm14, %v3324_v32, %v6499_v2  ;;  %v431_v10 = vsel %vm363_vm15, %v331_v45, %v399_v42  ;;  %v300_v32 = vld [vmem:[%s6040_s13 + $0x78] sm:$0xff] }
  0x89   : > { %v432_v11 = vsel %vm364_vm3, %v332_v4, %v400_v13  ;;  %v9177_v58 = vrot.slane %v6518_v38, 2  ;;  %3221 = vrot.lane.b32.xlu1 %v3186_v29, %s5940_s23  ;;  %v2923_v56 = vrot.slane %v6518_v38, 1  ;;  %v9176_v62 = vrot.slane %v6518_v38, 3 }
  0x8a   : > { %v6539_v55 = vshll.u32 %v6518_v38, 16  ;;  %v6544_v28 = vshrl.u32 %v6518_v38, 16  ;;  %v467_v36 = vadd.f32 %v6057_v21, %v431_v10  ;;  %v468_v35 = vadd.f32 %v6057_v21, %v432_v11 }
  0x8b   : > { %v1033_v34 = vcombine.high %v1031_v57, %v1031_v57  ;;  %v6554_v29 = vsel %vm3179_vm10, %v3185_v44, %v9177_v58  ;;  %v6557_v45 = vsel %vm9187_vm12, %v2752_v26, %v2756_v51  ;;  %v6560_v48 = vor.u32 %v6447_v33, %v2756_v51 }
  0x8c   : > { %v333_v4 = vadd.f32 %v6047_v15, %v297_v27  ;;  %3276 = vrot.lane.b32.xlu0 %v6554_v29, %s5941_s24  ;;  %v3330_v14 = vrot.slane %v6544_v28, 2  ;;  %v3331_v42 = vrot.slane %v6539_v55, 3  ;;  %v334_v13 = vadd.f32 %v6047_v15, %v298_v3 }
  0x8d   : > { %v6569_v44 = vadd.f32 %v6047_v15, %v299_v23  ;;  %3483 = vrot.lane.b32.xlu1 %v6436_v19, %s5942_s25  ;;  %v9200_v33 = vrot.slane %v6421_v8, 1  ;;  %v501_v51 = vmul.f32 %v6050_v16, %v467_v36  ;;  %v502_v10 = vmul.f32 %v6050_v16, %v468_v35 }
  0x8e   : > { %v6581_v11 = vadd.f32 %v6047_v15, %v300_v32  ;;  %v3452_v27 = vsel %vm9184_vm11, %v3449_v49, %v9176_v62  ;;  %v3068_v19 = vrot.slane %v6544_v28, 1  ;;  %v1047_v3 = vrot.slane %v1031_v57, %v6079_v31 }
  0x8f   : > { %v2924_v26 = vsel %vm2913_vm2, %v9200_v33, %v2923_v56  ;;  %v1061_v23 = vrot.slane %v1033_v34, %v6079_v31  ;;  %vm535_vm4 = vcmp.gt.f32.partialorder %v501_v51, %v6060_v22  ;;  %vm536_vm1 = vcmp.gt.f32.partialorder %v502_v10, %v6060_v22 }
  0x90   : > { %vm603_vm5 = vcmp.gt.f32.partialorder %v501_v51, %v6090_v40  ;;  %vm604_vm6 = vcmp.gt.f32.partialorder %v502_v10, %v6090_v40  ;;  %2957 = vrot.lane.b32.xlu0 %v6454_v37, %s5938_s19  ;;  %v6597_v8 = vor.u32 %v3331_v42, %v3330_v14  ;;  %v3069_v49 = vrot.slane %v6539_v55, 2 }
  0x91   : > { %v569_v36 = vsel %vm535_vm4, %v6074_v30, 0.0  ;;  %v570_v57 = vsel %vm536_vm1, %v6074_v30, 0.0  ;;  %3485 = vrot.lane.b32.xlu1 %v6496_v18, %s5942_s25  ;;  %vm671_vm7 = vcmp.gt.f32.partialorder %v501_v51, %v6105_v53  ;;  %vm672_vm8 = vcmp.gt.f32.partialorder %v502_v10, %v6105_v53 }
  0x92   : > { %v637_v35 = vsel %vm603_vm5, %v6102_v52, %v569_v36  ;;  %v638_v34 = vsel %vm604_vm6, %v6102_v52, %v570_v57  ;;  %v1063_v14 = vcombine.high %v1047_v3, %v1047_v3  ;;  %v1065_v42 = vcombine.high %v1061_v23, %v1061_v23 }
  0x93   : > { %v705_v37 = vsel %vm671_vm7, %v6114_v60, %v637_v35  ;;  %v706_v32 = vsel %vm672_vm8, %v6114_v60, %v638_v34  ;;  %v1845_v58 = vcombine.low %v1062_v63, %v1047_v3  ;;  %v1846_v18 = vcombine.low %v1064_v6, %v1061_v23 }
  0x94   : > { %v739_v33 = vmul.f32 %v6117_v61, %v705_v37  ;;  %v740_v62 = vmul.f32 %v6117_v61, %v706_v32  ;;  %2959 = vrot.lane.b32.xlu0 %v2924_v26, %s5938_s19  ;;  %v1869_v36 = vcombine.low %v1063_v14, %v6163_v39  ;;  %vm365_vm9 = vcmp.ge.f32.partialorder %v333_v4, 0.0 }
  0x95   : > { %vm366_vm15 = vcmp.ge.f32.partialorder %v334_v13, 0.0  ;;  %v401_v51 = vmul.f32 %v6055_v20, %v333_v4  ;;  %3487 = vrot.lane.b32.xlu1 %v3452_v27, %s5942_s25  ;;  %v1853_v57 = vrot.slane %v1845_v58, %v6168_v43  ;;  %v1860_v35 = vrot.slane %v1846_v18, %v6168_v43 }
  0x96   : > { %v766_v10 = vpack.c.bf16 %v740_v62, %v739_v33  ;;  %v5497_v34 = vpack.c.bf16 %v740_v62, %v740_v62  ;;  %v1877_v37 = vrot.slane %v1869_v36, %v6168_v43  ;;  %v402_v63 = vmul.f32 %v6055_v20, %v334_v13 }
  0x97   : > { %v433_v6 = vsel %vm365_vm9, %v333_v4, %v401_v51  ;;  %vm367_vm3 = vcmp.ge.f32.partialorder %v6569_v44, 0.0  ;;  %v1861_v23 = vcombine.low %v1853_v57, %v1860_v35  ;;  %vm368_vm4 = vcmp.ge.f32.partialorder %v6581_v11, 0.0 }
  0x98   : > { %v1073_v3 = vrot.slane %v766_v10, %v6079_v31  ;;  %v1080_v32 = vrot.slane %v5497_v34, %v6079_v31  ;;  %v469_v27 = vadd.f32 %v6057_v21, %v433_v6  ;;  %2872 = vrot.lane.b32.xlu0 %v6483_v5, %s5943_s26  ;;  %v434_v58 = vsel %vm366_vm15, %v334_v13, %v402_v63 }
  0x99   : > { %v403_v62 = vmul.f32 %v6055_v20, %v6569_v44  ;;  %v404_v4 = vmul.f32 %v6055_v20, %v6581_v11  ;;  %3012 = vrot.lane.b32.xlu1 %v2924_v26, %s5939_s20  ;;  %v1868_v33 = vrot.slane %v1861_v23, %v6168_v43  ;;  %v470_v13 = vadd.f32 %v6057_v21, %v434_v58 }
  0x9a   : > { %v1089_v14 = vrot.slane %v1073_v3, %v6079_v31  ;;  %v1081_v18 = vcombine.high %v1073_v3, %v1073_v3  ;;  %v1082_v36 = vcombine.high %v1080_v32, %v1080_v32  ;;  %v1096_v5 = vrot.slane %v1080_v32, %v6079_v31 }
  0x9b   : > { %v503_v51 = vmul.f32 %v6050_v16, %v469_v27  ;;  %v435_v10 = vsel %vm367_vm3, %v6569_v44, %v403_v62  ;;  %2538 = vst.msk [vmem:[#allocation2 + $0x38] sm:$0xf] %vm777_vm0, %v1868_v33  ;;  %v504_v6 = vmul.f32 %v6050_v16, %v470_v13 }
  0x9c   : > { %v1870_v57 = vcombine.low %v1065_v42, %v1089_v14  ;;  %v1103_v26 = vrot.slane %v1081_v18, %v6079_v31  ;;  %v1110_v35 = vrot.slane %v1082_v36, %v6079_v31  ;;  %v1111_v34 = vcombine.high %v1089_v14, %v1089_v14  ;;  %2874 = vrot.lane.b32.xlu0 %v6486_v46, %s5943_s26 }
  0x9d   : > { %v1112_v63 = vcombine.high %v1096_v5, %v1096_v5  ;;  %vm537_vm1 = vcmp.gt.f32.partialorder %v503_v51, %v6060_v22  ;;  %vm605_vm5 = vcmp.gt.f32.partialorder %v503_v51, %v6090_v40  ;;  %2876 = vrot.lane.b32.xlu1 %v6489_v9, %s5943_s26  ;;  %vm538_vm6 = vcmp.gt.f32.partialorder %v504_v6, %v6060_v22 }
  0x9e   : > { %v1884_v44 = vrot.slane %v1870_v57, %v6168_v43  ;;  %v1113_v42 = vcombine.high %v1103_v26, %v1103_v26  ;;  %v1114_v3 = vcombine.high %v1110_v35, %v1110_v35  ;;  %v1894_v23 = vcombine.low %v1111_v34, %v1096_v5 }
  0x9f   : > { %v1918_v32 = vcombine.low %v1112_v63, %v6163_v39  ;;  %v571_v46 = vsel %vm537_vm1, %v6074_v30, 0.0  ;;  %vm606_vm7 = vcmp.gt.f32.partialorder %v504_v6, %v6090_v40  ;;  %v572_v33 = vsel %vm538_vm6, %v6074_v30, 0.0 }
  0xa0   : > { %v1885_v27 = vcombine.low %v1877_v37, %v1884_v44  ;;  %v1893_v58 = vcombine.low %v1103_v26, %v1113_v42  ;;  %v1908_v62 = vrot.slane %v1894_v23, %v6168_v43  ;;  %v1917_v14 = vcombine.low %v1110_v35, %v1114_v3  ;;  %3142 = vrot.lane.b32.xlu0 %v6507_v59, %s5944_s27  ;;  %v302_v44 = vld [vmem:[%s6040_s13 + $0x88] sm:$0xff] }
  0xa1   : > { %v1932_v9 = vrot.slane %v1918_v32, %v6168_v43  ;;  %v639_v18 = vsel %vm605_vm5, %v6102_v52, %v571_v46  ;;  %vm673_vm8 = vcmp.gt.f32.partialorder %v503_v51, %v6105_v53  ;;  %3138 = vrot.lane.b32.xlu1 %v6510_v54, %s5944_s27  ;;  %v640_v59 = vsel %vm606_vm7, %v6102_v52, %v572_v33 }
  0xa2   : > { %v1892_v37 = vrot.slane %v1885_v27, %v6168_v43  ;;  %v1901_v36 = vrot.slane %v1893_v58, %v6168_v43  ;;  %v1925_v5 = vrot.slane %v1917_v14, %v6168_v43  ;;  %vm674_vm9 = vcmp.gt.f32.partialorder %v504_v6, %v6105_v53 }
  0xa3   : > { %v707_v13 = vsel %vm673_vm8, %v6114_v60, %v639_v18  ;;  %v436_v51 = vsel %vm368_vm4, %v6581_v11, %v404_v4  ;;  %v471_v54 = vadd.f32 %v6057_v21, %v435_v10  ;;  %v708_v35 = vsel %vm674_vm9, %v6114_v60, %v640_v59  ;;  %v301_v10 = vld [vmem:[%s6040_s13 + $0x80] sm:$0xff] }
  0xa4   : > { %2539 = vst.msk [vmem:[#allocation2 + $0x3c] sm:$0xf] %vm777_vm0, %v1892_v37  ;;  %v1909_v57 = vcombine.low %v1901_v36, %v1908_v62  ;;  %v1933_v26 = vcombine.low %v1925_v5, %v1932_v9  ;;  %v741_v34 = vmul.f32 %v6117_v61, %v707_v13  ;;  %3404 = vrot.lane.b32.xlu0 %v6527_v50, %s5945_s28  ;;  %v2764_v63 = vrot.slane %v6539_v55, 1 }
  0xa5   : > { %v742_v6 = vmul.f32 %v6117_v61, %v708_v35  ;;  %v472_v11 = vadd.f32 %v6057_v21, %v436_v51  ;;  %v505_v4 = vmul.f32 %v6050_v16, %v471_v54  ;;  %3140 = vrot.lane.b32.xlu1 %v6513_v24, %s5944_s27  ;;  %v3333_v42 = vsel %vm9188_vm14, %v6499_v2, %v6597_v8 }
  0xa6   : > { %v6697_v50 = vor.u32 %v3069_v49, %v3068_v19  ;;  %v1916_v3 = vrot.slane %v1909_v57, %v6168_v43  ;;  %v1940_v23 = vrot.slane %v1933_v26, %v6168_v43  ;;  %v337_v24 = vadd.f32 %v6047_v15, %v301_v10 }
  0xa7   : > { %v767_v32 = vpack.c.bf16 %v742_v6, %v741_v34  ;;  %v5498_v46 = vpack.c.bf16 %v742_v6, %v742_v6  ;;  %v6702_v27 = vmul.f32 %v6050_v16, %v472_v11  ;;  %vm539_vm15 = vcmp.gt.f32.partialorder %v505_v4, %v6060_v22 }
  0xa8   : > { %2540 = vst.msk [vmem:[#allocation2 + $0x40] sm:$0xf] %vm777_vm0, %v1916_v3  ;;  %2541 = vst.msk [vmem:[#allocation2 + $0x44] sm:$0xf] %vm777_vm0, %v1940_v23  ;;  %v573_v2 = vsel %vm539_vm15, %v6074_v30, 0.0  ;;  %vm607_vm3 = vcmp.gt.f32.partialorder %v505_v4, %v6090_v40  ;;  %v338_v55 = vadd.f32 %v6047_v15, %v302_v44  ;;  %3406 = vrot.lane.b32.xlu0 %v6531_v7, %s5945_s28  ;;  %vm369_vm6 = vcmp.ge.f32.partialorder %v337_v24, 0.0 }
  0xa9   : > { %v2765_v19 = vsel %vm9187_vm12, %v6560_v48, %v2764_v63  ;;  %v1122_v49 = vrot.slane %v767_v32, %v6079_v31  ;;  %v1129_v58 = vrot.slane %v5498_v46, %v6079_v31  ;;  %vm540_vm4 = vcmp.gt.f32.partialorder %v6702_v27, %v6060_v22  ;;  %3408 = vrot.lane.b32.xlu1 %v3333_v42, %s5945_s28 }
  0xaa   : > { %v3071_v62 = vsel %vm3047_vm13, %v6469_v25, %v6697_v50  ;;  %v2768_v14 = vor.u32 %v6544_v28, %v2764_v63  ;;  %vm608_vm1 = vcmp.gt.f32.partialorder %v6702_v27, %v6090_v40  ;;  %vm675_vm5 = vcmp.gt.f32.partialorder %v505_v4, %v6105_v53 }
  0xab   : > { %v6727_v7 = vld [vmem:[#allocation2 + $0x38] sm:$0xff]   ;;  %v1130_v48 = vcombine.high %v1122_v49, %v1122_v49  ;;  %v1131_v9 = vcombine.high %v1129_v58, %v1129_v58  ;;  %v574_v33 = vsel %vm540_vm4, %v6074_v30, 0.0  ;;  %v641_v18 = vsel %vm607_vm3, %v6102_v52, %v573_v2 }
  0xac   : > { %v1138_v37 = vrot.slane %v1122_v49, %v6079_v31  ;;  %vm370_vm7 = vcmp.ge.f32.partialorder %v338_v55, 0.0  ;;  %v405_v25 = vmul.f32 %v6055_v20, %v337_v24  ;;  %2878 = vrot.lane.b32.xlu0 %v6557_v45, %s5943_s26  ;;  %v2925_v28 = vrot.slane %v6727_v7, 1 }
  0xad   : > { %v3189_v36 = vrot.slane %v6727_v7, 2  ;;  %v2770_v5 = vshll.u32 %v6727_v7, 16  ;;  %v2774_v59 = vshrl.u32 %v6727_v7, 16  ;;  %vm676_vm8 = vcmp.gt.f32.partialorder %v6702_v27, %v6105_v53  ;;  %3144 = vrot.lane.b32.xlu1 %v3071_v62, %s5944_s27 }
  0xae   : > { %v1145_v13 = vrot.slane %v1129_v58, %v6079_v31  ;;  %v642_v45 = vsel %vm608_vm1, %v6102_v52, %v574_v33  ;;  %v709_v51 = vsel %vm675_vm5, %v6114_v60, %v641_v18  ;;  %v406_v54 = vmul.f32 %v6055_v20, %v338_v55 }
  0xaf   : > { %v3072_v57 = vrot.slane %v2774_v59, 1  ;;  %v3073_v26 = vrot.slane %v2770_v5, 2  ;;  %v1152_v35 = vrot.slane %v1130_v48, %v6079_v31  ;;  %v1159_v34 = vrot.slane %v1131_v9, %v6079_v31  ;;  %v6756_v10 = vld [vmem:[#allocation2 + $0x40] sm:$0xff]  }
  0xb0   : > { %v3334_v63 = vrot.slane %v2774_v59, 2  ;;  %v3335_v6 = vrot.slane %v2770_v5, 3  ;;  %v3453_v11 = vrot.slane %v6727_v7, 3  ;;  %v1160_v44 = vcombine.high %v1138_v37, %v1138_v37  ;;  %2880 = vrot.lane.b32.xlu0 %v2765_v19, %s5943_s26 }
  0xb1   : > { %v6764_v4 = vsel %vm2913_vm2, %v2923_v56, %v2925_v28  ;;  %v9201_v42 = vrot.slane %v6518_v38, 2  ;;  %v6769_v23 = vor.u32 %v3073_v26, %v3072_v57  ;;  %v2772_v32 = vrot.slane %v2770_v5, 1  ;;  %3223 = vrot.lane.b32.xlu1 %v6554_v29, %s5940_s23 }
  0xb2   : > { %v3336_v46 = vor.u32 %v3335_v6, %v3334_v63  ;;  %v9178_v2 = vrot.slane %v6756_v10, 2  ;;  %v6775_v19 = vshll.u32 %v6756_v10, 16  ;;  %v6778_v49 = vshrl.u32 %v6756_v10, 16 }
  0xb3   : > { %v3190_v3 = vsel %vm3179_vm10, %v9201_v42, %v3189_v36  ;;  %v3455_v56 = vrot.slane %v6756_v10, 3  ;;  %v1161_v58 = vcombine.high %v1145_v13, %v1145_v13  ;;  %v1162_v62 = vcombine.high %v1152_v35, %v1152_v35 }
  0xb4   : > { %v1163_v48 = vcombine.high %v1159_v34, %v1159_v34  ;;  %v3338_v9 = vrot.slane %v6778_v49, 2  ;;  %v3339_v33 = vrot.slane %v6775_v19, 3  ;;  %v437_v29 = vsel %vm369_vm6, %v337_v24, %v405_v25  ;;  %3014 = vrot.lane.b32.xlu0 %v6764_v4, %s5939_s20 }
  0xb5   : > { %v438_v18 = vsel %vm370_vm7, %v338_v55, %v406_v54  ;;  %v3075_v5 = vsel %vm3047_vm13, %v6697_v50, %v6769_v23  ;;  %v9202_v57 = vrot.slane %v6518_v38, 3  ;;  %v6794_v63 = vsel %vm9187_vm12, %v2768_v14, %v2772_v32  ;;  %3278 = vrot.lane.b32.xlu1 %v3190_v3, %s5941_s24 }
  0xb6   : > { %v2927_v6 = vrot.slane %v6756_v10, 1  ;;  %v3337_v24 = vsel %vm9188_vm14, %v6597_v8, %v3336_v46  ;;  %v6803_v55 = vsel %vm3179_vm10, %v3189_v36, %v9178_v2  ;;  %v6808_v38 = vsel %vm9184_vm11, %v3453_v11, %v3455_v56 }
  0xb7   : > { %v3454_v26 = vsel %vm9184_vm11, %v9202_v57, %v3453_v11  ;;  %v1941_v50 = vcombine.low %v1138_v37, %v1160_v44  ;;  %v6810_v14 = vor.u32 %v3339_v33, %v3338_v9  ;;  %v1942_v25 = vcombine.low %v1152_v35, %v1162_v62 }
  0xb8   : > { %v1965_v54 = vcombine.low %v1145_v13, %v1161_v58  ;;  %v1966_v42 = vcombine.low %v1159_v34, %v1163_v48  ;;  %v6812_v57 = vor.u32 %v2774_v59, %v2772_v32  ;;  %v2780_v8 = vrot.slane %v6775_v19, 1  ;;  %3146 = vrot.lane.b32.xlu0 %v3075_v5, %s5944_s27  ;;  %v303_v34 = vld [vmem:[%s6040_s13 + $0x90] sm:$0xff]  ;;  %v304_v32 = vld [vmem:[%s6040_s13 + $0x98] sm:$0xff] }
  0xb9   : > { %v1949_v36 = vrot.slane %v1941_v50, %v6168_v43  ;;  %v710_v2 = vsel %vm676_vm8, %v6114_v60, %v642_v45  ;;  %v1956_v37 = vrot.slane %v1942_v25, %v6168_v43  ;;  %v743_v59 = vmul.f32 %v6117_v61, %v709_v51  ;;  %3410 = vrot.lane.b32.xlu1 %v3337_v24, %s5945_s28 }
  0xba   : > { %v1973_v35 = vrot.slane %v1965_v54, %v6168_v43  ;;  %v1980_v13 = vrot.slane %v1966_v42, %v6168_v43  ;;  %v3076_v11 = vrot.slane %v6778_v49, 1  ;;  %v3077_v44 = vrot.slane %v6775_v19, 2 }
  0xbb   : > { %v744_v27 = vmul.f32 %v6117_v61, %v710_v2  ;;  %v473_v45 = vadd.f32 %v6057_v21, %v437_v29  ;;  %v3341_v58 = vsel %vm9188_vm14, %v3336_v46, %v6810_v14  ;;  %v1957_v62 = vcombine.low %v1949_v36, %v1956_v37 }
  0xbc   : > { %v1981_v48 = vcombine.low %v1973_v35, %v1980_v13  ;;  %v474_v9 = vadd.f32 %v6057_v21, %v438_v18  ;;  %v339_v24 = vadd.f32 %v6047_v15, %v303_v34  ;;  %3225 = vrot.lane.b32.xlu0 %v3190_v3, %s5940_s23  ;;  %v340_v46 = vadd.f32 %v6047_v15, %v304_v32 }
  0xbd   : > { %v768_v51 = vpack.c.bf16 %v744_v27, %v743_v59  ;;  %v5499_v33 = vpack.c.bf16 %v744_v27, %v744_v27  ;;  %v507_v5 = vmul.f32 %v6050_v16, %v473_v45  ;;  %v1964_v2 = vrot.slane %v1957_v62, %v6168_v43  ;;  %3489 = vrot.lane.b32.xlu1 %v3454_v26, %s5942_s25 }
  0xbe   : > { %v1988_v29 = vrot.slane %v1981_v48, %v6168_v43  ;;  %v508_v50 = vmul.f32 %v6050_v16, %v474_v9  ;;  %vm371_vm6 = vcmp.ge.f32.partialorder %v339_v24, 0.0  ;;  %v407_v62 = vmul.f32 %v6055_v20, %v339_v24 }
  0xbf   : > { %v1171_v18 = vrot.slane %v768_v51, %v6079_v31  ;;  %v1178_v25 = vrot.slane %v5499_v33, %v6079_v31  ;;  %vm541_vm9 = vcmp.gt.f32.partialorder %v507_v5, %v6060_v22  ;;  %vm609_vm15 = vcmp.gt.f32.partialorder %v507_v5, %v6090_v40  ;;  %2542 = vst.msk [vmem:[#allocation2 + $0x48] sm:$0xf] %vm777_vm0, %v1964_v2 }
  0xc0   : > { %2543 = vst.msk [vmem:[#allocation2 + $0x4c] sm:$0xf] %vm777_vm0, %v1988_v29  ;;  %vm542_vm3 = vcmp.gt.f32.partialorder %v508_v50, %v6060_v22  ;;  %v575_v3 = vsel %vm541_vm9, %v6074_v30, 0.0  ;;  %vm610_vm4 = vcmp.gt.f32.partialorder %v508_v50, %v6090_v40  ;;  %vm677_vm1 = vcmp.gt.f32.partialorder %v507_v5, %v6105_v53  ;;  %3280 = vrot.lane.b32.xlu0 %v6803_v55, %s5941_s24 }
  0xc1   : > { %v1179_v26 = vcombine.high %v1171_v18, %v1171_v18  ;;  %v1180_v54 = vcombine.high %v1178_v25, %v1178_v25  ;;  %v1187_v42 = vrot.slane %v1171_v18, %v6079_v31  ;;  %v1194_v36 = vrot.slane %v1178_v25, %v6079_v31  ;;  %3412 = vrot.lane.b32.xlu1 %v3341_v58, %s5945_s28 }
  0xc2   : > { %v576_v37 = vsel %vm542_vm3, %v6074_v30, 0.0  ;;  %v643_v35 = vsel %vm609_vm15, %v6102_v52, %v575_v3  ;;  %vm678_vm5 = vcmp.gt.f32.partialorder %v508_v50, %v6105_v53  ;;  %v408_v48 = vmul.f32 %v6055_v20, %v340_v46 }
  0xc3   : > { %v1201_v13 = vrot.slane %v1179_v26, %v6079_v31  ;;  %v6863_v59 = vrot.slane %v1180_v54, %v6079_v31  ;;  %v1209_v34 = vcombine.high %v1187_v42, %v1187_v42  ;;  %v1210_v27 = vcombine.high %v1194_v36, %v1194_v36 }
  0xc4   : > { %v644_v45 = vsel %vm610_vm4, %v6102_v52, %v576_v37  ;;  %v711_v32 = vsel %vm677_vm1, %v6114_v60, %v643_v35  ;;  %2882 = vrot.lane.b32.xlu0 %v6794_v63, %s5943_s26  ;;  %vm372_vm7 = vcmp.ge.f32.partialorder %v340_v46, 0.0  ;;  %v439_v63 = vsel %vm371_vm6, %v339_v24, %v407_v62 }
  0xc5   : > { %v1211_v58 = vcombine.high %v1201_v13, %v1201_v13  ;;  %v1989_v9 = vcombine.low %v6163_v39, %v1201_v13  ;;  %v1990_v51 = vcombine.low %v1187_v42, %v1209_v34  ;;  %v2014_v33 = vcombine.low %v1194_v36, %v1210_v27  ;;  %3491 = vrot.lane.b32.xlu1 %v6808_v38, %s5942_s25 }
  0xc6   : > { %v712_v2 = vsel %vm678_vm5, %v6114_v60, %v644_v45  ;;  %v745_v29 = vmul.f32 %v6117_v61, %v711_v32  ;;  %v2928_v50 = vsel %vm2913_vm2, %v2925_v28, %v2927_v6  ;;  %v2781_v38 = vsel %vm9187_vm12, %v6812_v57, %v2780_v8 }
  0xc7   : > { %v6882_v5 = vld [vmem:[#allocation2 + $0x48] sm:$0xff]   ;;  %v1997_v18 = vrot.slane %v1989_v9, %v6168_v43  ;;  %v2004_v25 = vrot.slane %v1990_v51, %v6168_v43  ;;  %v2013_v3 = vcombine.low %v1211_v58, %v6863_v59  ;;  %v6901_v26 = vor.u32 %v3077_v44, %v3076_v11 }
  0xc8   : > { %v746_v54 = vmul.f32 %v6117_v61, %v712_v2  ;;  %v6905_v24 = vshll.u32 %v6882_v5, 16  ;;  %v6908_v7 = vshrl.u32 %v6882_v5, 16  ;;  %v2028_v28 = vrot.slane %v2014_v33, %v6168_v43  ;;  %2961 = vrot.lane.b32.xlu0 %v6764_v4, %s5938_s19 }
  0xc9   : > { %v440_v42 = vsel %vm372_vm7, %v340_v46, %v408_v48  ;;  %v2005_v57 = vcombine.low %v1997_v18, %v2004_v25  ;;  %v2021_v36 = vrot.slane %v2013_v3, %v6168_v43  ;;  %v475_v11 = vadd.f32 %v6057_v21, %v439_v63  ;;  %3016 = vrot.lane.b32.xlu1 %v2928_v50, %s5939_s20 }
  0xca   : > { %v769_v37 = vpack.c.bf16 %v746_v54, %v745_v29  ;;  %v2929_v44 = vrot.slane %v6882_v5, 1  ;;  %v3193_v35 = vrot.slane %v6882_v5, 2  ;;  %v3080_v13 = vrot.slane %v6908_v7, 1 }
  0xcb   : > { %v3081_v34 = vrot.slane %v6905_v24, 2  ;;  %v3079_v4 = vsel %vm3047_vm13, %v6769_v23, %v6901_v26  ;;  %v3342_v46 = vrot.slane %v6908_v7, 2  ;;  %v3343_v27 = vrot.slane %v6905_v24, 3 }
  0xcc   : > { %v2012_v45 = vrot.slane %v2005_v57, %v6168_v43  ;;  %v2029_v32 = vcombine.low %v2021_v36, %v2028_v28  ;;  %v1212_v62 = vcombine.high %v6863_v59, %v6863_v59  ;;  %v5500_v48 = vpack.c.bf16 %v746_v54, %v746_v54  ;;  %2884 = vrot.lane.b32.xlu0 %v2781_v38, %s5943_s26 }
  0xcd   : > { %v3457_v58 = vrot.slane %v6882_v5, 3  ;;  %v1220_v9 = vrot.slane %v769_v37, %v6079_v31  ;;  %v476_v23 = vadd.f32 %v6057_v21, %v440_v42  ;;  %v509_v51 = vmul.f32 %v6050_v16, %v475_v11  ;;  %3148 = vrot.lane.b32.xlu1 %v3079_v4, %s5944_s27  ;;  %v7104_v5 = vld [vmem:[%s9171_s3 + $0x10] sm:$0xff]  }
  0xce   : > { %2544 = vst.msk [vmem:[#allocation2 + $0x50] sm:$0xf] %vm777_vm0, %v2012_v45  ;;  %v6940_v59 = vsel %vm2913_vm2, %v2927_v6, %v2929_v44  ;;  %v9203_v33 = vrot.slane %v6756_v10, 2  ;;  %v6949_v29 = vor.u32 %v3081_v34, %v3080_v13  ;;  %v2036_v18 = vrot.slane %v2029_v32, %v6168_v43 }
  0xcf   : > { %v6952_v25 = vor.u32 %v3343_v27, %v3342_v46  ;;  %v1227_v3 = vrot.slane %v5500_v48, %v6079_v31  ;;  %v1228_v63 = vcombine.high %v1220_v9, %v1220_v9  ;;  %v1236_v38 = vrot.slane %v1220_v9, %v6079_v31 }
  0xd0   : > { %v6947_v2 = vsel %vm3179_vm10, %v9203_v33, %v3193_v35  ;;  %2545 = vst.msk [vmem:[#allocation2 + $0x54] sm:$0xf] %vm777_vm0, %v2036_v18  ;;  %v510_v6 = vmul.f32 %v6050_v16, %v476_v23  ;;  %vm543_vm8 = vcmp.gt.f32.partialorder %v509_v51, %v6060_v22  ;;  %vm611_vm9 = vcmp.gt.f32.partialorder %v509_v51, %v6090_v40 }
  0xd1   : > { %vm679_vm15 = vcmp.gt.f32.partialorder %v509_v51, %v6105_v53  ;;  %2963 = vrot.lane.b32.xlu0 %v2928_v50, %s5938_s19  ;;  %v1229_v54 = vcombine.high %v1227_v3, %v1227_v3  ;;  %v1243_v28 = vrot.slane %v1227_v3, %v6079_v31  ;;  %v1250_v42 = vrot.slane %v1228_v63, %v6079_v31 }
  0xd2   : > { %v1258_v57 = vcombine.high %v1236_v38, %v1236_v38  ;;  %3227 = vrot.lane.b32.xlu1 %v6803_v55, %s5940_s23  ;;  %v2037_v36 = vcombine.low %v1212_v62, %v1236_v38  ;;  %vm544_vm3 = vcmp.gt.f32.partialorder %v510_v6, %v6060_v22  ;;  %v577_v37 = vsel %vm543_vm8, %v6074_v30, 0.0 }
  0xd3   : > { %vm612_vm4 = vcmp.gt.f32.partialorder %v510_v6, %v6090_v40  ;;  %v6970_v11 = vrot.slane %v1229_v54, %v6079_v31  ;;  %v1260_v50 = vcombine.high %v1250_v42, %v1250_v42  ;;  %v2038_v13 = vcombine.low %v6163_v39, %v1250_v42 }
  0xd4   : > { %v2061_v34 = vcombine.low %v1258_v57, %v1243_v28  ;;  %v2045_v4 = vrot.slane %v2037_v36, %v6168_v43  ;;  %v578_v46 = vsel %vm544_vm3, %v6074_v30, 0.0  ;;  %v645_v55 = vsel %vm611_vm9, %v6102_v52, %v577_v37 }
  0xd5   : > { %vm680_vm1 = vcmp.gt.f32.partialorder %v510_v6, %v6105_v53  ;;  %3018 = vrot.lane.b32.xlu0 %v6940_v59, %s5939_s20  ;;  %v3083_v27 = vsel %vm3047_vm13, %v6901_v26, %v6949_v29  ;;  %v2052_v45 = vrot.slane %v2038_v13, %v6168_v43  ;;  %v2062_v32 = vcombine.low %v1260_v50, %v6970_v11 }
  0xd6   : > { %v646_v62 = vsel %vm612_vm4, %v6102_v52, %v578_v46  ;;  %3282 = vrot.lane.b32.xlu1 %v6947_v2, %s5941_s24  ;;  %v3345_v48 = vsel %vm9188_vm14, %v6810_v14, %v6952_v25  ;;  %v2069_v9 = vrot.slane %v2061_v34, %v6168_v43  ;;  %v713_v23 = vsel %vm679_vm15, %v6114_v60, %v645_v55 }
  0xd7   : > { %v714_v26 = vsel %vm680_vm1, %v6114_v60, %v646_v62  ;;  %v6997_v33 = vld [vmem:[#allocation2 + $0x50] sm:$0xff]   ;;  %v2053_v18 = vcombine.low %v2045_v4, %v2052_v45  ;;  %v2076_v3 = vrot.slane %v2062_v32, %v6168_v43  ;;  %v747_v63 = vmul.f32 %v6117_v61, %v713_v23 }
  0xd8   : > { %v748_v38 = vmul.f32 %v6117_v61, %v714_v26  ;;  %v2784_v14 = vor.u32 %v6778_v49, %v2780_v8  ;;  %v2788_v6 = vrot.slane %v6905_v24, 1  ;;  %v1259_v54 = vcombine.high %v1243_v28, %v1243_v28 }
  0xd9   : > { %3150 = vrot.lane.b32.xlu0 %v3083_v27, %s5944_s27  ;;  %v7008_v51 = vshll.u32 %v6997_v33, 16  ;;  %v7011_v42 = vshrl.u32 %v6997_v33, 16  ;;  %v3195_v57 = vrot.slane %v6997_v33, 2  ;;  %v2060_v36 = vrot.slane %v2053_v18, %v6168_v43  ;;  %v5872_v27 = vld [vmem:[%s9171_s3 + $0x20] ss:$0 sps:$4 sm:$0xff]  }
  0xda   : > { %3414 = vrot.lane.b32.xlu1 %v3345_v48, %s5945_s28  ;;  %v2077_v19 = vcombine.low %v2069_v9, %v2076_v3  ;;  %v770_v37 = vpack.c.bf16 %v748_v38, %v747_v63  ;;  %v3458_v49 = vsel %vm9184_vm11, %v3455_v56, %v3457_v58  ;;  %v2789_v28 = vsel %vm9187_vm12, %v2784_v14, %v2788_v6  ;;  %v305_v48 = vld [vmem:[%s6040_s13 + $0xa0] sm:$0xff]  ;;  %v306_v9 = vld [vmem:[%s6040_s13 + $0xa8] sm:$0xff] }
  0xdb   : > { %v3346_v8 = vrot.slane %v7011_v42, 2  ;;  %v3347_v24 = vrot.slane %v7008_v51, 3  ;;  %2546 = vst.msk [vmem:[#allocation2 + $0x58] sm:$0xf] %vm777_vm0, %v2060_v36  ;;  %v1261_v50 = vcombine.high %v6970_v11, %v6970_v11  ;;  %v2085_v13 = vcombine.low %v1259_v54, %v6163_v39 }
  0xdc   : > { %v2084_v56 = vrot.slane %v2077_v19, %v6168_v43  ;;  %v5501_v34 = vpack.c.bf16 %v748_v38, %v748_v38  ;;  %v1269_v4 = vrot.slane %v770_v37, %v6079_v31  ;;  %v7040_v11 = vsel %vm3179_vm10, %v3193_v35, %v3195_v57  ;;  %v7085_v19 = vpop.permute.xlu0 %3006 }
  0xdd   : > { %3229 = vrot.lane.b32.xlu0 %v6947_v2, %s5940_s23  ;;  %v7030_v10 = vor.u32 %v3347_v24, %v3346_v8  ;;  %v3459_v2 = vrot.slane %v6997_v33, 3  ;;  %v2931_v46 = vrot.slane %v6997_v33, 1  ;;  %v7045_v55 = vor.u32 %v6908_v7, %v2788_v6  ;;  %v7096_v24 = vpop.permute.xlu1 %2951 }
  0xde   : > { %3493 = vrot.lane.b32.xlu1 %v3458_v49, %s5942_s25  ;;  %2547 = vst.msk [vmem:[#allocation2 + $0x5c] sm:$0xf] %vm777_vm0, %v2084_v56  ;;  %v7055_v35 = vrot.slane %v5501_v34, %v6079_v31  ;;  %v1277_v32 = vcombine.high %v1269_v4, %v1269_v4  ;;  %v1285_v62 = vrot.slane %v1269_v4, %v6079_v31  ;;  %v3084_v7 = vrot.slane %v7011_v42, 1 }
  0xdf   : > { %v3349_v45 = vsel %vm9188_vm14, %v6952_v25, %v7030_v10  ;;  %v3085_v23 = vrot.slane %v7008_v51, 2  ;;  %v2093_v26 = vrot.slane %v2085_v13, %v6168_v43  ;;  %vm4045_vm5 = vcmask 1043456   ;;  %v7066_v25 = vld [vmem:[%s9171_s3 + $0x18] sm:$0xff]  }
  0xe0   : > { %v7072_v18 = vrot.slane %v7055_v35, %v6079_v31  ;;  %v1299_v3 = vrot.slane %v1277_v32, %v6079_v31  ;;  %v1307_v63 = vcombine.high %v1285_v62, %v1285_v62  ;;  %v2086_v38 = vcombine.low %v1261_v50, %v1285_v62  ;;  %5752 = vmatprep.subr.msk.bf16.mxu0 %vm4045_vm5, %v5872_v27  ;;  %v7115_v62 = vld [vmem:[#allocation2 + $0x8] sm:$0xf] }
  0xe1   : > { %3284 = vrot.lane.b32.xlu0 %v7040_v11, %s5941_s24  ;;  %v3460_v14 = vsel %vm9184_vm11, %v3457_v58, %v3459_v2  ;;  %v4047_v6 = vsel %vm4045_vm5, %v5872_v27, 0  ;;  %v341_v54 = vadd.f32 %v6047_v15, %v305_v48  ;;  %v342_v36 = vadd.f32 %v6047_v15, %v306_v9  ;;  %5753 = vmatprep.subr.msk.bf16.mxu1 %vm4045_vm5, %v5872_v27 }
  0xe2   : > { %3416 = vrot.lane.b32.xlu1 %v3349_v45, %s5945_s28  ;;  %v7092_v37 = vsel %vm2913_vm2, %v2929_v44, %v2931_v46  ;;  %v1309_v49 = vcombine.high %v1299_v3, %v1299_v3  ;;  %v2100_v58 = vrot.slane %v2086_v38, %v6168_v43  ;;  %v2110_v8 = vcombine.low %v1307_v63, %v7072_v18  ;;  %v7138_v63 = vld [vmem:[%s9171_s3 + $0x8] sm:$0xff]  }
  0xe3   : > { %5697 = vmatpush3.bf16.msra.mxu0 %v4047_v6  ;;  %vm373_vm6 = vcmp.ge.f32.partialorder %v341_v54, 0.0  ;;  %vm374_vm7 = vcmp.ge.f32.partialorder %v342_v36, 0.0  ;;  %v409_v50 = vmul.f32 %v6055_v20, %v341_v54  ;;  %v410_v13 = vmul.f32 %v6055_v20, %v342_v36  ;;  %5747 = vmatpush3.bf16.msra.mxu1 %v4047_v6  ;;  %v7146_v6 = vld [vmem:[#allocation2 + $0xc] sm:$0xf] }
  0xe4   : > { %5698 = vmatprep.subr.bf16.mxu0 %v7066_v25  ;;  %v7108_v44 = vor.u32 %v3085_v23, %v3084_v7  ;;  %v2101_v56 = vcombine.low %v2093_v26, %v2100_v58  ;;  %v2109_v34 = vcombine.low %v1299_v3, %v1309_v49  ;;  %v2124_v4 = vrot.slane %v2110_v8, %v6168_v43  ;;  %v7156_v49 = vpop.permute.xlu1 %2953 }
  0xe5   : > { %2886 = vrot.lane.b32.xlu0 %v2789_v28, %s5943_s26  ;;  %v2796_v45 = vrot.slane %v7008_v51, 1  ;;  %v7113_v32 = vld [vmem:[#allocation2 + $0x58] sm:$0xff]   ;;  %v441_v48 = vsel %vm373_vm6, %v341_v54, %v409_v50  ;;  %v442_v27 = vsel %vm374_vm7, %v342_v36, %v410_v13  ;;  %v1278_v28 = vcombine.high %v7055_v35, %v7055_v35  ;;  %5743 = vmatprep.subr.bf16.mxu1 %v7066_v25 }
  0xe6   : > { %3495 = vrot.lane.b32.xlu1 %v3460_v14, %s5942_s25  ;;  %v2108_v9 = vrot.slane %v2101_v56, %v6168_v43  ;;  %v2117_v7 = vrot.slane %v2109_v34, %v6168_v43  ;;  %v477_v23 = vadd.f32 %v6057_v21, %v441_v48  ;;  %v478_v51 = vadd.f32 %v6057_v21, %v442_v27 }
  0xe7   : > { %5699 = vmatpush3.bf16.msra.mxu0 %v7066_v25  ;;  %v7127_v26 = vshll.u32 %v7113_v32, 16  ;;  %v7130_v3 = vshrl.u32 %v7113_v32, 16  ;;  %v1308_v35 = vcombine.high %v7072_v18, %v7072_v18  ;;  %v3087_v58 = vsel %vm3047_vm13, %v6949_v29, %v7108_v44  ;;  %5748 = vmatpush3.bf16.msra.mxu1 %v7066_v25  ;;  %v7180_v25 = vld [vmem:[%s9171_s3] sm:$0xff]  }
  0xe8   : > { %5700 = vmatprep.subr.bf16.mxu0 %v7104_v5  ;;  %v7143_v38 = vpop.permute.xlu0 %3008  ;;  %v2125_v14 = vcombine.low %v2117_v7, %v2124_v4  ;;  %2548 = vst.msk [vmem:[#allocation2 + $0x60] sm:$0xf] %vm777_vm0, %v2108_v9  ;;  %v511_v54 = vmul.f32 %v6050_v16, %v477_v23  ;;  %v512_v36 = vmul.f32 %v6050_v16, %v478_v51  ;;  %v9179_v8 = vrot.slane %v7113_v32, 1 }
  0xe9   : > { %2965 = vrot.lane.b32.xlu0 %v6940_v59, %s5938_s19  ;;  %v2797_v59 = vsel %vm9187_vm12, %v7045_v55, %v2796_v45  ;;  %v2800_v50 = vor.u32 %v7011_v42, %v2796_v45  ;;  %v3088_v13 = vrot.slane %v7130_v3, 1  ;;  %v3089_v56 = vrot.slane %v7127_v26, 2  ;;  %5744 = vmatprep.subr.bf16.mxu1 %v7104_v5 }
  0xea   : > { %3020 = vrot.lane.b32.xlu1 %v7092_v37, %s5939_s20  ;;  %v2132_v34 = vrot.slane %v2125_v14, %v6168_v43  ;;  %v1306_v55 = vrot.slane %v1278_v28, %v6079_v31  ;;  %v3350_v29 = vrot.slane %v7130_v3, 2  ;;  %vm545_vm8 = vcmp.gt.f32.partialorder %v511_v54, %v6060_v22  ;;  %v307_v14 = vld [vmem:[%s6040_s13 + $0xb0] sm:$0xff] }
  0xeb   : > { %5701 = vmatpush3.bf16.msra.mxu0 %v7104_v5  ;;  %vm546_vm9 = vcmp.gt.f32.partialorder %v512_v36, %v6060_v22  ;;  %v7174_v42 = vcombine.low %v1308_v35, %v6163_v39  ;;  %v3351_v45 = vrot.slane %v7127_v26, 3  ;;  %v579_v48 = vsel %vm545_vm8, %v6074_v30, 0.0  ;;  %5749 = vmatpush3.bf16.msra.mxu1 %v7104_v5 }
  0xec   : > { %5702 = vmatprep.subr.bf16.mxu0 %v7138_v63  ;;  %v7183_v4 = vpop.permute.xlu0 %2955  ;;  %2549 = vst.msk [vmem:[#allocation2 + $0x64] sm:$0xf] %vm777_vm0, %v2132_v34  ;;  %v580_v27 = vsel %vm546_vm9, %v6074_v30, 0.0  ;;  %vm613_vm15 = vcmp.gt.f32.partialorder %v511_v54, %v6090_v40  ;;  %v7196_v28 = vsel %vm2913_vm2, %v2931_v46, %v9179_v8  ;;  %v3197_v9 = vrot.slane %v7113_v32, 2  ;;  %5745 = vmatprep.subr.bf16.mxu1 %v7138_v63 }
  0xed   : > { %2888 = vrot.lane.b32.xlu0 %v2797_v59, %s5943_s26  ;;  %v9180_v7 = vrot.slane %v7113_v32, 3  ;;  %vm614_vm3 = vcmp.gt.f32.partialorder %v512_v36, %v6090_v40  ;;  %v7201_v23 = vor.u32 %v3089_v56, %v3088_v13  ;;  %v647_v51 = vsel %vm613_vm15, %v6102_v52, %v579_v48  ;;  %v308_v13 = vld [vmem:[%s6040_s13 + $0xb8] sm:$0xff] }
  0xee   : > { %3152 = vrot.lane.b32.xlu1 %v3087_v58, %s5944_s27  ;;  %v648_v35 = vsel %vm614_vm3, %v6102_v52, %v580_v27  ;;  %vm681_vm4 = vcmp.gt.f32.partialorder %v511_v54, %v6105_v53  ;;  %v2804_v46 = vrot.slane %v7127_v26, 1  ;;  %vm682_vm1 = vcmp.gt.f32.partialorder %v512_v36, %v6105_v53 }
  0xef   : > { %5703 = vmatpush3.bf16.msra.mxu0 %v7138_v63  ;;  %v7208_v59 = vpop.permute.xlu1 %3010  ;;  %v715_v58 = vsel %vm681_vm4, %v6114_v60, %v647_v51  ;;  %v1310_v34 = vcombine.high %v1306_v55, %v1306_v55  ;;  %v7217_v54 = vor.u32 %v3351_v45, %v3350_v29  ;;  %v716_v56 = vsel %vm682_vm1, %v6114_v60, %v648_v35 }
  0xf0   : > { %5704 = vmatprep.subr.bf16.mxu0 %v7180_v25  ;;  %v749_v48 = vmul.f32 %v6117_v61, %v715_v58  ;;  %v3198_v26 = vsel %vm3179_vm10, %v3195_v57, %v3197_v9  ;;  %v7230_v36 = vmul.f32 %v6117_v61, %v716_v56  ;;  %v343_v29 = vadd.f32 %v6047_v15, %v307_v14  ;;  %v7233_v45 = vpop.permute.xlu0 %3217  ;;  %v309_v57 = vld [vmem:[%s6040_s13 + $0xc0] sm:$0xff]  ;;  %v310_v56 = vld [vmem:[%s6040_s13 + $0xc8] sm:$0xff] }
  0xf1   : > { %2967 = vrot.lane.b32.xlu0 %v7092_v37, %s5938_s19  ;;  %v2133_v37 = vcombine.low %v1306_v55, %v1310_v34  ;;  %v2148_v5 = vrot.slane %v7174_v42, %v6168_v43  ;;  %v344_v27 = vadd.f32 %v6047_v15, %v308_v13  ;;  %v3091_v51 = vsel %vm3047_vm13, %v7108_v44, %v7201_v23 }
  0xf2   : > { %3231 = vrot.lane.b32.xlu1 %v7040_v11, %s5940_s23  ;;  %v3462_v11 = vsel %vm9184_vm11, %v3459_v2, %v9180_v7  ;;  %v7254_v2 = vsel %vm9187_vm12, %v2800_v50, %v2804_v46  ;;  %v771_v42 = vpack.c.bf16 %v7230_v36, %v749_v48  ;;  %v3353_v14 = vsel %vm9188_vm14, %v7030_v10, %v7217_v54 }
  0xf3   : > { %5705 = vmatpush3.bf16.msra.mxu0 %v7180_v25  ;;  %v7246_v55 = vpop.permute.xlu1 %3272  ;;  %v7251_v33 = vld [vmem:[#allocation2 + $0x60] sm:$0xff]   ;;  %v2141_v35 = vrot.slane %v2133_v37, %v6168_v43  ;;  %v7264_v58 = vor.u32 %v7130_v3, %v2804_v46  ;;  %vm375_vm5 = vcmp.ge.f32.partialorder %v343_v29, 0.0  ;;  %v411_v44 = vmul.f32 %v6055_v20, %v343_v29  ;;  %5750 = vmatpush3.bf16.msra.mxu1 %v7138_v63 }
  0xf4   : > { %v9181_v50 = vrot.slane %v7251_v33, 2  ;;  %v7271_v34 = vshll.u32 %v7251_v33, 16  ;;  %v7274_v13 = vshrl.u32 %v7251_v33, 16  ;;  %v7278_v10 = vadd.f32 %v6047_v15, %v309_v57  ;;  %5746 = vmatprep.subr.bf16.mxu1 %v7180_v25  ;;  %v7290_v57 = vpop.permute.xlu0 %3219 }
  0xf5   : > { %3022 = vrot.lane.b32.xlu0 %v7196_v28, %s5939_s20  ;;  %v1318_v63 = vrot.slane %v771_v42, %v6079_v31  ;;  %v2149_v46 = vcombine.low %v2141_v35, %v2148_v5  ;;  %v412_v48 = vmul.f32 %v6055_v20, %v344_v27  ;;  %vm376_vm6 = vcmp.ge.f32.partialorder %v344_v27, 0.0 }
  0xf6   : > { %3286 = vrot.lane.b32.xlu1 %v3198_v26, %s5941_s24  ;;  %v3354_v18 = vrot.slane %v7274_v13, 2  ;;  %v3355_v8 = vrot.slane %v7271_v34, 3  ;;  %v443_v7 = vsel %vm375_vm5, %v343_v29, %v411_v44  ;;  %v7297_v5 = vsel %vm3179_vm10, %v3197_v9, %v9181_v50 }
  0xf7   : > { %v7284_v37 = vpop.permute.xlu1 %3274  ;;  %v5502_v35 = vpack.c.bf16 %v7230_v36, %v7230_v36  ;;  %v7303_v3 = vadd.f32 %v6047_v15, %v310_v56  ;;  %5751 = vmatpush3.bf16.msra.mxu1 %v7180_v25  ;;  %v1334_v44 = vrot.slane %v1318_v63, %v6079_v31  ;;  %v2156_v9 = vrot.slane %v2149_v46, %v6168_v43 }
  0xf8   : > { %v7307_v29 = vor.u32 %v3355_v8, %v3354_v18  ;;  %vm377_vm7 = vcmp.ge.f32.partialorder %v7278_v10, 0.0  ;;  %v9204_v50 = vrot.slane %v7251_v33, 3  ;;  %v9205_v36 = vrot.slane %v7113_v32, 3 }
  0xf9   : > { %3154 = vrot.lane.b32.xlu0 %v3091_v51, %s5944_s27  ;;  %v1326_v51 = vcombine.high %v1318_v63, %v1318_v63  ;;  %v444_v25 = vsel %vm376_vm6, %v344_v27, %v412_v48  ;;  %v479_v18 = vadd.f32 %v6057_v21, %v443_v7  ;;  %v1356_v46 = vcombine.high %v1334_v44, %v1334_v44 }
  0xfa   : > { %3418 = vrot.lane.b32.xlu1 %v3353_v14, %s5945_s28  ;;  %v3464_v56 = vsel %vm9184_vm11, %v9205_v36, %v9204_v50  ;;  %v3092_v14 = vrot.slane %v7274_v13, 1  ;;  %2550 = vst.msk [vmem:[#allocation2 + $0x68] sm:$0xf] %vm777_vm0, %v2156_v9  ;;  %v480_v1 = vadd.f32 %v6057_v21, %v444_v25  ;;  %v3357_v50 = vsel %vm9188_vm14, %v7217_v54, %v7307_v29 }
  0xfb   : > { %v7320_v8 = vpop.permute.xlu1 %3221  ;;  %v1348_v63 = vrot.slane %v1326_v51, %v6079_v31  ;;  %v3093_v27 = vrot.slane %v7271_v34, 2  ;;  %v513_v7 = vmul.f32 %v6050_v16, %v479_v18  ;;  %v1325_v48 = vrot.slane %v5502_v35, %v6079_v31 }
  0xfc   : > { %v2157_v36 = vcombine.low %v1334_v44, %v1356_v46  ;;  %v514_v9 = vmul.f32 %v6050_v16, %v480_v1  ;;  %vm378_vm8 = vcmp.ge.f32.partialorder %v7303_v3, 0.0  ;;  %vm9190_vm1 = vcmask 64512  }
  0xfd   : > { %3233 = vrot.lane.b32.xlu0 %v3198_v26, %s5940_s23  ;;  %v1358_v51 = vcombine.high %v1348_v63, %v1348_v63  ;;  %vm547_vm9 = vcmp.gt.f32.partialorder %v513_v7, %v6060_v22  ;;  %vm615_vm15 = vcmp.gt.f32.partialorder %v513_v7, %v6090_v40  ;;  %vm683_vm3 = vcmp.gt.f32.partialorder %v513_v7, %v6105_v53 }
  0xfe   : > { %3497 = vrot.lane.b32.xlu1 %v3462_v11, %s5942_s25  ;;  %v7336_v25 = vpop.permute.xlu0 %3276  ;;  %v1327_v54 = vcombine.high %v1325_v48, %v1325_v48  ;;  %v2165_v11 = vrot.slane %v2157_v36, %v6168_v43  ;;  %vm548_vm4 = vcmp.gt.f32.partialorder %v514_v9, %v6060_v22  ;;  %v581_v1 = vsel %vm547_vm9, %v6074_v30, 0.0 }
  0xff   : > { %v7341_v26 = vpop.permute.xlu1 %3483  ;;  %v2158_v35 = vcombine.low %v1348_v63, %v1358_v51  ;;  %v582_v44 = vsel %vm548_vm4, %v6074_v30, 0.0  ;;  %vm616_vm5 = vcmp.gt.f32.partialorder %v514_v9, %v6090_v40  ;;  %v649_v18 = vsel %vm615_vm15, %v6102_v52, %v581_v1 }
 0x100   : > { %vm684_vm6 = vcmp.gt.f32.partialorder %v514_v9, %v6105_v53  ;;  %vm9189_vm11 = vcmask 130048   ;;  %v650_v46 = vsel %vm616_vm5, %v6102_v52, %v582_v44  ;;  %v717_v51 = vsel %vm683_vm3, %v6114_v60, %v649_v18 }
 0x101   : > { %3288 = vrot.lane.b32.xlu0 %v7297_v5, %s5941_s24  ;;  %v2172_v63 = vrot.slane %v2158_v35, %v6168_v43  ;;  %v1341_v36 = vrot.slane %v1325_v48, %v6079_v31  ;;  %v718_v1 = vsel %vm684_vm6, %v6114_v60, %v650_v46  ;;  %v751_v9 = vmul.f32 %v6117_v61, %v717_v51 }
 0x102   : > { %3420 = vrot.lane.b32.xlu1 %v3357_v50, %s5945_s28  ;;  %v7359_v42 = vpop.permute.xlu0 %2957  ;;  %v1355_v50 = vrot.slane %v1327_v54, %v6079_v31  ;;  %v413_v35 = vmul.f32 %v6055_v20, %v7278_v10  ;;  %v7369_v7 = vmul.f32 %v6117_v61, %v718_v1  ;;  %v414_v48 = vmul.f32 %v6055_v20, %v7303_v3 }
 0x103   : > { %9206 = vst [vmem:[#allocation10_spill] sm:$0xff] %v7359_v42  ;;  %v7366_v17 = vpop.permute.xlu1 %3485  ;;  %v2173_v44 = vcombine.low %v2165_v11, %v2172_v63  ;;  %v1357_v18 = vcombine.high %v1341_v36, %v1341_v36  ;;  %v7375_v46 = vor.u32 %v3093_v27, %v3092_v14  ;;  %vm3600_vm9 = vcmask 195584   ;;  %v311_v11 = vld [vmem:[%s6040_s13 + $0xd0] sm:$0xff]  ;;  %v312_v42 = vld [vmem:[%s6040_s13 + $0xd8] sm:$0xff] }
 0x104   : > { %v1359_v54 = vcombine.high %v1355_v50, %v1355_v50  ;;  %v445_v51 = vsel %vm377_vm7, %v7278_v10, %v413_v35  ;;  %v772_v1 = vpack.c.bf16 %v7369_v7, %v751_v9  ;;  %v9207_v27 = vrot.slane %v7251_v33, 1 }
 0x105   : > { %2890 = vrot.lane.b32.xlu0 %v7254_v2, %s5943_s26  ;;  %v2180_v63 = vrot.slane %v2173_v44, %v6168_v43  ;;  %v2181_v12 = vcombine.low %v1341_v36, %v1357_v18  ;;  %v446_v2 = vsel %vm378_vm8, %v7303_v3, %v414_v48  ;;  %v9208_v41 = vrot.slane %v7113_v32, 1 }
 0x106   : > { %3499 = vrot.lane.b32.xlu1 %v3464_v56, %s5942_s25  ;;  %v7387_v14 = vpop.permute.xlu0 %2959  ;;  %v2182_v35 = vcombine.low %v1355_v50, %v1359_v54  ;;  %v481_v56 = vadd.f32 %v6057_v21, %v445_v51  ;;  %v482_v44 = vadd.f32 %v6057_v21, %v446_v2  ;;  %v9209_v36 = vrot.slane %v7271_v34, 1 }
 0x107   : > { %v2936_v10 = vsel %vm2913_vm2, %v9208_v41, %v9207_v27  ;;  %v7397_v9 = vpop.permute.xlu1 %3487  ;;  %2551 = vst.msk [vmem:[#allocation2 + $0x6c] sm:$0xf] %vm777_vm0, %v2180_v63  ;;  %v1367_v18 = vrot.slane %v772_v1, %v6079_v31  ;;  %v2189_v32 = vrot.slane %v2181_v12, %v6168_v43  ;;  %v7407_v41 = vadd.f32 %v6047_v15, %v311_v11 }
 0x108   : > { %v2813_v3 = vsel %vm9187_vm12, %v7264_v58, %v9209_v36  ;;  %v3095_v50 = vsel %vm3047_vm13, %v7201_v23, %v7375_v46  ;;  %vm3639_vm7 = vcmask 261120   ;;  %v2196_v48 = vrot.slane %v2182_v35, %v6168_v43 }
 0x109   : > { %2969 = vrot.lane.b32.xlu0 %v7196_v28, %s5938_s19  ;;  %v7416_v58 = vmul.f32 %v6050_v16, %v481_v56  ;;  %v7419_v54 = vmul.f32 %v6050_v16, %v482_v44  ;;  %v1375_v12 = vcombine.high %v1367_v18, %v1367_v18  ;;  %v1383_v51 = vrot.slane %v1367_v18, %v6079_v31 }
 0x10a   : > { %3024 = vrot.lane.b32.xlu1 %v2936_v10, %s5939_s20  ;;  %v5503_v28 = vpack.c.bf16 %v7369_v7, %v7369_v7  ;;  %v7426_v11 = vadd.f32 %v6047_v15, %v312_v42  ;;  %v2873_v23 = vpop.permute.xlu0 %2872  ;;  %vm3678_vm8 = vcmask 326656   ;;  %v2197_v63 = vcombine.low %v2189_v32, %v2196_v48 }
 0x10b   : > { %vm549_vm15 = vcmp.gt.f32.partialorder %v7416_v58, %v6060_v22  ;;  %vm550_vm3 = vcmp.gt.f32.partialorder %v7419_v54, %v6060_v22  ;;  %vm617_vm4 = vcmp.gt.f32.partialorder %v7416_v58, %v6090_v40  ;;  %v9210_v1 = vcombine.low %v7115_v62, %v7146_v6  ;;  %v7438_v2 = vpop.permute.xlu1 %3012 }
 0x10c   : > { %vm9194_vm5 = vcmask 392192   ;;  %v7441_v42 = vrot.slane %v1375_v12, %v6079_v31  ;;  %v1405_v27 = vcombine.high %v1383_v51, %v1383_v51  ;;  %v583_v35 = vsel %vm549_vm15, %v6074_v30, 0.0 }
 0x10d   : > { %v3524_v7 = vsel %vm9190_vm1, %v9210_v1, %v2873_v23  ;;  %2892 = vrot.lane.b32.xlu0 %v2813_v3, %s5943_s26  ;;  %vm9193_vm6 = vcmask 457728   ;;  %v2204_v44 = vrot.slane %v2197_v63, %v6168_v43  ;;  %v584_v62 = vsel %vm550_vm3, %v6074_v30, 0.0 }
 0x10e   : > { %v3563_v56 = vsel %vm9189_vm11, %v3524_v7, %v7096_v24  ;;  %vm618_vm12 = vcmp.gt.f32.partialorder %v7419_v54, %v6090_v40  ;;  %3156 = vrot.lane.b32.xlu1 %v3095_v50, %s5944_s27  ;;  %vm9192_vm14 = vcmask 523264   ;;  %v2205_v6 = vcombine.low %v6163_v39, %v7441_v42  ;;  %v2875_v3 = vpop.permute.xlu0 %2874  ;;  %v7459_v32 = vld [vmem:[#allocation2 + $0x68] sm:$0xff]  }
 0x10f   : > { %v2206_v36 = vcombine.low %v1383_v51, %v1405_v27  ;;  %v9211_v18 = vrot.slane %v7271_v34, 1  ;;  %v3602_v48 = vsel %vm3600_vm9, %v3563_v56, %v7085_v19  ;;  %2552 = vst.msk [vmem:[#allocation2 + $0x70] sm:$0xf] %vm777_vm0, %v2204_v44  ;;  %v7465_v50 = vrot.slane %v5503_v28, %v6079_v31  ;;  %v2877_v51 = vpop.permute.xlu1 %2876 }
 0x110   : > { %v7469_v12 = vmul.f32 %v6055_v20, %v7407_v41  ;;  %v7473_v34 = vmul.f32 %v6055_v20, %v7426_v11  ;;  %v651_v19 = vsel %vm617_vm4, %v6102_v52, %v583_v35  ;;  %v652_v28 = vsel %vm618_vm12, %v6102_v52, %v584_v62 }
 0x111   : > { %v7457_v24 = vor.u32 %v7274_v13, %v9211_v18  ;;  %v3526_v13 = vsel %vm9190_vm1, %v6268_v47, %v2875_v3  ;;  %vm685_vm15 = vcmp.gt.f32.partialorder %v7416_v58, %v6105_v53  ;;  %2971 = vrot.lane.b32.xlu0 %v2936_v10, %s5938_s19  ;;  %v3528_v23 = vsel %vm9190_vm1, %v6283_v0, %v2877_v51 }
 0x112   : > { %v2937_v47 = vrot.slane %v7459_v32, 1  ;;  %v3201_v63 = vrot.slane %v7459_v32, 2  ;;  %v2213_v1 = vrot.slane %v2205_v6, %v6168_v43  ;;  %v3567_v7 = vsel %vm9189_vm11, %v3528_v23, %v7183_v4  ;;  %3235 = vrot.lane.b32.xlu1 %v7297_v5, %s5940_s23  ;;  %v3143_v44 = vpop.permute.xlu0 %3142 }
 0x113   : > { %v7498_v27 = vshll.u32 %v7459_v32, 16  ;;  %v7501_v10 = vshrl.u32 %v7459_v32, 16  ;;  %v2220_v0 = vrot.slane %v2206_v36, %v6168_v43  ;;  %v3565_v35 = vsel %vm9189_vm11, %v3526_v13, %v7156_v49  ;;  %v3139_v49 = vpop.permute.xlu1 %3138 }
 0x114   : > { %v3606_v56 = vsel %vm3600_vm9, %v3567_v7, %v7208_v59  ;;  %v9212_v4 = vrot.slane %v7251_v33, 1  ;;  %v9213_v62 = vrot.slane %v7251_v33, 2  ;;  %vm379_vm12 = vcmp.ge.f32.partialorder %v7407_v41, 0.0 }
 0x115   : > { %v3645_v36 = vsel %vm3639_vm7, %v3606_v56, %v3143_v44  ;;  %v3096_v18 = vrot.slane %v7501_v10, 1  ;;  %v3097_v59 = vrot.slane %v7498_v27, 2  ;;  %v3358_v3 = vrot.slane %v7501_v10, 2 }
 0x116   : > { %v7513_v5 = vsel %vm2913_vm2, %v9212_v4, %v2937_v47  ;;  %v3202_v6 = vsel %vm3179_vm10, %v9213_v62, %v3201_v63  ;;  %v3641_v13 = vsel %vm3639_vm7, %v3602_v48, %v3139_v49  ;;  %v3359_v51 = vrot.slane %v7498_v27, 3  ;;  %v3405_v49 = vpop.permute.xlu0 %3404 }
 0x117   : > { %3026 = vrot.lane.b32.xlu0 %v7513_v5, %s5939_s20  ;;  %vm686_vm3 = vcmp.gt.f32.partialorder %v7419_v54, %v6105_v53  ;;  %v719_v23 = vsel %vm685_vm15, %v6114_v60, %v651_v19  ;;  %v3680_v7 = vsel %vm3678_vm8, %v3641_v13, %v7233_v45  ;;  %3290 = vrot.lane.b32.xlu1 %v3202_v6, %s5941_s24  ;;  %v3465_v44 = vrot.slane %v7459_v32, 3 }
 0x118   : > { %v7538_v56 = vor.u32 %v3097_v59, %v3096_v18  ;;  %v2221_v48 = vcombine.low %v2213_v1, %v2220_v0  ;;  %v3684_v4 = vsel %vm3678_vm8, %v3645_v36, %v7320_v8  ;;  %v3719_v62 = vsel %vm9194_vm5, %v3680_v7, %v7246_v55  ;;  %v3141_v59 = vpop.permute.xlu1 %3140 }
 0x119   : > { %v3604_v58 = vsel %vm3600_vm9, %v3565_v35, %v7143_v38  ;;  %v7547_v19 = vor.u32 %v3359_v51, %v3358_v3  ;;  %v3758_v45 = vsel %vm9193_vm6, %v3719_v62, %v3405_v49  ;;  %vm9191_vm4 = vcmask 588800  }
 0x11a   : > { %v3099_v18 = vsel %vm3047_vm13, %v7375_v46, %v7538_v56  ;;  %v2228_v1 = vrot.slane %v2221_v48, %v6168_v43  ;;  %v720_v55 = vsel %vm686_vm3, %v6114_v60, %v652_v28  ;;  %v3797_v38 = vsel %vm9192_vm14, %v3758_v45, %v7341_v26  ;;  %v3407_v3 = vpop.permute.xlu0 %3406 }
 0x11b   : > { %3158 = vrot.lane.b32.xlu0 %v3099_v18, %s5944_s27  ;;  %v3643_v8 = vsel %vm3639_vm7, %v3604_v58, %v3141_v59  ;;  %vm9214_vm15 = vsmask.f32 5376  ;;  %v753_v0 = vmul.f32 %v6117_v61, %v719_v23  ;;  %v3836_v35 = vshll.u32 %v3797_v38, 16 }
 0x11c   : > { %v3361_v46 = vsel %vm9214_vm15, %v7307_v29, %v7547_v19  ;;  %v3682_v36 = vsel %vm3678_vm8, %v3643_v8, %v7290_v57  ;;  %v9215_v26 = vrot.slane %v7251_v33, 3  ;;  %vm9216_vm3 = vcmask 1044480   ;;  %2553 = vst.msk [vmem:[#allocation2 + $0x74] sm:$0xf] %vm777_vm0, %v2228_v1  ;;  %v3409_v48 = vpop.permute.xlu1 %3408  ;;  %v5892_v1 = vld [vmem:[#allocation2 + $0x20] sm:$0xff]  }
 0x11d   : > { %3422 = vrot.lane.b32.xlu1 %v3361_v46, %s5945_s28  ;;  %v1376_v28 = vcombine.high %v7465_v50, %v7465_v50  ;;  %v3721_v29 = vsel %vm9194_vm5, %v3682_v36, %v7284_v37  ;;  %v2820_v13 = vrot.slane %v7498_v27, 1  ;;  %v7581_v57 = vmul.f32 %v6117_v61, %v720_v55 }
 0x11e   : > { %v3466_v54 = vsel %vm9216_vm3, %v9215_v26, %v3465_v44  ;;  %v1390_v51 = vrot.slane %v7465_v50, %v6079_v31  ;;  %vm380_vm15 = vcmp.ge.f32.partialorder %v7426_v11, 0.0  ;;  %v3834_v33 = vshrl.u32 %v3797_v38, 16 }
 0x11f   : > { %v3838_v23 = vrot.slane %v3836_v35, 1  ;;  %v3760_v7 = vsel %vm9193_vm6, %v3721_v29, %v3407_v3  ;;  %v3723_v62 = vsel %vm9194_vm5, %v3684_v4, %v7336_v25  ;;  %3237 = vrot.lane.b32.xlu0 %v3202_v6, %s5940_s23  ;;  %v773_v49 = vpack.c.bf16 %v7581_v57, %v753_v0  ;;  %v2879_v6 = vpop.permute.xlu0 %2878  ;;  %v9218_v35 = vld [vmem:[#allocation10_spill] sm:$0xff] }
 0x120   : > { %v3799_v37 = vsel %vm9192_vm14, %v3760_v7, %v7366_v17  ;;  %v3762_v27 = vsel %vm9193_vm6, %v3723_v62, %v3409_v48  ;;  %v1407_v50 = vcombine.high %v7441_v42, %v7441_v42  ;;  %v1404_v25 = vrot.slane %v1376_v28, %v6079_v31  ;;  %v3145_v38 = vpop.permute.xlu1 %3144 }
 0x121   : > { %v3840_v58 = vshll.u32 %v3799_v37, 16  ;;  %v7598_v45 = vsel %vm9192_vm14, %v3762_v27, %v7397_v9  ;;  %3501 = vrot.lane.b32.xlu1 %v3466_v54, %s5942_s25  ;;  %v1406_v4 = vcombine.high %v1390_v51, %v1390_v51  ;;  %vm9217_vm3 = vsmask.f32 7424  ;;  %v5893_v27 = vld [vmem:[#allocation2 + $0x28] sm:$0xff]  }
 0x122   : > { %v3847_v17 = vshll.u32 %v7598_v45, 16  ;;  %v2821_v18 = vsel %vm9217_vm3, %v7457_v24, %v2820_v13  ;;  %v1416_v59 = vrot.slane %v773_v49, %v6079_v31  ;;  %v447_v42 = vsel %vm379_vm12, %v7407_v41, %v7469_v12  ;;  %vm9219_vm12 = vmmov %vm9217_vm3 }
 0x123   : > { %v3844_v9 = vshrl.u32 %v3799_v37, 16  ;;  %v3530_v55 = vsel %vm9190_vm1, %v5892_v1, %v2879_v6  ;;  %v3839_v8 = vor.u32 %v3838_v23, %v3834_v33  ;;  %v3842_v46 = vrot.slane %v3840_v58, 1  ;;  %v7615_v24 = vld [vmem:[#allocation2 + $0x70] sm:$0xff]   ;;  %v2881_v23 = vpop.permute.xlu0 %2880 }
 0x124   : > { %v7611_v0 = vrot.slane %v3847_v17, 1  ;;  %v3569_v36 = vsel %vm9189_vm11, %v3530_v55, %v9218_v35  ;;  %v2824_v26 = vor.u32 %v7501_v10, %v2820_v13  ;;  %v2229_v54 = vcombine.low %v1407_v50, %v1404_v25  ;;  %v3224_v13 = vpop.permute.xlu1 %3223 }
 0x125   : > { %v3843_v28 = vsel %vm9217_vm3, %v3839_v8, %v3842_v46  ;;  %v3846_v41 = vor.u32 %v3844_v9, %v3842_v46  ;;  %v1408_v12 = vcombine.high %v1404_v25, %v1404_v25  ;;  %v2230_v29 = vcombine.low %v1390_v51, %v1406_v4 }
 0x126   : > { %v3203_v3 = vrot.slane %v7615_v24, 2  ;;  %v3608_v33 = vsel %vm3600_vm9, %v3569_v36, %v7438_v2  ;;  %v7623_v7 = vshll.u32 %v7615_v24, 16  ;;  %5706 = vmatprep.mubr.msk.bf16.mxu0 %vm9191_vm4, %v3843_v28  ;;  %v1424_v48 = vcombine.high %v1416_v59, %v1416_v59 }
 0x127   : > { %v7627_v10 = vshrl.u32 %v7615_v24, 16  ;;  %v3850_v62 = vsel %vm9219_vm12, %v3846_v41, %v7611_v0  ;;  %v3467_v51 = vrot.slane %v7615_v24, 3  ;;  %v7633_v37 = vrot.slane %v1416_v59, %v6079_v31  ;;  %v3015_v59 = vpop.permute.xlu0 %3014 }
 0x128   : > { %v7640_v2 = vsel %vm3179_vm10, %v3201_v63, %v3203_v3  ;;  %v3532_v49 = vsel %vm9190_vm1, %v5893_v27, %v2881_v23  ;;  %v3363_v50 = vrot.slane %v7623_v7, 3  ;;  %5707 = vmatmul.mubr.msk.bf16.vlgmr.msra.gmra.mxu0 %vm9191_vm4, %v3850_v62  ;;  %v2237_v58 = vrot.slane %v2229_v54, %v6168_v43 }
 0x129   : > { %v3851_v25 = vshrl.u32 %v7598_v45, 16  ;;  %3292 = vrot.lane.b32.xlu0 %v7640_v2, %s5941_s24  ;;  %v3647_v4 = vsel %vm3639_vm7, %v3608_v33, %v3145_v38  ;;  %v3362_v17 = vrot.slane %v7627_v10, 2  ;;  %v448_v63 = vsel %vm380_vm15, %v7426_v11, %v7473_v34  ;;  %v3279_v34 = vpop.permute.xlu1 %3278 }
 0x12a   : > { %v3686_v6 = vsel %vm3678_vm8, %v3647_v4, %v3224_v13  ;;  %v2939_v9 = vrot.slane %v7615_v24, 1  ;;  %v7658_v1 = vrot.slane %v1424_v48, %v6079_v31  ;;  %v2244_v55 = vrot.slane %v2230_v29, %v6168_v43 }
 0x12b   : > { %v7661_v8 = vor.u32 %v3363_v50, %v3362_v17  ;;  %v3571_v38 = vsel %vm9189_vm11, %v3532_v49, %v7387_v14  ;;  %vm9220_vm15 = vcmask 1044480   ;;  %v2828_v46 = vrot.slane %v7623_v7, 1  ;;  %v3147_v33 = vpop.permute.xlu0 %3146 }
 0x12c   : > { %v3468_v11 = vsel %vm9220_vm15, %v3465_v44, %v3467_v51  ;;  %v3100_v35 = vrot.slane %v7627_v10, 1  ;;  %v3101_v36 = vrot.slane %v7623_v7, 2  ;;  %v2245_v54 = vcombine.low %v2237_v58, %v2244_v55 }
 0x12d   : > { %v2253_v28 = vcombine.low %v1408_v12, %v7633_v37  ;;  %vm9221_vm3 = vsmask.f32 5376  ;;  %2894 = vrot.lane.b32.xlu0 %v2821_v18, %s5943_s26  ;;  %v2254_v41 = vcombine.low %v6163_v39, %v7658_v1  ;;  %v483_v44 = vadd.f32 %v6057_v21, %v447_v42  ;;  %v3411_v48 = vpop.permute.xlu1 %3410 }
 0x12e   : > { %v3365_v14 = vsel %vm9221_vm3, %v7547_v19, %v7661_v8  ;;  %v484_v29 = vadd.f32 %v6057_v21, %v448_v63  ;;  %v2940_v12 = vsel %vm2913_vm2, %v2937_v47, %v2939_v9  ;;  %v2252_v19 = vrot.slane %v2245_v54, %v6168_v43 }
 0x12f   : > { %3424 = vrot.lane.b32.xlu1 %v3365_v14, %s5945_s28  ;;  %v2261_v18 = vrot.slane %v2253_v28, %v6168_v43  ;;  %v5504_v23 = vpack.c.bf16 %v7581_v57, %v7581_v57  ;;  %v3725_v42 = vsel %vm9194_vm5, %v3686_v6, %v3279_v34  ;;  %v2268_v13 = vrot.slane %v2254_v41, %v6168_v43 }
 0x130   : > { %v517_v62 = vmul.f32 %v6050_v16, %v483_v44  ;;  %v518_v27 = vmul.f32 %v6050_v16, %v484_v29  ;;  %v2829_v32 = vsel %vm9219_vm12, %v2824_v26, %v2828_v46  ;;  %v3764_v47 = vsel %vm9193_vm6, %v3725_v42, %v3411_v48  ;;  %2554 = vst.msk [vmem:[#allocation2 + $0x78] sm:$0xf] %vm777_vm0, %v2252_v19  ;;  %v3226_v26 = vpop.permute.xlu0 %3225 }
 0x131   : > { %v7700_v49 = vor.u32 %v3101_v36, %v3100_v35  ;;  %v1423_v57 = vrot.slane %v5504_v23, %v6079_v31  ;;  %2973 = vrot.lane.b32.xlu0 %v7513_v5, %s5938_s19  ;;  %v2269_v50 = vcombine.low %v2261_v18, %v2268_v13  ;;  %v3490_v17 = vpop.permute.xlu1 %3489  ;;  %v1454_v55 = vcombine.high %v7633_v37, %v7633_v37 }
 0x132   : > { %vm551_vm15 = vcmp.gt.f32.partialorder %v517_v62, %v6060_v22  ;;  %vm552_vm3 = vcmp.gt.f32.partialorder %v518_v27, %v6060_v22  ;;  %vm619_vm11 = vcmp.gt.f32.partialorder %v517_v62, %v6090_v40  ;;  %vm620_vm12 = vcmp.gt.f32.partialorder %v518_v27, %v6090_v40 }
 0x133   : > { %3503 = vrot.lane.b32.xlu1 %v3468_v11, %s5942_s25  ;;  %v585_v58 = vsel %vm551_vm15, %v6074_v30, 0.0  ;;  %v586_v4 = vsel %vm552_vm3, %v6074_v30, 0.0  ;;  %vm687_vm1 = vcmp.gt.f32.partialorder %v517_v62, %v6105_v53  ;;  %v2276_v5 = vrot.slane %v2269_v50, %v6168_v43  ;;  %v313_v62 = vld [vmem:[%s6040_s13 + $0xe0] sm:$0xff] }
 0x134   : > { %v653_v63 = vsel %vm619_vm11, %v6102_v52, %v585_v58  ;;  %v654_v6 = vsel %vm620_vm12, %v6102_v52, %v586_v4  ;;  %v3803_v11 = vsel %vm9192_vm14, %v3764_v47, %v3490_v17  ;;  %vm688_vm15 = vcmp.gt.f32.partialorder %v518_v27, %v6105_v53  ;;  %v3281_v44 = vpop.permute.xlu0 %3280 }
 0x135   : > { %v721_v34 = vsel %vm687_vm1, %v6114_v60, %v653_v63  ;;  %v1425_v35 = vcombine.high %v1423_v57, %v1423_v57  ;;  %2896 = vrot.lane.b32.xlu0 %v2829_v32, %s5943_s26  ;;  %v3854_v36 = vshll.u32 %v3803_v11, 16  ;;  %2555 = vst.msk [vmem:[#allocation2 + $0x7c] sm:$0xf] %vm777_vm0, %v2276_v5  ;;  %v722_v54 = vsel %vm688_vm15, %v6114_v60, %v654_v6  ;;  %v3413_v42 = vpop.permute.xlu1 %3412 }
 0x136   : > { %v755_v28 = vmul.f32 %v6117_v61, %v721_v34  ;;  %v1456_v14 = vcombine.high %v7658_v1, %v7658_v1  ;;  %v3853_v37 = vor.u32 %v3851_v25, %v7611_v0  ;;  %v3610_v41 = vsel %vm3600_vm9, %v3571_v38, %v3015_v59 }
 0x137   : > { %3028 = vrot.lane.b32.xlu1 %v2940_v12, %s5939_s20  ;;  %v756_v29 = vmul.f32 %v6117_v61, %v722_v54  ;;  %v1439_v19 = vrot.slane %v1423_v57, %v6079_v31  ;;  %v3649_v18 = vsel %vm3639_vm7, %v3610_v41, %v3147_v33  ;;  %v3103_v1 = vsel %vm3047_vm13, %v7538_v56, %v7700_v49 }
 0x138   : > { %v3856_v23 = vrot.slane %v3854_v36, 1  ;;  %v1453_v45 = vrot.slane %v1425_v35, %v6079_v31  ;;  %v3688_v0 = vsel %vm3678_vm8, %v3649_v18, %v3226_v26  ;;  %vm9222_vm11 = vsmask.f32 7424  ;;  %v7746_v56 = vpop.permute.xlu0 %2882 }
 0x139   : > { %v774_v25 = vpack.c.bf16 %v756_v29, %v755_v28  ;;  %2975 = vrot.lane.b32.xlu0 %v2940_v12, %s5938_s19  ;;  %v1455_v38 = vcombine.high %v1439_v19, %v1439_v19  ;;  %v2277_v48 = vcombine.low %v1454_v55, %v1439_v19  ;;  %v3727_v33 = vsel %vm9194_vm5, %v3688_v0, %v3281_v44  ;;  %v3492_v47 = vpop.permute.xlu1 %3491  ;;  %vm9223_vm1 = vmmov %vm9222_vm11 }
 0x13a   : > { %v3857_v59 = vsel %vm9222_vm11, %v3853_v37, %v3856_v23  ;;  %v2278_v13 = vcombine.low %v1456_v14, %v1453_v45  ;;  %v3766_v32 = vsel %vm9193_vm6, %v3727_v33, %v3413_v42  ;;  %v5505_v50 = vpack.c.bf16 %v756_v29, %v756_v29  ;;  %v314_v14 = vld [vmem:[%s6040_s13 + $0xe8] sm:$0xff]  ;;  %s5754_s13 = smul.u32 144, %s9427_s22 }
 0x13b   : > { %3160 = vrot.lane.b32.xlu1 %v3103_v1, %s5944_s27  ;;  %5710 = vmatprep.mubr.msk.bf16.mxu0 %vm9191_vm4, %v3857_v59  ;;  %v1465_v27 = vrot.slane %v774_v25, %v6079_v31  ;;  %v2285_v12 = vrot.slane %v2277_v48, %v6168_v43  ;;  %v3858_v26 = vshrl.u32 %v3803_v11, 16  ;;  %v7756_v4 = vsel %vm9192_vm14, %v3766_v32, %v3492_v47 }
 0x13c   : > { %v2292_v57 = vrot.slane %v2278_v13, %v6168_v43  ;;  %v7753_v58 = vld [vmem:[#allocation2 + $0x78] sm:$0xff]   ;;  %v1457_v17 = vcombine.high %v1453_v45, %v1453_v45  ;;  %v7759_v5 = vadd.f32 %v6047_v15, %v313_v62  ;;  %v3861_v63 = vshll.u32 %v7756_v4, 16  ;;  %v7774_v28 = vpop.permute.xlu0 %2961  ;;  %s8399_s18 = scalar_lea.vmem %s9172_s4, %s5754_s13 }
 0x13d   : > { %v1481_v6 = vrot.slane %v1465_v27, %v6079_v31  ;;  %v2301_v34 = vcombine.low %v1455_v38, %v6163_v39  ;;  %v2941_v11 = vrot.slane %v7753_v58, 1  ;;  %v3205_v35 = vrot.slane %v7753_v58, 2  ;;  %v7779_v44 = vpop.permute.xlu1 %3016 }
 0x13e   : > { %v2293_v55 = vcombine.low %v2285_v12, %v2292_v57  ;;  %v7769_v36 = vshll.u32 %v7753_v58, 16  ;;  %v7772_v54 = vshrl.u32 %v7753_v58, 16  ;;  %v3860_v37 = vor.u32 %v3858_v26, %v3856_v23 }
 0x13f   : > { %3239 = vrot.lane.b32.xlu1 %v7640_v2, %s5940_s23  ;;  %v7777_v41 = vrot.slane %v3861_v63, 1  ;;  %v1472_v29 = vrot.slane %v5505_v50, %v6079_v31  ;;  %v7788_v19 = vsel %vm2913_vm2, %v2939_v9, %v2941_v11  ;;  %v3206_v18 = vsel %vm3179_vm10, %v3203_v3, %v3205_v35 }
 0x140   : > { %v2300_v2 = vrot.slane %v2293_v55, %v6168_v43  ;;  %v3104_v1 = vrot.slane %v7772_v54, 1  ;;  %v3105_v23 = vrot.slane %v7769_v36, 2  ;;  %3030 = vrot.lane.b32.xlu0 %v7788_v19, %s5939_s20  ;;  %v3366_v42 = vrot.slane %v7772_v54, 2  ;;  %v7806_v3 = vpop.permute.xlu0 %2884 }
 0x141   : > { %v3367_v45 = vrot.slane %v7769_v36, 3  ;;  %v1473_v9 = vcombine.high %v1465_v27, %v1465_v27  ;;  %v350_v0 = vadd.f32 %v6047_v15, %v314_v14  ;;  %v2302_v59 = vcombine.low %v1457_v17, %v1481_v6  ;;  %v3149_v33 = vpop.permute.xlu1 %3148 }
 0x142   : > { %2556 = vst.msk [vmem:[#allocation2 + $0x80] sm:$0xf] %vm777_vm0, %v2300_v2  ;;  %v7804_v25 = vor.u32 %v3105_v23, %v3104_v1  ;;  %v2309_v38 = vrot.slane %v2301_v34, %v6168_v43  ;;  %v3864_v48 = vsel %vm9223_vm1, %v3860_v37, %v7777_v41  ;;  %v3469_v62 = vrot.slane %v7753_v58, 3 }
 0x143   : > { %3294 = vrot.lane.b32.xlu1 %v3206_v18, %s5941_s24  ;;  %v7811_v13 = vor.u32 %v3367_v45, %v3366_v42  ;;  %5711 = vmatmul.mubr.msk.bf16.gmra.mxu0 %vm9191_vm4, %v3864_v48  ;;  %v1474_v15 = vcombine.high %v1472_v29, %v1472_v29  ;;  %v2316_v32 = vrot.slane %v2302_v59, %v6168_v43  ;;  %vm9224_vm3 = vsmask.f32 5376  ;;  %v5894_v48 = vld [vmem:[#allocation2 + $0x30] sm:$0xff]  }
 0x144   : > { %v3107_v27 = vsel %vm3047_vm13, %v7700_v49, %v7804_v25  ;;  %v1488_v47 = vrot.slane %v1472_v29, %v6079_v31  ;;  %v1495_v57 = vrot.slane %v1473_v9, %v6079_v31  ;;  %vm381_vm12 = vcmp.ge.f32.partialorder %v7759_v5, 0.0  ;;  %v7827_v26 = vpop.permute.xlu0 %2963 }
 0x145   : > { %3162 = vrot.lane.b32.xlu0 %v3107_v27, %s5944_s27  ;;  %v3369_v12 = vsel %vm9224_vm3, %v7661_v8, %v7811_v13  ;;  %vm382_vm15 = vcmp.ge.f32.partialorder %v350_v0, 0.0  ;;  %v2317_v50 = vcombine.low %v2309_v38, %v2316_v32  ;;  %v1502_v49 = vrot.slane %v1474_v15, %v6079_v31  ;;  %v3228_v55 = vpop.permute.xlu1 %3227 }
 0x146   : > { %v1503_v17 = vcombine.high %v1481_v6, %v1481_v6  ;;  %v1504_v63 = vcombine.high %v1488_v47, %v1488_v47  ;;  %vm9225_vm11 = vcmask 1044480   ;;  %v1505_v34 = vcombine.high %v1495_v57, %v1495_v57 }
 0x147   : > { %3426 = vrot.lane.b32.xlu1 %v3369_v12, %s5945_s28  ;;  %v3470_v8 = vsel %vm9225_vm11, %v3467_v51, %v3469_v62  ;;  %v417_v14 = vmul.f32 %v6055_v20, %v7759_v5  ;;  %v418_v37 = vmul.f32 %v6055_v20, %v350_v0  ;;  %v2324_v2 = vrot.slane %v2317_v50, %v6168_v43  ;;  %v9229_v50 = vld [vmem:[#allocation9_spill] sm:$0xff] }
 0x148   : > { %v1506_v29 = vcombine.high %v1502_v49, %v1502_v49  ;;  %v2326_v1 = vcombine.low %v1503_v17, %v1488_v47  ;;  %v2325_v6 = vcombine.low %v1495_v57, %v1505_v34  ;;  %v2350_v23 = vcombine.low %v1504_v63, %v6163_v39  ;;  %v7847_v20 = vpop.permute.xlu0 %3018  ;;  %v9227_v47 = vld [vmem:[#allocation7_spill] sm:$0xff] }
 0x149   : > { %3241 = vrot.lane.b32.xlu0 %v3206_v18, %s5940_s23  ;;  %v449_v24 = vsel %vm381_vm12, %v7759_v5, %v417_v14  ;;  %v450_v51 = vsel %vm382_vm15, %v350_v0, %v418_v37  ;;  %2557 = vst.msk [vmem:[#allocation2 + $0x84] sm:$0xf] %vm777_vm0, %v2324_v2  ;;  %v3283_v59 = vpop.permute.xlu1 %3282  ;;  %vm9226_vm1 = vcmask 64512   ;;  %v7861_v12 = vrot.slane %v9227_v47, %v6079_v31 }
 0x14a   : > { %v2340_v42 = vrot.slane %v2326_v1, %v6168_v43  ;;  %v2349_v45 = vcombine.low %v1502_v49, %v1506_v29  ;;  %v485_v18 = vadd.f32 %v6057_v21, %v449_v24  ;;  %v486_v9 = vadd.f32 %v6057_v21, %v450_v51 }
 0x14b   : > { %3505 = vrot.lane.b32.xlu1 %v3470_v8, %s5942_s25  ;;  %v2333_v38 = vrot.slane %v2325_v6, %v6168_v43  ;;  %v2364_v5 = vrot.slane %v2350_v23, %v6168_v43  ;;  %v3534_v0 = vsel %vm9226_vm1, %v5894_v48, %v7746_v56  ;;  %vm9228_vm3 = vcmask 130048  }
 0x14c   : > { %v2357_v15 = vrot.slane %v2349_v45, %v6168_v43  ;;  %v519_v27 = vmul.f32 %v6050_v16, %v485_v18  ;;  %v520_v32 = vmul.f32 %v6050_v16, %v486_v9  ;;  %v3573_v21 = vsel %vm9228_vm3, %v3534_v0, %v7774_v28  ;;  %v3151_v17 = vpop.permute.xlu0 %3150  ;;  %v9232_v18 = vld [vmem:[#allocation8_spill] sm:$0xff] }
 0x14d   : > { %v2341_v57 = vcombine.low %v2333_v38, %v2340_v42  ;;  %v2468_v49 = vrot.slane %v9229_v50, %v6168_v43  ;;  %v3612_v16 = vsel %vm3600_vm9, %v3573_v21, %v7779_v44  ;;  %v3415_v56 = vpop.permute.xlu1 %3414  ;;  %v5895_v44 = vld [vmem:[#allocation2 + $0x38] sm:$0xff]   ;;  %vm9230_vm3 = vcmask 64512  }
 0x14e   : > { %v2365_v63 = vcombine.low %v2357_v15, %v2364_v5  ;;  %vm553_vm12 = vcmp.gt.f32.partialorder %v519_v27, %v6060_v22  ;;  %vm554_vm15 = vcmp.gt.f32.partialorder %v520_v32, %v6060_v22  ;;  %vm621_vm11 = vcmp.gt.f32.partialorder %v519_v27, %v6090_v40 }
 0x14f   : > { %v2348_v8 = vrot.slane %v2341_v57, %v6168_v43  ;;  %v587_v28 = vsel %vm553_vm12, %v6074_v30, 0.0  ;;  %v588_v34 = vsel %vm554_vm15, %v6074_v30, 0.0  ;;  %2563 = vst.msk [vmem:[#allocation2 + $0x9c] sm:$0xf] %vm777_vm0, %v2468_v49  ;;  %v3651_v14 = vsel %vm3639_vm7, %v3612_v16, %v3149_v33 }
 0x150   : > { %v2832_v22 = vor.u32 %v7627_v10, %v2828_v46  ;;  %v2372_v37 = vrot.slane %v2365_v63, %v6168_v43  ;;  %vm622_vm1 = vcmp.gt.f32.partialorder %v520_v32, %v6090_v40  ;;  %v3536_v2 = vsel %vm9230_vm3, %v5895_v44, %v7806_v3  ;;  %v7884_v29 = vld [vmem:[#allocation2 + $0x80] sm:$0xff]   ;;  %v3230_v33 = vpop.permute.xlu0 %3229 }
 0x151   : > { %v3690_v30 = vsel %vm3678_vm8, %v3651_v14, %v3228_v55  ;;  %2558 = vst.msk [vmem:[#allocation2 + $0x88] sm:$0xf] %vm777_vm0, %v2348_v8  ;;  %v655_v7 = vsel %vm621_vm11, %v6102_v52, %v587_v28  ;;  %vm689_vm12 = vcmp.gt.f32.partialorder %v519_v27, %v6105_v53  ;;  %v2836_v10 = vrot.slane %v7769_v36, 1  ;;  %v3494_v36 = vpop.permute.xlu1 %3493 }
 0x152   : > { %v3729_v46 = vsel %vm9194_vm5, %v3690_v30, %v3283_v59  ;;  %2559 = vst.msk [vmem:[#allocation2 + $0x8c] sm:$0xf] %vm777_vm0, %v2372_v37  ;;  %v656_v3 = vsel %vm622_vm1, %v6102_v52, %v588_v34  ;;  %vm690_vm15 = vcmp.gt.f32.partialorder %v520_v32, %v6105_v53  ;;  %v3207_v55 = vrot.slane %v7884_v29, 2 }
 0x153   : > { %v7899_v1 = vshll.u32 %v7884_v29, 16  ;;  %v7902_v40 = vshrl.u32 %v7884_v29, 16  ;;  %v3768_v6 = vsel %vm9193_vm6, %v3729_v46, %v3415_v56  ;;  %vm9231_vm11 = vcmask 130048  }
 0x154   : > { %v3575_v23 = vsel %vm9231_vm11, %v3536_v2, %v7827_v26  ;;  %v7908_v24 = vsel %vm9192_vm14, %v3768_v6, %v3494_v36  ;;  %v723_v52 = vsel %vm689_vm12, %v6114_v60, %v655_v7  ;;  %v1601_v53 = vcombine.high %v7861_v12, %v7861_v12  ;;  %v3285_v5 = vpop.permute.xlu0 %3284 }
 0x155   : > { %v7918_v51 = vsel %vm3179_vm10, %v3205_v35, %v3207_v55  ;;  %v3370_v42 = vrot.slane %v7902_v40, 2  ;;  %v3371_v45 = vrot.slane %v7899_v1, 3  ;;  %v724_v26 = vsel %vm690_vm15, %v6114_v60, %v656_v3  ;;  %v3417_v15 = vpop.permute.xlu1 %3416 }
 0x156   : > { %v2421_v9 = vcombine.low %v6163_v39, %v9232_v18  ;;  %v3865_v59 = vshrl.u32 %v7756_v4, 16  ;;  %3296 = vrot.lane.b32.xlu0 %v7918_v51, %s5941_s24  ;;  %vm9233_vm1 = vsmask.f32 7424  ;;  %v3614_v35 = vsel %vm3600_vm9, %v3575_v23, %v7847_v20 }
 0x157   : > { %v2837_v38 = vsel %vm9233_vm1, %v2832_v22, %v2836_v10  ;;  %v7931_v48 = vor.u32 %v3371_v45, %v3370_v42  ;;  %v3471_v0 = vrot.slane %v7884_v29, 3  ;;  %v3868_v60 = vshll.u32 %v7908_v24, 16  ;;  %vm9236_vm15 = vmmov %vm9233_vm1 }
 0x158   : > { %v757_v39 = vmul.f32 %v6117_v61, %v723_v52  ;;  %v3867_v4 = vor.u32 %v3865_v59, %v7777_v41  ;;  %v3653_v27 = vsel %vm3639_vm7, %v3614_v35, %v3151_v17  ;;  %v2840_v32 = vor.u32 %v7772_v54, %v2836_v10  ;;  %vm9237_vm11 = vmmov %vm9233_vm1 }
 0x159   : > { %v758_v47 = vmul.f32 %v6117_v61, %v724_v26  ;;  %vm9234_vm3 = vsmask.f32 5376  ;;  %v3692_v21 = vsel %vm3678_vm8, %v3653_v27, %v3230_v33  ;;  %v3870_v57 = vrot.slane %v3868_v60, 1  ;;  %v7951_v17 = vld [vmem:[#allocation2 + $0x88] sm:$0xff]   ;;  %v3496_v56 = vpop.permute.xlu1 %3495 }
 0x15a   : > { %v3373_v20 = vsel %vm9234_vm3, %v7811_v13, %v7931_v48  ;;  %v2422_v50 = vcombine.low %v7861_v12, %v1601_v53  ;;  %2898 = vrot.lane.b32.xlu0 %v2837_v38, %s5943_s26  ;;  %v2943_v41 = vrot.slane %v7884_v29, 1  ;;  %v3108_v49 = vrot.slane %v7902_v40, 1  ;;  %v7953_v13 = vpop.permute.xlu0 %2886 }
 0x15b   : > { %3428 = vrot.lane.b32.xlu1 %v3373_v20, %s5945_s28  ;;  %v3109_v54 = vrot.slane %v7899_v1, 2  ;;  %v3731_v61 = vsel %vm9194_vm5, %v3692_v21, %v3285_v5  ;;  %vm9235_vm12 = vcmask 1044480   ;;  %v2844_v63 = vrot.slane %v7899_v1, 1 }
 0x15c   : > { %v3472_v12 = vsel %vm9235_vm12, %v3469_v62, %v3471_v0  ;;  %v3770_v16 = vsel %vm9193_vm6, %v3731_v61, %v3417_v15  ;;  %v775_v8 = vpack.c.bf16 %v758_v47, %v757_v39  ;;  %v3871_v28 = vsel %vm9236_vm15, %v3867_v4, %v3870_v57 }
 0x15d   : > { %v7964_v34 = vsel %vm9192_vm14, %v3770_v16, %v3496_v56  ;;  %v5506_v14 = vpack.c.bf16 %v758_v47, %v758_v47  ;;  %5714 = vmatprep.mubr.msk.bf16.mxu0 %vm9191_vm4, %v3871_v28  ;;  %v2429_v37 = vrot.slane %v2421_v9, %v6168_v43  ;;  %v2436_v62 = vrot.slane %v2422_v50, %v6168_v43  ;;  %v7987_v33 = vpop.permute.xlu1 %3020 }
 0x15e   : > { %v3875_v22 = vshll.u32 %v7964_v34, 16  ;;  %2977 = vrot.lane.b32.xlu0 %v7788_v19, %s5938_s19  ;;  %v3110_v44 = vor.u32 %v3109_v54, %v3108_v49  ;;  %v7974_v2 = vshrl.u32 %v7951_v17, 16  ;;  %v7976_v30 = vpop.permute.xlu0 %2965  ;;  %v2944_v7 = vsel %vm2913_vm2, %v2941_v11, %v2943_v41 }
 0x15f   : > { %3507 = vrot.lane.b32.xlu1 %v3472_v12, %s5942_s25  ;;  %v2845_v10 = vsel %vm9237_vm11, %v2840_v32, %v2844_v63  ;;  %v7985_v46 = vshll.u32 %v7951_v17, 16  ;;  %v1514_v19 = vrot.slane %v775_v8, %v6079_v31  ;;  %v3872_v3 = vshrl.u32 %v7908_v24, 16 }
 0x160   : > { %v7991_v6 = vrot.slane %v3875_v22, 1  ;;  %v1521_v36 = vrot.slane %v5506_v14, %v6079_v31  ;;  %v2945_v58 = vrot.slane %v7951_v17, 1  ;;  %v2437_v52 = vcombine.low %v2429_v37, %v2436_v62 }
 0x161   : > { %v1522_v11 = vcombine.high %v1514_v19, %v1514_v19  ;;  %v1530_v23 = vrot.slane %v1514_v19, %v6079_v31  ;;  %v3111_v53 = vsel %vm3047_vm13, %v7804_v25, %v3110_v44  ;;  %v3874_v42 = vor.u32 %v3872_v3, %v3870_v57  ;;  %v3153_v35 = vpop.permute.xlu1 %3152 }
 0x162   : > { %2900 = vrot.lane.b32.xlu0 %v2845_v10, %s5943_s26  ;;  %v3112_v24 = vrot.slane %v7974_v2, 1  ;;  %v8001_v45 = vpop.permute.xlu0 %2888  ;;  %v1523_v26 = vcombine.high %v1521_v36, %v1521_v36  ;;  %v3113_v18 = vrot.slane %v7985_v46, 2  ;;  %v1537_v9 = vrot.slane %v1521_v36, %v6079_v31 }
 0x163   : > { %3032 = vrot.lane.b32.xlu1 %v2944_v7, %s5939_s20  ;;  %v1544_v59 = vrot.slane %v1522_v11, %v6079_v31  ;;  %v1552_v38 = vcombine.high %v1530_v23, %v1530_v23  ;;  %v3209_v5 = vrot.slane %v7951_v17, 2  ;;  %v3878_v25 = vsel %vm9233_vm1, %v3874_v42, %v7991_v6 }
 0x164   : > { %v1551_v60 = vrot.slane %v1523_v26, %v6079_v31  ;;  %v8013_v15 = vsel %vm2913_vm2, %v2943_v41, %v2945_v58  ;;  %v1553_v39 = vcombine.high %v1537_v9, %v1537_v9  ;;  %5715 = vmatmul.mubr.msk.bf16.gmra.mxu0 %vm9191_vm4, %v3878_v25  ;;  %v3374_v32 = vrot.slane %v7974_v2, 2 }
 0x165   : > { %v1554_v4 = vcombine.high %v1544_v59, %v1544_v59  ;;  %v2373_v27 = vcombine.low %v1530_v23, %v1552_v38  ;;  %v3375_v31 = vrot.slane %v7985_v46, 3  ;;  %v2444_v21 = vrot.slane %v2437_v52, %v6168_v43  ;;  %v3232_v54 = vpop.permute.xlu1 %3231 }
 0x166   : > { %2979 = vrot.lane.b32.xlu0 %v2944_v7, %s5938_s19  ;;  %v1555_v47 = vcombine.high %v1551_v60, %v1551_v60  ;;  %v2968_v20 = vpop.permute.xlu0 %2967  ;;  %v8021_v57 = vor.u32 %v3113_v18, %v3112_v24  ;;  %v2397_v49 = vcombine.low %v1537_v9, %v1553_v39  ;;  %v3210_v28 = vsel %vm3179_vm10, %v3207_v55, %v3209_v5  ;;  %v5896_v7 = vld [vmem:[#allocation2 + $0x40] sm:$0xff]  }
 0x167   : > { %3164 = vrot.lane.b32.xlu1 %v3111_v53, %s5944_s27  ;;  %v2374_v50 = vcombine.low %v1544_v59, %v1554_v4  ;;  %v2381_v41 = vrot.slane %v2373_v27, %v6168_v43  ;;  %2562 = vst.msk [vmem:[#allocation2 + $0x98] sm:$0xf] %vm777_vm0, %v2444_v21  ;;  %v8039_v22 = vor.u32 %v3375_v31, %v3374_v32  ;;  %vm9238_vm3 = vcmask 64512   ;;  %v5897_v59 = vld [vmem:[#allocation2 + $0x48] sm:$0xff]  }
 0x168   : > { %v2398_v61 = vcombine.low %v1551_v60, %v1555_v47  ;;  %v2405_v16 = vrot.slane %v2397_v49, %v6168_v43  ;;  %v3115_v14 = vsel %vm3047_vm13, %v3110_v44, %v8021_v57  ;;  %v3538_v10 = vsel %vm9238_vm3, %v5896_v7, %v7953_v13  ;;  %vm9242_vm1 = vmmov %vm9238_vm3 }
 0x169   : > { %v2388_v12 = vrot.slane %v2374_v50, %v6168_v43  ;;  %v3287_v62 = vpop.permute.xlu1 %3286  ;;  %vm9239_vm12 = vcmask 130048   ;;  %vm9240_vm15 = vsmask.f32 5376  ;;  %v3473_v13 = vrot.slane %v7951_v17, 3 }
 0x16a   : > { %3034 = vrot.lane.b32.xlu0 %v8013_v15, %s5939_s20  ;;  %v2412_v56 = vrot.slane %v2398_v61, %v6168_v43  ;;  %v3023_v8 = vpop.permute.xlu0 %3022  ;;  %v3577_v55 = vsel %vm9239_vm12, %v3538_v10, %v7976_v30  ;;  %v3377_v36 = vsel %vm9240_vm15, %v7931_v48, %v8039_v22  ;;  %vm9241_vm11 = vcmask 1044480   ;;  %vm9243_vm3 = vmmov %vm9239_vm12 }
 0x16b   : > { %3243 = vrot.lane.b32.xlu1 %v7918_v51, %s5940_s23  ;;  %v2389_v37 = vcombine.low %v2381_v41, %v2388_v12  ;;  %v3616_v11 = vsel %vm3600_vm9, %v3577_v55, %v7987_v33  ;;  %v3474_v33 = vsel %vm9241_vm11, %v3471_v0, %v3473_v13  ;;  %v3879_v18 = vshrl.u32 %v7964_v34, 16 }
 0x16c   : > { %v2413_v51 = vcombine.low %v2405_v16, %v2412_v56  ;;  %v3655_v52 = vsel %vm3639_vm7, %v3616_v11, %v3153_v35  ;;  %v3540_v38 = vsel %vm9242_vm1, %v5897_v59, %v8001_v45  ;;  %v2848_v39 = vor.u32 %v7902_v40, %v2844_v63 }
 0x16d   : > { %v2396_v19 = vrot.slane %v2389_v37, %v6168_v43  ;;  %v3419_v23 = vpop.permute.xlu1 %3418  ;;  %v3694_v30 = vsel %vm3678_vm8, %v3655_v52, %v3232_v54  ;;  %v3881_v0 = vor.u32 %v3879_v18, %v7991_v6  ;;  %v3579_v25 = vsel %vm9243_vm3, %v3540_v38, %v2968_v20 }
 0x16e   : > { %3166 = vrot.lane.b32.xlu0 %v3115_v14, %s5944_s27  ;;  %v2420_v44 = vrot.slane %v2413_v51, %v6168_v43  ;;  %v3155_v3 = vpop.permute.xlu0 %3154  ;;  %v3733_v43 = vsel %vm9194_vm5, %v3694_v30, %v3287_v62  ;;  %v2852_v34 = vrot.slane %v7985_v46, 1  ;;  %v3618_v32 = vsel %vm3600_vm9, %v3579_v25, %v3023_v8  ;;  %v8124_v51 = vld [vmem:[#allocation2 + $0x98] sm:$0xff]  }
 0x16f   : > { %3298 = vrot.lane.b32.xlu1 %v3210_v28, %s5941_s24  ;;  %2560 = vst.msk [vmem:[#allocation2 + $0x90] sm:$0xf] %vm777_vm0, %v2396_v19  ;;  %v3772_v53 = vsel %vm9193_vm6, %v3733_v43, %v3419_v23  ;;  %v3657_v6 = vsel %vm3639_vm7, %v3618_v32, %v3155_v3  ;;  %vm9244_vm12 = vsmask.f32 7424  ;;  %vm9246_vm11 = vsmask.f32 5376 }
 0x170   : > { %2561 = vst.msk [vmem:[#allocation2 + $0x94] sm:$0xf] %vm777_vm0, %v2420_v44  ;;  %vm9245_vm15 = vmmov %vm9244_vm12  ;;  %vm9247_vm1 = vcmask 1044480   ;;  %v2856_v37 = vor.u32 %v7974_v2, %v2852_v34  ;;  %v3121_v2 = vshrl.u32 %v8124_v51, 16  ;;  %v3124_v23 = vshll.u32 %v8124_v51, 16 }
 0x171   : > { %v3498_v42 = vpop.permute.xlu1 %3497  ;;  %vm9248_vm3 = vmmov %vm9244_vm12 }
 0x172   : > { %3245 = vrot.lane.b32.xlu0 %v3210_v28, %s5940_s23  ;;  %v3234_v48 = vpop.permute.xlu0 %3233  ;;  %v3811_v24 = vsel %vm9192_vm14, %v3772_v53, %v3498_v42  ;;  %v3126_v43 = vrot.slane %v3124_v23, 2  ;;  %v8157_v53 = vrot.slane %v8124_v51, 2  ;;  %v3382_v42 = vrot.slane %v3121_v2, 2 }
 0x173   : > { %3430 = vrot.lane.b32.xlu1 %v3377_v36, %s5945_s28  ;;  %v3882_v26 = vshll.u32 %v3811_v24, 16  ;;  %v3696_v46 = vsel %vm3678_vm8, %v3657_v6, %v3234_v48  ;;  %v3886_v54 = vshrl.u32 %v3811_v24, 16  ;;  %v8159_v24 = vld [vmem:[#allocation2 + $0xa0] sm:$0xff]   ;;  %v3383_v59 = vrot.slane %v3124_v23, 3 }
 0x175   : > { %v3884_v29 = vrot.slane %v3882_v26, 1  ;;  %v3421_v60 = vpop.permute.xlu1 %3420  ;;  %v5898_v26 = vld [vmem:[#allocation2 + $0x50] sm:$0xff]  }
 0x176   : > { %v3289_v9 = vpop.permute.xlu0 %3288 }
 0x177   : > { %3509 = vrot.lane.b32.xlu1 %v3474_v33, %s5942_s25  ;;  %v8071_v35 = vld [vmem:[#allocation2 + $0x90] sm:$0xff]   ;;  %v3885_v47 = vsel %vm9244_vm12, %v3881_v0, %v3884_v29  ;;  %v3735_v50 = vsel %vm9194_vm5, %v3696_v46, %v3289_v9  ;;  %v3888_v62 = vor.u32 %v3886_v54, %v3884_v29  ;;  %vm9249_vm12 = vmmov %vm9248_vm3 }
 0x178   : > { %v3211_v4 = vrot.slane %v8071_v35, 2  ;;  %v8081_v27 = vshll.u32 %v8071_v35, 16  ;;  %v8084_v45 = vshrl.u32 %v8071_v35, 16  ;;  %5718 = vmatprep.mubr.msk.bf16.mxu0 %vm9191_vm4, %v3885_v47  ;;  %v3475_v21 = vrot.slane %v8071_v35, 3 }
 0x179   : > { %v3500_v20 = vpop.permute.xlu1 %3499  ;;  %v3774_v49 = vsel %vm9193_vm6, %v3735_v50, %v3421_v60  ;;  %v8121_v14 = vrot.slane %v8071_v35, 1  ;;  %v8182_v47 = vld [vmem:[#allocation2 + $0x98] ss:$0 sps:$4 sm:$0x11]  }
 0x17a   : > { %v2891_v31 = vpop.permute.xlu0 %2890  ;;  %v8094_v1 = vsel %vm3179_vm10, %v3209_v5, %v3211_v4  ;;  %v3378_v40 = vrot.slane %v8084_v45, 2  ;;  %v3379_v63 = vrot.slane %v8081_v27, 3  ;;  %v2853_v5 = vsel %vm9245_vm15, %v2848_v39, %v2852_v34 }
 0x17b   : > { %3300 = vrot.lane.b32.xlu0 %v8094_v1, %s5941_s24  ;;  %v8109_v61 = vsel %vm9192_vm14, %v3774_v49, %v3500_v20  ;;  %v3476_v28 = vsel %vm9247_vm1, %v3473_v13, %v3475_v21  ;;  %v3116_v7 = vrot.slane %v8084_v45, 1  ;;  %v3117_v10 = vrot.slane %v8081_v27, 2 }
 0x17c   : > { %v8104_v41 = vor.u32 %v3379_v63, %v3378_v40  ;;  %v3889_v56 = vshll.u32 %v8109_v61, 16  ;;  %v2948_v36 = vsel %vm2913_vm2, %v2945_v58, %v8121_v14  ;;  %v3002_v58 = vrot.slane %v8124_v51, 1 }
 0x17d   : > { %v3025_v8 = vpop.permute.xlu1 %3024  ;;  %v3118_v13 = vor.u32 %v3117_v10, %v3116_v7  ;;  %vm9250_vm15 = vcmask 64512   ;;  %v3387_v39 = vshrl.u32 %v8159_v24, 16  ;;  %v3390_v34 = vshll.u32 %v8159_v24, 16 }
 0x17e   : > { %v2970_v12 = vpop.permute.xlu0 %2969  ;;  %v3381_v16 = vsel %vm9246_vm11, %v8039_v22, %v8104_v41  ;;  %v2860_v22 = vrot.slane %v8081_v27, 1  ;;  %v3891_v19 = vrot.slane %v3889_v56, 1  ;;  %v3542_v18 = vsel %vm9250_vm15, %v5898_v26, %v2891_v31 }
 0x17f   : > { %3432 = vrot.lane.b32.xlu1 %v3381_v16, %s5945_s28  ;;  %2902 = vrot.lane.b32.xlu0 %v2853_v5, %s5943_s26  ;;  %v3119_v17 = vsel %vm3047_vm13, %v8021_v57, %v3118_v13  ;;  %v3003_v57 = vsel %vm2913_vm2, %v8121_v14, %v3002_v58  ;;  %vm9251_vm11 = vcmask 130048   ;;  %v3214_v32 = vsel %vm3179_vm10, %v3211_v4, %v8157_v53 }
 0x180   : > { %v3892_v44 = vsel %vm9248_vm3, %v3888_v62, %v3891_v19  ;;  %v2861_v11 = vsel %vm9249_vm12, %v2856_v37, %v2860_v22  ;;  %v3581_v38 = vsel %vm9251_vm11, %v3542_v18, %v2970_v12  ;;  %v3384_v31 = vor.u32 %v3383_v59, %v3382_v42  ;;  %vm9255_vm11 = vmmov %vm9249_vm12 }
 0x181   : > { %v3157_v3 = vpop.permute.xlu1 %3156  ;;  %5719 = vmatmul.mubr.msk.bf16.gmra.mxu0 %vm9191_vm4, %v3892_v44  ;;  %v3620_v29 = vsel %vm3600_vm9, %v3581_v38, %v3025_v8  ;;  %v3268_v63 = vrot.slane %v8159_v24, 2  ;;  %v3477_v4 = vrot.slane %v8124_v51, 3  ;;  %v3389_v50 = vrot.slane %v3387_v39, 2  ;;  %v5886_v44 = vld [vmem:[#allocation2 + $0x98] ss:$0 sps:$4 sm:$0x33]  }
 0x182   : > { %v8129_v55 = vpop.permute.xlu0 %2892  ;;  %v3659_v25 = vsel %vm3639_vm7, %v3620_v29, %v3157_v3  ;;  %v3392_v5 = vrot.slane %v3390_v34, 3  ;;  %v3893_v54 = vshrl.u32 %v8109_v61, 16  ;;  %vm9252_vm1 = vsmask.f32 5376 }
 0x183   : > { %3511 = vrot.lane.b32.xlu1 %v3476_v28, %s5942_s25  ;;  %2981 = vrot.lane.b32.xlu0 %v8013_v15, %s5938_s19  ;;  %v3123_v15 = vrot.slane %v3121_v2, 1  ;;  %v3385_v12 = vsel %vm9252_vm1, %v8104_v41, %v3384_v31  ;;  %v2866_v16 = vshll.u32 %v8182_v47, 16  ;;  %v3269_v62 = vsel %vm3179_vm10, %v8157_v53, %v3268_v63  ;;  %v8204_v61 = vld [vmem:[#allocation2 + $0xa0] ss:$0 sps:$4 sm:$0x33]   ;;  %vm9254_vm15 = vmmov %vm9252_vm1 }
 0x184   : > { %v3895_v28 = vor.u32 %v3893_v54, %v3891_v19  ;;  %v8202_v7 = vor.u32 %v3392_v5, %v3389_v50  ;;  %vm9253_vm3 = vcmask 1044480   ;;  %v2864_v10 = vor.u32 %v8084_v45, %v2860_v22 }
 0x185   : > { %v3236_v30 = vpop.permute.xlu1 %3235  ;;  %v8166_v9 = vor.u32 %v3126_v43, %v3123_v15  ;;  %v3478_v41 = vsel %vm9253_vm3, %v3475_v21, %v3477_v4  ;;  %v2868_v19 = vrot.slane %v2866_v16, 1  ;;  %v3130_v35 = vshrl.u32 %v8204_v61, 16 }
 0x186   : > { %v8145_v52 = vpop.permute.xlu0 %2971  ;;  %v3394_v27 = vsel %vm9254_vm15, %v3384_v31, %v8202_v7  ;;  %v2949_v21 = vrot.slane %v5886_v44, 1  ;;  %v3133_v22 = vshll.u32 %v8204_v61, 16  ;;  %vm9256_vm1 = vcmask 64512  }
 0x187   : > { %3036 = vrot.lane.b32.xlu1 %v2948_v36, %s5939_s20  ;;  %2904 = vrot.lane.b32.xlu0 %v2861_v11, %s5943_s26  ;;  %v3128_v6 = vsel %vm3047_vm13, %v3118_v13, %v8166_v9  ;;  %v2869_v45 = vsel %vm9255_vm11, %v2864_v10, %v2868_v19  ;;  %v5899_v11 = vld [vmem:[#allocation2 + $0x58] sm:$0xff]   ;;  %vm9257_vm3 = vcmask 130048   ;;  %v3004_v15 = vrot.slane %v8204_v61, 1  ;;  %v5900_v61 = vld [vmem:[#allocation2 + $0x60] sm:$0xff]  }
 0x188   : > { %v3544_v13 = vsel %vm9256_vm1, %v5899_v11, %v8129_v55  ;;  %v3132_v43 = vrot.slane %v3130_v35, 1  ;;  %v2950_v55 = vsel %vm2913_vm2, %v8121_v14, %v2949_v21 }
 0x189   : > { %v3291_v33 = vpop.permute.xlu1 %3290  ;;  %v3583_v23 = vsel %vm9257_vm3, %v3544_v13, %v8145_v52  ;;  %v3005_v14 = vsel %vm2913_vm2, %v3002_v58, %v3004_v15  ;;  %vm9259_vm2 = vmmov %vm9255_vm11 }
 0x18a   : > { %v8152_v48 = vpop.permute.xlu0 %3026  ;;  %vm9262_vm11 = vmmov %vm9257_vm3 }
 0x18b   : > { %3168 = vrot.lane.b32.xlu1 %v3119_v17, %s5944_s27  ;;  %2983 = vrot.lane.b32.xlu0 %v2948_v36, %s5938_s19  ;;  %v3479_v36 = vrot.slane %v8159_v24, 3  ;;  %v3622_v17 = vsel %vm3600_vm9, %v3583_v23, %v8152_v48  ;;  %v2870_v48 = vshrl.u32 %v8182_v47, 16 }
 0x18e   : > { %v3159_v60 = vpop.permute.xlu0 %3158 }
 0x18f   : > { %v3423_v0 = vpop.permute.xlu1 %3422  ;;  %3247 = vrot.lane.b32.xlu1 %v8094_v1, %s5940_s23  ;;  %3038 = vrot.lane.b32.xlu0 %v3003_v57, %s5939_s20  ;;  %v3698_v1 = vsel %vm3678_vm8, %v3659_v25, %v3236_v30  ;;  %v3661_v52 = vsel %vm3639_vm7, %v3622_v17, %v3159_v60  ;;  %v3135_v57 = vrot.slane %v3133_v22, 2  ;;  %v5889_v25 = vld [vmem:[#allocation2 + $0xa8] ss:$0 sps:$4 sm:$0x77]   ;;  %v9265_v17 = vld [vmem:[#allocation6_spill] sm:$0xff] }
 0x190   : > { %v3737_v40 = vsel %vm9194_vm5, %v3698_v1, %v3291_v33  ;;  %v3399_v58 = vshll.u32 %v5889_v25, 16 }
 0x191   : > { %v3776_v46 = vsel %vm9193_vm6, %v3737_v40, %v3423_v0  ;;  %v3136_v60 = vor.u32 %v3135_v57, %v3132_v43  ;;  %v5888_v0 = vld [vmem:[#allocation2 + $0xa0] ss:$0 sps:$4 sm:$0x77]  }
 0x192   : > { %v3238_v56 = vpop.permute.xlu0 %3237  ;;  %v3215_v51 = vrot.slane %v5888_v0, 2 }
 0x193   : > { %v3502_v20 = vpop.permute.xlu1 %3501  ;;  %3302 = vrot.lane.b32.xlu1 %v3214_v32, %s5941_s24  ;;  %3170 = vrot.lane.b32.xlu0 %v3128_v6, %s5944_s27  ;;  %v3700_v26 = vsel %vm3678_vm8, %v3661_v52, %v3238_v56  ;;  %v3137_v40 = vsel %vm3047_vm13, %v8166_v9, %v3136_v60  ;;  %vm9260_vm13 = vmmov %vm9254_vm15  ;;  %v4228_v52 = vadd.s32 8, %v9265_v17 }
 0x194   : > { %v3815_v49 = vsel %vm9192_vm14, %v3776_v46, %v3502_v20  ;;  %v3396_v46 = vshrl.u32 %v5889_v25, 16  ;;  %v3216_v5 = vsel %vm3179_vm10, %v8157_v53, %v3215_v51  ;;  %vm9261_vm15 = vmmov %vm9256_vm1 }
 0x195   : > { %v3896_v8 = vshll.u32 %v3815_v49, 16  ;;  %v3900_v34 = vshrl.u32 %v3815_v49, 16  ;;  %v3270_v49 = vrot.slane %v5889_v25, 2  ;;  %vm9264_vm1 = vmmov %vm9259_vm2 }
 0x196   : > { %v3398_v54 = vrot.slane %v3396_v46, 2  ;;  %vm9266_vm3 = vmmov %vm9261_vm15 }
 0x197   : > { %v3898_v37 = vrot.slane %v3896_v8, 1  ;;  %3434 = vrot.lane.b32.xlu1 %v3385_v12, %s5945_s28  ;;  %3249 = vrot.lane.b32.xlu0 %v3214_v32, %s5940_s23  ;;  %v3401_v12 = vrot.slane %v3399_v58, 3  ;;  %v3271_v56 = vsel %vm3179_vm10, %v3268_v63, %v3270_v49 }
 0x199   : > { %v3899_v3 = vsel %vm9249_vm12, %v3895_v28, %v3898_v37  ;;  %vm9258_vm12 = vcmask 1044480   ;;  %v3902_v6 = vor.u32 %v3900_v34, %v3898_v37  ;;  %v3402_v8 = vor.u32 %v3401_v12, %v3398_v54  ;;  %v5890_v28 = vld [vmem:[#allocation2 + $0xa8] ss:$0 sps:$4 sm:$0xff]  }
 0x19a   : > { %5722 = vmatprep.mubr.msk.bf16.mxu0 %vm9191_vm4, %v3899_v3  ;;  %v3480_v42 = vsel %vm9258_vm12, %v3477_v4, %v3479_v36  ;;  %vm9263_vm10 = vmmov %vm9258_vm12 }
 0x19b   : > { %v3293_v2 = vpop.permute.xlu0 %3292  ;;  %3513 = vrot.lane.b32.xlu1 %v3478_v41, %s5942_s25  ;;  %3304 = vrot.lane.b32.xlu0 %v3269_v62, %s5941_s24  ;;  %v3403_v37 = vsel %vm9260_vm13, %v8202_v7, %v3402_v8  ;;  %v3481_v62 = vrot.slane %v5890_v28, 3  ;;  %vm9267_vm12 = vmmov %vm9262_vm11 }
 0x19c   : > { %v3739_v18 = vsel %vm9194_vm5, %v3700_v26, %v3293_v2 }
 0x19d   : > { %v3482_v3 = vsel %vm9263_vm10, %v3479_v36, %v3481_v62 }
 0x19f   : > { %v2895_v30 = vpop.permute.xlu0 %2894  ;;  %3436 = vrot.lane.b32.xlu1 %v3394_v27, %s5945_s28  ;;  %2906 = vrot.lane.b32.xlu0 %v2869_v45, %s5943_s26 }
 0x1a0   : > { %v3546_v41 = vsel %vm9261_vm15, %v5900_v61, %v2895_v30 }
 0x1a1   : > { %v3425_v33 = vpop.permute.xlu1 %3424 }
 0x1a2   : > { %v3778_v59 = vsel %vm9193_vm6, %v3739_v18, %v3425_v33  ;;  %v5901_v18 = vld [vmem:[#allocation2 + $0x68] sm:$0xff]  }
 0x1a3   : > { %3515 = vrot.lane.b32.xlu1 %v3480_v42, %s5942_s25  ;;  %2985 = vrot.lane.b32.xlu0 %v2950_v55, %s5938_s19  ;;  %v2974_v29 = vpop.permute.xlu0 %2973  ;;  %v4230_v42 = vadd.s32 24, %v9265_v17 }
 0x1a4   : > { %v3585_v19 = vsel %vm9262_vm11, %v3546_v41, %v2974_v29 }
 0x1a5   : > { %v3504_v38 = vpop.permute.xlu1 %3503 }
 0x1a6   : > { %v3817_v39 = vsel %vm9192_vm14, %v3778_v59, %v3504_v38  ;;  %v8296_v59 = vmul.u32.u64.low 3817748708, %v4230_v42  ;;  %v8297_v38 = vmul.u32.u64.high 3817748708, %v4230_v42, %v8296_v59 }
 0x1a7   : > { %v3903_v32 = vshll.u32 %v3817_v39, 16  ;;  %3040 = vrot.lane.b32.xlu1 %v3005_v14, %s5939_s20  ;;  %2908 = vrot.lane.b32.xlu0 %v2870_v48, %s5943_s26  ;;  %v2897_v20 = vpop.permute.xlu0 %2896  ;;  %v3907_v11 = vshrl.u32 %v3817_v39, 16  ;;  %v8301_v25 = vmul.u32.u64.low 3817748708, %v4228_v52  ;;  %v8302_v39 = vmul.u32.u64.high 3817748708, %v4228_v52, %v8301_v25  ;;  %s282_s26 = scalar_lea.vmem %s9174_s6, %s9427_s22 }
 0x1a8   : > { %v3548_v48 = vsel %vm9266_vm3, %v5901_v18, %v2897_v20 }
 0x1a9   : > { %v3905_v31 = vrot.slane %v3903_v32, 1  ;;  %v3029_v1 = vpop.permute.xlu1 %3028 }
 0x1aa   : > { %v3624_v63 = vsel %vm3600_vm9, %v3585_v19, %v3029_v1 }
 0x1ab   : > { %v3906_v4 = vsel %vm9259_vm2, %v3902_v6, %v3905_v31  ;;  %3172 = vrot.lane.b32.xlu1 %v3137_v40, %s5944_s27  ;;  %2987 = vrot.lane.b32.xlu0 %v2949_v21, %s5938_s19  ;;  %v2976_v9 = vpop.permute.xlu0 %2975  ;;  %v3909_v13 = vor.u32 %v3907_v11, %v3905_v31  ;;  %vm9268_vm2 = vmmov %vm9264_vm1 }
 0x1ac   : > { %5723 = vmatmul.mubr.msk.bf16.gmra.mxu0 %vm9191_vm4, %v3906_v4  ;;  %v3587_v29 = vsel %vm9267_vm12, %v3548_v48, %v2976_v9 }
 0x1ad   : > { %v3161_v50 = vpop.permute.xlu1 %3160 }
 0x1ae   : > { %v3663_v7 = vsel %vm3639_vm7, %v3624_v63, %v3161_v50  ;;  %v8330_v63 = vadd.s32 32, %v9265_v17 }
 0x1af   : > { %3251 = vrot.lane.b32.xlu1 %v3216_v5, %s5940_s23  ;;  %3042 = vrot.lane.b32.xlu0 %v3004_v15, %s5939_s20  ;;  %v4229_v15 = vadd.s32 16, %v9265_v17  ;;  %v4302_v5 = vshrl.u32 %v8297_v38, 4 }
 0x1b1   : > { %v3240_v16 = vpop.permute.xlu1 %3239  ;;  %v8292_v57 = vmul.u32.u64.low 3817748708, %v4229_v15  ;;  %v8293_v26 = vmul.u32.u64.high 3817748708, %v4229_v15, %v8292_v57 }
 0x1b2   : > { %v3031_v10 = vpop.permute.xlu0 %3030  ;;  %v3702_v2 = vsel %vm3678_vm8, %v3663_v7, %v3240_v16  ;;  %v4280_v16 = vshrl.u32 %v8302_v39, 4 }
 0x1b3   : > { %3306 = vrot.lane.b32.xlu1 %v3271_v56, %s5941_s24  ;;  %3174 = vrot.lane.b32.xlu0 %v3132_v43, %s5944_s27  ;;  %v8287_v43 = vmul.u32.u64.low 3817748708, %v9265_v17  ;;  %v8288_v33 = vmul.u32.u64.high 3817748708, %v9265_v17, %v8287_v43  ;;  %v3626_v14 = vsel %vm3600_vm9, %v3587_v29, %v3031_v10  ;;  %v4291_v58 = vshrl.u32 %v8293_v26, 4 }
 0x1b4   : > { %v4281_v61 = vmul.u32 18, %v4280_v16  ;;  %v8327_v10 = vadd.s32 48, %v9265_v17 }
 0x1b5   : > { %v3295_v53 = vpop.permute.xlu1 %3294  ;;  %v4269_v6 = vshrl.u32 %v8288_v33, 4  ;;  %v4292_v56 = vmul.u32 18, %v4291_v58  ;;  %v8362_v33 = vadd.s32 40, %v9265_v17 }
 0x1b6   : > { %v3741_v35 = vsel %vm9194_vm5, %v3702_v2, %v3295_v53  ;;  %v4303_v53 = vmul.u32 18, %v4302_v5  ;;  %v4282_v2 = vsub.s32 %v4228_v52, %v4281_v61 }
 0x1b7   : > { %3438 = vrot.lane.b32.xlu1 %v3403_v37, %s5945_s28  ;;  %3253 = vrot.lane.b32.xlu0 %v3215_v51, %s5940_s23  ;;  %v3163_v27 = vpop.permute.xlu0 %3162  ;;  %v4270_v50 = vmul.u32 18, %v4269_v6  ;;  %v4293_v41 = vsub.s32 %v4229_v15, %v4292_v56  ;;  %s279_s23 = scalar_lea.vmem %s9173_s5, %s9427_s22 }
 0x1b8   : > { %v3665_v34 = vsel %vm3639_vm7, %v3626_v14, %v3163_v27  ;;  %v4304_v19 = vsub.s32 %v4230_v42, %v4303_v53  ;;  %v5902_v42 = vld [vmem:[#allocation2 + $0x70] sm:$0xff]   ;;  %v4768_v52 = vadd.s32 18, %v4282_v2 }
 0x1b9   : > { %v3427_v44 = vpop.permute.xlu1 %3426  ;;  %v4271_v28 = vsub.s32 %v9265_v17, %v4270_v50  ;;  %vm4661_vm11 = vcmp.ne.s32.totalorder %v4293_v41, 0  ;;  %vm4697_vm10 = vcmp.lt.s32.totalorder %v4293_v41, 0 }
 0x1ba   : > { %v3780_v45 = vsel %vm9193_vm6, %v3741_v35, %v3427_v44  ;;  %vm4662_vm3 = vcmp.ne.s32.totalorder %v4304_v19, 0  ;;  %vm4698_vm12 = vcmp.lt.s32.totalorder %v4304_v19, 0  ;;  %v5903_v35 = vld [vmem:[#allocation2 + $0x78] sm:$0xff]  }
 0x1bb   : > { %3517 = vrot.lane.b32.xlu1 %v3482_v3, %s5942_s25  ;;  %3308 = vrot.lane.b32.xlu0 %v3270_v49, %s5941_s24  ;;  %v3242_v23 = vpop.permute.xlu0 %3241  ;;  %vm4659_vm13 = vcmp.ne.s32.totalorder %v4271_v28, 0  ;;  %vm4695_vm15 = vcmp.lt.s32.totalorder %v4271_v28, 0  ;;  %v4767_v7 = vadd.s32 18, %v4271_v28 }
 0x1bc   : > { %v3704_v32 = vsel %vm3678_vm8, %v3665_v34, %v3242_v23  ;;  %v8387_v39 = vmul.u32.u64.low 3817748708, %v8362_v33  ;;  %v8388_v34 = vmul.u32.u64.high 3817748708, %v8362_v33, %v8387_v39 }
 0x1bd   : > { %v3506_v21 = vpop.permute.xlu1 %3505 }
 0x1be   : > { %v3819_v22 = vsel %vm9192_vm14, %v3780_v45, %v3506_v21  ;;  %v8339_v27 = vmul.u32.u64.low 3817748708, %v8327_v10  ;;  %v8340_v45 = vmul.u32.u64.high 3817748708, %v8327_v10, %v8339_v27  ;;  %v4769_v21 = vadd.s32 18, %v4293_v41 }
 0x1bf   : > { %v3910_v24 = vshll.u32 %v3819_v22, 16  ;;  %3440 = vrot.lane.b32.xlu0 %v3398_v54, %s5945_s28  ;;  %3519 = vrot.lane.b32.xlu1 %v3481_v62, %s5942_s25  ;;  %v3914_v20 = vshrl.u32 %v3819_v22, 16  ;;  %v4770_v22 = vadd.s32 18, %v4304_v19 }
 0x1c0   : > { %v4335_v25 = vshrl.u32 %v8340_v45, 4 }
 0x1c1   : > { %v3912_v36 = vrot.slane %v3910_v24, 1  ;;  %v8343_v11 = vmul.u32.u64.low 3817748708, %v8330_v63  ;;  %v8344_v24 = vmul.u32.u64.high 3817748708, %v8330_v63, %v8343_v11 }
 0x1c2   : > { %v4336_v16 = vmul.u32 18, %v4335_v25 }
 0x1c3   : > { %v3913_v30 = vsel %vm9264_vm1, %v3909_v13, %v3912_v36  ;;  %v3916_v49 = vor.u32 %v3914_v20, %v3912_v36  ;;  %vm8334_vm1 = vmand %vm4695_vm15, %vm4659_vm13  ;;  %vm4660_vm13 = vcmp.ne.s32.totalorder %v4282_v2, 0  ;;  %vm4696_vm15 = vcmp.lt.s32.totalorder %v4282_v2, 0 }
 0x1c4   : > { %5726 = vmatprep.mubr.msk.bf16.mxu1 %vm9191_vm4, %v3913_v30  ;;  %v4803_v23 = vsel %vm8334_vm1, %v4767_v7, %v4271_v28  ;;  %v8353_v30 = vadd.s32 56, %v9265_v17  ;;  %v8428_v45 = vsub.s32 %v8327_v10, %v4336_v16  ;;  %v8473_v16 = vadd.s32 80, %v9265_v17 }
 0x1c5   : > { %vm8368_vm1 = vcmp.lt.s32.totalorder %v4803_v23, 16 }
 0x1c8   : > { %v3297_v55 = vpop.permute.xlu0 %3296 }
 0x1c9   : > { %v3743_v31 = vsel %vm9194_vm5, %v3704_v32, %v3297_v55 }
 0x1cc   : > { %v2899_v0 = vpop.permute.xlu0 %2898 }
 0x1cd   : > { %v3429_v60 = vpop.permute.xlu1 %3428 }
 0x1ce   : > { %v3782_v1 = vsel %vm9193_vm6, %v3743_v31, %v3429_v60  ;;  %v8381_v14 = vmul.u32.u64.low 3817748708, %v8353_v30  ;;  %v8382_v60 = vmul.u32.u64.high 3817748708, %v8353_v30, %v8381_v14 }
 0x1d0   : > { %v2978_v51 = vpop.permute.xlu0 %2977 }
 0x1d1   : > { %v3508_v40 = vpop.permute.xlu1 %3507 }
 0x1d2   : > { %v8310_v46 = vsel %vm9192_vm14, %v3782_v1, %v3508_v40  ;;  %v4313_v40 = vshrl.u32 %v8344_v24, 4 }
 0x1d3   : > { %v3917_v4 = vshll.u32 %v8310_v46, 16  ;;  %v3921_v56 = vshrl.u32 %v8310_v46, 16 }
 0x1d4   : > { %v8317_v9 = vpop.permute.xlu0 %2900 }
 0x1d5   : > { %v8315_v54 = vrot.slane %v3917_v4, 1  ;;  %v3033_v12 = vpop.permute.xlu1 %3032  ;;  %v5946_v4 = vmov 0.0  }
 0x1d6   : > { %v5562_v50 = vsel %vm8368_vm1, 1.0, %v5946_v4  ;;  %vm4665_vm1 = vcmp.ne.s32.totalorder %v8428_v45, 0 }
 0x1d7   : > { %v3920_v8 = vsel %vm9268_vm2, %v3916_v49, %v8315_v54  ;;  %vm8346_vm2 = vmand %vm4697_vm10, %vm4661_vm11  ;;  %vm9275_vm11 = vcmask 64512   ;;  %vm9276_vm10 = vcmask 130048  }
 0x1d8   : > { %5727 = vmatmul.mubr.msk.bf16.vlgmr.msra.gmra.mxu1 %vm9191_vm4, %v3920_v8  ;;  %v8324_v62 = vpop.permute.xlu0 %2979  ;;  %vm8357_vm4 = vmand %vm4698_vm12, %vm4662_vm3  ;;  %v3550_v55 = vsel %vm9275_vm11, %v5902_v42, %v2899_v0  ;;  %v4805_v26 = vsel %vm8346_vm2, %v4769_v21, %v4293_v41  ;;  %v4314_v41 = vmul.u32 18, %v4313_v40  ;;  %v4324_v21 = vshrl.u32 %v8388_v34, 4 }
 0x1d9   : > { %v3165_v37 = vpop.permute.xlu1 %3164  ;;  %v3589_v57 = vsel %vm9276_vm10, %v3550_v55, %v2978_v51  ;;  %vm8372_vm3 = vmand %vm4696_vm15, %vm4660_vm13  ;;  %v4806_v29 = vsel %vm8357_vm4, %v4770_v22, %v4304_v19  ;;  %vm4841_vm4 = vcmp.lt.s32.totalorder %v4805_v26, 16  ;;  %v3923_v19 = vor.u32 %v3921_v56, %v8315_v54 }
 0x1da   : > { %v3628_v59 = vsel %vm3600_vm9, %v3589_v57, %v3033_v12  ;;  %v4804_v6 = vsel %vm8372_vm3, %v4768_v52, %v4282_v2  ;;  %vm4842_vm12 = vcmp.lt.s32.totalorder %v4806_v29, 16  ;;  %v5564_v53 = vsel %vm4841_vm4, 1.0, %v5946_v4  ;;  %vm9283_vm13 = vmmov %vm9275_vm11 }
 0x1db   : > { %v3667_v0 = vsel %vm3639_vm7, %v3628_v59, %v3165_v37  ;;  %vm8407_vm2 = vcmp.lt.s32.totalorder %v4804_v6, 16  ;;  %v5565_v61 = vsel %vm4842_vm12, 1.0, %v5946_v4  ;;  %v3552_v27 = vsel %vm9283_vm13, %v5903_v35, %v8317_v9  ;;  %vm9284_vm15 = vmmov %vm9276_vm10 }
 0x1dc   : > { %v8332_v3 = vpop.permute.xlu0 %3034  ;;  %v5563_v46 = vsel %vm8407_vm2, 1.0, %v5946_v4  ;;  %v4346_v54 = vshrl.u32 %v8382_v60, 4  ;;  %v3591_v22 = vsel %vm9284_vm15, %v3552_v27, %v8324_v62  ;;  %vm9285_vm11 = vsmask.f32 7424  ;;  %vm9287_vm3 = vmmov %vm9283_vm13 }
 0x1dd   : > { %v3244_v44 = vpop.permute.xlu1 %3243  ;;  %v3630_v23 = vsel %vm3600_vm9, %v3591_v22, %v8332_v3  ;;  %vm9286_vm10 = vcmask 588800   ;;  %v8440_v10 = vsub.s32 %v8330_v63, %v4314_v41  ;;  %v4325_v26 = vmul.u32 18, %v4324_v21  ;;  %vm9288_vm4 = vmmov %vm9287_vm3 }
 0x1de   : > { %v3706_v32 = vsel %vm3678_vm8, %v3667_v0, %v3244_v44  ;;  %v4347_v57 = vmul.u32 18, %v4346_v54  ;;  %vm9289_vm13 = vmmov %vm9287_vm3 }
 0x1df   : > { %vm4663_vm12 = vcmp.ne.s32.totalorder %v8440_v10, 0  ;;  %vm4699_vm2 = vcmp.lt.s32.totalorder %v8440_v10, 0  ;;  %vm9290_vm15 = vmmov %vm9287_vm3 }
 0x1e0   : > { %v8355_v15 = vpop.permute.xlu0 %3166  ;;  %v4348_v6 = vsub.s32 %v8353_v30, %v4347_v57 }
 0x1e1   : > { %v3299_v13 = vpop.permute.xlu1 %3298  ;;  %v3669_v52 = vsel %vm3639_vm7, %v3630_v23, %v8355_v15 }
 0x1e2   : > { %v3745_v31 = vsel %vm9194_vm5, %v3706_v32, %v3299_v13  ;;  %v4774_v27 = vadd.s32 18, %v4348_v6 }
 0x1e4   : > { %v3246_v1 = vpop.permute.xlu0 %3245 }
 0x1e5   : > { %v3431_v38 = vpop.permute.xlu1 %3430  ;;  %v3708_v29 = vsel %vm3678_vm8, %v3669_v52, %v3246_v1  ;;  %v8549_v52 = vadd.s32 72, %v9265_v17 }
 0x1e6   : > { %v3784_v51 = vsel %vm9193_vm6, %v3745_v31, %v3431_v38 }
 0x1e8   : > { %v5708_v20 = vpop.f32.mrf.mxu0 }
 0x1e9   : > { %v3510_v58 = vpop.permute.xlu1 %3509  ;;  %v5639_v49 = vpack.c.bf16 %v5708_v20, %v5708_v20  ;;  %v4949_v13 = vmul.f32 %v5708_v20, %v5564_v53 }
 0x1ea   : > { %v8405_v5 = vsel %vm9192_vm14, %v3784_v51, %v3510_v58  ;;  %v4083_v28 = vpop.f32.mrf.mxu0 }
 0x1eb   : > { %v3924_v8 = vshll.u32 %v8405_v5, 16  ;;  %5321 = vst.msk [vmem:[%s8399_s18 + $0x8] sm:$0xf] %vm777_vm0, %v5639_v49  ;;  %v5637_v37 = vpack.c.bf16 %v4083_v28, %v4083_v28  ;;  %v4947_v7 = vmul.f32 %v5562_v50, %v4083_v28  ;;  %v5063_v48 = vmul.f32 %v5708_v20, %v4949_v13 }
 0x1ec   : > { %v5709_v2 = vpop.f32.mrf.mxu0  ;;  %v4986_v15 = vsel %vm9289_vm13, %v4949_v13, 0.0  ;;  %v4326_v20 = vsub.s32 %v8362_v33, %v4325_v26  ;;  %v3928_v30 = vshrl.u32 %v8405_v5, 16  ;;  %vm4701_vm13 = vcmp.lt.s32.totalorder %v8428_v45, 0 }
 0x1ed   : > { %v8418_v44 = vrot.slane %v3924_v8, 1  ;;  %5319 = vst.msk [vmem:[%s8399_s18] sm:$0xf] %vm777_vm0, %v5637_v37  ;;  %v3301_v11 = vpop.permute.xlu0 %3300  ;;  %v5640_v36 = vpack.c.bf16 %v5709_v2, %v5709_v2  ;;  %v5061_v43 = vmul.f32 %v4947_v7, %v4083_v28  ;;  %v4950_v42 = vmul.f32 %v5709_v2, %v5565_v61 }
 0x1ee   : > { %v4086_v9 = vpop.f32.mrf.mxu0  ;;  %v4983_v63 = vsel %vm9287_vm3, %v4947_v7, 0.0  ;;  %v3747_v39 = vsel %vm9194_vm5, %v3708_v29, %v3301_v11  ;;  %v4773_v28 = vadd.s32 18, %v8428_v45  ;;  %v4771_v33 = vadd.s32 18, %v8440_v10 }
 0x1ef   : > { %v3927_v24 = vsel %vm9285_vm11, %v3923_v19, %v8418_v44  ;;  %5322 = vst.msk [vmem:[%s8399_s18 + $0xc] sm:$0xf] %vm777_vm0, %v5640_v36  ;;  %v4948_v62 = vmul.f32 %v5563_v46, %v4086_v9  ;;  %v5638_v55 = vpack.c.bf16 %v4086_v9, %v4086_v9  ;;  %v5097_v60 = vsel %vm9290_vm15, %v5061_v43, 0.0  ;;  %vm9291_vm11 = vmmov %vm9287_vm3 }
 0x1f0   : > { %5730 = vmatprep.mubr.msk.bf16.mxu1 %vm9286_vm10, %v3927_v24  ;;  %v5064_v0 = vmul.f32 %v5709_v2, %v4950_v42  ;;  %vm9292_vm10 = vmmov %vm9287_vm3  ;;  %v4988_v58 = vsel %vm9287_vm3, %v4950_v42, 0.0  ;;  %vm4666_vm15 = vcmp.ne.s32.totalorder %v4348_v6, 0  ;;  %v3930_v37 = vor.u32 %v3928_v30, %v8418_v44 }
 0x1f1   : > { %v3433_v3 = vpop.permute.xlu1 %3432  ;;  %v8447_v18 = vpop.permute.xlu0 %2902  ;;  %v4984_v59 = vsel %vm9288_vm4, %v4948_v62, 0.0  ;;  %v5062_v38 = vmul.f32 %v4948_v62, %v4086_v9  ;;  %5320 = vst.msk [vmem:[%s8399_s18 + $0x4] sm:$0xf] %vm777_vm0, %v5638_v55  ;;  %v5100_v51 = vsel %vm9292_vm10, %v5063_v48, 0.0  ;;  %vm9293_vm4 = vmmov %vm9287_vm3  ;;  %vm4702_vm10 = vcmp.lt.s32.totalorder %v4348_v6, 0 }
 0x1f2   : > { %v4985_v14 = vadd.f32 %v4984_v59, %v4983_v63  ;;  %v3786_v31 = vsel %vm9193_vm6, %v3747_v39, %v3433_v3  ;;  %v5102_v8 = vsel %vm9293_vm4, %v5064_v0, 0.0  ;;  %vm4664_vm3 = vcmp.ne.s32.totalorder %v4326_v20, 0  ;;  %vm8520_vm6 = vmand %vm4702_vm10, %vm4666_vm15 }
 0x1f3   : > { %v5098_v25 = vsel %vm9291_vm11, %v5062_v38, 0.0  ;;  %vm8494_vm11 = vmand %vm4699_vm2, %vm4663_vm12  ;;  %vm4700_vm4 = vcmp.lt.s32.totalorder %v4326_v20, 0  ;;  %v8499_v7 = vmul.u32.u64.low 3817748708, %v8473_v16  ;;  %v8500_v44 = vmul.u32.u64.high 3817748708, %v8473_v16, %v8499_v7 }
 0x1f4   : > { %v4987_v34 = vadd.f32 %v4986_v15, %v4985_v14  ;;  %v5099_v32 = vadd.f32 %v5098_v25, %v5097_v60  ;;  %v8503_v2 = vadd.s32 64, %v9265_v17  ;;  %vm8511_vm12 = vmand %vm4701_vm13, %vm4665_vm1  ;;  %vm9299_vm2 = vcmask 588800  }
 0x1f5   : > { %v3512_v1 = vpop.permute.xlu1 %3511  ;;  %v8462_v40 = vpop.permute.xlu0 %2981  ;;  %v4807_v54 = vsel %vm8494_vm11, %v4771_v33, %v8440_v10  ;;  %v4772_v22 = vadd.s32 18, %v4326_v20  ;;  %v8525_v11 = vadd.s32 88, %v9265_v17  ;;  %v4809_v9 = vsel %vm8511_vm12, %v4773_v28, %v8428_v45 }
 0x1f6   : > { %v8468_v50 = vsel %vm9192_vm14, %v3786_v31, %v3512_v1  ;;  %v5101_v49 = vadd.f32 %v5100_v51, %v5099_v32  ;;  %v8470_v12 = vadd.f32 %v4988_v58, %v4987_v34  ;;  %vm9296_vm14 = vsmask.f32 7424  ;;  %v5904_v1 = vld [vmem:[#allocation2 + $0x80] sm:$0xff]  }
 0x1f7   : > { %v3931_v56 = vshll.u32 %v8468_v50, 16  ;;  %v8537_v23 = vmul.u32.u64.low 3817748708, %v8503_v2  ;;  %v8538_v10 = vmul.u32.u64.high 3817748708, %v8503_v2, %v8537_v23  ;;  %vm4843_vm1 = vcmp.lt.s32.totalorder %v4807_v54, 16 }
 0x1f8   : > { %v8481_v53 = vadd.f32 %v5102_v8, %v5101_v49  ;;  %v4810_v43 = vsel %vm8520_vm6, %v4774_v27, %v4348_v6  ;;  %v8545_v62 = vmul.u32.u64.low 3817748708, %v8525_v11  ;;  %v8546_v55 = vmul.u32.u64.high 3817748708, %v8525_v11, %v8545_v62 }
 0x1f9   : > { %v8484_v61 = vrot.slane %v3931_v56, 1  ;;  %v8486_v41 = vpop.permute.xlu1 %3036  ;;  %v8488_v5 = vpop.permute.xlu0 %2904  ;;  %vm4845_vm13 = vcmp.lt.s32.totalorder %v4809_v9, 16  ;;  %v5566_v3 = vsel %vm4843_vm1, 1.0, %v5946_v4  ;;  %v4379_v48 = vshrl.u32 %v8500_v44, 4 }
 0x1fa   : > { %vm4846_vm6 = vcmp.lt.s32.totalorder %v4810_v43, 16  ;;  %v5568_v59 = vsel %vm4845_vm13, 1.0, %v5946_v4  ;;  %v8557_v29 = vmul.u32.u64.low 3817748708, %v8549_v52  ;;  %v8558_v14 = vmul.u32.u64.high 3817748708, %v8549_v52, %v8557_v29 }
 0x1fb   : > { %v3934_v46 = vsel %vm9296_vm14, %v3930_v37, %v8484_v61  ;;  %vm8529_vm14 = vmand %vm4700_vm4, %vm4664_vm3  ;;  %v5569_v34 = vsel %vm4846_vm6, 1.0, %v5946_v4  ;;  %v4380_v6 = vmul.u32 18, %v4379_v48  ;;  %v4357_v31 = vshrl.u32 %v8538_v10, 4 }
 0x1fc   : > { %5731 = vmatmul.mubr.msk.bf16.gmra.mxu1 %vm9299_vm2, %v3934_v46  ;;  %v4808_v42 = vsel %vm8529_vm14, %v4772_v22, %v4326_v20  ;;  %vm9304_vm11 = vcmask 64512   ;;  %vm9306_vm3 = vcmask 130048   ;;  %v4390_v33 = vshrl.u32 %v8546_v55, 4 }
 0x1fd   : > { %v3169_v24 = vpop.permute.xlu1 %3168  ;;  %v8527_v13 = vpop.permute.xlu0 %2983  ;;  %vm4844_vm15 = vcmp.lt.s32.totalorder %v4808_v42, 16  ;;  %v3554_v51 = vsel %vm9304_vm11, %v5904_v1, %v8447_v18  ;;  %vm9305_vm10 = vmmov %vm9304_vm11  ;;  %v4358_v27 = vmul.u32 18, %v4357_v31  ;;  %vm9309_vm2 = vcmask 457728  }
 0x1fe   : > { %v5567_v32 = vsel %vm4844_vm15, 1.0, %v5946_v4  ;;  %v3593_v30 = vsel %vm9306_vm3, %v3554_v51, %v8462_v40  ;;  %vm9307_vm4 = vmmov %vm9305_vm10  ;;  %v4391_v23 = vmul.u32 18, %v4390_v33  ;;  %vm9312_vm13 = vcmask 523264  }
 0x1ff   : > { %v3632_v37 = vsel %vm3600_vm9, %v3593_v30, %v8486_v41  ;;  %vm9308_vm12 = vmmov %vm9307_vm4  ;;  %v8628_v33 = vadd.s32 112, %v9265_v17 }
 0x200   : > { %v3671_v35 = vsel %vm3639_vm7, %v3632_v37, %v3169_v24  ;;  %v4368_v24 = vshrl.u32 %v8558_v14, 4  ;;  %vm9310_vm14 = vmmov %vm9307_vm4  ;;  %v4392_v30 = vsub.s32 %v8525_v11, %v4391_v23  ;;  %v8631_v11 = vadd.s32 96, %v9265_v17 }
 0x201   : > { %v3248_v45 = vpop.permute.xlu1 %3247  ;;  %v8551_v57 = vpop.permute.xlu0 %3038  ;;  %vm9311_vm1 = vmmov %vm9307_vm4  ;;  %v8665_v23 = vadd.s32 120, %v9265_v17 }
 0x202   : > { %v3710_v54 = vsel %vm3678_vm8, %v3671_v35, %v3248_v45  ;;  %v3935_v45 = vshrl.u32 %v8468_v50, 16  ;;  %vm9313_vm6 = vmmov %vm9311_vm1  ;;  %v4369_v50 = vmul.u32 18, %v4368_v24  ;;  %v8668_v24 = vadd.s32 104, %v9265_v17 }
 0x203   : > { %v5712_v26 = vpop.f32.mrf.mxu0  ;;  %vm9314_vm15 = vmmov %vm9311_vm1 }
 0x204   : > { %v5643_v63 = vpack.c.bf16 %v5712_v26, %v5712_v26  ;;  %v4953_v58 = vmul.f32 %v5712_v26, %v5568_v59  ;;  %vm9315_vm11 = vmmov %vm9311_vm1 }
 0x205   : > { %v4099_v38 = vpop.f32.mrf.mxu0  ;;  %v3303_v15 = vpop.permute.xlu1 %3302 }
 0x206   : > { %v8560_v60 = vpop.permute.xlu0 %3170  ;;  %5325 = vst.msk [vmem:[%s8399_s18 + $0x18] sm:$0xf] %vm777_vm0, %v5643_v63  ;;  %v4951_v0 = vmul.f32 %v5566_v3, %v4099_v38  ;;  %v5641_v25 = vpack.c.bf16 %v4099_v38, %v4099_v38  ;;  %v5067_v21 = vmul.f32 %v5712_v26, %v4953_v58  ;;  %v3749_v36 = vsel %vm9194_vm5, %v3710_v54, %v3303_v15  ;;  %v5905_v63 = vld [vmem:[#allocation2 + $0x88] sm:$0xff]  }
 0x207   : > { %v5713_v39 = vpop.f32.mrf.mxu0  ;;  %v4994_v42 = vsel %vm9310_vm14, %v4953_v58, 0.0  ;;  %v3556_v59 = vsel %vm9313_vm6, %v5905_v63, %v8488_v5  ;;  %v4359_v58 = vsub.s32 %v8503_v2, %v4358_v27  ;;  %vm9320_vm14 = vmmov %vm9312_vm13 }
 0x208   : > { %v4990_v20 = vsel %vm9305_vm10, %v4951_v0, 0.0  ;;  %v5065_v49 = vmul.f32 %v4951_v0, %v4099_v38  ;;  %5323 = vst.msk [vmem:[%s8399_s18 + $0x10] sm:$0xf] %vm777_vm0, %v5641_v25  ;;  %v5644_v8 = vpack.c.bf16 %v5713_v39, %v5713_v39  ;;  %v4954_v44 = vmul.f32 %v5713_v39, %v5569_v34  ;;  %vm9316_vm10 = vmmov %vm9306_vm3 }
 0x209   : > { %v4991_v56 = vadd.f32 %v4990_v20, %v8470_v12  ;;  %v4102_v28 = vpop.f32.mrf.mxu0  ;;  %v3435_v18 = vpop.permute.xlu1 %3434  ;;  %v5108_v29 = vsel %vm9314_vm15, %v5067_v21, 0.0  ;;  %v3595_v15 = vsel %vm9316_vm10, %v3556_v59, %v8527_v13  ;;  %vm9317_vm3 = vmmov %vm9311_vm1  ;;  %v4381_v13 = vsub.s32 %v8473_v16, %v4380_v6 }
 0x20a   : > { %v3250_v19 = vpop.permute.xlu0 %3249  ;;  %v5104_v7 = vsel %vm9307_vm4, %v5065_v49, 0.0  ;;  %v4952_v46 = vmul.f32 %v5567_v32, %v4102_v28  ;;  %5326 = vst.msk [vmem:[%s8399_s18 + $0x1c] sm:$0xf] %vm777_vm0, %v5644_v8  ;;  %v5642_v12 = vpack.c.bf16 %v4102_v28, %v4102_v28  ;;  %v5068_v62 = vmul.f32 %v5713_v39, %v4954_v44 }
 0x20b   : > { %v5105_v40 = vadd.f32 %v5104_v7, %v8481_v53  ;;  %v3788_v53 = vsel %vm9309_vm2, %v3749_v36, %v3435_v18  ;;  %v4996_v14 = vsel %vm9315_vm11, %v4954_v44, 0.0  ;;  %v3937_v39 = vor.u32 %v3935_v45, %v8484_v61 }
 0x20c   : > { %v4992_v41 = vsel %vm9308_vm12, %v4952_v46, 0.0  ;;  %v5066_v22 = vmul.f32 %v4952_v46, %v4102_v28  ;;  %5324 = vst.msk [vmem:[%s8399_s18 + $0x14] sm:$0xf] %vm777_vm0, %v5642_v12  ;;  %v3634_v34 = vsel %vm3600_vm9, %v3595_v15, %v8551_v57  ;;  %v5110_v1 = vsel %vm9317_vm3, %v5068_v62, 0.0 }
 0x20d   : > { %v4993_v9 = vadd.f32 %v4992_v41, %v4991_v56  ;;  %v3514_v10 = vpop.permute.xlu1 %3513  ;;  %v3673_v51 = vsel %vm3639_vm7, %v3634_v34, %v8560_v60  ;;  %vm9318_vm4 = vsmask.f32 7424  ;;  %vm9319_vm12 = vcmask 588800   ;;  %v5906_v34 = vld [vmem:[#allocation2 + $0x90] sm:$0xff]  }
 0x20e   : > { %v3305_v43 = vpop.permute.xlu0 %3304  ;;  %v5106_v55 = vsel %vm9311_vm1, %v5066_v22, 0.0  ;;  %v3827_v26 = vsel %vm9312_vm13, %v3788_v53, %v3514_v10  ;;  %v3712_v61 = vsel %vm3678_vm8, %v3673_v51, %v3250_v19  ;;  %v4370_v16 = vsub.s32 %v8549_v52, %v4369_v50 }
 0x20f   : > { %v4995_v3 = vadd.f32 %v4994_v42, %v4993_v9  ;;  %v5107_v48 = vadd.f32 %v5106_v55, %v5105_v40  ;;  %v3938_v38 = vshll.u32 %v3827_v26, 16  ;;  %v3751_v57 = vsel %vm9194_vm5, %v3712_v61, %v3305_v43 }
 0x210   : > { %vm4669_vm1 = vcmp.ne.s32.totalorder %v4381_v13, 0  ;;  %vm4705_vm13 = vcmp.lt.s32.totalorder %v4381_v13, 0  ;;  %vm4667_vm6 = vcmp.ne.s32.totalorder %v4359_v58, 0  ;;  %v3942_v6 = vshrl.u32 %v3827_v26, 16 }
 0x211   : > { %v5109_v0 = vadd.f32 %v5108_v29, %v5107_v48  ;;  %v8600_v25 = vadd.f32 %v4996_v14, %v4995_v3  ;;  %v3940_v32 = vrot.slane %v3938_v38, 1  ;;  %v3437_v31 = vpop.permute.xlu1 %3436  ;;  %vm4703_vm15 = vcmp.lt.s32.totalorder %v4359_v58, 0  ;;  %vm8635_vm3 = vmand %vm4705_vm13, %vm4669_vm1 }
 0x212   : > { %v8605_v5 = vpop.permute.xlu0 %2906  ;;  %v3790_v56 = vsel %vm9309_vm2, %v3751_v57, %v3437_v31  ;;  %vm4670_vm11 = vcmp.ne.s32.totalorder %v4392_v30, 0  ;;  %vm4706_vm10 = vcmp.lt.s32.totalorder %v4392_v30, 0  ;;  %v4777_v44 = vadd.s32 18, %v4381_v13  ;;  %vm8640_vm2 = vmand %vm4703_vm15, %vm4667_vm6 }
 0x213   : > { %v8612_v20 = vadd.f32 %v5110_v1, %v5109_v0  ;;  %v3941_v49 = vsel %vm9318_vm4, %v3937_v39, %v3940_v32  ;;  %v3944_v37 = vor.u32 %v3942_v6, %v3940_v32  ;;  %vm4668_vm4 = vcmp.ne.s32.totalorder %v4370_v16, 0  ;;  %vm8647_vm5 = vmand %vm4706_vm10, %vm4670_vm11 }
 0x214   : > { %5734 = vmatprep.mubr.msk.bf16.mxu1 %vm9319_vm12, %v3941_v49  ;;  %vm4704_vm12 = vcmp.lt.s32.totalorder %v4370_v16, 0  ;;  %v4775_v35 = vadd.s32 18, %v4359_v58  ;;  %v4778_v40 = vadd.s32 18, %v4392_v30  ;;  %v4776_v54 = vadd.s32 18, %v4370_v16 }
 0x215   : > { %v3516_v8 = vpop.permute.xlu1 %3515  ;;  %v8652_v21 = vmul.u32.u64.low 3817748708, %v8628_v33  ;;  %v8653_v41 = vmul.u32.u64.high 3817748708, %v8628_v33, %v8652_v21  ;;  %vm9328_vm1 = vcmask 588800   ;;  %vm8656_vm13 = vmand %vm4704_vm12, %vm4668_vm4  ;;  %v4813_v42 = vsel %vm8635_vm3, %v4777_v44, %v4381_v13 }
 0x216   : > { %v8620_v60 = vpop.permute.xlu0 %2985  ;;  %v8624_v2 = vsel %vm9320_vm14, %v3790_v56, %v3516_v8  ;;  %vm9325_vm14 = vsmask.f32 7424  ;;  %v8661_v36 = vmul.u32.u64.low 3817748708, %v8631_v11  ;;  %v8662_v9 = vmul.u32.u64.high 3817748708, %v8631_v11, %v8661_v36 }
 0x217   : > { %v3945_v28 = vshll.u32 %v8624_v2, 16  ;;  %v4811_v43 = vsel %vm8640_vm2, %v4775_v35, %v4359_v58  ;;  %v4814_v62 = vsel %vm8647_vm5, %v4778_v40, %v4392_v30  ;;  %v4812_v55 = vsel %vm8656_vm13, %v4776_v54, %v4370_v16 }
 0x218   : > { %v8679_v45 = vmul.u32.u64.low 3817748708, %v8665_v23  ;;  %v8680_v26 = vmul.u32.u64.high 3817748708, %v8665_v23, %v8679_v45  ;;  %v8683_v3 = vmul.u32.u64.low 3817748708, %v8668_v24  ;;  %v8684_v48 = vmul.u32.u64.high 3817748708, %v8668_v24, %v8683_v3 }
 0x219   : > { %v8633_v52 = vrot.slane %v3945_v28, 1  ;;  %v3041_v18 = vpop.permute.xlu1 %3040  ;;  %vm4847_vm6 = vcmp.lt.s32.totalorder %v4811_v43, 16  ;;  %vm4849_vm15 = vcmp.lt.s32.totalorder %v4813_v42, 16  ;;  %vm4850_vm11 = vcmp.lt.s32.totalorder %v4814_v62, 16 }
 0x21a   : > { %v2909_v19 = vpop.permute.xlu0 %2908  ;;  %vm4848_vm10 = vcmp.lt.s32.totalorder %v4812_v55, 16  ;;  %v4423_v38 = vshrl.u32 %v8653_v41, 4  ;;  %v5570_v14 = vsel %vm4847_vm6, 1.0, %v5946_v4  ;;  %v4401_v15 = vshrl.u32 %v8662_v9, 4 }
 0x21b   : > { %v3948_v12 = vsel %vm9325_vm14, %v3944_v37, %v8633_v52  ;;  %vm9331_vm5 = vcmask 64512   ;;  %v5572_v31 = vsel %vm4849_vm15, 1.0, %v5946_v4  ;;  %v5573_v51 = vsel %vm4850_vm11, 1.0, %v5946_v4 }
 0x21c   : > { %5735 = vmatmul.mubr.msk.bf16.gmra.mxu1 %vm9328_vm1, %v3948_v12  ;;  %v3558_v32 = vsel %vm9331_vm5, %v5906_v34, %v8605_v5  ;;  %v5571_v13 = vsel %vm4848_vm10, 1.0, %v5946_v4  ;;  %vm9332_vm3 = vcmask 130048   ;;  %v8698_v57 = vmul.u32 18, %v4423_v38  ;;  %vm9333_vm4 = vmmov %vm9331_vm5 }
 0x21d   : > { %v3173_v53 = vpop.permute.xlu1 %3172  ;;  %v3597_v58 = vsel %vm9332_vm3, %v3558_v32, %v8620_v60  ;;  %v4402_v56 = vmul.u32 18, %v4401_v15  ;;  %v4434_v8 = vshrl.u32 %v8680_v26, 4  ;;  %v4412_v16 = vshrl.u32 %v8684_v48, 4  ;;  %vm9334_vm12 = vmmov %vm9333_vm4 }
 0x21e   : > { %v2988_v10 = vpop.permute.xlu0 %2987  ;;  %v3636_v30 = vsel %vm3600_vm9, %v3597_v58, %v3041_v18  ;;  %v3560_v6 = vsel %vm9333_vm4, %v8182_v47, %v2909_v19  ;;  %vm9335_vm2 = vmmov %vm9332_vm3  ;;  %vm9337_vm1 = vcmask 392192   ;;  %vm9338_vm13 = vcmask 457728  }
 0x21f   : > { %v3675_v18 = vsel %vm3639_vm7, %v3636_v30, %v3173_v53  ;;  %v3599_v46 = vsel %vm9335_vm2, %v3560_v6, %v2988_v10  ;;  %vm9336_vm14 = vmmov %vm9333_vm4  ;;  %v3949_v62 = vshrl.u32 %v8624_v2, 16  ;;  %vm9350_vm2 = vcmask 588800  }
 0x220   : > { %vm9339_vm6 = vmmov %vm9333_vm4  ;;  %v4413_v6 = vmul.u32 18, %v4412_v16 }
 0x221   : > { %v3252_v63 = vpop.permute.xlu1 %3251  ;;  %vm9341_vm15 = vmmov %vm9333_vm4 }
 0x222   : > { %v3043_v59 = vpop.permute.xlu0 %3042  ;;  %v3714_v27 = vsel %vm3678_vm8, %v3675_v18, %v3252_v63  ;;  %vm9342_vm11 = vmmov %vm9333_vm4 }
 0x223   : > { %v3638_v21 = vsel %vm3600_vm9, %v3599_v46, %v3043_v59  ;;  %vm9340_vm9 = vcmask 523264   ;;  %v3951_v59 = vor.u32 %v3949_v62, %v8633_v52  ;;  %vm9343_vm10 = vmmov %vm9337_vm1  ;;  %v4244_v62 = vadd.s32 136, %v9265_v17 }
 0x224   : > { %v5716_v29 = vpop.f32.mrf.mxu0  ;;  %vm9345_vm5 = vmmov %vm9333_vm4 }
 0x225   : > { %v3307_v0 = vpop.permute.xlu1 %3306  ;;  %v5647_v39 = vpack.c.bf16 %v5716_v29, %v5716_v29  ;;  %v4957_v37 = vmul.f32 %v5716_v29, %v5572_v31  ;;  %vm9346_vm3 = vmmov %vm9338_vm13 }
 0x226   : > { %v3175_v50 = vpop.permute.xlu0 %3174  ;;  %v4115_v1 = vpop.f32.mrf.mxu0  ;;  %v3753_v41 = vsel %vm9337_vm1, %v3714_v27, %v3307_v0 }
 0x227   : > { %5329 = vst.msk [vmem:[%s8399_s18 + $0x28] sm:$0xf] %vm777_vm0, %v5647_v39  ;;  %v4955_v61 = vmul.f32 %v5570_v14, %v4115_v1  ;;  %v5645_v49 = vpack.c.bf16 %v4115_v1, %v4115_v1  ;;  %v5071_v10 = vmul.f32 %v5716_v29, %v4957_v37  ;;  %v3677_v55 = vsel %vm3639_vm7, %v3638_v21, %v3175_v50  ;;  %vm9344_vm7 = vmmov %vm9333_vm4 }
 0x228   : > { %v5717_v5 = vpop.f32.mrf.mxu0  ;;  %v5002_v3 = vsel %vm9341_vm15, %v4957_v37, 0.0  ;;  %vm9347_vm4 = vmmov %vm9340_vm9  ;;  %v4425_v37 = vsub.s32 %v8628_v33, %v8698_v57 }
 0x229   : > { %v3439_v28 = vpop.permute.xlu1 %3438  ;;  %v4998_v7 = vsel %vm9334_vm12, %v4955_v61, 0.0  ;;  %v5069_v44 = vmul.f32 %v4955_v61, %v4115_v1  ;;  %5327 = vst.msk [vmem:[%s8399_s18 + $0x20] sm:$0xf] %vm777_vm0, %v5645_v49  ;;  %v5648_v40 = vpack.c.bf16 %v5717_v5, %v5717_v5  ;;  %v4958_v19 = vmul.f32 %v5717_v5, %v5573_v51  ;;  %vm9349_vm12 = vmmov %vm9345_vm5 }
 0x22a   : > { %v3254_v60 = vpop.permute.xlu0 %3253  ;;  %v4999_v35 = vadd.f32 %v4998_v7, %v8600_v25  ;;  %v4118_v12 = vpop.f32.mrf.mxu0  ;;  %v3792_v25 = vsel %vm9338_vm13, %v3753_v41, %v3439_v28  ;;  %v5116_v39 = vsel %vm9344_vm7, %v5071_v10, 0.0  ;;  %v4403_v1 = vsub.s32 %v8631_v11, %v4402_v56 }
 0x22b   : > { %v5112_v47 = vsel %vm9336_vm14, %v5069_v44, 0.0  ;;  %v4956_v54 = vmul.f32 %v5571_v13, %v4118_v12  ;;  %5330 = vst.msk [vmem:[%s8399_s18 + $0x2c] sm:$0xf] %vm777_vm0, %v5648_v40  ;;  %v5646_v36 = vpack.c.bf16 %v4118_v12, %v4118_v12  ;;  %v5072_v48 = vmul.f32 %v5717_v5, %v4958_v19 }
 0x22c   : > { %v5113_v22 = vadd.f32 %v5112_v47, %v8612_v20  ;;  %v3716_v38 = vsel %vm3678_vm8, %v3677_v55, %v3254_v60  ;;  %v5004_v34 = vsel %vm9345_vm5, %v4958_v19, 0.0  ;;  %vm9348_vm8 = vsmask.f32 7424 }
 0x22d   : > { %v3518_v9 = vpop.permute.xlu1 %3517  ;;  %v5000_v43 = vsel %vm9339_vm6, %v4956_v54, 0.0  ;;  %v5070_v42 = vmul.f32 %v4956_v54, %v4118_v12  ;;  %5328 = vst.msk [vmem:[%s8399_s18 + $0x24] sm:$0xf] %vm777_vm0, %v5646_v36  ;;  %v5118_v58 = vsel %vm9349_vm12, %v5072_v48, 0.0  ;;  %v4435_v61 = vmul.u32 18, %v4434_v8  ;;  %vm9351_vm14 = vmmov %vm9348_vm8 }
 0x22e   : > { %v3309_v53 = vpop.permute.xlu0 %3308  ;;  %v3831_v45 = vsel %vm9340_vm9, %v3792_v25, %v3518_v9  ;;  %v5001_v26 = vadd.f32 %v5000_v43, %v4999_v35  ;;  %vm4671_vm1 = vcmp.ne.s32.totalorder %v4403_v1, 0  ;;  %vm4707_vm13 = vcmp.lt.s32.totalorder %v4403_v1, 0  ;;  %vm9352_vm6 = vmmov %vm9350_vm2 }
 0x22f   : > { %v3952_v20 = vshll.u32 %v3831_v45, 16  ;;  %v5114_v63 = vsel %vm9342_vm11, %v5070_v42, 0.0  ;;  %v3755_v15 = vsel %vm9343_vm10, %v3716_v38, %v3309_v53  ;;  %v3956_v49 = vshrl.u32 %v3831_v45, 16  ;;  %vm4743_vm11 = vmand %vm4707_vm13, %vm4671_vm1 }
 0x230   : > { %v5003_v29 = vadd.f32 %v5002_v3, %v5001_v26  ;;  %v5115_v14 = vadd.f32 %v5114_v63, %v5113_v22  ;;  %v4436_v11 = vsub.s32 %v8665_v23, %v4435_v61  ;;  %v4414_v7 = vsub.s32 %v8668_v24, %v4413_v6 }
 0x231   : > { %v3954_v2 = vrot.slane %v3952_v20, 1  ;;  %v3520_v50 = vpop.permute.xlu1 %3519  ;;  %vm4673_vm9 = vcmp.ne.s32.totalorder %v4425_v37, 0  ;;  %vm4709_vm15 = vcmp.lt.s32.totalorder %v4425_v37, 0  ;;  %v4779_v8 = vadd.s32 18, %v4403_v1 }
 0x232   : > { %v3441_v0 = vpop.permute.xlu0 %3440  ;;  %v5117_v31 = vadd.f32 %v5116_v39, %v5115_v14  ;;  %v5005_v51 = vadd.f32 %v5004_v34, %v5003_v29  ;;  %vm4674_vm10 = vcmp.ne.s32.totalorder %v4436_v11, 0  ;;  %vm4710_vm7 = vcmp.lt.s32.totalorder %v4436_v11, 0 }
 0x233   : > { %v3794_v32 = vsel %vm9346_vm3, %v3755_v15, %v3441_v0  ;;  %v3955_v13 = vsel %vm9348_vm8, %v3951_v59, %v3954_v2  ;;  %v3958_v28 = vor.u32 %v3956_v49, %v3954_v2  ;;  %v4781_v16 = vadd.s32 18, %v4425_v37  ;;  %vm4746_vm8 = vmand %vm4710_vm7, %vm4674_vm10 }
 0x234   : > { %v3833_v52 = vsel %vm9347_vm4, %v3794_v32, %v3520_v50  ;;  %5738 = vmatprep.mubr.msk.bf16.mxu1 %vm9350_vm2, %v3955_v13  ;;  %v5119_v5 = vadd.f32 %v5118_v58, %v5117_v31  ;;  %vm4672_vm5 = vcmp.ne.s32.totalorder %v4414_v7, 0  ;;  %vm4708_vm3 = vcmp.lt.s32.totalorder %v4414_v7, 0  ;;  %vm4745_vm4 = vmand %vm4709_vm15, %vm4673_vm9 }
 0x235   : > { %v3959_v30 = vshll.u32 %v3833_v52, 16  ;;  %v4782_v33 = vadd.s32 18, %v4436_v11  ;;  %v4815_v23 = vsel %vm4743_vm11, %v4779_v8, %v4403_v1  ;;  %v4780_v57 = vadd.s32 18, %v4414_v7  ;;  %vm4744_vm12 = vmand %vm4708_vm3, %vm4672_vm5 }
 0x236   : > { %v4817_v44 = vsel %vm4745_vm4, %v4781_v16, %v4425_v37  ;;  %vm4851_vm2 = vcmp.lt.s32.totalorder %v4815_v23, 16  ;;  %v4245_v40 = vadd.s32 144, %v9265_v17  ;;  %v4243_v19 = vadd.s32 128, %v9265_v17 }
 0x237   : > { %v3961_v60 = vrot.slane %v3959_v30, 1  ;;  %v4818_v24 = vsel %vm4746_vm8, %v4782_v33, %v4436_v11  ;;  %v4816_v18 = vsel %vm4744_vm12, %v4780_v57, %v4414_v7  ;;  %v5574_v35 = vsel %vm4851_vm2, 1.0, %v5946_v4 }
 0x238   : > { %vm4854_vm1 = vcmp.lt.s32.totalorder %v4818_v24, 16  ;;  %vm4852_vm13 = vcmp.lt.s32.totalorder %v4816_v18, 16  ;;  %v8752_v25 = vmul.u32.u64.low 3817748708, %v4245_v40  ;;  %v8753_v9 = vmul.u32.u64.high 3817748708, %v4245_v40, %v8752_v25 }
 0x239   : > { %v3962_v56 = vsel %vm9351_vm14, %v3958_v28, %v3961_v60  ;;  %vm4853_vm14 = vcmp.lt.s32.totalorder %v4817_v44, 16  ;;  %v5577_v41 = vsel %vm4854_vm1, 1.0, %v5946_v4  ;;  %v5575_v36 = vsel %vm4852_vm13, 1.0, %v5946_v4 }
 0x23a   : > { %5739 = vmatmul.mubr.msk.bf16.gmra.mxu1 %vm9352_vm6, %v3962_v56  ;;  %v5576_v27 = vsel %vm4853_vm14, 1.0, %v5946_v4  ;;  %v4246_v53 = vadd.s32 152, %v9265_v17  ;;  %vm9353_vm6 = vcmask 64512   ;;  %v4467_v28 = vshrl.u32 %v8753_v9, 4 }
 0x23b   : > { %v8760_v20 = vmul.u32.u64.low 3817748708, %v4243_v19  ;;  %v8761_v3 = vmul.u32.u64.high 3817748708, %v4243_v19, %v8760_v20  ;;  %vm9354_vm9 = vmmov %vm9353_vm6  ;;  %v8772_v34 = vmul.u32.u64.low 3817748708, %v4244_v62  ;;  %v8773_v32 = vmul.u32.u64.high 3817748708, %v4244_v62, %v8772_v34 }
 0x23c   : > { %v8766_v14 = vmul.u32.u64.low 3817748708, %v4246_v53  ;;  %v8767_v2 = vmul.u32.u64.high 3817748708, %v4246_v53, %v8766_v14  ;;  %vm9355_vm15 = vmmov %vm9353_vm6  ;;  %v4468_v7 = vmul.u32 18, %v4467_v28 }
 0x23d   : > { %vm9356_vm11 = vmmov %vm9353_vm6  ;;  %v4445_v30 = vshrl.u32 %v8761_v3, 4  ;;  %v4456_v56 = vshrl.u32 %v8773_v32, 4 }
 0x23e   : > { %vm9357_vm10 = vmmov %vm9353_vm6  ;;  %v4478_v37 = vshrl.u32 %v8767_v2, 4  ;;  %v4469_v23 = vsub.s32 %v4245_v40, %v4468_v7 }
 0x23f   : > { %vm9358_vm7 = vmmov %vm9353_vm6  ;;  %v4446_v11 = vmul.u32 18, %v4445_v30  ;;  %v4457_v33 = vmul.u32 18, %v4456_v56 }
 0x240   : > { %vm9359_vm5 = vmmov %vm9353_vm6  ;;  %v4479_v8 = vmul.u32 18, %v4478_v37  ;;  %vm4677_vm12 = vcmp.ne.s32.totalorder %v4469_v23, 0  ;;  %vm4713_vm2 = vcmp.lt.s32.totalorder %v4469_v23, 0  ;;  %v4785_v18 = vadd.s32 18, %v4469_v23 }
 0x241   : > { %v5720_v46 = vpop.f32.mrf.mxu0  ;;  %vm9360_vm3 = vmmov %vm9359_vm5  ;;  %v4447_v16 = vsub.s32 %v4243_v19, %v4446_v11  ;;  %v4458_v44 = vsub.s32 %v4244_v62, %v4457_v33 }
 0x242   : > { %v5651_v12 = vpack.c.bf16 %v5720_v46, %v5720_v46  ;;  %v4961_v10 = vmul.f32 %v5720_v46, %v5576_v27  ;;  %v4480_v57 = vsub.s32 %v4246_v53, %v4479_v8 }
 0x243   : > { %v4131_v47 = vpop.f32.mrf.mxu0  ;;  %vm4675_vm4 = vcmp.ne.s32.totalorder %v4447_v16, 0  ;;  %vm4711_vm8 = vcmp.lt.s32.totalorder %v4447_v16, 0  ;;  %v4783_v24 = vadd.s32 18, %v4447_v16 }
 0x244   : > { %5333 = vst.msk [vmem:[%s8399_s18 + $0x38] sm:$0xf] %vm777_vm0, %v5651_v12  ;;  %v4959_v54 = vmul.f32 %v5574_v35, %v4131_v47  ;;  %v5649_v21 = vpack.c.bf16 %v4131_v47, %v4131_v47  ;;  %v5075_v15 = vmul.f32 %v5720_v46, %v4961_v10  ;;  %v5010_v31 = vsel %vm9356_vm11, %v4961_v10, 0.0  ;;  %vm4747_vm14 = vmand %vm4711_vm8, %vm4675_vm4 }
 0x245   : > { %v5721_v22 = vpop.f32.mrf.mxu0  ;;  %vm4678_vm1 = vcmp.ne.s32.totalorder %v4480_v57, 0  ;;  %vm4714_vm13 = vcmp.lt.s32.totalorder %v4480_v57, 0  ;;  %v4819_v46 = vsel %vm4747_vm14, %v4783_v24, %v4447_v16  ;;  %v4786_v35 = vadd.s32 18, %v4480_v57 }
 0x246   : > { %v5006_v43 = vsel %vm9353_vm6, %v4959_v54, 0.0  ;;  %v5073_v42 = vmul.f32 %v4959_v54, %v4131_v47  ;;  %5331 = vst.msk [vmem:[%s8399_s18 + $0x30] sm:$0xf] %vm777_vm0, %v5649_v21  ;;  %v5652_v45 = vpack.c.bf16 %v5721_v22, %v5721_v22  ;;  %v4962_v63 = vmul.f32 %v5721_v22, %v5577_v41  ;;  %vm4750_vm11 = vmand %vm4714_vm13, %vm4678_vm1 }
 0x247   : > { %v5007_v55 = vadd.f32 %v5006_v43, %v5005_v51  ;;  %v4134_v26 = vpop.f32.mrf.mxu0  ;;  %v5124_v58 = vsel %vm9358_vm7, %v5075_v15, 0.0  ;;  %vm4676_vm6 = vcmp.ne.s32.totalorder %v4458_v44, 0  ;;  %v4784_v12 = vadd.s32 18, %v4458_v44 }
 0x248   : > { %v5120_v48 = vsel %vm9354_vm9, %v5073_v42, 0.0  ;;  %v4960_v59 = vmul.f32 %v5575_v36, %v4134_v26  ;;  %5334 = vst.msk [vmem:[%s8399_s18 + $0x3c] sm:$0xf] %vm777_vm0, %v5652_v45  ;;  %v5650_v29 = vpack.c.bf16 %v4134_v26, %v4134_v26  ;;  %v5076_v1 = vmul.f32 %v5721_v22, %v4962_v63 }
 0x249   : > { %v5121_v38 = vadd.f32 %v5120_v48, %v5119_v5  ;;  %v5012_v61 = vsel %vm9359_vm5, %v4962_v63, 0.0  ;;  %vm4712_vm9 = vcmp.lt.s32.totalorder %v4458_v44, 0  ;;  %vm4855_vm7 = vcmp.lt.s32.totalorder %v4819_v46, 16 }
 0x24a   : > { %v5008_v0 = vsel %vm9355_vm15, %v4960_v59, 0.0  ;;  %v5074_v50 = vmul.f32 %v4960_v59, %v4134_v26  ;;  %5332 = vst.msk [vmem:[%s8399_s18 + $0x34] sm:$0xf] %vm777_vm0, %v5650_v29  ;;  %v5126_v6 = vsel %vm9360_vm3, %v5076_v1, 0.0  ;;  %vm4749_vm15 = vmand %vm4713_vm2, %vm4677_vm12  ;;  %v4822_v27 = vsel %vm4750_vm11, %v4786_v35, %v4480_v57 }
 0x24b   : > { %v5009_v39 = vadd.f32 %v5008_v0, %v5007_v55  ;;  %v4821_v40 = vsel %vm4749_vm15, %v4785_v18, %v4469_v23  ;;  %v5578_v54 = vsel %vm4855_vm7, 1.0, %v5946_v4  ;;  %vm4858_vm3 = vcmp.lt.s32.totalorder %v4822_v27, 16 }
 0x24c   : > { %v5122_v51 = vsel %vm9357_vm10, %v5074_v50, 0.0  ;;  %vm4748_vm10 = vmand %vm4712_vm9, %vm4676_vm6  ;;  %vm4857_vm5 = vcmp.lt.s32.totalorder %v4821_v40, 16  ;;  %v5581_v53 = vsel %vm4858_vm3, 1.0, %v5946_v4  ;;  %vm9361_vm8 = vcmask 64512  }
 0x24d   : > { %v5011_v52 = vadd.f32 %v5010_v31, %v5009_v39  ;;  %v5123_v13 = vadd.f32 %v5122_v51, %v5121_v38  ;;  %v4820_v47 = vsel %vm4748_vm10, %v4784_v12, %v4458_v44  ;;  %v5580_v41 = vsel %vm4857_vm5, 1.0, %v5946_v4  ;;  %vm9362_vm12 = vmmov %vm9361_vm8 }
 0x24e   : > { %vm4856_vm4 = vcmp.lt.s32.totalorder %v4820_v47, 16  ;;  %v4247_v38 = vadd.s32 160, %v9265_v17  ;;  %vm9363_vm2 = vmmov %vm9361_vm8  ;;  %v4249_v0 = vadd.s32 176, %v9265_v17  ;;  %v4250_v50 = vadd.s32 184, %v9265_v17 }
 0x24f   : > { %v5125_v49 = vadd.f32 %v5124_v58, %v5123_v13  ;;  %v5013_v5 = vadd.f32 %v5012_v61, %v5011_v52  ;;  %v5579_v10 = vsel %vm4856_vm4, 1.0, %v5946_v4  ;;  %vm9364_vm14 = vmmov %vm9363_vm2  ;;  %v4248_v31 = vadd.s32 168, %v9265_v17 }
 0x250   : > { %vm9365_vm1 = vmmov %vm9363_vm2  ;;  %v8805_v52 = vmul.u32.u64.low 3817748708, %v4247_v38  ;;  %v8806_v13 = vmul.u32.u64.high 3817748708, %v4247_v38, %v8805_v52 }
 0x251   : > { %v5127_v60 = vadd.f32 %v5126_v6, %v5125_v49  ;;  %vm9366_vm13 = vmmov %vm9365_vm1  ;;  %v8817_v56 = vmul.u32.u64.low 3817748708, %v4248_v31  ;;  %v8818_v7 = vmul.u32.u64.high 3817748708, %v4248_v31, %v8817_v56 }
 0x252   : > { %vm9367_vm6 = vmmov %vm9365_vm1  ;;  %v4489_v8 = vshrl.u32 %v8806_v13, 4 }
 0x253   : > { %vm9368_vm9 = vmmov %vm9365_vm1  ;;  %v4500_v57 = vshrl.u32 %v8818_v7, 4  ;;  %v4253_v7 = vadd.s32 208, %v9265_v17 }
 0x254   : > { %v4490_v23 = vmul.u32 18, %v4489_v8 }
 0x255   : > { %v4501_v46 = vmul.u32 18, %v4500_v57 }
 0x256   : > { %v4491_v18 = vsub.s32 %v4247_v38, %v4490_v23 }
 0x257   : > { %v4502_v40 = vsub.s32 %v4248_v31, %v4501_v46 }
 0x258   : > { %vm4679_vm15 = vcmp.ne.s32.totalorder %v4491_v18, 0  ;;  %vm4715_vm11 = vcmp.lt.s32.totalorder %v4491_v18, 0  ;;  %v4787_v27 = vadd.s32 18, %v4491_v18 }
 0x259   : > { %vm4751_vm5 = vmand %vm4715_vm11, %vm4679_vm15  ;;  %vm9369_vm11 = vcmask 64512  }
 0x26c   : > { %v5724_v19 = vpop.f32.mrf.mxu0 }
 0x26d   : > { %v5655_v21 = vpack.c.bf16 %v5724_v19, %v5724_v19  ;;  %v4965_v43 = vmul.f32 %v5724_v19, %v5580_v41 }
 0x26e   : > { %v4147_v22 = vpop.f32.mrf.mxu0 }
 0x26f   : > { %5337 = vst.msk [vmem:[%s8399_s18 + $0x48] sm:$0xf] %vm777_vm0, %v5655_v21  ;;  %v4963_v36 = vmul.f32 %v5578_v54, %v4147_v22  ;;  %v5653_v25 = vpack.c.bf16 %v4147_v22, %v4147_v22  ;;  %v5079_v29 = vmul.f32 %v5724_v19, %v4965_v43  ;;  %v5018_v39 = vsel %vm9364_vm14, %v4965_v43, 0.0 }
 0x270   : > { %v5725_v9 = vpop.f32.mrf.mxu0  ;;  %v4823_v19 = vsel %vm4751_vm5, %v4787_v27, %v4491_v18  ;;  %v4788_v21 = vadd.s32 18, %v4502_v40  ;;  %v8870_v18 = vmul.u32.u64.low 3817748708, %v4253_v7  ;;  %v8871_v46 = vmul.u32.u64.high 3817748708, %v4253_v7, %v8870_v18 }
 0x271   : > { %v5014_v42 = vsel %vm9361_vm8, %v4963_v36, 0.0  ;;  %v5077_v62 = vmul.f32 %v4963_v36, %v4147_v22  ;;  %5335 = vst.msk [vmem:[%s8399_s18 + $0x40] sm:$0xf] %vm777_vm0, %v5653_v25  ;;  %v5656_v45 = vpack.c.bf16 %v5725_v9, %v5725_v9  ;;  %v4966_v3 = vmul.f32 %v5725_v9, %v5581_v53 }
 0x272   : > { %v5015_v55 = vadd.f32 %v5014_v42, %v5013_v5  ;;  %v4150_v26 = vpop.f32.mrf.mxu0  ;;  %v5132_v58 = vsel %vm9366_vm13, %v5079_v29, 0.0  ;;  %v8810_v30 = vmul.u32.u64.low 3817748708, %v4249_v0  ;;  %v8811_v5 = vmul.u32.u64.high 3817748708, %v4249_v0, %v8810_v30 }
 0x273   : > { %v5128_v20 = vsel %vm9362_vm12, %v5077_v62, 0.0  ;;  %v4964_v48 = vmul.f32 %v5579_v10, %v4150_v26  ;;  %5338 = vst.msk [vmem:[%s8399_s18 + $0x4c] sm:$0xf] %vm777_vm0, %v5656_v45  ;;  %v5654_v59 = vpack.c.bf16 %v4150_v26, %v4150_v26  ;;  %v5080_v34 = vmul.f32 %v5725_v9, %v4966_v3 }
 0x274   : > { %v5129_v63 = vadd.f32 %v5128_v20, %v5127_v60  ;;  %v5020_v61 = vsel %vm9367_vm6, %v4966_v3, 0.0  ;;  %v8814_v60 = vmul.u32.u64.low 3817748708, %v4250_v50  ;;  %v8815_v37 = vmul.u32.u64.high 3817748708, %v4250_v50, %v8814_v60 }
 0x275   : > { %v5016_v14 = vsel %vm9363_vm2, %v4964_v48, 0.0  ;;  %v5078_v2 = vmul.f32 %v4964_v48, %v4150_v26  ;;  %5336 = vst.msk [vmem:[%s8399_s18 + $0x44] sm:$0xf] %vm777_vm0, %v5654_v59  ;;  %v5134_v28 = vsel %vm9368_vm9, %v5080_v34, 0.0  ;;  %v4511_v16 = vshrl.u32 %v8811_v5, 4 }
 0x276   : > { %v5017_v15 = vadd.f32 %v5016_v14, %v5015_v55  ;;  %v4522_v33 = vshrl.u32 %v8815_v37, 4  ;;  %vm4680_vm8 = vcmp.ne.s32.totalorder %v4502_v40, 0  ;;  %vm4716_vm12 = vcmp.lt.s32.totalorder %v4502_v40, 0 }
 0x277   : > { %v5130_v32 = vsel %vm9365_vm1, %v5078_v2, 0.0  ;;  %v4512_v44 = vmul.u32 18, %v4511_v16  ;;  %vm4752_vm1 = vmand %vm4716_vm12, %vm4680_vm8  ;;  %vm4859_vm13 = vcmp.lt.s32.totalorder %v4823_v19, 16  ;;  %v4252_v60 = vadd.s32 200, %v9265_v17 }
 0x278   : > { %v5019_v1 = vadd.f32 %v5018_v39, %v5017_v15  ;;  %v5131_v51 = vadd.f32 %v5130_v32, %v5129_v63  ;;  %v4523_v24 = vmul.u32 18, %v4522_v33  ;;  %v4824_v36 = vsel %vm4752_vm1, %v4788_v21, %v4502_v40 }
 0x279   : > { %v4513_v35 = vsub.s32 %v4249_v0, %v4512_v44  ;;  %v5582_v9 = vsel %vm4859_vm13, 1.0, %v5946_v4  ;;  %vm4860_vm15 = vcmp.lt.s32.totalorder %v4824_v36, 16  ;;  %v4254_v16 = vadd.s32 216, %v9265_v17 }
 0x27a   : > { %v5133_v49 = vadd.f32 %v5132_v58, %v5131_v51  ;;  %v5021_v6 = vadd.f32 %v5020_v61, %v5019_v1  ;;  %v4524_v12 = vsub.s32 %v4250_v50, %v4523_v24  ;;  %v5583_v26 = vsel %vm4860_vm15, 1.0, %v5946_v4 }
 0x27b   : > { %vm4681_vm10 = vcmp.ne.s32.totalorder %v4513_v35, 0  ;;  %vm4717_vm7 = vcmp.lt.s32.totalorder %v4513_v35, 0  ;;  %v4789_v47 = vadd.s32 18, %v4513_v35  ;;  %v4256_v36 = vadd.s32 232, %v9265_v17 }
 0x27c   : > { %v5135_v11 = vadd.f32 %v5134_v28, %v5133_v49  ;;  %vm4682_vm3 = vcmp.ne.s32.totalorder %v4524_v12, 0  ;;  %vm4718_vm4 = vcmp.lt.s32.totalorder %v4524_v12, 0  ;;  %vm4753_vm2 = vmand %vm4717_vm7, %vm4681_vm10  ;;  %v4790_v54 = vadd.s32 18, %v4524_v12 }
 0x27d   : > { %vm4754_vm14 = vmand %vm4718_vm4, %vm4682_vm3  ;;  %v4825_v41 = vsel %vm4753_vm2, %v4789_v47, %v4513_v35  ;;  %v4251_v28 = vadd.s32 192, %v9265_v17  ;;  %v8859_v33 = vmul.u32.u64.low 3817748708, %v4252_v60  ;;  %v8860_v23 = vmul.u32.u64.high 3817748708, %v4252_v60, %v8859_v33 }
 0x27e   : > { %v4826_v22 = vsel %vm4754_vm14, %v4790_v54, %v4524_v12  ;;  %vm4861_vm6 = vcmp.lt.s32.totalorder %v4825_v41, 16  ;;  %vm9370_vm10 = vmmov %vm9369_vm11  ;;  %v8875_v35 = vmul.u32.u64.low 3817748708, %v4254_v16  ;;  %v8876_v12 = vmul.u32.u64.high 3817748708, %v4254_v16, %v8875_v35 }
 0x27f   : > { %vm4862_vm9 = vcmp.lt.s32.totalorder %v4826_v22, 16  ;;  %v5584_v10 = vsel %vm4861_vm6, 1.0, %v5946_v4  ;;  %vm9371_vm7 = vmmov %vm9370_vm10  ;;  %v4255_v54 = vadd.s32 224, %v9265_v17  ;;  %v4544_v21 = vshrl.u32 %v8860_v23, 4 }
 0x280   : > { %v5585_v45 = vsel %vm4862_vm9, 1.0, %v5946_v4  ;;  %vm9372_vm5 = vmmov %vm9371_vm7  ;;  %v4257_v41 = vadd.s32 240, %v9265_v17 }
 0x281   : > { %vm9373_vm3 = vmmov %vm9372_vm5 }
 0x282   : > { %vm9374_vm4 = vmmov %vm9373_vm3 }
 0x283   : > { %vm9375_vm8 = vmmov %vm9373_vm3 }
 0x284   : > { %vm9376_vm12 = vmmov %vm9373_vm3 }
 0x298   : > { %v5728_v25 = vpop.f32.mrf.mxu1 }
 0x299   : > { %v5659_v53 = vpack.c.bf16 %v5728_v25, %v5728_v25  ;;  %v4969_v20 = vmul.f32 %v5728_v25, %v5584_v10  ;;  %v4566_v10 = vshrl.u32 %v8876_v12, 4 }
 0x29a   : > { %v4163_v43 = vpop.f32.mrf.mxu1 }
 0x29b   : > { %5341 = vst.msk [vmem:[%s8399_s18 + $0x58] sm:$0xf] %vm777_vm0, %v5659_v53  ;;  %v4967_v42 = vmul.f32 %v5582_v9, %v4163_v43  ;;  %v5657_v62 = vpack.c.bf16 %v4163_v43, %v4163_v43  ;;  %v5083_v50 = vmul.f32 %v5728_v25, %v4969_v20  ;;  %v5026_v31 = vsel %vm9372_vm5, %v4969_v20, 0.0 }
 0x29c   : > { %v5729_v55 = vpop.f32.mrf.mxu1  ;;  %v8893_v25 = vmul.u32.u64.low 3817748708, %v4255_v54  ;;  %v8894_v9 = vmul.u32.u64.high 3817748708, %v4255_v54, %v8893_v25  ;;  %v4555_v53 = vshrl.u32 %v8871_v46, 4 }
 0x29d   : > { %v5022_v3 = vsel %vm9369_vm11, %v4967_v42, 0.0  ;;  %v5081_v48 = vmul.f32 %v4967_v42, %v4163_v43  ;;  %5339 = vst.msk [vmem:[%s8399_s18 + $0x50] sm:$0xf] %vm777_vm0, %v5657_v62  ;;  %v5660_v59 = vpack.c.bf16 %v5729_v55, %v5729_v55  ;;  %v4970_v14 = vmul.f32 %v5729_v55, %v5585_v45 }
 0x29e   : > { %v5023_v63 = vadd.f32 %v5022_v3, %v5021_v6  ;;  %v4166_v38 = vpop.f32.mrf.mxu1  ;;  %v5140_v58 = vsel %vm9374_vm4, %v5083_v50, 0.0  ;;  %v4545_v43 = vmul.u32 18, %v4544_v21  ;;  %v4556_v20 = vmul.u32 18, %v4555_v53 }
 0x29f   : > { %v5136_v29 = vsel %vm9370_vm10, %v5081_v48, 0.0  ;;  %v4968_v2 = vmul.f32 %v5583_v26, %v4166_v38  ;;  %5342 = vst.msk [vmem:[%s8399_s18 + $0x5c] sm:$0xf] %vm777_vm0, %v5660_v59  ;;  %v5658_v0 = vpack.c.bf16 %v4166_v38, %v4166_v38  ;;  %v5084_v1 = vmul.f32 %v5729_v55, %v4970_v14 }
 0x2a0   : > { %v5137_v15 = vadd.f32 %v5136_v29, %v5135_v11  ;;  %v5028_v61 = vsel %vm9375_vm8, %v4970_v14, 0.0  ;;  %v8850_v37 = vmul.u32.u64.low 3817748708, %v4251_v28  ;;  %v8851_v11 = vmul.u32.u64.high 3817748708, %v4251_v28, %v8850_v37 }
 0x2a1   : > { %v5024_v39 = vsel %vm9371_vm7, %v4968_v2, 0.0  ;;  %v5082_v34 = vmul.f32 %v4968_v2, %v4166_v38  ;;  %5340 = vst.msk [vmem:[%s8399_s18 + $0x54] sm:$0xf] %vm777_vm0, %v5658_v0  ;;  %v5142_v5 = vsel %vm9376_vm12, %v5084_v1, 0.0  ;;  %v4567_v3 = vmul.u32 18, %v4566_v10 }
 0x2a2   : > { %v5025_v32 = vadd.f32 %v5024_v39, %v5023_v63  ;;  %v4533_v47 = vshrl.u32 %v8851_v11, 4  ;;  %v8898_v42 = vmul.u32.u64.low 3817748708, %v4257_v41  ;;  %v8899_v62 = vmul.u32.u64.high 3817748708, %v4257_v41, %v8898_v42 }
 0x2a3   : > { %v5138_v51 = vsel %vm9373_vm3, %v5082_v34, 0.0  ;;  %v8901_v45 = vmul.u32.u64.low 3817748708, %v4256_v36  ;;  %v8902_v26 = vmul.u32.u64.high 3817748708, %v4256_v36, %v8901_v45  ;;  %v4546_v48 = vsub.s32 %v4252_v60, %v4545_v43 }
 0x2a4   : > { %v5027_v52 = vadd.f32 %v5026_v31, %v5025_v32  ;;  %v5139_v13 = vadd.f32 %v5138_v51, %v5137_v15  ;;  %v4534_v22 = vmul.u32 18, %v4533_v47  ;;  %v8905_v63 = vadd.s32 248, %v9265_v17 }
 0x2a5   : > { %v4577_v59 = vshrl.u32 %v8894_v9, 4  ;;  %v8908_v38 = vsub.s32 %v4253_v7, %v4556_v20  ;;  %v8910_v14 = vsub.s32 %v4254_v16, %v4567_v3  ;;  %vm4684_vm1 = vcmp.ne.s32.totalorder %v4546_v48, 0 }
 0x2a6   : > { %v5141_v49 = vadd.f32 %v5140_v58, %v5139_v13  ;;  %v8843_v30 = vadd.f32 %v5028_v61, %v5027_v52  ;;  %v4535_v55 = vsub.s32 %v4251_v28, %v4534_v22  ;;  %vm4720_vm6 = vcmp.lt.s32.totalorder %v4546_v48, 0 }
 0x2a7   : > { %v4599_v15 = vshrl.u32 %v8899_v62, 4  ;;  %v8918_v0 = vmul.u32.u64.low 3817748708, %v8905_v63  ;;  %v8919_v50 = vmul.u32.u64.high 3817748708, %v8905_v63, %v8918_v0  ;;  %v4588_v39 = vshrl.u32 %v8902_v26, 4  ;;  %vm8926_vm11 = vmand %vm4720_vm6, %vm4684_vm1 }
 0x2a8   : > { %v8846_v6 = vadd.f32 %v5142_v5, %v5141_v49  ;;  %vm4683_vm2 = vcmp.ne.s32.totalorder %v4535_v55, 0  ;;  %vm4719_vm14 = vcmp.lt.s32.totalorder %v4535_v55, 0  ;;  %v4791_v29 = vadd.s32 18, %v4535_v55 }
 0x2a9   : > { %vm8912_vm13 = vmand %vm4719_vm14, %vm4683_vm2  ;;  %v4792_v34 = vadd.s32 18, %v4546_v48  ;;  %v4578_v32 = vmul.u32 18, %v4577_v59  ;;  %vm4685_vm9 = vcmp.ne.s32.totalorder %v8908_v38, 0  ;;  %vm4721_vm15 = vcmp.lt.s32.totalorder %v8908_v38, 0 }
 0x2aa   : > { %v4827_v31 = vsel %vm8912_vm13, %v4791_v29, %v4535_v55  ;;  %v8931_v51 = vadd.s32 256, %v9265_v17  ;;  %vm4686_vm10 = vcmp.ne.s32.totalorder %v8910_v14, 0  ;;  %vm4722_vm7 = vcmp.lt.s32.totalorder %v8910_v14, 0  ;;  %vm8941_vm5 = vmand %vm4721_vm15, %vm4685_vm9 }
 0x2ab   : > { %v4600_v52 = vmul.u32 18, %v4599_v15  ;;  %v8936_v13 = vadd.s32 272, %v9265_v17  ;;  %v4589_v58 = vmul.u32 18, %v4588_v39  ;;  %v8939_v61 = vadd.s32 280, %v9265_v17  ;;  %vm8949_vm4 = vmand %vm4722_vm7, %vm4686_vm10 }
 0x2ac   : > { %v4793_v5 = vadd.s32 18, %v8908_v38  ;;  %v4794_v28 = vadd.s32 18, %v8910_v14  ;;  %v4828_v60 = vsel %vm8926_vm11, %v4792_v34, %v4546_v48  ;;  %v4579_v37 = vsub.s32 %v4255_v54, %v4578_v32 }
 0x2ad   : > { %vm4863_vm3 = vcmp.lt.s32.totalorder %v4827_v31, 16  ;;  %v8958_v16 = vadd.s32 264, %v9265_v17  ;;  %v4601_v33 = vsub.s32 %v4257_v41, %v4600_v52  ;;  %v4610_v23 = vshrl.u32 %v8919_v50, 4 }
 0x2ae   : > { %vm4864_vm8 = vcmp.lt.s32.totalorder %v4828_v60, 16  ;;  %v8965_v46 = vsub.s32 %v4256_v36, %v4589_v58  ;;  %v8968_v35 = vmul.u32.u64.low 3817748708, %v8939_v61  ;;  %v8969_v12 = vmul.u32.u64.high 3817748708, %v8939_v61, %v8968_v35 }
 0x2af   : > { %v4829_v17 = vsel %vm8941_vm5, %v4793_v5, %v8908_v38  ;;  %v4830_v47 = vsel %vm8949_vm4, %v4794_v28, %v8910_v14  ;;  %vm4687_vm12 = vcmp.ne.s32.totalorder %v4579_v37, 0  ;;  %vm4723_vm2 = vcmp.lt.s32.totalorder %v4579_v37, 0 }
 0x2b0   : > { %v8983_v21 = vmul.u32.u64.low 3817748708, %v8958_v16  ;;  %v8984_v41 = vmul.u32.u64.high 3817748708, %v8958_v16, %v8983_v21  ;;  %v5587_v22 = vsel %vm4864_vm8, 1.0, %v5946_v4  ;;  %vm4689_vm14 = vcmp.ne.s32.totalorder %v4601_v33, 0  ;;  %vm8998_vm9 = vmand %vm4723_vm2, %vm4687_vm12 }
 0x2b1   : > { %vm4725_vm1 = vcmp.lt.s32.totalorder %v4601_v33, 0  ;;  %v4611_v25 = vmul.u32 18, %v4610_v23  ;;  %v4795_v9 = vadd.s32 18, %v4579_v37  ;;  %vm4688_vm13 = vcmp.ne.s32.totalorder %v8965_v46, 0 }
 0x2b2   : > { %vm4724_vm6 = vcmp.lt.s32.totalorder %v8965_v46, 0  ;;  %v4797_v43 = vadd.s32 18, %v4601_v33  ;;  %vm4865_vm15 = vcmp.lt.s32.totalorder %v4829_v17, 16  ;;  %vm9006_vm11 = vmand %vm4725_vm1, %vm4689_vm14  ;;  %v4796_v45 = vadd.s32 18, %v8965_v46 }
 0x2b3   : > { %vm4866_vm10 = vcmp.lt.s32.totalorder %v4830_v47, 16  ;;  %vm9023_vm7 = vmand %vm4724_vm6, %vm4688_vm13  ;;  %v4831_v29 = vsel %vm8998_vm9, %v4795_v9, %v4579_v37  ;;  %v9031_v14 = vsub.s32 %v8905_v63, %v4611_v25  ;;  %v4654_v2 = vshrl.u32 %v8969_v12, 4 }
 0x2b4   : > { %v5588_v15 = vsel %vm4865_vm15, 1.0, %v5946_v4  ;;  %v4833_v50 = vsel %vm9006_vm11, %v4797_v43, %v4601_v33  ;;  %v5589_v34 = vsel %vm4866_vm10, 1.0, %v5946_v4  ;;  %v4832_v63 = vsel %vm9023_vm7, %v4796_v45, %v8965_v46 }
 0x2b5   : > { %v4632_v31 = vshrl.u32 %v8984_v41, 4  ;;  %vm9391_vm5 = vcmask 64512   ;;  %vm9051_vm4 = vcmp.lt.s32.totalorder %v4833_v50, 16  ;;  %vm4690_vm8 = vcmp.ne.s32.totalorder %v9031_v14, 0 }
 0x2b6   : > { %vm4726_vm12 = vcmp.lt.s32.totalorder %v9031_v14, 0  ;;  %v4655_v49 = vmul.u32 18, %v4654_v2  ;;  %vm9394_vm2 = vmmov %vm9391_vm5  ;;  %vm4868_vm1 = vcmp.lt.s32.totalorder %v4832_v63, 16  ;;  %v4798_v33 = vadd.s32 18, %v9031_v14 }
 0x2b7   : > { %vm9395_vm14 = vmmov %vm9394_vm2 }
 0x2b8   : > { %vm9396_vm13 = vmmov %vm9394_vm2  ;;  %v4656_v46 = vsub.s32 %v8939_v61, %v4655_v49 }
 0x2b9   : > { %vm9071_vm6 = vmand %vm4726_vm12, %vm4690_vm8 }
 0x2ba   : > { %vm9399_vm11 = vmmov %vm9394_vm2  ;;  %v4834_v61 = vsel %vm9071_vm6, %v4798_v33, %v9031_v14  ;;  %vm4730_vm8 = vcmp.lt.s32.totalorder %v4656_v46, 0 }
 0x2bc   : > { %v8853_v56 = vpop.f32.mrf.mxu1 }
 0x2bd   : > { %v5663_v8 = vpack.c.bf16 %v8853_v56, %v8853_v56  ;;  %v4973_v5 = vmul.f32 %v8853_v56, %v5588_v15 }
 0x2be   : > { %v8862_v57 = vpop.f32.mrf.mxu1 }
 0x2bf   : > { %5345 = vst.msk [vmem:[%s8399_s18 + $0x68] sm:$0xf] %vm777_vm0, %v5663_v8  ;;  %v5661_v44 = vpack.c.bf16 %v8862_v57, %v8862_v57  ;;  %v8954_v7 = vmul.u32.u64.low 3817748708, %v8931_v51  ;;  %v8955_v8 = vmul.u32.u64.high 3817748708, %v8931_v51, %v8954_v7  ;;  %v5087_v35 = vmul.f32 %v8853_v56, %v4973_v5 }
 0x2c0   : > { %v8868_v24 = vpop.f32.mrf.mxu1  ;;  %v4633_v7 = vmul.u32 18, %v4632_v31  ;;  %v5034_v47 = vsel %vm9399_vm11, %v4973_v5, 0.0 }
 0x2c1   : > { %5343 = vst.msk [vmem:[%s8399_s18 + $0x60] sm:$0xf] %vm777_vm0, %v5661_v44  ;;  %v5664_v40 = vpack.c.bf16 %v8868_v24, %v8868_v24  ;;  %v8962_v44 = vmul.u32.u64.low 3817748708, %v8936_v13  ;;  %v8963_v18 = vmul.u32.u64.high 3817748708, %v8936_v13, %v8962_v44  ;;  %v4621_v26 = vshrl.u32 %v8955_v8, 4 }
 0x2c2   : > { %v8880_v27 = vpop.f32.mrf.mxu1  ;;  %v4974_v12 = vmul.f32 %v8868_v24, %v5589_v34 }
 0x2c3   : > { %5346 = vst.msk [vmem:[%s8399_s18 + $0x6c] sm:$0xf] %vm777_vm0, %v5664_v40  ;;  %v5662_v19 = vpack.c.bf16 %v8880_v27, %v8880_v27  ;;  %v5586_v40 = vsel %vm4863_vm3, 1.0, %v5946_v4  ;;  %v4972_v20 = vmul.f32 %v5587_v22, %v8880_v27  ;;  %v4643_v38 = vshrl.u32 %v8963_v18, 4 }
 0x2c4   : > { %v4971_v10 = vmul.f32 %v5586_v40, %v8862_v57  ;;  %v4622_v32 = vmul.u32 18, %v4621_v26  ;;  %vm4867_vm3 = vcmp.lt.s32.totalorder %v4831_v29, 16  ;;  %v4634_v40 = vsub.s32 %v8958_v16, %v4633_v7 }
 0x2c5   : > { %5344 = vst.msk [vmem:[%s8399_s18 + $0x64] sm:$0xf] %vm777_vm0, %v5662_v19  ;;  %v4644_v52 = vmul.u32 18, %v4643_v38  ;;  %v5032_v60 = vsel %vm9395_vm14, %v4972_v20, 0.0  ;;  %v5590_v37 = vsel %vm4867_vm3, 1.0, %v5946_v4  ;;  %vm9400_vm3 = vmmov %vm9394_vm2  ;;  %v5088_v22 = vmul.f32 %v8868_v24, %v4974_v12 }
 0x2c6   : > { %v5085_v0 = vmul.f32 %v4971_v10, %v8862_v57  ;;  %v5030_v1 = vsel %vm9391_vm5, %v4971_v10, 0.0  ;;  %v5086_v57 = vmul.f32 %v4972_v20, %v8880_v27  ;;  %v4623_v11 = vsub.s32 %v8931_v51, %v4622_v32  ;;  %vm9403_vm14 = vmmov %vm9400_vm3 }
 0x2c7   : > { %v5031_v27 = vadd.f32 %v5030_v1, %v8843_v30  ;;  %v4645_v23 = vsub.s32 %v8936_v13, %v4644_v52  ;;  %v5591_v51 = vsel %vm4868_vm1, 1.0, %v5946_v4  ;;  %vm4694_vm5 = vcmp.ne.s32.totalorder %v4656_v46, 0  ;;  %vm9404_vm1 = vmmov %vm9400_vm3 }
 0x2c8   : > { %v5144_v28 = vsel %vm9394_vm2, %v5085_v0, 0.0  ;;  %v5146_v8 = vsel %vm9396_vm13, %v5086_v57, 0.0  ;;  %vm4691_vm9 = vcmp.ne.s32.totalorder %v4623_v11, 0  ;;  %vm4727_vm15 = vcmp.lt.s32.totalorder %v4623_v11, 0  ;;  %vm9410_vm11 = vmmov %vm9404_vm1 }
 0x2c9   : > { %v5145_v44 = vadd.f32 %v5144_v28, %v8846_v6  ;;  %v5033_v18 = vadd.f32 %v5032_v60, %v5031_v27  ;;  %v5592_v6 = vsel %vm9051_vm4, 1.0, %v5946_v4  ;;  %vm4693_vm10 = vcmp.ne.s32.totalorder %v4645_v23, 0  ;;  %vm9092_vm4 = vmand %vm4727_vm15, %vm4691_vm9 }
 0x2ca   : > { %vm4729_vm7 = vcmp.lt.s32.totalorder %v4645_v23, 0  ;;  %v4799_v21 = vadd.s32 18, %v4623_v11  ;;  %v5148_v41 = vsel %vm9400_vm3, %v5087_v35, 0.0  ;;  %vm4692_vm12 = vcmp.ne.s32.totalorder %v4634_v40, 0  ;;  %vm9108_vm9 = vmand %vm4730_vm8, %vm4694_vm5 }
 0x2cb   : > { %v5147_v17 = vadd.f32 %v5146_v8, %v5145_v44  ;;  %vm4728_vm2 = vcmp.lt.s32.totalorder %v4634_v40, 0  ;;  %v5036_v10 = vsel %vm9403_vm14, %v4974_v12, 0.0  ;;  %vm4870_vm13 = vcmp.lt.s32.totalorder %v4834_v61, 16  ;;  %vm9101_vm6 = vmand %vm4729_vm7, %vm4693_vm10 }
 0x2cc   : > { %v4835_v55 = vsel %vm9092_vm4, %v4799_v21, %v4623_v11  ;;  %v4802_v26 = vadd.s32 18, %v4656_v46  ;;  %v4800_v20 = vadd.s32 18, %v4634_v40  ;;  %vm9409_vm15 = vmmov %vm9404_vm1  ;;  %v5593_v15 = vsel %vm4870_vm13, 1.0, %v5946_v4 }
 0x2cd   : > { %v5149_v9 = vadd.f32 %v5148_v41, %v5147_v17  ;;  %vm9411_vm10 = vmmov %vm9404_vm1  ;;  %vm4871_vm3 = vcmp.lt.s32.totalorder %v4835_v55, 16 }
 0x2ce   : > { %vm9118_vm7 = vmand %vm4728_vm2, %vm4692_vm12  ;;  %v4838_v63 = vsel %vm9108_vm9, %v4802_v26, %v4656_v46  ;;  %v5594_v58 = vsel %vm4871_vm3, 1.0, %v5946_v4 }
 0x2cf   : > { %vm9414_vm5 = vmmov %vm9404_vm1  ;;  %v4836_v32 = vsel %vm9118_vm7, %v4800_v20, %v4634_v40  ;;  %vm4874_vm12 = vcmp.lt.s32.totalorder %v4838_v63, 16 }
 0x2d0   : > { %vm9415_vm8 = vmmov %vm9404_vm1  ;;  %vm4872_vm2 = vcmp.lt.s32.totalorder %v4836_v32, 16 }
 0x2d1   : > { %vm9416_vm14 = vmmov %vm9404_vm1  ;;  %v5595_v44 = vsel %vm4872_vm2, 1.0, %v5946_v4 }
 0x2d2   : > { %vm9417_vm13 = vmmov %vm9404_vm1 }
 0x2d3   : > { %vm9419_vm9 = vmmov %vm9404_vm1 }
 0x2d4   : > { %vm9423_vm7 = vmmov %vm9404_vm1 }
 0x2d5   : > { %vm9425_vm3 = vmmov %vm9404_vm1 }
 0x2dc   : > { %v8978_v19 = vpop.f32.mrf.mxu1 }
 0x2dd   : > { %v5667_v54 = vpack.c.bf16 %v8978_v19, %v8978_v19 }
 0x2de   : > { %v8987_v36 = vpop.f32.mrf.mxu1 }
 0x2df   : > { %5349 = vst.msk [vmem:[%s8399_s18 + $0x78] sm:$0xf] %vm777_vm0, %v5667_v54  ;;  %v5665_v53 = vpack.c.bf16 %v8987_v36, %v8987_v36  ;;  %v4975_v13 = vmul.f32 %v5590_v37, %v8987_v36  ;;  %v5035_v54 = vadd.f32 %v5034_v47, %v5033_v18 }
 0x2e0   : > { %v9002_v62 = vpop.f32.mrf.mxu1 }
 0x2e1   : > { %5347 = vst.msk [vmem:[%s8399_s18 + $0x70] sm:$0xf] %vm777_vm0, %v5665_v53  ;;  %v5668_v3 = vpack.c.bf16 %v9002_v62, %v9002_v62  ;;  %v5089_v25 = vmul.f32 %v4975_v13, %v8987_v36  ;;  %v4801_v53 = vadd.s32 18, %v4645_v23  ;;  %v5038_v43 = vsel %vm9404_vm1, %v4975_v13, 0.0 }
 0x2e2   : > { %v9017_v48 = vpop.f32.mrf.mxu1  ;;  %v5037_v36 = vadd.f32 %v5036_v10, %v5035_v54  ;;  %v4978_v1 = vmul.f32 %v9002_v62, %v5593_v15 }
 0x2e3   : > { %5350 = vst.msk [vmem:[%s8399_s18 + $0x7c] sm:$0xf] %vm777_vm0, %v5668_v3  ;;  %v5666_v39 = vpack.c.bf16 %v9017_v48, %v9017_v48  ;;  %v4976_v56 = vmul.f32 %v5591_v51, %v9017_v48  ;;  %v5150_v3 = vsel %vm9409_vm15, %v5088_v22, 0.0  ;;  %v5152_v59 = vsel %vm9410_vm11, %v5089_v25, 0.0  ;;  %vm9420_vm15 = vmmov %vm9404_vm1 }
 0x2e4   : > { %v5039_v14 = vadd.f32 %v5038_v43, %v5037_v36  ;;  %v5151_v2 = vadd.f32 %v5150_v3, %v5149_v9  ;;  %v4837_v0 = vsel %vm9101_vm6, %v4801_v53, %v4645_v23  ;;  %v5597_v23 = vsel %vm4874_vm12, 1.0, %v5946_v4  ;;  %vm9418_vm6 = vmmov %vm9404_vm1 }
 0x2e5   : > { %5348 = vst.msk [vmem:[%s8399_s18 + $0x74] sm:$0xf] %vm777_vm0, %v5666_v39  ;;  %v5090_v42 = vmul.f32 %v4976_v56, %v9017_v48  ;;  %v4977_v48 = vmul.f32 %v8978_v19, %v5592_v6  ;;  %v5040_v38 = vsel %vm9411_vm10, %v4976_v56, 0.0  ;;  %vm4873_vm4 = vcmp.lt.s32.totalorder %v4837_v0, 16  ;;  %vm9421_vm11 = vmmov %vm9404_vm1 }
 0x2e6   : > { %v5153_v39 = vadd.f32 %v5152_v59, %v5151_v2  ;;  %v5041_v34 = vadd.f32 %v5040_v38, %v5039_v14  ;;  %v5596_v60 = vsel %vm4873_vm4, 1.0, %v5946_v4  ;;  %v5044_v18 = vsel %vm9404_vm1, %v4978_v1, 0.0  ;;  %vm9422_vm10 = vmmov %vm9404_vm1 }
 0x2e7   : > { %v5154_v50 = vsel %vm9414_vm5, %v5090_v42, 0.0  ;;  %v5091_v31 = vmul.f32 %v8978_v19, %v4977_v48  ;;  %v5042_v49 = vsel %vm9415_vm8, %v4977_v48, 0.0  ;;  %v5092_v19 = vmul.f32 %v9002_v62, %v4978_v1  ;;  %vm9424_vm5 = vmmov %vm9404_vm1 }
 0x2e8   : > { %v5155_v57 = vadd.f32 %v5154_v50, %v5153_v39  ;;  %v5043_v28 = vadd.f32 %v5042_v49, %v5041_v34 }
 0x2e9   : > { %v5156_v37 = vsel %vm9416_vm14, %v5091_v31, 0.0  ;;  %v5158_v6 = vsel %vm9418_vm6, %v5092_v19, 0.0 }
 0x2ea   : > { %v5157_v8 = vadd.f32 %v5156_v37, %v5155_v57  ;;  %v5045_v62 = vadd.f32 %v5044_v18, %v5043_v28 }
 0x2ec   : > { %v5159_v4 = vadd.f32 %v5158_v6, %v5157_v8 }
 0x2fa   : > { %v5740_v52 = vpop.f32.mrf.mxu1 }
 0x2fb   : > { %v5671_v5 = vpack.c.bf16 %v5740_v52, %v5740_v52  ;;  %v4981_v30 = vmul.f32 %v5740_v52, %v5596_v60 }
 0x2fc   : > { %v4211_v27 = vpop.f32.mrf.mxu1 }
 0x2fd   : > { %5353 = vst.msk [vmem:[%s8399_s18 + $0x88] sm:$0xf] %vm777_vm0, %v5671_v5  ;;  %v4979_v11 = vmul.f32 %v5594_v58, %v4211_v27  ;;  %v5669_v7 = vpack.c.bf16 %v4211_v27, %v4211_v27  ;;  %v5095_v56 = vmul.f32 %v5740_v52, %v4981_v30  ;;  %v5050_v25 = vsel %vm9421_vm11, %v4981_v30, 0.0 }
 0x2fe   : > { %v5741_v33 = vpop.f32.mrf.mxu1 }
 0x2ff   : > { %v5046_v51 = vsel %vm9417_vm13, %v4979_v11, 0.0  ;;  %v5093_v46 = vmul.f32 %v4979_v11, %v4211_v27  ;;  %5351 = vst.msk [vmem:[%s8399_s18 + $0x80] sm:$0xf] %vm777_vm0, %v5669_v7  ;;  %v5672_v35 = vpack.c.bf16 %v5741_v33, %v5741_v33  ;;  %v4982_v17 = vmul.f32 %v5741_v33, %v5597_v23 }
 0x300   : > { %v4214_v12 = vpop.f32.mrf.mxu1  ;;  %v5047_v47 = vadd.f32 %v5046_v51, %v5045_v62  ;;  %v5164_v43 = vsel %vm9423_vm7, %v5095_v56, 0.0 }
 0x301   : > { %v5160_v13 = vsel %vm9419_vm9, %v5093_v46, 0.0  ;;  %v4980_v40 = vmul.f32 %v5595_v44, %v4214_v12  ;;  %5354 = vst.msk [vmem:[%s8399_s18 + $0x8c] sm:$0xf] %vm777_vm0, %v5672_v35  ;;  %v5670_v61 = vpack.c.bf16 %v4214_v12, %v4214_v12  ;;  %v5096_v16 = vmul.f32 %v5741_v33, %v4982_v17 }
 0x302   : > { %v5161_v41 = vadd.f32 %v5160_v13, %v5159_v4  ;;  %v5052_v42 = vsel %vm9424_vm5, %v4982_v17, 0.0 }
 0x303   : > { %v5048_v54 = vsel %vm9420_vm15, %v4980_v40, 0.0  ;;  %v5094_v21 = vmul.f32 %v4980_v40, %v4214_v12  ;;  %5352 = vst.msk [vmem:[%s8399_s18 + $0x84] sm:$0xf] %vm777_vm0, %v5670_v61  ;;  %v5166_v55 = vsel %vm9425_vm3, %v5096_v16, 0.0  ;;  %vm5355_vm0 = vcmask 57344  }
 0x304   : > { %v5049_v22 = vadd.f32 %v5048_v54, %v5047_v47 }
 0x305   : > { %v5162_v9 = vsel %vm9422_vm10, %v5094_v21, 0.0 }
 0x306   : > { %v5051_v53 = vadd.f32 %v5050_v25, %v5049_v22  ;;  %v5163_v10 = vadd.f32 %v5162_v9, %v5161_v41 }
 0x308   : > { %v5053_v24 = vadd.f32 %v5052_v42, %v5051_v53  ;;  %v5165_v36 = vadd.f32 %v5164_v43, %v5163_v10 }
 0x30a   : > { %v5054_v45 = vrot.slane %v5053_v24, 4  ;;  %v5167_v26 = vadd.f32 %v5166_v55, %v5165_v36 }
 0x30c   : > { %v5055_v20 = vadd.f32 %v5054_v45, %v5053_v24  ;;  %v5168_v3 = vrot.slane %v5167_v26, 4 }
 0x30e   : > { %v5056_v48 = vrot.slane %v5055_v20, 2  ;;  %v5169_v59 = vadd.f32 %v5168_v3, %v5167_v26 }
 0x310   : > { %v5057_v38 = vadd.f32 %v5056_v48, %v5055_v20  ;;  %v5170_v29 = vrot.slane %v5169_v59, 2 }
 0x312   : > { %v5058_v14 = vrot.slane %v5057_v38, 1  ;;  %v5171_v2 = vadd.f32 %v5170_v29, %v5169_v59 }
 0x314   : > { %v5059_v15 = vadd.f32 %v5058_v14, %v5057_v38  ;;  %v5172_v0 = vrot.slane %v5171_v2, 1 }
 0x316   : > { %v5173_v50 = vadd.f32 %v5172_v0, %v5171_v2  ;;  %5356 = vst.msk [vmem:[%s279_s23] sm:$0x1] %vm5355_vm0, %v5059_v15 }
 0x318   : > { %5357 = vst.msk [vmem:[%s282_s26] sm:$0x1] %vm5355_vm0, %v5173_v50 }
 0x319 PF: > { %s18_s21 = sadd.s32 1, %s5932_s21  }
 0x31a   : > { %p15_p1 = scmp.ge.s32.totalorder %s18_s21, 4  }
 0x31c   :  { %17 = sbr.rel (!%p15_p1) target bundleno = 1 (0x1), region = 95 }
 0x321   :  { %5403 = vsyncpa [#allocation4], 1 }
 0x322   :  { %5405 = vsyncpa [#allocation4 + $0x1], 1 }

</bundles_post_ra>
